<compile_context>
chip_gen: v6e
topology: v6e:2x2x1
jax: 0.10.0
libtpu: 0.0.40
codegen_flags: <defaults>
</compile_context>

<pallas_src>
import jax
import jax.numpy as jnp
import numpy as np
from jax.experimental import pallas as pl
from jax.experimental.pallas import tpu as pltpu

# ---- static shape constants (derived from L = 10178) ----
L_IN = 10178          # input length
PH = 120              # input width-phase factor = 5*3*4*2 (product of all strides)
M_IN = 87             # padded columns per input phase (120*87 = 10440 >= needed)
NQ = 3                # conv1 shift taps: 5*23 + 127 < 3*120
U1 = 24               # conv1 output width-phases kept = 3*4*2
MC1 = 85              # conv1 phase-columns computed
MP1 = 82              # pool1/conv2 phase-columns computed
W4 = 81               # AE output width
P1_PHASES = (0, 1, 4, 5)   # the pool1 (phase-8) planes conv2 actually needs


# ----------------------------- Pallas kernels ------------------------------ #

def _stream_kernel(x_ref, w1q_ref, b1_ref, wc2_ref, b2_ref,
                   wf0_ref, wf1_ref, bf_ref, s0_ref, s1_ref,
                   z_ref, x44_ref, c1_ref, p1_ref):
    """One (sensor-pair stream, batch) element of the shared AE_block + fusion slab."""
    x = x_ref[0]                                                 # (240, 87) phase-split signal

    # conv1 (k=(2,128), stride 5): all 24 width-phases at once; rows = u*16 + co.
    acc = jnp.dot(w1q_ref[0], x[:, 0:MC1], preferred_element_type=jnp.float32)
    acc = acc + jnp.dot(w1q_ref[1], x[:, 1:1 + MC1], preferred_element_type=jnp.float32)
    acc = acc + jnp.dot(w1q_ref[2], x[:, 2:2 + MC1], preferred_element_type=jnp.float32)
    c1_ref[...] = acc + b1_ref[...]                              # (384, 85)

    # maxpool1 (k=64, stride 3) + ReLU for the four pool-output phases conv2 needs.
    # p1[c, 8m+v] = max_j c1[c, 24m + 3v + j]; tap (v, j) -> c1 phase u at shift a.
    for e, v in enumerate(P1_PHASES):
        best = None
        for j in range(64):
            off = 3 * v + j
            a, u = off // U1, off % U1
            tap = c1_ref[u * 16:(u + 1) * 16, a:a + MP1]         # (16, 82) unit-stride slice
            best = tap if best is None else jnp.maximum(best, tap)
        p1_ref[e * 16:(e + 1) * 16, :] = jnp.maximum(best, 0.0)  # ReLU

    # conv2 (k=(1,2), stride 4): both output width-phases in one matmul.
    c2 = jnp.dot(wc2_ref[...], p1_ref[...],
                 preferred_element_type=jnp.float32) + b2_ref[...]          # (64, 82)

    # maxpool2 (k=3, stride 2) + ReLU -> z[32, 81] (channels-major).
    z = jnp.maximum(jnp.maximum(c2[0:32, 0:W4], c2[32:64, 0:W4]), c2[0:32, 1:W4 + 1])
    z = jnp.maximum(z, 0.0)
    z_ref[0] = z

    # This stream's slab of the fusion conv (columns 27*s .. 27*s+26 of x44).
    # Stride-3 taps of z are done on the MXU with 0/1 selection matrices.
    t0 = jnp.dot(z, s0_ref[...], preferred_element_type=jnp.float32)        # z[:, 3*wl]
    t1 = jnp.dot(z, s1_ref[...], preferred_element_type=jnp.float32)        # z[:, 3*wl+1]
    slab = (jnp.dot(wf0_ref[...], t0, preferred_element_type=jnp.float32)
            + jnp.dot(wf1_ref[...], t1, preferred_element_type=jnp.float32)
            + bf_ref[...])
    x44_ref[0] = jnp.maximum(slab, 0.0)                                      # (32, 27)


def _head_kernel(zf_ref, x44f_ref, wcon_ref, bcon_ref, wfl_ref, bfl_ref,
                 wout_ref, bout_ref, out_ref, x6_ref):
    """Epilogue: connect1 (shared), fusion linear, concat, output linear."""
    B = x44f_ref.shape[0]
    x5 = jnp.dot(zf_ref[...], wcon_ref[...],
                 preferred_element_type=jnp.float32) + bcon_ref[...]
    x5 = jnp.maximum(x5, 0.0)                                    # (3B, 32), rows = s*B + b
    x54 = jnp.dot(x44f_ref[...], wfl_ref[...],
                  preferred_element_type=jnp.float32) + bfl_ref[...]
    x54 = jnp.maximum(x54, 0.0)                                  # (B, 32)
    x6 = jnp.concatenate([x5[0:B], x5[B:2 * B], x5[2 * B:3 * B], x54], axis=1)   # (B, 128)
    x6_ref[...] = x6
    out_ref[...] = jnp.dot(x6, wout_ref[...],
                           preferred_element_type=jnp.float32) + bout_ref[...]


# ---------------------------- weight prepacking ----------------------------- #

def prepack_params(p):
    """One-time repack of PyTorch-layout params into the phase-decomposed layout."""
    f32 = jnp.float32
    # conv1 -> per-shift, phase-expanded weights [3, 24*16, 2*120]
    w1 = p["conv1_w"].astype(f32)[:, 0]                          # (16, 2, 128)
    q = jnp.arange(NQ)[:, None, None]
    u = jnp.arange(U1)[None, :, None]
    ph = jnp.arange(PH)[None, None, :]
    k = PH * q + ph - 5 * u                                      # (3, 24, 120)
    valid = ((k >= 0) & (k < 128)).astype(f32)
    g = jnp.take(w1, jnp.clip(k, 0, 127), axis=-1)               # (16, 2, 3, 24, 120)
    g = g * valid[None, None]
    w1q = jnp.transpose(g, (2, 3, 0, 1, 4)).reshape(NQ, U1 * 16, 2 * PH)
    b1s = jnp.tile(p["conv1_b"].astype(f32), U1).reshape(U1 * 16, 1)

    # conv2 -> block matrix over (output phase d, tap j): [[W0 W1 0 0], [0 0 W0 W1]]
    w2 = p["conv2_w"].astype(f32)
    w20, w21 = w2[:, :, 0, 0], w2[:, :, 0, 1]
    zb = jnp.zeros((32, 16), f32)
    wc2 = jnp.concatenate([jnp.concatenate([w20, w21, zb, zb], axis=1),
                           jnp.concatenate([zb, zb, w20, w21], axis=1)], axis=0)
    b2s = jnp.tile(p["conv2_b"].astype(f32), 2).reshape(64, 1)

    # fusion conv taps + stride-3 selection matrices
    wf = p["fusion_conv_w"].astype(f32)
    wi = jnp.arange(W4)[:, None]
    wl = jnp.arange(27)[None, :]
    return {
        "w1q": w1q, "b1s": b1s, "wc2": wc2, "b2s": b2s,
        "wf0": wf[:, :, 0, 0], "wf1": wf[:, :, 0, 1],
        "bf": p["fusion_conv_b"].astype(f32).reshape(32, 1),
        "s0": (wi == 3 * wl).astype(f32), "s1": (wi == 3 * wl + 1).astype(f32),
        "wcon": p["connect1_w"].astype(f32).T, "bcon": p["connect1_b"].astype(f32).reshape(1, 32),
        "wfl": p["fusion_lin_w"].astype(f32).T, "bfl": p["fusion_lin_b"].astype(f32).reshape(1, 32),
        "wout": p["out_w"].astype(f32).T, "bout": p["out_b"].astype(f32).reshape(1, -1),
    }


# ------------------------------ forward pass -------------------------------- #

def swae_forward(x, pp):
    """x: [B, 1, 6, L] float32 (NCHW). Returns (logits [B, nc], x6 [B, 128])."""
    B, C, S, L = x.shape
    assert C == 1 and S == 6 and L == L_IN
    NS = 3 * B
    xs = x[:, 0].astype(jnp.float32)
    # sensor pairs (0,1),(2,3),(4,5) -> shared AE block; stream-major rows g = s*B + b
    pairs = jnp.stack([xs[:, 0:2], xs[:, 2:4], xs[:, 4:6]], axis=0).reshape(NS, 2, L)
    # width-phase split by 120 (layout glue only, ~0.5 MB)
    xpad = jnp.pad(pairs, ((0, 0), (0, 0), (0, PH * M_IN - L)))
    x120 = xpad.reshape(NS, 2, M_IN, PH).transpose(0, 1, 3, 2).reshape(NS, 2 * PH, M_IN)

    nc = pp["wout"].shape[1]
    z, x44s = pl.pallas_call(
        _stream_kernel,
        out_shape=(jax.ShapeDtypeStruct((NS, 32, W4), jnp.float32),
                   jax.ShapeDtypeStruct((NS, 32, 27), jnp.float32)),
        grid=(NS,),
        in_specs=[
            pl.BlockSpec((1, 2 * PH, M_IN), lambda g: (g, 0, 0)),
            pl.BlockSpec((NQ, U1 * 16, 2 * PH), lambda g: (0, 0, 0)),
            pl.BlockSpec((U1 * 16, 1), lambda g: (0, 0)),
            pl.BlockSpec((64, 64), lambda g: (0, 0)),
            pl.BlockSpec((64, 1), lambda g: (0, 0)),
            pl.BlockSpec((32, 32), lambda g: (0, 0)),
            pl.BlockSpec((32, 32), lambda g: (0, 0)),
            pl.BlockSpec((32, 1), lambda g: (0, 0)),
            pl.BlockSpec((W4, 27), lambda g: (0, 0)),
            pl.BlockSpec((W4, 27), lambda g: (0, 0)),
        ],
        out_specs=(pl.BlockSpec((1, 32, W4), lambda g: (g, 0, 0)),
                   pl.BlockSpec((1, 32, 27), lambda g: (g, 0, 0))),
        scratch_shapes=[pltpu.VMEM((U1 * 16, MC1), jnp.float32),
                        pltpu.VMEM((64, MP1), jnp.float32)],
        compiler_params=pltpu.CompilerParams(dimension_semantics=("parallel",)),
    )(x120, pp["w1q"], pp["b1s"], pp["wc2"], pp["b2s"],
      pp["wf0"], pp["wf1"], pp["bf"], pp["s0"], pp["s1"])

    # free HBM reshape: (channel, width) flatten for the big linears
    z_flat = z.reshape(NS, 32 * W4)
    # assemble x44 columns (stream s owns columns 27s..27s+26), flatten (co, s, wl)
    x44_flat = x44s.reshape(3, B, 32, 27).transpose(1, 2, 0, 3).reshape(B, 32 * W4)

    out, x6 = pl.pallas_call(
        _head_kernel,
        out_shape=(jax.ShapeDtypeStruct((B, nc), jnp.float32),
                   jax.ShapeDtypeStruct((B, 128), jnp.float32)),
        grid=(1,),
        in_specs=[
            pl.BlockSpec((NS, 32 * W4), lambda i: (0, 0)),
            pl.BlockSpec((B, 32 * W4), lambda i: (0, 0)),
            pl.BlockSpec((32 * W4, 32), lambda i: (0, 0)),
            pl.BlockSpec((1, 32), lambda i: (0, 0)),
            pl.BlockSpec((32 * W4, 32), lambda i: (0, 0)),
            pl.BlockSpec((1, 32), lambda i: (0, 0)),
            pl.BlockSpec((128, nc), lambda i: (0, 0)),
            pl.BlockSpec((1, nc), lambda i: (0, 0)),
        ],
        out_specs=(pl.BlockSpec((B, nc), lambda i: (0, 0)),
                   pl.BlockSpec((B, 128), lambda i: (0, 0))),
    )(z_flat, x44_flat, pp["wcon"], pp["bcon"], pp["wfl"], pp["bfl"], pp["wout"], pp["bout"])
    return out, x6


# --------------------------- params / reference ----------------------------- #

def init_params(key, num_classes):
    """Deterministic PyTorch-style uniform(-1/sqrt(fan_in), 1/sqrt(fan_in)) init."""
    ks = jax.random.split(key, 12)

    def u(k, shape, fan_in):
        bound = 1.0 / (fan_in ** 0.5)
        return jax.random.uniform(k, shape, jnp.float32, -bound, bound)

    return {
        "conv1_w": u(ks[0], (16, 1, 2, 128), 256),
        "conv1_b": u(ks[1], (16,), 256),
        "conv2_w": u(ks[2], (32, 16, 1, 2), 32),
        "conv2_b": u(ks[3], (32,), 32),
        "connect1_w": u(ks[4], (32, 32 * 81), 32 * 81),
        "connect1_b": u(ks[5], (32,), 32 * 81),
        "fusion_conv_w": u(ks[6], (32, 32, 1, 2), 64),
        "fusion_conv_b": u(ks[7], (32,), 64),
        "fusion_lin_w": u(ks[8], (32, 32 * 81), 32 * 81),
        "fusion_lin_b": u(ks[9], (32,), 32 * 81),
        "out_w": u(ks[10], (num_classes, 128), 128),
        "out_b": u(ks[11], (num_classes,), 128),
    }


def _ref_forward(x, params):
    """Straightforward pure-JAX reference (same math, im2col via gathers)."""
    B, _, _, L = x.shape
    xs = x[:, 0]
    xp = jnp.stack([xs[:, 0:2], xs[:, 2:4], xs[:, 4:6]], 0).reshape(3 * B, 2, L)

    def win(a, k, s, n):
        idx = jnp.arange(n)[:, None] * s + jnp.arange(k)[None, :]
        return jnp.take(a, idx, axis=-1)

    N = 3 * B
    W1 = (L - 128) // 5 + 1
    p1 = win(xp, 128, 5, W1).transpose(0, 2, 1, 3).reshape(N * W1, 256)
    c1 = (p1 @ params["conv1_w"].reshape(16, -1).T + params["conv1_b"]).reshape(N, W1, 16)
    c1 = c1.transpose(0, 2, 1)
    W2 = (W1 - 64) // 3 + 1
    y1 = jnp.maximum(win(c1, 64, 3, W2).max(-1), 0.0)
    W3 = (W2 - 2) // 4 + 1
    p2 = win(y1, 2, 4, W3).transpose(0, 2, 1, 3).reshape(N * W3, 32)
    c2 = (p2 @ params["conv2_w"].reshape(32, -1).T + params["conv2_b"]).reshape(N, W3, 32)
    c2 = c2.transpose(0, 2, 1)
    Wz = (W3 - 3) // 2 + 1
    z = jnp.maximum(win(c2, 3, 2, Wz).max(-1), 0.0)                    # (N, 32, 81)
    x5 = jnp.maximum(z.reshape(N, 32 * Wz) @ params["connect1_w"].T
                     + params["connect1_b"], 0.0).reshape(3, B, 32)
    zr = z.reshape(3, B, 32, Wz)
    x34 = jnp.concatenate([zr[0], zr[1], zr[2]], -1)
    Wf = (3 * Wz - 2) // 3 + 1
    pf = win(x34, 2, 3, Wf).transpose(0, 2, 1, 3).reshape(B * Wf, 64)
    x44 = jnp.maximum(pf @ params["fusion_conv_w"].reshape(32, -1).T
                      + params["fusion_conv_b"], 0.0)
    x44 = x44.reshape(B, Wf, 32).transpose(0, 2, 1).reshape(B, 32 * Wf)
    x54 = jnp.maximum(x44 @ params["fusion_lin_w"].T + params["fusion_lin_b"], 0.0)
    x6 = jnp.concatenate([x5[0], x5[1], x5[2], x54], 1)
    out = x6 @ params["out_w"].T + params["out_b"]
    return out, x6


if __name__ == "__main__":
    key = jax.random.PRNGKey(0)
    kx, kp = jax.random.split(key)
    B = 2
    num_classes = 10      # `sensor` arg of the PyTorch module is unused in forward
    x = jax.random.normal(kx, (B, 1, 6, L_IN), jnp.float32)
    params = init_params(kp, num_classes)
    pp = prepack_params(params)   # one-time repack, outside the hot path

    fwd = jax.jit(swae_forward)
    out, x6 = fwd(x, pp)
    jax.block_until_ready((out, x6))
    assert out.shape == (B, num_classes), out.shape
    assert x6.shape == (B, 128), x6.shape

    # sanity check against a plain-JAX implementation of the same module
    ref_out, ref_x6 = jax.jit(_ref_forward)(x, params)
    np.testing.assert_allclose(np.asarray(out), np.asarray(ref_out), rtol=3e-2, atol=3e-2)
    np.testing.assert_allclose(np.asarray(x6), np.asarray(ref_x6), rtol=3e-2, atol=3e-2)
    print("KERNEL_OK")
</pallas_src>

<mosaic_0001>
module attributes {stable_mosaic.version = 11 : i64} {
  func.func @_stream_kernel(%arg0: i32, %arg1: memref<1x240x87xf32, #tpu.memory_space<vmem>>, %arg2: memref<3x384x240xf32, #tpu.memory_space<vmem>>, %arg3: memref<384x1xf32, #tpu.memory_space<vmem>>, %arg4: memref<64x64xf32, #tpu.memory_space<vmem>>, %arg5: memref<64x1xf32, #tpu.memory_space<vmem>>, %arg6: memref<32x32xf32, #tpu.memory_space<vmem>>, %arg7: memref<32x32xf32, #tpu.memory_space<vmem>>, %arg8: memref<32x1xf32, #tpu.memory_space<vmem>>, %arg9: memref<81x27xf32, #tpu.memory_space<vmem>>, %arg10: memref<81x27xf32, #tpu.memory_space<vmem>>, %arg11: memref<1x32x81xf32, #tpu.memory_space<vmem>>, %arg12: memref<1x32x27xf32, #tpu.memory_space<vmem>>, %arg13: memref<384x85xf32, #tpu.memory_space<vmem>>, %arg14: memref<64x82xf32, #tpu.memory_space<vmem>>) attributes {dimension_semantics = [#tpu.dimension_semantics<parallel>], iteration_bounds = array<i64: 6>, scalar_prefetch = 0 : i64, scratch_operands = 2 : i64, tpu.core_type = #tpu.core_type<tc>, window_params = [{transform_indices = @transform_0, window_bounds = array<i64: 1, 240, 87>}, {pipeline_mode = #tpu.pipeline_mode<synchronous>, transform_indices = @transform_1, window_bounds = array<i64: 3, 384, 240>}, {pipeline_mode = #tpu.pipeline_mode<synchronous>, transform_indices = @transform_2, window_bounds = array<i64: 384, 1>}, {pipeline_mode = #tpu.pipeline_mode<synchronous>, transform_indices = @transform_3, window_bounds = array<i64: 64, 64>}, {pipeline_mode = #tpu.pipeline_mode<synchronous>, transform_indices = @transform_4, window_bounds = array<i64: 64, 1>}, {pipeline_mode = #tpu.pipeline_mode<synchronous>, transform_indices = @transform_5, window_bounds = array<i64: 32, 32>}, {pipeline_mode = #tpu.pipeline_mode<synchronous>, transform_indices = @transform_6, window_bounds = array<i64: 32, 32>}, {pipeline_mode = #tpu.pipeline_mode<synchronous>, transform_indices = @transform_7, window_bounds = array<i64: 32, 1>}, {pipeline_mode = #tpu.pipeline_mode<synchronous>, transform_indices = @transform_8, window_bounds = array<i64: 81, 27>}, {pipeline_mode = #tpu.pipeline_mode<synchronous>, transform_indices = @transform_9, window_bounds = array<i64: 81, 27>}, {transform_indices = @transform_10, window_bounds = array<i64: 1, 32, 81>}, {transform_indices = @transform_11, window_bounds = array<i64: 1, 32, 27>}]} {
    %c0 = arith.constant 0 : index
    %c0_0 = arith.constant 0 : index
    %c0_1 = arith.constant 0 : index
    %0 = vector.load %arg1[%c0, %c0_0, %c0_1] : memref<1x240x87xf32, #tpu.memory_space<vmem>>, vector<1x240x87xf32>
    %1 = vector.shape_cast %0 : vector<1x240x87xf32> to vector<240x87xf32>
    %c0_2 = arith.constant 0 : index
    %c0_3 = arith.constant 0 : index
    %c0_4 = arith.constant 0 : index
    %2 = vector.load %arg2[%c0_2, %c0_3, %c0_4] : memref<3x384x240xf32, #tpu.memory_space<vmem>>, vector<1x384x240xf32>
    %3 = vector.shape_cast %2 : vector<1x384x240xf32> to vector<384x240xf32>
    %4 = vector.extract_strided_slice %1 {offsets = [0, 0], sizes = [240, 85], strides = [1, 1]} : vector<240x87xf32> to vector<240x85xf32>
    %cst = arith.constant dense<0.000000e+00> : vector<384x85xf32>
    %5 = tpu.matmul %3, %4, %cst {dimension_numbers = #tpu.dot_dimension_numbers<[1], [0], [0], [1], [0, 0, 1, 1], [], []>} : vector<384x240xf32>, vector<240x85xf32>, vector<384x85xf32> -> vector<384x85xf32>
    %c1 = arith.constant 1 : index
    %c0_5 = arith.constant 0 : index
    %c0_6 = arith.constant 0 : index
    %6 = vector.load %arg2[%c1, %c0_5, %c0_6] : memref<3x384x240xf32, #tpu.memory_space<vmem>>, vector<1x384x240xf32>
    %7 = vector.shape_cast %6 : vector<1x384x240xf32> to vector<384x240xf32>
    %8 = vector.extract_strided_slice %1 {offsets = [0, 1], sizes = [240, 85], strides = [1, 1]} : vector<240x87xf32> to vector<240x85xf32>
    %cst_7 = arith.constant dense<0.000000e+00> : vector<384x85xf32>
    %9 = tpu.matmul %7, %8, %cst_7 {dimension_numbers = #tpu.dot_dimension_numbers<[1], [0], [0], [1], [0, 0, 1, 1], [], []>} : vector<384x240xf32>, vector<240x85xf32>, vector<384x85xf32> -> vector<384x85xf32>
    %10 = arith.addf %5, %9 : vector<384x85xf32>
    %c2 = arith.constant 2 : index
    %c0_8 = arith.constant 0 : index
    %c0_9 = arith.constant 0 : index
    %11 = vector.load %arg2[%c2, %c0_8, %c0_9] : memref<3x384x240xf32, #tpu.memory_space<vmem>>, vector<1x384x240xf32>
    %12 = vector.shape_cast %11 : vector<1x384x240xf32> to vector<384x240xf32>
    %13 = vector.extract_strided_slice %1 {offsets = [0, 2], sizes = [240, 85], strides = [1, 1]} : vector<240x87xf32> to vector<240x85xf32>
    %cst_10 = arith.constant dense<0.000000e+00> : vector<384x85xf32>
    %14 = tpu.matmul %12, %13, %cst_10 {dimension_numbers = #tpu.dot_dimension_numbers<[1], [0], [0], [1], [0, 0, 1, 1], [], []>} : vector<384x240xf32>, vector<240x85xf32>, vector<384x85xf32> -> vector<384x85xf32>
    %15 = arith.addf %10, %14 : vector<384x85xf32>
    %c0_11 = arith.constant 0 : index
    %c0_12 = arith.constant 0 : index
    %16 = vector.load %arg3[%c0_11, %c0_12] : memref<384x1xf32, #tpu.memory_space<vmem>>, vector<384x1xf32>
    %17 = vector.broadcast %16 : vector<384x1xf32> to vector<384x85xf32>
    %18 = arith.addf %15, %17 : vector<384x85xf32>
    %c0_13 = arith.constant 0 : index
    %c0_14 = arith.constant 0 : index
    %19 = vector.load %arg13[%c0_13, %c0_14] : memref<384x85xf32, #tpu.memory_space<vmem>>, vector<384x85xf32>
    tpu.vector_store %arg13[%c0_13, %c0_14], %18 {strides = array<i32>} : memref<384x85xf32, #tpu.memory_space<vmem>>, vector<384x85xf32>,
    %c0_15 = arith.constant 0 : index
    %c0_16 = arith.constant 0 : index
    %20 = vector.load %arg13[%c0_15, %c0_16] : memref<384x85xf32, #tpu.memory_space<vmem>>, vector<16x82xf32>
    %c16 = arith.constant 16 : index
    %c0_17 = arith.constant 0 : index
    %21 = vector.load %arg13[%c16, %c0_17] : memref<384x85xf32, #tpu.memory_space<vmem>>, vector<16x82xf32>
    %22 = arith.maximumf %20, %21 : vector<16x82xf32>
    %c32 = arith.constant 32 : index
    %c0_18 = arith.constant 0 : index
    %23 = vector.load %arg13[%c32, %c0_18] : memref<384x85xf32, #tpu.memory_space<vmem>>, vector<16x82xf32>
    %24 = arith.maximumf %22, %23 : vector<16x82xf32>
    %c48 = arith.constant 48 : index
    %c0_19 = arith.constant 0 : index
    %25 = vector.load %arg13[%c48, %c0_19] : memref<384x85xf32, #tpu.memory_space<vmem>>, vector<16x82xf32>
    %26 = arith.maximumf %24, %25 : vector<16x82xf32>
    %c64 = arith.constant 64 : index
    %c0_20 = arith.constant 0 : index
    %27 = vector.load %arg13[%c64, %c0_20] : memref<384x85xf32, #tpu.memory_space<vmem>>, vector<16x82xf32>
    %28 = arith.maximumf %26, %27 : vector<16x82xf32>
    %c80 = arith.constant 80 : index
    %c0_21 = arith.constant 0 : index
    %29 = vector.load %arg13[%c80, %c0_21] : memref<384x85xf32, #tpu.memory_space<vmem>>, vector<16x82xf32>
    %30 = arith.maximumf %28, %29 : vector<16x82xf32>
    %c96 = arith.constant 96 : index
    %c0_22 = arith.constant 0 : index
    %31 = vector.load %arg13[%c96, %c0_22] : memref<384x85xf32, #tpu.memory_space<vmem>>, vector<16x82xf32>
    %32 = arith.maximumf %30, %31 : vector<16x82xf32>
    %c112 = arith.constant 112 : index
    %c0_23 = arith.constant 0 : index
    %33 = vector.load %arg13[%c112, %c0_23] : memref<384x85xf32, #tpu.memory_space<vmem>>, vector<16x82xf32>
    %34 = arith.maximumf %32, %33 : vector<16x82xf32>
    %c128 = arith.constant 128 : index
    %c0_24 = arith.constant 0 : index
    %35 = vector.load %arg13[%c128, %c0_24] : memref<384x85xf32, #tpu.memory_space<vmem>>, vector<16x82xf32>
    %36 = arith.maximumf %34, %35 : vector<16x82xf32>
    %c144 = arith.constant 144 : index
    %c0_25 = arith.constant 0 : index
    %37 = vector.load %arg13[%c144, %c0_25] : memref<384x85xf32, #tpu.memory_space<vmem>>, vector<16x82xf32>
    %38 = arith.maximumf %36, %37 : vector<16x82xf32>
    %c160 = arith.constant 160 : index
    %c0_26 = arith.constant 0 : index
    %39 = vector.load %arg13[%c160, %c0_26] : memref<384x85xf32, #tpu.memory_space<vmem>>, vector<16x82xf32>
    %40 = arith.maximumf %38, %39 : vector<16x82xf32>
    %c176 = arith.constant 176 : index
    %c0_27 = arith.constant 0 : index
    %41 = vector.load %arg13[%c176, %c0_27] : memref<384x85xf32, #tpu.memory_space<vmem>>, vector<16x82xf32>
    %42 = arith.maximumf %40, %41 : vector<16x82xf32>
    %c192 = arith.constant 192 : index
    %c0_28 = arith.constant 0 : index
    %43 = vector.load %arg13[%c192, %c0_28] : memref<384x85xf32, #tpu.memory_space<vmem>>, vector<16x82xf32>
    %44 = arith.maximumf %42, %43 : vector<16x82xf32>
    %c208 = arith.constant 208 : index
    %c0_29 = arith.constant 0 : index
    %45 = vector.load %arg13[%c208, %c0_29] : memref<384x85xf32, #tpu.memory_space<vmem>>, vector<16x82xf32>
    %46 = arith.maximumf %44, %45 : vector<16x82xf32>
    %c224 = arith.constant 224 : index
    %c0_30 = arith.constant 0 : index
    %47 = vector.load %arg13[%c224, %c0_30] : memref<384x85xf32, #tpu.memory_space<vmem>>, vector<16x82xf32>
    %48 = arith.maximumf %46, %47 : vector<16x82xf32>
    %c240 = arith.constant 240 : index
    %c0_31 = arith.constant 0 : index
    %49 = vector.load %arg13[%c240, %c0_31] : memref<384x85xf32, #tpu.memory_space<vmem>>, vector<16x82xf32>
    %50 = arith.maximumf %48, %49 : vector<16x82xf32>
    %c256 = arith.constant 256 : index
    %c0_32 = arith.constant 0 : index
    %51 = vector.load %arg13[%c256, %c0_32] : memref<384x85xf32, #tpu.memory_space<vmem>>, vector<16x82xf32>
    %52 = arith.maximumf %50, %51 : vector<16x82xf32>
    %c272 = arith.constant 272 : index
    %c0_33 = arith.constant 0 : index
    %53 = vector.load %arg13[%c272, %c0_33] : memref<384x85xf32, #tpu.memory_space<vmem>>, vector<16x82xf32>
    %54 = arith.maximumf %52, %53 : vector<16x82xf32>
    %c288 = arith.constant 288 : index
    %c0_34 = arith.constant 0 : index
    %55 = vector.load %arg13[%c288, %c0_34] : memref<384x85xf32, #tpu.memory_space<vmem>>, vector<16x82xf32>
    %56 = arith.maximumf %54, %55 : vector<16x82xf32>
    %c304 = arith.constant 304 : index
    %c0_35 = arith.constant 0 : index
    %57 = vector.load %arg13[%c304, %c0_35] : memref<384x85xf32, #tpu.memory_space<vmem>>, vector<16x82xf32>
    %58 = arith.maximumf %56, %57 : vector<16x82xf32>
    %c320 = arith.constant 320 : index
    %c0_36 = arith.constant 0 : index
    %59 = vector.load %arg13[%c320, %c0_36] : memref<384x85xf32, #tpu.memory_space<vmem>>, vector<16x82xf32>
    %60 = arith.maximumf %58, %59 : vector<16x82xf32>
    %c336 = arith.constant 336 : index
    %c0_37 = arith.constant 0 : index
    %61 = vector.load %arg13[%c336, %c0_37] : memref<384x85xf32, #tpu.memory_space<vmem>>, vector<16x82xf32>
    %62 = arith.maximumf %60, %61 : vector<16x82xf32>
    %c352 = arith.constant 352 : index
    %c0_38 = arith.constant 0 : index
    %63 = vector.load %arg13[%c352, %c0_38] : memref<384x85xf32, #tpu.memory_space<vmem>>, vector<16x82xf32>
    %64 = arith.maximumf %62, %63 : vector<16x82xf32>
    %c368 = arith.constant 368 : index
    %c0_39 = arith.constant 0 : index
    %65 = vector.load %arg13[%c368, %c0_39] : memref<384x85xf32, #tpu.memory_space<vmem>>, vector<16x82xf32>
    %66 = arith.maximumf %64, %65 : vector<16x82xf32>
    %c0_40 = arith.constant 0 : index
    %c1_41 = arith.constant 1 : index
    %67 = vector.load %arg13[%c0_40, %c1_41] : memref<384x85xf32, #tpu.memory_space<vmem>>, vector<16x82xf32>
    %68 = arith.maximumf %66, %67 : vector<16x82xf32>
    %c16_42 = arith.constant 16 : index
    %c1_43 = arith.constant 1 : index
    %69 = vector.load %arg13[%c16_42, %c1_43] : memref<384x85xf32, #tpu.memory_space<vmem>>, vector<16x82xf32>
    %70 = arith.maximumf %68, %69 : vector<16x82xf32>
    %c32_44 = arith.constant 32 : index
    %c1_45 = arith.constant 1 : index
    %71 = vector.load %arg13[%c32_44, %c1_45] : memref<384x85xf32, #tpu.memory_space<vmem>>, vector<16x82xf32>
    %72 = arith.maximumf %70, %71 : vector<16x82xf32>
    %c48_46 = arith.constant 48 : index
    %c1_47 = arith.constant 1 : index
    %73 = vector.load %arg13[%c48_46, %c1_47] : memref<384x85xf32, #tpu.memory_space<vmem>>, vector<16x82xf32>
    %74 = arith.maximumf %72, %73 : vector<16x82xf32>
    %c64_48 = arith.constant 64 : index
    %c1_49 = arith.constant 1 : index
    %75 = vector.load %arg13[%c64_48, %c1_49] : memref<384x85xf32, #tpu.memory_space<vmem>>, vector<16x82xf32>
    %76 = arith.maximumf %74, %75 : vector<16x82xf32>
    %c80_50 = arith.constant 80 : index
    %c1_51 = arith.constant 1 : index
    %77 = vector.load %arg13[%c80_50, %c1_51] : memref<384x85xf32, #tpu.memory_space<vmem>>, vector<16x82xf32>
    %78 = arith.maximumf %76, %77 : vector<16x82xf32>
    %c96_52 = arith.constant 96 : index
    %c1_53 = arith.constant 1 : index
    %79 = vector.load %arg13[%c96_52, %c1_53] : memref<384x85xf32, #tpu.memory_space<vmem>>, vector<16x82xf32>
    %80 = arith.maximumf %78, %79 : vector<16x82xf32>
    %c112_54 = arith.constant 112 : index
    %c1_55 = arith.constant 1 : index
    %81 = vector.load %arg13[%c112_54, %c1_55] : memref<384x85xf32, #tpu.memory_space<vmem>>, vector<16x82xf32>
    %82 = arith.maximumf %80, %81 : vector<16x82xf32>
    %c128_56 = arith.constant 128 : index
    %c1_57 = arith.constant 1 : index
    %83 = vector.load %arg13[%c128_56, %c1_57] : memref<384x85xf32, #tpu.memory_space<vmem>>, vector<16x82xf32>
    %84 = arith.maximumf %82, %83 : vector<16x82xf32>
    %c144_58 = arith.constant 144 : index
    %c1_59 = arith.constant 1 : index
    %85 = vector.load %arg13[%c144_58, %c1_59] : memref<384x85xf32, #tpu.memory_space<vmem>>, vector<16x82xf32>
    %86 = arith.maximumf %84, %85 : vector<16x82xf32>
    %c160_60 = arith.constant 160 : index
    %c1_61 = arith.constant 1 : index
    %87 = vector.load %arg13[%c160_60, %c1_61] : memref<384x85xf32, #tpu.memory_space<vmem>>, vector<16x82xf32>
    %88 = arith.maximumf %86, %87 : vector<16x82xf32>
    %c176_62 = arith.constant 176 : index
    %c1_63 = arith.constant 1 : index
    %89 = vector.load %arg13[%c176_62, %c1_63] : memref<384x85xf32, #tpu.memory_space<vmem>>, vector<16x82xf32>
    %90 = arith.maximumf %88, %89 : vector<16x82xf32>
    %c192_64 = arith.constant 192 : index
    %c1_65 = arith.constant 1 : index
    %91 = vector.load %arg13[%c192_64, %c1_65] : memref<384x85xf32, #tpu.memory_space<vmem>>, vector<16x82xf32>
    %92 = arith.maximumf %90, %91 : vector<16x82xf32>
    %c208_66 = arith.constant 208 : index
    %c1_67 = arith.constant 1 : index
    %93 = vector.load %arg13[%c208_66, %c1_67] : memref<384x85xf32, #tpu.memory_space<vmem>>, vector<16x82xf32>
    %94 = arith.maximumf %92, %93 : vector<16x82xf32>
    %c224_68 = arith.constant 224 : index
    %c1_69 = arith.constant 1 : index
    %95 = vector.load %arg13[%c224_68, %c1_69] : memref<384x85xf32, #tpu.memory_space<vmem>>, vector<16x82xf32>
    %96 = arith.maximumf %94, %95 : vector<16x82xf32>
    %c240_70 = arith.constant 240 : index
    %c1_71 = arith.constant 1 : index
    %97 = vector.load %arg13[%c240_70, %c1_71] : memref<384x85xf32, #tpu.memory_space<vmem>>, vector<16x82xf32>
    %98 = arith.maximumf %96, %97 : vector<16x82xf32>
    %c256_72 = arith.constant 256 : index
    %c1_73 = arith.constant 1 : index
    %99 = vector.load %arg13[%c256_72, %c1_73] : memref<384x85xf32, #tpu.memory_space<vmem>>, vector<16x82xf32>
    %100 = arith.maximumf %98, %99 : vector<16x82xf32>
    %c272_74 = arith.constant 272 : index
    %c1_75 = arith.constant 1 : index
    %101 = vector.load %arg13[%c272_74, %c1_75] : memref<384x85xf32, #tpu.memory_space<vmem>>, vector<16x82xf32>
    %102 = arith.maximumf %100, %101 : vector<16x82xf32>
    %c288_76 = arith.constant 288 : index
    %c1_77 = arith.constant 1 : index
    %103 = vector.load %arg13[%c288_76, %c1_77] : memref<384x85xf32, #tpu.memory_space<vmem>>, vector<16x82xf32>
    %104 = arith.maximumf %102, %103 : vector<16x82xf32>
    %c304_78 = arith.constant 304 : index
    %c1_79 = arith.constant 1 : index
    %105 = vector.load %arg13[%c304_78, %c1_79] : memref<384x85xf32, #tpu.memory_space<vmem>>, vector<16x82xf32>
    %106 = arith.maximumf %104, %105 : vector<16x82xf32>
    %c320_80 = arith.constant 320 : index
    %c1_81 = arith.constant 1 : index
    %107 = vector.load %arg13[%c320_80, %c1_81] : memref<384x85xf32, #tpu.memory_space<vmem>>, vector<16x82xf32>
    %108 = arith.maximumf %106, %107 : vector<16x82xf32>
    %c336_82 = arith.constant 336 : index
    %c1_83 = arith.constant 1 : index
    %109 = vector.load %arg13[%c336_82, %c1_83] : memref<384x85xf32, #tpu.memory_space<vmem>>, vector<16x82xf32>
    %110 = arith.maximumf %108, %109 : vector<16x82xf32>
    %c352_84 = arith.constant 352 : index
    %c1_85 = arith.constant 1 : index
    %111 = vector.load %arg13[%c352_84, %c1_85] : memref<384x85xf32, #tpu.memory_space<vmem>>, vector<16x82xf32>
    %112 = arith.maximumf %110, %111 : vector<16x82xf32>
    %c368_86 = arith.constant 368 : index
    %c1_87 = arith.constant 1 : index
    %113 = vector.load %arg13[%c368_86, %c1_87] : memref<384x85xf32, #tpu.memory_space<vmem>>, vector<16x82xf32>
    %114 = arith.maximumf %112, %113 : vector<16x82xf32>
    %c0_88 = arith.constant 0 : index
    %c2_89 = arith.constant 2 : index
    %115 = vector.load %arg13[%c0_88, %c2_89] : memref<384x85xf32, #tpu.memory_space<vmem>>, vector<16x82xf32>
    %116 = arith.maximumf %114, %115 : vector<16x82xf32>
    %c16_90 = arith.constant 16 : index
    %c2_91 = arith.constant 2 : index
    %117 = vector.load %arg13[%c16_90, %c2_91] : memref<384x85xf32, #tpu.memory_space<vmem>>, vector<16x82xf32>
    %118 = arith.maximumf %116, %117 : vector<16x82xf32>
    %c32_92 = arith.constant 32 : index
    %c2_93 = arith.constant 2 : index
    %119 = vector.load %arg13[%c32_92, %c2_93] : memref<384x85xf32, #tpu.memory_space<vmem>>, vector<16x82xf32>
    %120 = arith.maximumf %118, %119 : vector<16x82xf32>
    %c48_94 = arith.constant 48 : index
    %c2_95 = arith.constant 2 : index
    %121 = vector.load %arg13[%c48_94, %c2_95] : memref<384x85xf32, #tpu.memory_space<vmem>>, vector<16x82xf32>
    %122 = arith.maximumf %120, %121 : vector<16x82xf32>
    %c64_96 = arith.constant 64 : index
    %c2_97 = arith.constant 2 : index
    %123 = vector.load %arg13[%c64_96, %c2_97] : memref<384x85xf32, #tpu.memory_space<vmem>>, vector<16x82xf32>
    %124 = arith.maximumf %122, %123 : vector<16x82xf32>
    %c80_98 = arith.constant 80 : index
    %c2_99 = arith.constant 2 : index
    %125 = vector.load %arg13[%c80_98, %c2_99] : memref<384x85xf32, #tpu.memory_space<vmem>>, vector<16x82xf32>
    %126 = arith.maximumf %124, %125 : vector<16x82xf32>
    %c96_100 = arith.constant 96 : index
    %c2_101 = arith.constant 2 : index
    %127 = vector.load %arg13[%c96_100, %c2_101] : memref<384x85xf32, #tpu.memory_space<vmem>>, vector<16x82xf32>
    %128 = arith.maximumf %126, %127 : vector<16x82xf32>
    %c112_102 = arith.constant 112 : index
    %c2_103 = arith.constant 2 : index
    %129 = vector.load %arg13[%c112_102, %c2_103] : memref<384x85xf32, #tpu.memory_space<vmem>>, vector<16x82xf32>
    %130 = arith.maximumf %128, %129 : vector<16x82xf32>
    %c128_104 = arith.constant 128 : index
    %c2_105 = arith.constant 2 : index
    %131 = vector.load %arg13[%c128_104, %c2_105] : memref<384x85xf32, #tpu.memory_space<vmem>>, vector<16x82xf32>
    %132 = arith.maximumf %130, %131 : vector<16x82xf32>
    %c144_106 = arith.constant 144 : index
    %c2_107 = arith.constant 2 : index
    %133 = vector.load %arg13[%c144_106, %c2_107] : memref<384x85xf32, #tpu.memory_space<vmem>>, vector<16x82xf32>
    %134 = arith.maximumf %132, %133 : vector<16x82xf32>
    %c160_108 = arith.constant 160 : index
    %c2_109 = arith.constant 2 : index
    %135 = vector.load %arg13[%c160_108, %c2_109] : memref<384x85xf32, #tpu.memory_space<vmem>>, vector<16x82xf32>
    %136 = arith.maximumf %134, %135 : vector<16x82xf32>
    %c176_110 = arith.constant 176 : index
    %c2_111 = arith.constant 2 : index
    %137 = vector.load %arg13[%c176_110, %c2_111] : memref<384x85xf32, #tpu.memory_space<vmem>>, vector<16x82xf32>
    %138 = arith.maximumf %136, %137 : vector<16x82xf32>
    %c192_112 = arith.constant 192 : index
    %c2_113 = arith.constant 2 : index
    %139 = vector.load %arg13[%c192_112, %c2_113] : memref<384x85xf32, #tpu.memory_space<vmem>>, vector<16x82xf32>
    %140 = arith.maximumf %138, %139 : vector<16x82xf32>
    %c208_114 = arith.constant 208 : index
    %c2_115 = arith.constant 2 : index
    %141 = vector.load %arg13[%c208_114, %c2_115] : memref<384x85xf32, #tpu.memory_space<vmem>>, vector<16x82xf32>
    %142 = arith.maximumf %140, %141 : vector<16x82xf32>
    %c224_116 = arith.constant 224 : index
    %c2_117 = arith.constant 2 : index
    %143 = vector.load %arg13[%c224_116, %c2_117] : memref<384x85xf32, #tpu.memory_space<vmem>>, vector<16x82xf32>
    %144 = arith.maximumf %142, %143 : vector<16x82xf32>
    %c240_118 = arith.constant 240 : index
    %c2_119 = arith.constant 2 : index
    %145 = vector.load %arg13[%c240_118, %c2_119] : memref<384x85xf32, #tpu.memory_space<vmem>>, vector<16x82xf32>
    %146 = arith.maximumf %144, %145 : vector<16x82xf32>
    %cst_120 = arith.constant 0.000000e+00 : f32
    %147 = vector.broadcast %cst_120 : f32 to vector<16x82xf32>
    %148 = arith.maximumf %146, %147 : vector<16x82xf32>
    %c0_121 = arith.constant 0 : index
    %c0_122 = arith.constant 0 : index
    %149 = vector.load %arg14[%c0_121, %c0_122] : memref<64x82xf32, #tpu.memory_space<vmem>>, vector<16x82xf32>
    tpu.vector_store %arg14[%c0_121, %c0_122], %148 {strides = array<i32>} : memref<64x82xf32, #tpu.memory_space<vmem>>, vector<16x82xf32>,
    %c48_123 = arith.constant 48 : index
    %c0_124 = arith.constant 0 : index
    %150 = vector.load %arg13[%c48_123, %c0_124] : memref<384x85xf32, #tpu.memory_space<vmem>>, vector<16x82xf32>
    %c64_125 = arith.constant 64 : index
    %c0_126 = arith.constant 0 : index
    %151 = vector.load %arg13[%c64_125, %c0_126] : memref<384x85xf32, #tpu.memory_space<vmem>>, vector<16x82xf32>
    %152 = arith.maximumf %150, %151 : vector<16x82xf32>
    %c80_127 = arith.constant 80 : index
    %c0_128 = arith.constant 0 : index
    %153 = vector.load %arg13[%c80_127, %c0_128] : memref<384x85xf32, #tpu.memory_space<vmem>>, vector<16x82xf32>
    %154 = arith.maximumf %152, %153 : vector<16x82xf32>
    %c96_129 = arith.constant 96 : index
    %c0_130 = arith.constant 0 : index
    %155 = vector.load %arg13[%c96_129, %c0_130] : memref<384x85xf32, #tpu.memory_space<vmem>>, vector<16x82xf32>
    %156 = arith.maximumf %154, %155 : vector<16x82xf32>
    %c112_131 = arith.constant 112 : index
    %c0_132 = arith.constant 0 : index
    %157 = vector.load %arg13[%c112_131, %c0_132] : memref<384x85xf32, #tpu.memory_space<vmem>>, vector<16x82xf32>
    %158 = arith.maximumf %156, %157 : vector<16x82xf32>
    %c128_133 = arith.constant 128 : index
    %c0_134 = arith.constant 0 : index
    %159 = vector.load %arg13[%c128_133, %c0_134] : memref<384x85xf32, #tpu.memory_space<vmem>>, vector<16x82xf32>
    %160 = arith.maximumf %158, %159 : vector<16x82xf32>
    %c144_135 = arith.constant 144 : index
    %c0_136 = arith.constant 0 : index
    %161 = vector.load %arg13[%c144_135, %c0_136] : memref<384x85xf32, #tpu.memory_space<vmem>>, vector<16x82xf32>
    %162 = arith.maximumf %160, %161 : vector<16x82xf32>
    %c160_137 = arith.constant 160 : index
    %c0_138 = arith.constant 0 : index
    %163 = vector.load %arg13[%c160_137, %c0_138] : memref<384x85xf32, #tpu.memory_space<vmem>>, vector<16x82xf32>
    %164 = arith.maximumf %162, %163 : vector<16x82xf32>
    %c176_139 = arith.constant 176 : index
    %c0_140 = arith.constant 0 : index
    %165 = vector.load %arg13[%c176_139, %c0_140] : memref<384x85xf32, #tpu.memory_space<vmem>>, vector<16x82xf32>
    %166 = arith.maximumf %164, %165 : vector<16x82xf32>
    %c192_141 = arith.constant 192 : index
    %c0_142 = arith.constant 0 : index
    %167 = vector.load %arg13[%c192_141, %c0_142] : memref<384x85xf32, #tpu.memory_space<vmem>>, vector<16x82xf32>
    %168 = arith.maximumf %166, %167 : vector<16x82xf32>
    %c208_143 = arith.constant 208 : index
    %c0_144 = arith.constant 0 : index
    %169 = vector.load %arg13[%c208_143, %c0_144] : memref<384x85xf32, #tpu.memory_space<vmem>>, vector<16x82xf32>
    %170 = arith.maximumf %168, %169 : vector<16x82xf32>
    %c224_145 = arith.constant 224 : index
    %c0_146 = arith.constant 0 : index
    %171 = vector.load %arg13[%c224_145, %c0_146] : memref<384x85xf32, #tpu.memory_space<vmem>>, vector<16x82xf32>
    %172 = arith.maximumf %170, %171 : vector<16x82xf32>
    %c240_147 = arith.constant 240 : index
    %c0_148 = arith.constant 0 : index
    %173 = vector.load %arg13[%c240_147, %c0_148] : memref<384x85xf32, #tpu.memory_space<vmem>>, vector<16x82xf32>
    %174 = arith.maximumf %172, %173 : vector<16x82xf32>
    %c256_149 = arith.constant 256 : index
    %c0_150 = arith.constant 0 : index
    %175 = vector.load %arg13[%c256_149, %c0_150] : memref<384x85xf32, #tpu.memory_space<vmem>>, vector<16x82xf32>
    %176 = arith.maximumf %174, %175 : vector<16x82xf32>
    %c272_151 = arith.constant 272 : index
    %c0_152 = arith.constant 0 : index
    %177 = vector.load %arg13[%c272_151, %c0_152] : memref<384x85xf32, #tpu.memory_space<vmem>>, vector<16x82xf32>
    %178 = arith.maximumf %176, %177 : vector<16x82xf32>
    %c288_153 = arith.constant 288 : index
    %c0_154 = arith.constant 0 : index
    %179 = vector.load %arg13[%c288_153, %c0_154] : memref<384x85xf32, #tpu.memory_space<vmem>>, vector<16x82xf32>
    %180 = arith.maximumf %178, %179 : vector<16x82xf32>
    %c304_155 = arith.constant 304 : index
    %c0_156 = arith.constant 0 : index
    %181 = vector.load %arg13[%c304_155, %c0_156] : memref<384x85xf32, #tpu.memory_space<vmem>>, vector<16x82xf32>
    %182 = arith.maximumf %180, %181 : vector<16x82xf32>
    %c320_157 = arith.constant 320 : index
    %c0_158 = arith.constant 0 : index
    %183 = vector.load %arg13[%c320_157, %c0_158] : memref<384x85xf32, #tpu.memory_space<vmem>>, vector<16x82xf32>
    %184 = arith.maximumf %182, %183 : vector<16x82xf32>
    %c336_159 = arith.constant 336 : index
    %c0_160 = arith.constant 0 : index
    %185 = vector.load %arg13[%c336_159, %c0_160] : memref<384x85xf32, #tpu.memory_space<vmem>>, vector<16x82xf32>
    %186 = arith.maximumf %184, %185 : vector<16x82xf32>
    %c352_161 = arith.constant 352 : index
    %c0_162 = arith.constant 0 : index
    %187 = vector.load %arg13[%c352_161, %c0_162] : memref<384x85xf32, #tpu.memory_space<vmem>>, vector<16x82xf32>
    %188 = arith.maximumf %186, %187 : vector<16x82xf32>
    %c368_163 = arith.constant 368 : index
    %c0_164 = arith.constant 0 : index
    %189 = vector.load %arg13[%c368_163, %c0_164] : memref<384x85xf32, #tpu.memory_space<vmem>>, vector<16x82xf32>
    %190 = arith.maximumf %188, %189 : vector<16x82xf32>
    %c0_165 = arith.constant 0 : index
    %c1_166 = arith.constant 1 : index
    %191 = vector.load %arg13[%c0_165, %c1_166] : memref<384x85xf32, #tpu.memory_space<vmem>>, vector<16x82xf32>
    %192 = arith.maximumf %190, %191 : vector<16x82xf32>
    %c16_167 = arith.constant 16 : index
    %c1_168 = arith.constant 1 : index
    %193 = vector.load %arg13[%c16_167, %c1_168] : memref<384x85xf32, #tpu.memory_space<vmem>>, vector<16x82xf32>
    %194 = arith.maximumf %192, %193 : vector<16x82xf32>
    %c32_169 = arith.constant 32 : index
    %c1_170 = arith.constant 1 : index
    %195 = vector.load %arg13[%c32_169, %c1_170] : memref<384x85xf32, #tpu.memory_space<vmem>>, vector<16x82xf32>
    %196 = arith.maximumf %194, %195 : vector<16x82xf32>
    %c48_171 = arith.constant 48 : index
    %c1_172 = arith.constant 1 : index
    %197 = vector.load %arg13[%c48_171, %c1_172] : memref<384x85xf32, #tpu.memory_space<vmem>>, vector<16x82xf32>
    %198 = arith.maximumf %196, %197 : vector<16x82xf32>
    %c64_173 = arith.constant 64 : index
    %c1_174 = arith.constant 1 : index
    %199 = vector.load %arg13[%c64_173, %c1_174] : memref<384x85xf32, #tpu.memory_space<vmem>>, vector<16x82xf32>
    %200 = arith.maximumf %198, %199 : vector<16x82xf32>
    %c80_175 = arith.constant 80 : index
    %c1_176 = arith.constant 1 : index
    %201 = vector.load %arg13[%c80_175, %c1_176] : memref<384x85xf32, #tpu.memory_space<vmem>>, vector<16x82xf32>
    %202 = arith.maximumf %200, %201 : vector<16x82xf32>
    %c96_177 = arith.constant 96 : index
    %c1_178 = arith.constant 1 : index
    %203 = vector.load %arg13[%c96_177, %c1_178] : memref<384x85xf32, #tpu.memory_space<vmem>>, vector<16x82xf32>
    %204 = arith.maximumf %202, %203 : vector<16x82xf32>
    %c112_179 = arith.constant 112 : index
    %c1_180 = arith.constant 1 : index
    %205 = vector.load %arg13[%c112_179, %c1_180] : memref<384x85xf32, #tpu.memory_space<vmem>>, vector<16x82xf32>
    %206 = arith.maximumf %204, %205 : vector<16x82xf32>
    %c128_181 = arith.constant 128 : index
    %c1_182 = arith.constant 1 : index
    %207 = vector.load %arg13[%c128_181, %c1_182] : memref<384x85xf32, #tpu.memory_space<vmem>>, vector<16x82xf32>
    %208 = arith.maximumf %206, %207 : vector<16x82xf32>
    %c144_183 = arith.constant 144 : index
    %c1_184 = arith.constant 1 : index
    %209 = vector.load %arg13[%c144_183, %c1_184] : memref<384x85xf32, #tpu.memory_space<vmem>>, vector<16x82xf32>
    %210 = arith.maximumf %208, %209 : vector<16x82xf32>
    %c160_185 = arith.constant 160 : index
    %c1_186 = arith.constant 1 : index
    %211 = vector.load %arg13[%c160_185, %c1_186] : memref<384x85xf32, #tpu.memory_space<vmem>>, vector<16x82xf32>
    %212 = arith.maximumf %210, %211 : vector<16x82xf32>
    %c176_187 = arith.constant 176 : index
    %c1_188 = arith.constant 1 : index
    %213 = vector.load %arg13[%c176_187, %c1_188] : memref<384x85xf32, #tpu.memory_space<vmem>>, vector<16x82xf32>
    %214 = arith.maximumf %212, %213 : vector<16x82xf32>
    %c192_189 = arith.constant 192 : index
    %c1_190 = arith.constant 1 : index
    %215 = vector.load %arg13[%c192_189, %c1_190] : memref<384x85xf32, #tpu.memory_space<vmem>>, vector<16x82xf32>
    %216 = arith.maximumf %214, %215 : vector<16x82xf32>
    %c208_191 = arith.constant 208 : index
    %c1_192 = arith.constant 1 : index
    %217 = vector.load %arg13[%c208_191, %c1_192] : memref<384x85xf32, #tpu.memory_space<vmem>>, vector<16x82xf32>
    %218 = arith.maximumf %216, %217 : vector<16x82xf32>
    %c224_193 = arith.constant 224 : index
    %c1_194 = arith.constant 1 : index
    %219 = vector.load %arg13[%c224_193, %c1_194] : memref<384x85xf32, #tpu.memory_space<vmem>>, vector<16x82xf32>
    %220 = arith.maximumf %218, %219 : vector<16x82xf32>
    %c240_195 = arith.constant 240 : index
    %c1_196 = arith.constant 1 : index
    %221 = vector.load %arg13[%c240_195, %c1_196] : memref<384x85xf32, #tpu.memory_space<vmem>>, vector<16x82xf32>
    %222 = arith.maximumf %220, %221 : vector<16x82xf32>
    %c256_197 = arith.constant 256 : index
    %c1_198 = arith.constant 1 : index
    %223 = vector.load %arg13[%c256_197, %c1_198] : memref<384x85xf32, #tpu.memory_space<vmem>>, vector<16x82xf32>
    %224 = arith.maximumf %222, %223 : vector<16x82xf32>
    %c272_199 = arith.constant 272 : index
    %c1_200 = arith.constant 1 : index
    %225 = vector.load %arg13[%c272_199, %c1_200] : memref<384x85xf32, #tpu.memory_space<vmem>>, vector<16x82xf32>
    %226 = arith.maximumf %224, %225 : vector<16x82xf32>
    %c288_201 = arith.constant 288 : index
    %c1_202 = arith.constant 1 : index
    %227 = vector.load %arg13[%c288_201, %c1_202] : memref<384x85xf32, #tpu.memory_space<vmem>>, vector<16x82xf32>
    %228 = arith.maximumf %226, %227 : vector<16x82xf32>
    %c304_203 = arith.constant 304 : index
    %c1_204 = arith.constant 1 : index
    %229 = vector.load %arg13[%c304_203, %c1_204] : memref<384x85xf32, #tpu.memory_space<vmem>>, vector<16x82xf32>
    %230 = arith.maximumf %228, %229 : vector<16x82xf32>
    %c320_205 = arith.constant 320 : index
    %c1_206 = arith.constant 1 : index
    %231 = vector.load %arg13[%c320_205, %c1_206] : memref<384x85xf32, #tpu.memory_space<vmem>>, vector<16x82xf32>
    %232 = arith.maximumf %230, %231 : vector<16x82xf32>
    %c336_207 = arith.constant 336 : index
    %c1_208 = arith.constant 1 : index
    %233 = vector.load %arg13[%c336_207, %c1_208] : memref<384x85xf32, #tpu.memory_space<vmem>>, vector<16x82xf32>
    %234 = arith.maximumf %232, %233 : vector<16x82xf32>
    %c352_209 = arith.constant 352 : index
    %c1_210 = arith.constant 1 : index
    %235 = vector.load %arg13[%c352_209, %c1_210] : memref<384x85xf32, #tpu.memory_space<vmem>>, vector<16x82xf32>
    %236 = arith.maximumf %234, %235 : vector<16x82xf32>
    %c368_211 = arith.constant 368 : index
    %c1_212 = arith.constant 1 : index
    %237 = vector.load %arg13[%c368_211, %c1_212] : memref<384x85xf32, #tpu.memory_space<vmem>>, vector<16x82xf32>
    %238 = arith.maximumf %236, %237 : vector<16x82xf32>
    %c0_213 = arith.constant 0 : index
    %c2_214 = arith.constant 2 : index
    %239 = vector.load %arg13[%c0_213, %c2_214] : memref<384x85xf32, #tpu.memory_space<vmem>>, vector<16x82xf32>
    %240 = arith.maximumf %238, %239 : vector<16x82xf32>
    %c16_215 = arith.constant 16 : index
    %c2_216 = arith.constant 2 : index
    %241 = vector.load %arg13[%c16_215, %c2_216] : memref<384x85xf32, #tpu.memory_space<vmem>>, vector<16x82xf32>
    %242 = arith.maximumf %240, %241 : vector<16x82xf32>
    %c32_217 = arith.constant 32 : index
    %c2_218 = arith.constant 2 : index
    %243 = vector.load %arg13[%c32_217, %c2_218] : memref<384x85xf32, #tpu.memory_space<vmem>>, vector<16x82xf32>
    %244 = arith.maximumf %242, %243 : vector<16x82xf32>
    %c48_219 = arith.constant 48 : index
    %c2_220 = arith.constant 2 : index
    %245 = vector.load %arg13[%c48_219, %c2_220] : memref<384x85xf32, #tpu.memory_space<vmem>>, vector<16x82xf32>
    %246 = arith.maximumf %244, %245 : vector<16x82xf32>
    %c64_221 = arith.constant 64 : index
    %c2_222 = arith.constant 2 : index
    %247 = vector.load %arg13[%c64_221, %c2_222] : memref<384x85xf32, #tpu.memory_space<vmem>>, vector<16x82xf32>
    %248 = arith.maximumf %246, %247 : vector<16x82xf32>
    %c80_223 = arith.constant 80 : index
    %c2_224 = arith.constant 2 : index
    %249 = vector.load %arg13[%c80_223, %c2_224] : memref<384x85xf32, #tpu.memory_space<vmem>>, vector<16x82xf32>
    %250 = arith.maximumf %248, %249 : vector<16x82xf32>
    %c96_225 = arith.constant 96 : index
    %c2_226 = arith.constant 2 : index
    %251 = vector.load %arg13[%c96_225, %c2_226] : memref<384x85xf32, #tpu.memory_space<vmem>>, vector<16x82xf32>
    %252 = arith.maximumf %250, %251 : vector<16x82xf32>
    %c112_227 = arith.constant 112 : index
    %c2_228 = arith.constant 2 : index
    %253 = vector.load %arg13[%c112_227, %c2_228] : memref<384x85xf32, #tpu.memory_space<vmem>>, vector<16x82xf32>
    %254 = arith.maximumf %252, %253 : vector<16x82xf32>
    %c128_229 = arith.constant 128 : index
    %c2_230 = arith.constant 2 : index
    %255 = vector.load %arg13[%c128_229, %c2_230] : memref<384x85xf32, #tpu.memory_space<vmem>>, vector<16x82xf32>
    %256 = arith.maximumf %254, %255 : vector<16x82xf32>
    %c144_231 = arith.constant 144 : index
    %c2_232 = arith.constant 2 : index
    %257 = vector.load %arg13[%c144_231, %c2_232] : memref<384x85xf32, #tpu.memory_space<vmem>>, vector<16x82xf32>
    %258 = arith.maximumf %256, %257 : vector<16x82xf32>
    %c160_233 = arith.constant 160 : index
    %c2_234 = arith.constant 2 : index
    %259 = vector.load %arg13[%c160_233, %c2_234] : memref<384x85xf32, #tpu.memory_space<vmem>>, vector<16x82xf32>
    %260 = arith.maximumf %258, %259 : vector<16x82xf32>
    %c176_235 = arith.constant 176 : index
    %c2_236 = arith.constant 2 : index
    %261 = vector.load %arg13[%c176_235, %c2_236] : memref<384x85xf32, #tpu.memory_space<vmem>>, vector<16x82xf32>
    %262 = arith.maximumf %260, %261 : vector<16x82xf32>
    %c192_237 = arith.constant 192 : index
    %c2_238 = arith.constant 2 : index
    %263 = vector.load %arg13[%c192_237, %c2_238] : memref<384x85xf32, #tpu.memory_space<vmem>>, vector<16x82xf32>
    %264 = arith.maximumf %262, %263 : vector<16x82xf32>
    %c208_239 = arith.constant 208 : index
    %c2_240 = arith.constant 2 : index
    %265 = vector.load %arg13[%c208_239, %c2_240] : memref<384x85xf32, #tpu.memory_space<vmem>>, vector<16x82xf32>
    %266 = arith.maximumf %264, %265 : vector<16x82xf32>
    %c224_241 = arith.constant 224 : index
    %c2_242 = arith.constant 2 : index
    %267 = vector.load %arg13[%c224_241, %c2_242] : memref<384x85xf32, #tpu.memory_space<vmem>>, vector<16x82xf32>
    %268 = arith.maximumf %266, %267 : vector<16x82xf32>
    %c240_243 = arith.constant 240 : index
    %c2_244 = arith.constant 2 : index
    %269 = vector.load %arg13[%c240_243, %c2_244] : memref<384x85xf32, #tpu.memory_space<vmem>>, vector<16x82xf32>
    %270 = arith.maximumf %268, %269 : vector<16x82xf32>
    %c256_245 = arith.constant 256 : index
    %c2_246 = arith.constant 2 : index
    %271 = vector.load %arg13[%c256_245, %c2_246] : memref<384x85xf32, #tpu.memory_space<vmem>>, vector<16x82xf32>
    %272 = arith.maximumf %270, %271 : vector<16x82xf32>
    %c272_247 = arith.constant 272 : index
    %c2_248 = arith.constant 2 : index
    %273 = vector.load %arg13[%c272_247, %c2_248] : memref<384x85xf32, #tpu.memory_space<vmem>>, vector<16x82xf32>
    %274 = arith.maximumf %272, %273 : vector<16x82xf32>
    %c288_249 = arith.constant 288 : index
    %c2_250 = arith.constant 2 : index
    %275 = vector.load %arg13[%c288_249, %c2_250] : memref<384x85xf32, #tpu.memory_space<vmem>>, vector<16x82xf32>
    %276 = arith.maximumf %274, %275 : vector<16x82xf32>
    %cst_251 = arith.constant 0.000000e+00 : f32
    %277 = vector.broadcast %cst_251 : f32 to vector<16x82xf32>
    %278 = arith.maximumf %276, %277 : vector<16x82xf32>
    %c16_252 = arith.constant 16 : index
    %c0_253 = arith.constant 0 : index
    %279 = vector.load %arg14[%c16_252, %c0_253] : memref<64x82xf32, #tpu.memory_space<vmem>>, vector<16x82xf32>
    tpu.vector_store %arg14[%c16_252, %c0_253], %278 {strides = array<i32>} : memref<64x82xf32, #tpu.memory_space<vmem>>, vector<16x82xf32>,
    %c192_254 = arith.constant 192 : index
    %c0_255 = arith.constant 0 : index
    %280 = vector.load %arg13[%c192_254, %c0_255] : memref<384x85xf32, #tpu.memory_space<vmem>>, vector<16x82xf32>
    %c208_256 = arith.constant 208 : index
    %c0_257 = arith.constant 0 : index
    %281 = vector.load %arg13[%c208_256, %c0_257] : memref<384x85xf32, #tpu.memory_space<vmem>>, vector<16x82xf32>
    %282 = arith.maximumf %280, %281 : vector<16x82xf32>
    %c224_258 = arith.constant 224 : index
    %c0_259 = arith.constant 0 : index
    %283 = vector.load %arg13[%c224_258, %c0_259] : memref<384x85xf32, #tpu.memory_space<vmem>>, vector<16x82xf32>
    %284 = arith.maximumf %282, %283 : vector<16x82xf32>
    %c240_260 = arith.constant 240 : index
    %c0_261 = arith.constant 0 : index
    %285 = vector.load %arg13[%c240_260, %c0_261] : memref<384x85xf32, #tpu.memory_space<vmem>>, vector<16x82xf32>
    %286 = arith.maximumf %284, %285 : vector<16x82xf32>
    %c256_262 = arith.constant 256 : index
    %c0_263 = arith.constant 0 : index
    %287 = vector.load %arg13[%c256_262, %c0_263] : memref<384x85xf32, #tpu.memory_space<vmem>>, vector<16x82xf32>
    %288 = arith.maximumf %286, %287 : vector<16x82xf32>
    %c272_264 = arith.constant 272 : index
    %c0_265 = arith.constant 0 : index
    %289 = vector.load %arg13[%c272_264, %c0_265] : memref<384x85xf32, #tpu.memory_space<vmem>>, vector<16x82xf32>
    %290 = arith.maximumf %288, %289 : vector<16x82xf32>
    %c288_266 = arith.constant 288 : index
    %c0_267 = arith.constant 0 : index
    %291 = vector.load %arg13[%c288_266, %c0_267] : memref<384x85xf32, #tpu.memory_space<vmem>>, vector<16x82xf32>
    %292 = arith.maximumf %290, %291 : vector<16x82xf32>
    %c304_268 = arith.constant 304 : index
    %c0_269 = arith.constant 0 : index
    %293 = vector.load %arg13[%c304_268, %c0_269] : memref<384x85xf32, #tpu.memory_space<vmem>>, vector<16x82xf32>
    %294 = arith.maximumf %292, %293 : vector<16x82xf32>
    %c320_270 = arith.constant 320 : index
    %c0_271 = arith.constant 0 : index
    %295 = vector.load %arg13[%c320_270, %c0_271] : memref<384x85xf32, #tpu.memory_space<vmem>>, vector<16x82xf32>
    %296 = arith.maximumf %294, %295 : vector<16x82xf32>
    %c336_272 = arith.constant 336 : index
    %c0_273 = arith.constant 0 : index
    %297 = vector.load %arg13[%c336_272, %c0_273] : memref<384x85xf32, #tpu.memory_space<vmem>>, vector<16x82xf32>
    %298 = arith.maximumf %296, %297 : vector<16x82xf32>
    %c352_274 = arith.constant 352 : index
    %c0_275 = arith.constant 0 : index
    %299 = vector.load %arg13[%c352_274, %c0_275] : memref<384x85xf32, #tpu.memory_space<vmem>>, vector<16x82xf32>
    %300 = arith.maximumf %298, %299 : vector<16x82xf32>
    %c368_276 = arith.constant 368 : index
    %c0_277 = arith.constant 0 : index
    %301 = vector.load %arg13[%c368_276, %c0_277] : memref<384x85xf32, #tpu.memory_space<vmem>>, vector<16x82xf32>
    %302 = arith.maximumf %300, %301 : vector<16x82xf32>
    %c0_278 = arith.constant 0 : index
    %c1_279 = arith.constant 1 : index
    %303 = vector.load %arg13[%c0_278, %c1_279] : memref<384x85xf32, #tpu.memory_space<vmem>>, vector<16x82xf32>
    %304 = arith.maximumf %302, %303 : vector<16x82xf32>
    %c16_280 = arith.constant 16 : index
    %c1_281 = arith.constant 1 : index
    %305 = vector.load %arg13[%c16_280, %c1_281] : memref<384x85xf32, #tpu.memory_space<vmem>>, vector<16x82xf32>
    %306 = arith.maximumf %304, %305 : vector<16x82xf32>
    %c32_282 = arith.constant 32 : index
    %c1_283 = arith.constant 1 : index
    %307 = vector.load %arg13[%c32_282, %c1_283] : memref<384x85xf32, #tpu.memory_space<vmem>>, vector<16x82xf32>
    %308 = arith.maximumf %306, %307 : vector<16x82xf32>
    %c48_284 = arith.constant 48 : index
    %c1_285 = arith.constant 1 : index
    %309 = vector.load %arg13[%c48_284, %c1_285] : memref<384x85xf32, #tpu.memory_space<vmem>>, vector<16x82xf32>
    %310 = arith.maximumf %308, %309 : vector<16x82xf32>
    %c64_286 = arith.constant 64 : index
    %c1_287 = arith.constant 1 : index
    %311 = vector.load %arg13[%c64_286, %c1_287] : memref<384x85xf32, #tpu.memory_space<vmem>>, vector<16x82xf32>
    %312 = arith.maximumf %310, %311 : vector<16x82xf32>
    %c80_288 = arith.constant 80 : index
    %c1_289 = arith.constant 1 : index
    %313 = vector.load %arg13[%c80_288, %c1_289] : memref<384x85xf32, #tpu.memory_space<vmem>>, vector<16x82xf32>
    %314 = arith.maximumf %312, %313 : vector<16x82xf32>
    %c96_290 = arith.constant 96 : index
    %c1_291 = arith.constant 1 : index
    %315 = vector.load %arg13[%c96_290, %c1_291] : memref<384x85xf32, #tpu.memory_space<vmem>>, vector<16x82xf32>
    %316 = arith.maximumf %314, %315 : vector<16x82xf32>
    %c112_292 = arith.constant 112 : index
    %c1_293 = arith.constant 1 : index
    %317 = vector.load %arg13[%c112_292, %c1_293] : memref<384x85xf32, #tpu.memory_space<vmem>>, vector<16x82xf32>
    %318 = arith.maximumf %316, %317 : vector<16x82xf32>
    %c128_294 = arith.constant 128 : index
    %c1_295 = arith.constant 1 : index
    %319 = vector.load %arg13[%c128_294, %c1_295] : memref<384x85xf32, #tpu.memory_space<vmem>>, vector<16x82xf32>
    %320 = arith.maximumf %318, %319 : vector<16x82xf32>
    %c144_296 = arith.constant 144 : index
    %c1_297 = arith.constant 1 : index
    %321 = vector.load %arg13[%c144_296, %c1_297] : memref<384x85xf32, #tpu.memory_space<vmem>>, vector<16x82xf32>
    %322 = arith.maximumf %320, %321 : vector<16x82xf32>
    %c160_298 = arith.constant 160 : index
    %c1_299 = arith.constant 1 : index
    %323 = vector.load %arg13[%c160_298, %c1_299] : memref<384x85xf32, #tpu.memory_space<vmem>>, vector<16x82xf32>
    %324 = arith.maximumf %322, %323 : vector<16x82xf32>
    %c176_300 = arith.constant 176 : index
    %c1_301 = arith.constant 1 : index
    %325 = vector.load %arg13[%c176_300, %c1_301] : memref<384x85xf32, #tpu.memory_space<vmem>>, vector<16x82xf32>
    %326 = arith.maximumf %324, %325 : vector<16x82xf32>
    %c192_302 = arith.constant 192 : index
    %c1_303 = arith.constant 1 : index
    %327 = vector.load %arg13[%c192_302, %c1_303] : memref<384x85xf32, #tpu.memory_space<vmem>>, vector<16x82xf32>
    %328 = arith.maximumf %326, %327 : vector<16x82xf32>
    %c208_304 = arith.constant 208 : index
    %c1_305 = arith.constant 1 : index
    %329 = vector.load %arg13[%c208_304, %c1_305] : memref<384x85xf32, #tpu.memory_space<vmem>>, vector<16x82xf32>
    %330 = arith.maximumf %328, %329 : vector<16x82xf32>
    %c224_306 = arith.constant 224 : index
    %c1_307 = arith.constant 1 : index
    %331 = vector.load %arg13[%c224_306, %c1_307] : memref<384x85xf32, #tpu.memory_space<vmem>>, vector<16x82xf32>
    %332 = arith.maximumf %330, %331 : vector<16x82xf32>
    %c240_308 = arith.constant 240 : index
    %c1_309 = arith.constant 1 : index
    %333 = vector.load %arg13[%c240_308, %c1_309] : memref<384x85xf32, #tpu.memory_space<vmem>>, vector<16x82xf32>
    %334 = arith.maximumf %332, %333 : vector<16x82xf32>
    %c256_310 = arith.constant 256 : index
    %c1_311 = arith.constant 1 : index
    %335 = vector.load %arg13[%c256_310, %c1_311] : memref<384x85xf32, #tpu.memory_space<vmem>>, vector<16x82xf32>
    %336 = arith.maximumf %334, %335 : vector<16x82xf32>
    %c272_312 = arith.constant 272 : index
    %c1_313 = arith.constant 1 : index
    %337 = vector.load %arg13[%c272_312, %c1_313] : memref<384x85xf32, #tpu.memory_space<vmem>>, vector<16x82xf32>
    %338 = arith.maximumf %336, %337 : vector<16x82xf32>
    %c288_314 = arith.constant 288 : index
    %c1_315 = arith.constant 1 : index
    %339 = vector.load %arg13[%c288_314, %c1_315] : memref<384x85xf32, #tpu.memory_space<vmem>>, vector<16x82xf32>
    %340 = arith.maximumf %338, %339 : vector<16x82xf32>
    %c304_316 = arith.constant 304 : index
    %c1_317 = arith.constant 1 : index
    %341 = vector.load %arg13[%c304_316, %c1_317] : memref<384x85xf32, #tpu.memory_space<vmem>>, vector<16x82xf32>
    %342 = arith.maximumf %340, %341 : vector<16x82xf32>
    %c320_318 = arith.constant 320 : index
    %c1_319 = arith.constant 1 : index
    %343 = vector.load %arg13[%c320_318, %c1_319] : memref<384x85xf32, #tpu.memory_space<vmem>>, vector<16x82xf32>
    %344 = arith.maximumf %342, %343 : vector<16x82xf32>
    %c336_320 = arith.constant 336 : index
    %c1_321 = arith.constant 1 : index
    %345 = vector.load %arg13[%c336_320, %c1_321] : memref<384x85xf32, #tpu.memory_space<vmem>>, vector<16x82xf32>
    %346 = arith.maximumf %344, %345 : vector<16x82xf32>
    %c352_322 = arith.constant 352 : index
    %c1_323 = arith.constant 1 : index
    %347 = vector.load %arg13[%c352_322, %c1_323] : memref<384x85xf32, #tpu.memory_space<vmem>>, vector<16x82xf32>
    %348 = arith.maximumf %346, %347 : vector<16x82xf32>
    %c368_324 = arith.constant 368 : index
    %c1_325 = arith.constant 1 : index
    %349 = vector.load %arg13[%c368_324, %c1_325] : memref<384x85xf32, #tpu.memory_space<vmem>>, vector<16x82xf32>
    %350 = arith.maximumf %348, %349 : vector<16x82xf32>
    %c0_326 = arith.constant 0 : index
    %c2_327 = arith.constant 2 : index
    %351 = vector.load %arg13[%c0_326, %c2_327] : memref<384x85xf32, #tpu.memory_space<vmem>>, vector<16x82xf32>
    %352 = arith.maximumf %350, %351 : vector<16x82xf32>
    %c16_328 = arith.constant 16 : index
    %c2_329 = arith.constant 2 : index
    %353 = vector.load %arg13[%c16_328, %c2_329] : memref<384x85xf32, #tpu.memory_space<vmem>>, vector<16x82xf32>
    %354 = arith.maximumf %352, %353 : vector<16x82xf32>
    %c32_330 = arith.constant 32 : index
    %c2_331 = arith.constant 2 : index
    %355 = vector.load %arg13[%c32_330, %c2_331] : memref<384x85xf32, #tpu.memory_space<vmem>>, vector<16x82xf32>
    %356 = arith.maximumf %354, %355 : vector<16x82xf32>
    %c48_332 = arith.constant 48 : index
    %c2_333 = arith.constant 2 : index
    %357 = vector.load %arg13[%c48_332, %c2_333] : memref<384x85xf32, #tpu.memory_space<vmem>>, vector<16x82xf32>
    %358 = arith.maximumf %356, %357 : vector<16x82xf32>
    %c64_334 = arith.constant 64 : index
    %c2_335 = arith.constant 2 : index
    %359 = vector.load %arg13[%c64_334, %c2_335] : memref<384x85xf32, #tpu.memory_space<vmem>>, vector<16x82xf32>
    %360 = arith.maximumf %358, %359 : vector<16x82xf32>
    %c80_336 = arith.constant 80 : index
    %c2_337 = arith.constant 2 : index
    %361 = vector.load %arg13[%c80_336, %c2_337] : memref<384x85xf32, #tpu.memory_space<vmem>>, vector<16x82xf32>
    %362 = arith.maximumf %360, %361 : vector<16x82xf32>
    %c96_338 = arith.constant 96 : index
    %c2_339 = arith.constant 2 : index
    %363 = vector.load %arg13[%c96_338, %c2_339] : memref<384x85xf32, #tpu.memory_space<vmem>>, vector<16x82xf32>
    %364 = arith.maximumf %362, %363 : vector<16x82xf32>
    %c112_340 = arith.constant 112 : index
    %c2_341 = arith.constant 2 : index
    %365 = vector.load %arg13[%c112_340, %c2_341] : memref<384x85xf32, #tpu.memory_space<vmem>>, vector<16x82xf32>
    %366 = arith.maximumf %364, %365 : vector<16x82xf32>
    %c128_342 = arith.constant 128 : index
    %c2_343 = arith.constant 2 : index
    %367 = vector.load %arg13[%c128_342, %c2_343] : memref<384x85xf32, #tpu.memory_space<vmem>>, vector<16x82xf32>
    %368 = arith.maximumf %366, %367 : vector<16x82xf32>
    %c144_344 = arith.constant 144 : index
    %c2_345 = arith.constant 2 : index
    %369 = vector.load %arg13[%c144_344, %c2_345] : memref<384x85xf32, #tpu.memory_space<vmem>>, vector<16x82xf32>
    %370 = arith.maximumf %368, %369 : vector<16x82xf32>
    %c160_346 = arith.constant 160 : index
    %c2_347 = arith.constant 2 : index
    %371 = vector.load %arg13[%c160_346, %c2_347] : memref<384x85xf32, #tpu.memory_space<vmem>>, vector<16x82xf32>
    %372 = arith.maximumf %370, %371 : vector<16x82xf32>
    %c176_348 = arith.constant 176 : index
    %c2_349 = arith.constant 2 : index
    %373 = vector.load %arg13[%c176_348, %c2_349] : memref<384x85xf32, #tpu.memory_space<vmem>>, vector<16x82xf32>
    %374 = arith.maximumf %372, %373 : vector<16x82xf32>
    %c192_350 = arith.constant 192 : index
    %c2_351 = arith.constant 2 : index
    %375 = vector.load %arg13[%c192_350, %c2_351] : memref<384x85xf32, #tpu.memory_space<vmem>>, vector<16x82xf32>
    %376 = arith.maximumf %374, %375 : vector<16x82xf32>
    %c208_352 = arith.constant 208 : index
    %c2_353 = arith.constant 2 : index
    %377 = vector.load %arg13[%c208_352, %c2_353] : memref<384x85xf32, #tpu.memory_space<vmem>>, vector<16x82xf32>
    %378 = arith.maximumf %376, %377 : vector<16x82xf32>
    %c224_354 = arith.constant 224 : index
    %c2_355 = arith.constant 2 : index
    %379 = vector.load %arg13[%c224_354, %c2_355] : memref<384x85xf32, #tpu.memory_space<vmem>>, vector<16x82xf32>
    %380 = arith.maximumf %378, %379 : vector<16x82xf32>
    %c240_356 = arith.constant 240 : index
    %c2_357 = arith.constant 2 : index
    %381 = vector.load %arg13[%c240_356, %c2_357] : memref<384x85xf32, #tpu.memory_space<vmem>>, vector<16x82xf32>
    %382 = arith.maximumf %380, %381 : vector<16x82xf32>
    %c256_358 = arith.constant 256 : index
    %c2_359 = arith.constant 2 : index
    %383 = vector.load %arg13[%c256_358, %c2_359] : memref<384x85xf32, #tpu.memory_space<vmem>>, vector<16x82xf32>
    %384 = arith.maximumf %382, %383 : vector<16x82xf32>
    %c272_360 = arith.constant 272 : index
    %c2_361 = arith.constant 2 : index
    %385 = vector.load %arg13[%c272_360, %c2_361] : memref<384x85xf32, #tpu.memory_space<vmem>>, vector<16x82xf32>
    %386 = arith.maximumf %384, %385 : vector<16x82xf32>
    %c288_362 = arith.constant 288 : index
    %c2_363 = arith.constant 2 : index
    %387 = vector.load %arg13[%c288_362, %c2_363] : memref<384x85xf32, #tpu.memory_space<vmem>>, vector<16x82xf32>
    %388 = arith.maximumf %386, %387 : vector<16x82xf32>
    %c304_364 = arith.constant 304 : index
    %c2_365 = arith.constant 2 : index
    %389 = vector.load %arg13[%c304_364, %c2_365] : memref<384x85xf32, #tpu.memory_space<vmem>>, vector<16x82xf32>
    %390 = arith.maximumf %388, %389 : vector<16x82xf32>
    %c320_366 = arith.constant 320 : index
    %c2_367 = arith.constant 2 : index
    %391 = vector.load %arg13[%c320_366, %c2_367] : memref<384x85xf32, #tpu.memory_space<vmem>>, vector<16x82xf32>
    %392 = arith.maximumf %390, %391 : vector<16x82xf32>
    %c336_368 = arith.constant 336 : index
    %c2_369 = arith.constant 2 : index
    %393 = vector.load %arg13[%c336_368, %c2_369] : memref<384x85xf32, #tpu.memory_space<vmem>>, vector<16x82xf32>
    %394 = arith.maximumf %392, %393 : vector<16x82xf32>
    %c352_370 = arith.constant 352 : index
    %c2_371 = arith.constant 2 : index
    %395 = vector.load %arg13[%c352_370, %c2_371] : memref<384x85xf32, #tpu.memory_space<vmem>>, vector<16x82xf32>
    %396 = arith.maximumf %394, %395 : vector<16x82xf32>
    %c368_372 = arith.constant 368 : index
    %c2_373 = arith.constant 2 : index
    %397 = vector.load %arg13[%c368_372, %c2_373] : memref<384x85xf32, #tpu.memory_space<vmem>>, vector<16x82xf32>
    %398 = arith.maximumf %396, %397 : vector<16x82xf32>
    %c0_374 = arith.constant 0 : index
    %c3 = arith.constant 3 : index
    %399 = vector.load %arg13[%c0_374, %c3] : memref<384x85xf32, #tpu.memory_space<vmem>>, vector<16x82xf32>
    %400 = arith.maximumf %398, %399 : vector<16x82xf32>
    %c16_375 = arith.constant 16 : index
    %c3_376 = arith.constant 3 : index
    %401 = vector.load %arg13[%c16_375, %c3_376] : memref<384x85xf32, #tpu.memory_space<vmem>>, vector<16x82xf32>
    %402 = arith.maximumf %400, %401 : vector<16x82xf32>
    %c32_377 = arith.constant 32 : index
    %c3_378 = arith.constant 3 : index
    %403 = vector.load %arg13[%c32_377, %c3_378] : memref<384x85xf32, #tpu.memory_space<vmem>>, vector<16x82xf32>
    %404 = arith.maximumf %402, %403 : vector<16x82xf32>
    %c48_379 = arith.constant 48 : index
    %c3_380 = arith.constant 3 : index
    %405 = vector.load %arg13[%c48_379, %c3_380] : memref<384x85xf32, #tpu.memory_space<vmem>>, vector<16x82xf32>
    %406 = arith.maximumf %404, %405 : vector<16x82xf32>
    %cst_381 = arith.constant 0.000000e+00 : f32
    %407 = vector.broadcast %cst_381 : f32 to vector<16x82xf32>
    %408 = arith.maximumf %406, %407 : vector<16x82xf32>
    %c32_382 = arith.constant 32 : index
    %c0_383 = arith.constant 0 : index
    %409 = vector.load %arg14[%c32_382, %c0_383] : memref<64x82xf32, #tpu.memory_space<vmem>>, vector<16x82xf32>
    tpu.vector_store %arg14[%c32_382, %c0_383], %408 {strides = array<i32>} : memref<64x82xf32, #tpu.memory_space<vmem>>, vector<16x82xf32>,
    %c240_384 = arith.constant 240 : index
    %c0_385 = arith.constant 0 : index
    %410 = vector.load %arg13[%c240_384, %c0_385] : memref<384x85xf32, #tpu.memory_space<vmem>>, vector<16x82xf32>
    %c256_386 = arith.constant 256 : index
    %c0_387 = arith.constant 0 : index
    %411 = vector.load %arg13[%c256_386, %c0_387] : memref<384x85xf32, #tpu.memory_space<vmem>>, vector<16x82xf32>
    %412 = arith.maximumf %410, %411 : vector<16x82xf32>
    %c272_388 = arith.constant 272 : index
    %c0_389 = arith.constant 0 : index
    %413 = vector.load %arg13[%c272_388, %c0_389] : memref<384x85xf32, #tpu.memory_space<vmem>>, vector<16x82xf32>
    %414 = arith.maximumf %412, %413 : vector<16x82xf32>
    %c288_390 = arith.constant 288 : index
    %c0_391 = arith.constant 0 : index
    %415 = vector.load %arg13[%c288_390, %c0_391] : memref<384x85xf32, #tpu.memory_space<vmem>>, vector<16x82xf32>
    %416 = arith.maximumf %414, %415 : vector<16x82xf32>
    %c304_392 = arith.constant 304 : index
    %c0_393 = arith.constant 0 : index
    %417 = vector.load %arg13[%c304_392, %c0_393] : memref<384x85xf32, #tpu.memory_space<vmem>>, vector<16x82xf32>
    %418 = arith.maximumf %416, %417 : vector<16x82xf32>
    %c320_394 = arith.constant 320 : index
    %c0_395 = arith.constant 0 : index
    %419 = vector.load %arg13[%c320_394, %c0_395] : memref<384x85xf32, #tpu.memory_space<vmem>>, vector<16x82xf32>
    %420 = arith.maximumf %418, %419 : vector<16x82xf32>
    %c336_396 = arith.constant 336 : index
    %c0_397 = arith.constant 0 : index
    %421 = vector.load %arg13[%c336_396, %c0_397] : memref<384x85xf32, #tpu.memory_space<vmem>>, vector<16x82xf32>
    %422 = arith.maximumf %420, %421 : vector<16x82xf32>
    %c352_398 = arith.constant 352 : index
    %c0_399 = arith.constant 0 : index
    %423 = vector.load %arg13[%c352_398, %c0_399] : memref<384x85xf32, #tpu.memory_space<vmem>>, vector<16x82xf32>
    %424 = arith.maximumf %422, %423 : vector<16x82xf32>
    %c368_400 = arith.constant 368 : index
    %c0_401 = arith.constant 0 : index
    %425 = vector.load %arg13[%c368_400, %c0_401] : memref<384x85xf32, #tpu.memory_space<vmem>>, vector<16x82xf32>
    %426 = arith.maximumf %424, %425 : vector<16x82xf32>
    %c0_402 = arith.constant 0 : index
    %c1_403 = arith.constant 1 : index
    %427 = vector.load %arg13[%c0_402, %c1_403] : memref<384x85xf32, #tpu.memory_space<vmem>>, vector<16x82xf32>
    %428 = arith.maximumf %426, %427 : vector<16x82xf32>
    %c16_404 = arith.constant 16 : index
    %c1_405 = arith.constant 1 : index
    %429 = vector.load %arg13[%c16_404, %c1_405] : memref<384x85xf32, #tpu.memory_space<vmem>>, vector<16x82xf32>
    %430 = arith.maximumf %428, %429 : vector<16x82xf32>
    %c32_406 = arith.constant 32 : index
    %c1_407 = arith.constant 1 : index
    %431 = vector.load %arg13[%c32_406, %c1_407] : memref<384x85xf32, #tpu.memory_space<vmem>>, vector<16x82xf32>
    %432 = arith.maximumf %430, %431 : vector<16x82xf32>
    %c48_408 = arith.constant 48 : index
    %c1_409 = arith.constant 1 : index
    %433 = vector.load %arg13[%c48_408, %c1_409] : memref<384x85xf32, #tpu.memory_space<vmem>>, vector<16x82xf32>
    %434 = arith.maximumf %432, %433 : vector<16x82xf32>
    %c64_410 = arith.constant 64 : index
    %c1_411 = arith.constant 1 : index
    %435 = vector.load %arg13[%c64_410, %c1_411] : memref<384x85xf32, #tpu.memory_space<vmem>>, vector<16x82xf32>
    %436 = arith.maximumf %434, %435 : vector<16x82xf32>
    %c80_412 = arith.constant 80 : index
    %c1_413 = arith.constant 1 : index
    %437 = vector.load %arg13[%c80_412, %c1_413] : memref<384x85xf32, #tpu.memory_space<vmem>>, vector<16x82xf32>
    %438 = arith.maximumf %436, %437 : vector<16x82xf32>
    %c96_414 = arith.constant 96 : index
    %c1_415 = arith.constant 1 : index
    %439 = vector.load %arg13[%c96_414, %c1_415] : memref<384x85xf32, #tpu.memory_space<vmem>>, vector<16x82xf32>
    %440 = arith.maximumf %438, %439 : vector<16x82xf32>
    %c112_416 = arith.constant 112 : index
    %c1_417 = arith.constant 1 : index
    %441 = vector.load %arg13[%c112_416, %c1_417] : memref<384x85xf32, #tpu.memory_space<vmem>>, vector<16x82xf32>
    %442 = arith.maximumf %440, %441 : vector<16x82xf32>
    %c128_418 = arith.constant 128 : index
    %c1_419 = arith.constant 1 : index
    %443 = vector.load %arg13[%c128_418, %c1_419] : memref<384x85xf32, #tpu.memory_space<vmem>>, vector<16x82xf32>
    %444 = arith.maximumf %442, %443 : vector<16x82xf32>
    %c144_420 = arith.constant 144 : index
    %c1_421 = arith.constant 1 : index
    %445 = vector.load %arg13[%c144_420, %c1_421] : memref<384x85xf32, #tpu.memory_space<vmem>>, vector<16x82xf32>
    %446 = arith.maximumf %444, %445 : vector<16x82xf32>
    %c160_422 = arith.constant 160 : index
    %c1_423 = arith.constant 1 : index
    %447 = vector.load %arg13[%c160_422, %c1_423] : memref<384x85xf32, #tpu.memory_space<vmem>>, vector<16x82xf32>
    %448 = arith.maximumf %446, %447 : vector<16x82xf32>
    %c176_424 = arith.constant 176 : index
    %c1_425 = arith.constant 1 : index
    %449 = vector.load %arg13[%c176_424, %c1_425] : memref<384x85xf32, #tpu.memory_space<vmem>>, vector<16x82xf32>
    %450 = arith.maximumf %448, %449 : vector<16x82xf32>
    %c192_426 = arith.constant 192 : index
    %c1_427 = arith.constant 1 : index
    %451 = vector.load %arg13[%c192_426, %c1_427] : memref<384x85xf32, #tpu.memory_space<vmem>>, vector<16x82xf32>
    %452 = arith.maximumf %450, %451 : vector<16x82xf32>
    %c208_428 = arith.constant 208 : index
    %c1_429 = arith.constant 1 : index
    %453 = vector.load %arg13[%c208_428, %c1_429] : memref<384x85xf32, #tpu.memory_space<vmem>>, vector<16x82xf32>
    %454 = arith.maximumf %452, %453 : vector<16x82xf32>
    %c224_430 = arith.constant 224 : index
    %c1_431 = arith.constant 1 : index
    %455 = vector.load %arg13[%c224_430, %c1_431] : memref<384x85xf32, #tpu.memory_space<vmem>>, vector<16x82xf32>
    %456 = arith.maximumf %454, %455 : vector<16x82xf32>
    %c240_432 = arith.constant 240 : index
    %c1_433 = arith.constant 1 : index
    %457 = vector.load %arg13[%c240_432, %c1_433] : memref<384x85xf32, #tpu.memory_space<vmem>>, vector<16x82xf32>
    %458 = arith.maximumf %456, %457 : vector<16x82xf32>
    %c256_434 = arith.constant 256 : index
    %c1_435 = arith.constant 1 : index
    %459 = vector.load %arg13[%c256_434, %c1_435] : memref<384x85xf32, #tpu.memory_space<vmem>>, vector<16x82xf32>
    %460 = arith.maximumf %458, %459 : vector<16x82xf32>
    %c272_436 = arith.constant 272 : index
    %c1_437 = arith.constant 1 : index
    %461 = vector.load %arg13[%c272_436, %c1_437] : memref<384x85xf32, #tpu.memory_space<vmem>>, vector<16x82xf32>
    %462 = arith.maximumf %460, %461 : vector<16x82xf32>
    %c288_438 = arith.constant 288 : index
    %c1_439 = arith.constant 1 : index
    %463 = vector.load %arg13[%c288_438, %c1_439] : memref<384x85xf32, #tpu.memory_space<vmem>>, vector<16x82xf32>
    %464 = arith.maximumf %462, %463 : vector<16x82xf32>
    %c304_440 = arith.constant 304 : index
    %c1_441 = arith.constant 1 : index
    %465 = vector.load %arg13[%c304_440, %c1_441] : memref<384x85xf32, #tpu.memory_space<vmem>>, vector<16x82xf32>
    %466 = arith.maximumf %464, %465 : vector<16x82xf32>
    %c320_442 = arith.constant 320 : index
    %c1_443 = arith.constant 1 : index
    %467 = vector.load %arg13[%c320_442, %c1_443] : memref<384x85xf32, #tpu.memory_space<vmem>>, vector<16x82xf32>
    %468 = arith.maximumf %466, %467 : vector<16x82xf32>
    %c336_444 = arith.constant 336 : index
    %c1_445 = arith.constant 1 : index
    %469 = vector.load %arg13[%c336_444, %c1_445] : memref<384x85xf32, #tpu.memory_space<vmem>>, vector<16x82xf32>
    %470 = arith.maximumf %468, %469 : vector<16x82xf32>
    %c352_446 = arith.constant 352 : index
    %c1_447 = arith.constant 1 : index
    %471 = vector.load %arg13[%c352_446, %c1_447] : memref<384x85xf32, #tpu.memory_space<vmem>>, vector<16x82xf32>
    %472 = arith.maximumf %470, %471 : vector<16x82xf32>
    %c368_448 = arith.constant 368 : index
    %c1_449 = arith.constant 1 : index
    %473 = vector.load %arg13[%c368_448, %c1_449] : memref<384x85xf32, #tpu.memory_space<vmem>>, vector<16x82xf32>
    %474 = arith.maximumf %472, %473 : vector<16x82xf32>
    %c0_450 = arith.constant 0 : index
    %c2_451 = arith.constant 2 : index
    %475 = vector.load %arg13[%c0_450, %c2_451] : memref<384x85xf32, #tpu.memory_space<vmem>>, vector<16x82xf32>
    %476 = arith.maximumf %474, %475 : vector<16x82xf32>
    %c16_452 = arith.constant 16 : index
    %c2_453 = arith.constant 2 : index
    %477 = vector.load %arg13[%c16_452, %c2_453] : memref<384x85xf32, #tpu.memory_space<vmem>>, vector<16x82xf32>
    %478 = arith.maximumf %476, %477 : vector<16x82xf32>
    %c32_454 = arith.constant 32 : index
    %c2_455 = arith.constant 2 : index
    %479 = vector.load %arg13[%c32_454, %c2_455] : memref<384x85xf32, #tpu.memory_space<vmem>>, vector<16x82xf32>
    %480 = arith.maximumf %478, %479 : vector<16x82xf32>
    %c48_456 = arith.constant 48 : index
    %c2_457 = arith.constant 2 : index
    %481 = vector.load %arg13[%c48_456, %c2_457] : memref<384x85xf32, #tpu.memory_space<vmem>>, vector<16x82xf32>
    %482 = arith.maximumf %480, %481 : vector<16x82xf32>
    %c64_458 = arith.constant 64 : index
    %c2_459 = arith.constant 2 : index
    %483 = vector.load %arg13[%c64_458, %c2_459] : memref<384x85xf32, #tpu.memory_space<vmem>>, vector<16x82xf32>
    %484 = arith.maximumf %482, %483 : vector<16x82xf32>
    %c80_460 = arith.constant 80 : index
    %c2_461 = arith.constant 2 : index
    %485 = vector.load %arg13[%c80_460, %c2_461] : memref<384x85xf32, #tpu.memory_space<vmem>>, vector<16x82xf32>
    %486 = arith.maximumf %484, %485 : vector<16x82xf32>
    %c96_462 = arith.constant 96 : index
    %c2_463 = arith.constant 2 : index
    %487 = vector.load %arg13[%c96_462, %c2_463] : memref<384x85xf32, #tpu.memory_space<vmem>>, vector<16x82xf32>
    %488 = arith.maximumf %486, %487 : vector<16x82xf32>
    %c112_464 = arith.constant 112 : index
    %c2_465 = arith.constant 2 : index
    %489 = vector.load %arg13[%c112_464, %c2_465] : memref<384x85xf32, #tpu.memory_space<vmem>>, vector<16x82xf32>
    %490 = arith.maximumf %488, %489 : vector<16x82xf32>
    %c128_466 = arith.constant 128 : index
    %c2_467 = arith.constant 2 : index
    %491 = vector.load %arg13[%c128_466, %c2_467] : memref<384x85xf32, #tpu.memory_space<vmem>>, vector<16x82xf32>
    %492 = arith.maximumf %490, %491 : vector<16x82xf32>
    %c144_468 = arith.constant 144 : index
    %c2_469 = arith.constant 2 : index
    %493 = vector.load %arg13[%c144_468, %c2_469] : memref<384x85xf32, #tpu.memory_space<vmem>>, vector<16x82xf32>
    %494 = arith.maximumf %492, %493 : vector<16x82xf32>
    %c160_470 = arith.constant 160 : index
    %c2_471 = arith.constant 2 : index
    %495 = vector.load %arg13[%c160_470, %c2_471] : memref<384x85xf32, #tpu.memory_space<vmem>>, vector<16x82xf32>
    %496 = arith.maximumf %494, %495 : vector<16x82xf32>
    %c176_472 = arith.constant 176 : index
    %c2_473 = arith.constant 2 : index
    %497 = vector.load %arg13[%c176_472, %c2_473] : memref<384x85xf32, #tpu.memory_space<vmem>>, vector<16x82xf32>
    %498 = arith.maximumf %496, %497 : vector<16x82xf32>
    %c192_474 = arith.constant 192 : index
    %c2_475 = arith.constant 2 : index
    %499 = vector.load %arg13[%c192_474, %c2_475] : memref<384x85xf32, #tpu.memory_space<vmem>>, vector<16x82xf32>
    %500 = arith.maximumf %498, %499 : vector<16x82xf32>
    %c208_476 = arith.constant 208 : index
    %c2_477 = arith.constant 2 : index
    %501 = vector.load %arg13[%c208_476, %c2_477] : memref<384x85xf32, #tpu.memory_space<vmem>>, vector<16x82xf32>
    %502 = arith.maximumf %500, %501 : vector<16x82xf32>
    %c224_478 = arith.constant 224 : index
    %c2_479 = arith.constant 2 : index
    %503 = vector.load %arg13[%c224_478, %c2_479] : memref<384x85xf32, #tpu.memory_space<vmem>>, vector<16x82xf32>
    %504 = arith.maximumf %502, %503 : vector<16x82xf32>
    %c240_480 = arith.constant 240 : index
    %c2_481 = arith.constant 2 : index
    %505 = vector.load %arg13[%c240_480, %c2_481] : memref<384x85xf32, #tpu.memory_space<vmem>>, vector<16x82xf32>
    %506 = arith.maximumf %504, %505 : vector<16x82xf32>
    %c256_482 = arith.constant 256 : index
    %c2_483 = arith.constant 2 : index
    %507 = vector.load %arg13[%c256_482, %c2_483] : memref<384x85xf32, #tpu.memory_space<vmem>>, vector<16x82xf32>
    %508 = arith.maximumf %506, %507 : vector<16x82xf32>
    %c272_484 = arith.constant 272 : index
    %c2_485 = arith.constant 2 : index
    %509 = vector.load %arg13[%c272_484, %c2_485] : memref<384x85xf32, #tpu.memory_space<vmem>>, vector<16x82xf32>
    %510 = arith.maximumf %508, %509 : vector<16x82xf32>
    %c288_486 = arith.constant 288 : index
    %c2_487 = arith.constant 2 : index
    %511 = vector.load %arg13[%c288_486, %c2_487] : memref<384x85xf32, #tpu.memory_space<vmem>>, vector<16x82xf32>
    %512 = arith.maximumf %510, %511 : vector<16x82xf32>
    %c304_488 = arith.constant 304 : index
    %c2_489 = arith.constant 2 : index
    %513 = vector.load %arg13[%c304_488, %c2_489] : memref<384x85xf32, #tpu.memory_space<vmem>>, vector<16x82xf32>
    %514 = arith.maximumf %512, %513 : vector<16x82xf32>
    %c320_490 = arith.constant 320 : index
    %c2_491 = arith.constant 2 : index
    %515 = vector.load %arg13[%c320_490, %c2_491] : memref<384x85xf32, #tpu.memory_space<vmem>>, vector<16x82xf32>
    %516 = arith.maximumf %514, %515 : vector<16x82xf32>
    %c336_492 = arith.constant 336 : index
    %c2_493 = arith.constant 2 : index
    %517 = vector.load %arg13[%c336_492, %c2_493] : memref<384x85xf32, #tpu.memory_space<vmem>>, vector<16x82xf32>
    %518 = arith.maximumf %516, %517 : vector<16x82xf32>
    %c352_494 = arith.constant 352 : index
    %c2_495 = arith.constant 2 : index
    %519 = vector.load %arg13[%c352_494, %c2_495] : memref<384x85xf32, #tpu.memory_space<vmem>>, vector<16x82xf32>
    %520 = arith.maximumf %518, %519 : vector<16x82xf32>
    %c368_496 = arith.constant 368 : index
    %c2_497 = arith.constant 2 : index
    %521 = vector.load %arg13[%c368_496, %c2_497] : memref<384x85xf32, #tpu.memory_space<vmem>>, vector<16x82xf32>
    %522 = arith.maximumf %520, %521 : vector<16x82xf32>
    %c0_498 = arith.constant 0 : index
    %c3_499 = arith.constant 3 : index
    %523 = vector.load %arg13[%c0_498, %c3_499] : memref<384x85xf32, #tpu.memory_space<vmem>>, vector<16x82xf32>
    %524 = arith.maximumf %522, %523 : vector<16x82xf32>
    %c16_500 = arith.constant 16 : index
    %c3_501 = arith.constant 3 : index
    %525 = vector.load %arg13[%c16_500, %c3_501] : memref<384x85xf32, #tpu.memory_space<vmem>>, vector<16x82xf32>
    %526 = arith.maximumf %524, %525 : vector<16x82xf32>
    %c32_502 = arith.constant 32 : index
    %c3_503 = arith.constant 3 : index
    %527 = vector.load %arg13[%c32_502, %c3_503] : memref<384x85xf32, #tpu.memory_space<vmem>>, vector<16x82xf32>
    %528 = arith.maximumf %526, %527 : vector<16x82xf32>
    %c48_504 = arith.constant 48 : index
    %c3_505 = arith.constant 3 : index
    %529 = vector.load %arg13[%c48_504, %c3_505] : memref<384x85xf32, #tpu.memory_space<vmem>>, vector<16x82xf32>
    %530 = arith.maximumf %528, %529 : vector<16x82xf32>
    %c64_506 = arith.constant 64 : index
    %c3_507 = arith.constant 3 : index
    %531 = vector.load %arg13[%c64_506, %c3_507] : memref<384x85xf32, #tpu.memory_space<vmem>>, vector<16x82xf32>
    %532 = arith.maximumf %530, %531 : vector<16x82xf32>
    %c80_508 = arith.constant 80 : index
    %c3_509 = arith.constant 3 : index
    %533 = vector.load %arg13[%c80_508, %c3_509] : memref<384x85xf32, #tpu.memory_space<vmem>>, vector<16x82xf32>
    %534 = arith.maximumf %532, %533 : vector<16x82xf32>
    %c96_510 = arith.constant 96 : index
    %c3_511 = arith.constant 3 : index
    %535 = vector.load %arg13[%c96_510, %c3_511] : memref<384x85xf32, #tpu.memory_space<vmem>>, vector<16x82xf32>
    %536 = arith.maximumf %534, %535 : vector<16x82xf32>
    %cst_512 = arith.constant 0.000000e+00 : f32
    %537 = vector.broadcast %cst_512 : f32 to vector<16x82xf32>
    %538 = arith.maximumf %536, %537 : vector<16x82xf32>
    %c48_513 = arith.constant 48 : index
    %c0_514 = arith.constant 0 : index
    %539 = vector.load %arg14[%c48_513, %c0_514] : memref<64x82xf32, #tpu.memory_space<vmem>>, vector<16x82xf32>
    tpu.vector_store %arg14[%c48_513, %c0_514], %538 {strides = array<i32>} : memref<64x82xf32, #tpu.memory_space<vmem>>, vector<16x82xf32>,
    %c0_515 = arith.constant 0 : index
    %c0_516 = arith.constant 0 : index
    %540 = vector.load %arg4[%c0_515, %c0_516] : memref<64x64xf32, #tpu.memory_space<vmem>>, vector<64x64xf32>
    %c0_517 = arith.constant 0 : index
    %c0_518 = arith.constant 0 : index
    %541 = vector.load %arg14[%c0_517, %c0_518] : memref<64x82xf32, #tpu.memory_space<vmem>>, vector<64x82xf32>
    %cst_519 = arith.constant dense<0.000000e+00> : vector<64x82xf32>
    %542 = tpu.matmul %540, %541, %cst_519 {dimension_numbers = #tpu.dot_dimension_numbers<[1], [0], [0], [1], [0, 0, 1, 1], [], []>} : vector<64x64xf32>, vector<64x82xf32>, vector<64x82xf32> -> vector<64x82xf32>
    %c0_520 = arith.constant 0 : index
    %c0_521 = arith.constant 0 : index
    %543 = vector.load %arg5[%c0_520, %c0_521] : memref<64x1xf32, #tpu.memory_space<vmem>>, vector<64x1xf32>
    %544 = vector.broadcast %543 : vector<64x1xf32> to vector<64x82xf32>
    %545 = arith.addf %542, %544 : vector<64x82xf32>
    %546 = vector.extract_strided_slice %545 {offsets = [0, 0], sizes = [32, 81], strides = [1, 1]} : vector<64x82xf32> to vector<32x81xf32>
    %547 = vector.extract_strided_slice %545 {offsets = [32, 0], sizes = [32, 81], strides = [1, 1]} : vector<64x82xf32> to vector<32x81xf32>
    %548 = arith.maximumf %546, %547 : vector<32x81xf32>
    %549 = vector.extract_strided_slice %545 {offsets = [0, 1], sizes = [32, 81], strides = [1, 1]} : vector<64x82xf32> to vector<32x81xf32>
    %550 = arith.maximumf %548, %549 : vector<32x81xf32>
    %cst_522 = arith.constant 0.000000e+00 : f32
    %551 = vector.broadcast %cst_522 : f32 to vector<32x81xf32>
    %552 = arith.maximumf %550, %551 : vector<32x81xf32>
    %c0_523 = arith.constant 0 : index
    %c0_524 = arith.constant 0 : index
    %c0_525 = arith.constant 0 : index
    %553 = vector.load %arg11[%c0_523, %c0_524, %c0_525] : memref<1x32x81xf32, #tpu.memory_space<vmem>>, vector<1x32x81xf32>
    %554 = vector.shape_cast %553 : vector<1x32x81xf32> to vector<32x81xf32>
    %555 = vector.shape_cast %552 : vector<32x81xf32> to vector<1x32x81xf32>
    tpu.vector_store %arg11[%c0_523, %c0_524, %c0_525], %555 {strides = array<i32>} : memref<1x32x81xf32, #tpu.memory_space<vmem>>, vector<1x32x81xf32>,
    %c0_526 = arith.constant 0 : index
    %c0_527 = arith.constant 0 : index
    %556 = vector.load %arg9[%c0_526, %c0_527] : memref<81x27xf32, #tpu.memory_space<vmem>>, vector<81x27xf32>
    %cst_528 = arith.constant dense<0.000000e+00> : vector<32x27xf32>
    %557 = tpu.matmul %552, %556, %cst_528 {dimension_numbers = #tpu.dot_dimension_numbers<[1], [0], [0], [1], [0, 0, 1, 1], [], []>} : vector<32x81xf32>, vector<81x27xf32>, vector<32x27xf32> -> vector<32x27xf32>
    %c0_529 = arith.constant 0 : index
    %c0_530 = arith.constant 0 : index
    %558 = vector.load %arg10[%c0_529, %c0_530] : memref<81x27xf32, #tpu.memory_space<vmem>>, vector<81x27xf32>
    %cst_531 = arith.constant dense<0.000000e+00> : vector<32x27xf32>
    %559 = tpu.matmul %552, %558, %cst_531 {dimension_numbers = #tpu.dot_dimension_numbers<[1], [0], [0], [1], [0, 0, 1, 1], [], []>} : vector<32x81xf32>, vector<81x27xf32>, vector<32x27xf32> -> vector<32x27xf32>
    %c0_532 = arith.constant 0 : index
    %c0_533 = arith.constant 0 : index
    %560 = vector.load %arg6[%c0_532, %c0_533] : memref<32x32xf32, #tpu.memory_space<vmem>>, vector<32x32xf32>
    %cst_534 = arith.constant dense<0.000000e+00> : vector<32x27xf32>
    %561 = tpu.matmul %560, %557, %cst_534 {dimension_numbers = #tpu.dot_dimension_numbers<[1], [0], [0], [1], [0, 0, 1, 1], [], []>} : vector<32x32xf32>, vector<32x27xf32>, vector<32x27xf32> -> vector<32x27xf32>
    %c0_535 = arith.constant 0 : index
    %c0_536 = arith.constant 0 : index
    %562 = vector.load %arg7[%c0_535, %c0_536] : memref<32x32xf32, #tpu.memory_space<vmem>>, vector<32x32xf32>
    %cst_537 = arith.constant dense<0.000000e+00> : vector<32x27xf32>
    %563 = tpu.matmul %562, %559, %cst_537 {dimension_numbers = #tpu.dot_dimension_numbers<[1], [0], [0], [1], [0, 0, 1, 1], [], []>} : vector<32x32xf32>, vector<32x27xf32>, vector<32x27xf32> -> vector<32x27xf32>
    %564 = arith.addf %561, %563 : vector<32x27xf32>
    %c0_538 = arith.constant 0 : index
    %c0_539 = arith.constant 0 : index
    %565 = vector.load %arg8[%c0_538, %c0_539] : memref<32x1xf32, #tpu.memory_space<vmem>>, vector<32x1xf32>
    %566 = vector.broadcast %565 : vector<32x1xf32> to vector<32x27xf32>
    %567 = arith.addf %564, %566 : vector<32x27xf32>
    %cst_540 = arith.constant 0.000000e+00 : f32
    %568 = vector.broadcast %cst_540 : f32 to vector<32x27xf32>
    %569 = arith.maximumf %567, %568 : vector<32x27xf32>
    %c0_541 = arith.constant 0 : index
    %c0_542 = arith.constant 0 : index
    %c0_543 = arith.constant 0 : index
    %570 = vector.load %arg12[%c0_541, %c0_542, %c0_543] : memref<1x32x27xf32, #tpu.memory_space<vmem>>, vector<1x32x27xf32>
    %571 = vector.shape_cast %570 : vector<1x32x27xf32> to vector<32x27xf32>
    %572 = vector.shape_cast %569 : vector<32x27xf32> to vector<1x32x27xf32>
    tpu.vector_store %arg12[%c0_541, %c0_542, %c0_543], %572 {strides = array<i32>} : memref<1x32x27xf32, #tpu.memory_space<vmem>>, vector<1x32x27xf32>,
    return
  }
  func.func @transform_0(%arg0: i32) -> (i32, i32, i32) {
    %c0_i32 = arith.constant 0 : i32
    %c0_i32_0 = arith.constant 0 : i32
    %c0_i32_1 = arith.constant 0 : i32
    return %arg0, %c0_i32, %c0_i32_0 : i32, i32, i32
  }
  func.func @transform_1(%arg0: i32) -> (i32, i32, i32) {
    %c0_i32 = arith.constant 0 : i32
    %c0_i32_0 = arith.constant 0 : i32
    %c0_i32_1 = arith.constant 0 : i32
    %c0_i32_2 = arith.constant 0 : i32
    return %c0_i32, %c0_i32_0, %c0_i32_1 : i32, i32, i32
  }
  func.func @transform_2(%arg0: i32) -> (i32, i32) {
    %c0_i32 = arith.constant 0 : i32
    %c0_i32_0 = arith.constant 0 : i32
    %c0_i32_1 = arith.constant 0 : i32
    return %c0_i32, %c0_i32_0 : i32, i32
  }
  func.func @transform_3(%arg0: i32) -> (i32, i32) {
    %c0_i32 = arith.constant 0 : i32
    %c0_i32_0 = arith.constant 0 : i32
    %c0_i32_1 = arith.constant 0 : i32
    return %c0_i32, %c0_i32_0 : i32, i32
  }
  func.func @transform_4(%arg0: i32) -> (i32, i32) {
    %c0_i32 = arith.constant 0 : i32
    %c0_i32_0 = arith.constant 0 : i32
    %c0_i32_1 = arith.constant 0 : i32
    return %c0_i32, %c0_i32_0 : i32, i32
  }
  func.func @transform_5(%arg0: i32) -> (i32, i32) {
    %c0_i32 = arith.constant 0 : i32
    %c0_i32_0 = arith.constant 0 : i32
    %c0_i32_1 = arith.constant 0 : i32
    return %c0_i32, %c0_i32_0 : i32, i32
  }
  func.func @transform_6(%arg0: i32) -> (i32, i32) {
    %c0_i32 = arith.constant 0 : i32
    %c0_i32_0 = arith.constant 0 : i32
    %c0_i32_1 = arith.constant 0 : i32
    return %c0_i32, %c0_i32_0 : i32, i32
  }
  func.func @transform_7(%arg0: i32) -> (i32, i32) {
    %c0_i32 = arith.constant 0 : i32
    %c0_i32_0 = arith.constant 0 : i32
    %c0_i32_1 = arith.constant 0 : i32
    return %c0_i32, %c0_i32_0 : i32, i32
  }
  func.func @transform_8(%arg0: i32) -> (i32, i32) {
    %c0_i32 = arith.constant 0 : i32
    %c0_i32_0 = arith.constant 0 : i32
    %c0_i32_1 = arith.constant 0 : i32
    return %c0_i32, %c0_i32_0 : i32, i32
  }
  func.func @transform_9(%arg0: i32) -> (i32, i32) {
    %c0_i32 = arith.constant 0 : i32
    %c0_i32_0 = arith.constant 0 : i32
    %c0_i32_1 = arith.constant 0 : i32
    return %c0_i32, %c0_i32_0 : i32, i32
  }
  func.func @transform_10(%arg0: i32) -> (i32, i32, i32) {
    %c0_i32 = arith.constant 0 : i32
    %c0_i32_0 = arith.constant 0 : i32
    %c0_i32_1 = arith.constant 0 : i32
    return %arg0, %c0_i32, %c0_i32_0 : i32, i32, i32
  }
  func.func @transform_11(%arg0: i32) -> (i32, i32, i32) {
    %c0_i32 = arith.constant 0 : i32
    %c0_i32_0 = arith.constant 0 : i32
    %c0_i32_1 = arith.constant 0 : i32
    return %arg0, %c0_i32, %c0_i32_0 : i32, i32, i32
  }
}

module attributes {stable_mosaic.version = 11 : i64} {
  func.func @_head_kernel(%arg0: i32, %arg1: memref<6x2592xf32, #tpu.memory_space<vmem>>, %arg2: memref<2x2592xf32, #tpu.memory_space<vmem>>, %arg3: memref<2592x32xf32, #tpu.memory_space<vmem>>, %arg4: memref<1x32xf32, #tpu.memory_space<vmem>>, %arg5: memref<2592x32xf32, #tpu.memory_space<vmem>>, %arg6: memref<1x32xf32, #tpu.memory_space<vmem>>, %arg7: memref<128x10xf32, #tpu.memory_space<vmem>>, %arg8: memref<1x10xf32, #tpu.memory_space<vmem>>, %arg9: memref<2x10xf32, #tpu.memory_space<vmem>>, %arg10: memref<2x128xf32, #tpu.memory_space<vmem>>) attributes {dimension_semantics = [#tpu.dimension_semantics<arbitrary>], iteration_bounds = array<i64: 1>, scalar_prefetch = 0 : i64, scratch_operands = 0 : i64, tpu.core_type = #tpu.core_type<tc>, window_params = [{pipeline_mode = #tpu.pipeline_mode<synchronous>, transform_indices = @transform_0, window_bounds = array<i64: 6, 2592>}, {pipeline_mode = #tpu.pipeline_mode<synchronous>, transform_indices = @transform_1, window_bounds = array<i64: 2, 2592>}, {pipeline_mode = #tpu.pipeline_mode<synchronous>, transform_indices = @transform_2, window_bounds = array<i64: 2592, 32>}, {pipeline_mode = #tpu.pipeline_mode<synchronous>, transform_indices = @transform_3, window_bounds = array<i64: 1, 32>}, {pipeline_mode = #tpu.pipeline_mode<synchronous>, transform_indices = @transform_4, window_bounds = array<i64: 2592, 32>}, {pipeline_mode = #tpu.pipeline_mode<synchronous>, transform_indices = @transform_5, window_bounds = array<i64: 1, 32>}, {pipeline_mode = #tpu.pipeline_mode<synchronous>, transform_indices = @transform_6, window_bounds = array<i64: 128, 10>}, {pipeline_mode = #tpu.pipeline_mode<synchronous>, transform_indices = @transform_7, window_bounds = array<i64: 1, 10>}, {pipeline_mode = #tpu.pipeline_mode<synchronous>, transform_indices = @transform_8, window_bounds = array<i64: 2, 10>}, {pipeline_mode = #tpu.pipeline_mode<synchronous>, transform_indices = @transform_9, window_bounds = array<i64: 2, 128>}]} {
    %c0 = arith.constant 0 : index
    %c0_0 = arith.constant 0 : index
    %0 = vector.load %arg1[%c0, %c0_0] : memref<6x2592xf32, #tpu.memory_space<vmem>>, vector<6x2592xf32>
    %c0_1 = arith.constant 0 : index
    %c0_2 = arith.constant 0 : index
    %1 = vector.load %arg3[%c0_1, %c0_2] : memref<2592x32xf32, #tpu.memory_space<vmem>>, vector<2592x32xf32>
    %cst = arith.constant dense<0.000000e+00> : vector<6x32xf32>
    %2 = tpu.matmul %0, %1, %cst {dimension_numbers = #tpu.dot_dimension_numbers<[1], [0], [0], [1], [0, 0, 1, 1], [], []>} : vector<6x2592xf32>, vector<2592x32xf32>, vector<6x32xf32> -> vector<6x32xf32>
    %c0_3 = arith.constant 0 : index
    %c0_4 = arith.constant 0 : index
    %3 = vector.load %arg4[%c0_3, %c0_4] : memref<1x32xf32, #tpu.memory_space<vmem>>, vector<1x32xf32>
    %4 = vector.broadcast %3 : vector<1x32xf32> to vector<6x32xf32>
    %5 = arith.addf %2, %4 : vector<6x32xf32>
    %cst_5 = arith.constant 0.000000e+00 : f32
    %6 = vector.broadcast %cst_5 : f32 to vector<6x32xf32>
    %7 = arith.maximumf %5, %6 : vector<6x32xf32>
    %c0_6 = arith.constant 0 : index
    %c0_7 = arith.constant 0 : index
    %8 = vector.load %arg2[%c0_6, %c0_7] : memref<2x2592xf32, #tpu.memory_space<vmem>>, vector<2x2592xf32>
    %c0_8 = arith.constant 0 : index
    %c0_9 = arith.constant 0 : index
    %9 = vector.load %arg5[%c0_8, %c0_9] : memref<2592x32xf32, #tpu.memory_space<vmem>>, vector<2592x32xf32>
    %cst_10 = arith.constant dense<0.000000e+00> : vector<2x32xf32>
    %10 = tpu.matmul %8, %9, %cst_10 {dimension_numbers = #tpu.dot_dimension_numbers<[1], [0], [0], [1], [0, 0, 1, 1], [], []>} : vector<2x2592xf32>, vector<2592x32xf32>, vector<2x32xf32> -> vector<2x32xf32>
    %c0_11 = arith.constant 0 : index
    %c0_12 = arith.constant 0 : index
    %11 = vector.load %arg6[%c0_11, %c0_12] : memref<1x32xf32, #tpu.memory_space<vmem>>, vector<1x32xf32>
    %12 = vector.broadcast %11 : vector<1x32xf32> to vector<2x32xf32>
    %13 = arith.addf %10, %12 : vector<2x32xf32>
    %cst_13 = arith.constant 0.000000e+00 : f32
    %14 = vector.broadcast %cst_13 : f32 to vector<2x32xf32>
    %15 = arith.maximumf %13, %14 : vector<2x32xf32>
    %16 = vector.extract_strided_slice %7 {offsets = [0, 0], sizes = [2, 32], strides = [1, 1]} : vector<6x32xf32> to vector<2x32xf32>
    %17 = vector.extract_strided_slice %7 {offsets = [2, 0], sizes = [2, 32], strides = [1, 1]} : vector<6x32xf32> to vector<2x32xf32>
    %18 = vector.extract_strided_slice %7 {offsets = [4, 0], sizes = [2, 32], strides = [1, 1]} : vector<6x32xf32> to vector<2x32xf32>
    %19 = tpu.concatenate %16, %17, %18, %15 in 1 : vector<2x32xf32>, vector<2x32xf32>, vector<2x32xf32>, vector<2x32xf32> -> vector<2x128xf32>
    %c0_14 = arith.constant 0 : index
    %c0_15 = arith.constant 0 : index
    %20 = vector.load %arg10[%c0_14, %c0_15] : memref<2x128xf32, #tpu.memory_space<vmem>>, vector<2x128xf32>
    tpu.vector_store %arg10[%c0_14, %c0_15], %19 {strides = array<i32>} : memref<2x128xf32, #tpu.memory_space<vmem>>, vector<2x128xf32>,
    %c0_16 = arith.constant 0 : index
    %c0_17 = arith.constant 0 : index
    %21 = vector.load %arg7[%c0_16, %c0_17] : memref<128x10xf32, #tpu.memory_space<vmem>>, vector<128x10xf32>
    %cst_18 = arith.constant dense<0.000000e+00> : vector<2x10xf32>
    %22 = tpu.matmul %19, %21, %cst_18 {dimension_numbers = #tpu.dot_dimension_numbers<[1], [0], [0], [1], [0, 0, 1, 1], [], []>} : vector<2x128xf32>, vector<128x10xf32>, vector<2x10xf32> -> vector<2x10xf32>
    %c0_19 = arith.constant 0 : index
    %c0_20 = arith.constant 0 : index
    %23 = vector.load %arg8[%c0_19, %c0_20] : memref<1x10xf32, #tpu.memory_space<vmem>>, vector<1x10xf32>
    %24 = vector.broadcast %23 : vector<1x10xf32> to vector<2x10xf32>
    %25 = arith.addf %22, %24 : vector<2x10xf32>
    %c0_21 = arith.constant 0 : index
    %c0_22 = arith.constant 0 : index
    %26 = vector.load %arg9[%c0_21, %c0_22] : memref<2x10xf32, #tpu.memory_space<vmem>>, vector<2x10xf32>
    tpu.vector_store %arg9[%c0_21, %c0_22], %25 {strides = array<i32>} : memref<2x10xf32, #tpu.memory_space<vmem>>, vector<2x10xf32>,
    return
  }
  func.func @transform_0(%arg0: i32) -> (i32, i32) {
    %c0_i32 = arith.constant 0 : i32
    %c0_i32_0 = arith.constant 0 : i32
    %c0_i32_1 = arith.constant 0 : i32
    return %c0_i32, %c0_i32_0 : i32, i32
  }
  func.func @transform_1(%arg0: i32) -> (i32, i32) {
    %c0_i32 = arith.constant 0 : i32
    %c0_i32_0 = arith.constant 0 : i32
    %c0_i32_1 = arith.constant 0 : i32
    return %c0_i32, %c0_i32_0 : i32, i32
  }
  func.func @transform_2(%arg0: i32) -> (i32, i32) {
    %c0_i32 = arith.constant 0 : i32
    %c0_i32_0 = arith.constant 0 : i32
    %c0_i32_1 = arith.constant 0 : i32
    return %c0_i32, %c0_i32_0 : i32, i32
  }
  func.func @transform_3(%arg0: i32) -> (i32, i32) {
    %c0_i32 = arith.constant 0 : i32
    %c0_i32_0 = arith.constant 0 : i32
    %c0_i32_1 = arith.constant 0 : i32
    return %c0_i32, %c0_i32_0 : i32, i32
  }
  func.func @transform_4(%arg0: i32) -> (i32, i32) {
    %c0_i32 = arith.constant 0 : i32
    %c0_i32_0 = arith.constant 0 : i32
    %c0_i32_1 = arith.constant 0 : i32
    return %c0_i32, %c0_i32_0 : i32, i32
  }
  func.func @transform_5(%arg0: i32) -> (i32, i32) {
    %c0_i32 = arith.constant 0 : i32
    %c0_i32_0 = arith.constant 0 : i32
    %c0_i32_1 = arith.constant 0 : i32
    return %c0_i32, %c0_i32_0 : i32, i32
  }
  func.func @transform_6(%arg0: i32) -> (i32, i32) {
    %c0_i32 = arith.constant 0 : i32
    %c0_i32_0 = arith.constant 0 : i32
    %c0_i32_1 = arith.constant 0 : i32
    return %c0_i32, %c0_i32_0 : i32, i32
  }
  func.func @transform_7(%arg0: i32) -> (i32, i32) {
    %c0_i32 = arith.constant 0 : i32
    %c0_i32_0 = arith.constant 0 : i32
    %c0_i32_1 = arith.constant 0 : i32
    return %c0_i32, %c0_i32_0 : i32, i32
  }
  func.func @transform_8(%arg0: i32) -> (i32, i32) {
    %c0_i32 = arith.constant 0 : i32
    %c0_i32_0 = arith.constant 0 : i32
    %c0_i32_1 = arith.constant 0 : i32
    return %c0_i32, %c0_i32_0 : i32, i32
  }
  func.func @transform_9(%arg0: i32) -> (i32, i32) {
    %c0_i32 = arith.constant 0 : i32
    %c0_i32_0 = arith.constant 0 : i32
    %c0_i32_1 = arith.constant 0 : i32
    return %c0_i32, %c0_i32_0 : i32, i32
  }
}

</mosaic_0001>

<bundles_post_ra>
// kernel: swae_forward.3
= control target key start
LH: loop header
LB: loop body
LE: loop exit
PB: predicated region body
PF: predicated region fallthrough
CT: control target
= control target key end

     0   :  { %15 = vsyncpa [#allocation3], 0  ;;  %vm3378_vm0 = vmmov 0   ;;  %vm385_vm1 = vcmask 261120   ;;  %s5573_s0 = inlined_call_operand.vmem [shape: f32[6,2592], index: 0, kind: input, shape index: {}]   ;;  %s5574_s1 = inlined_call_operand.vmem [shape: f32[2,2592], index: 1, kind: input, shape index: {}]   ;;  %s5575_s2 = inlined_call_operand.vmem [shape: f32[2592,32], index: 2, kind: input, shape index: {}]   ;;  %s5576_s3 = inlined_call_operand.vmem [shape: f32[1,32], index: 3, kind: input, shape index: {}]   ;;  %s5577_s4 = inlined_call_operand.vmem [shape: f32[2592,32], index: 4, kind: input, shape index: {}]   ;;  %s5578_s5 = inlined_call_operand.vmem [shape: f32[1,32], index: 5, kind: input, shape index: {}]   ;;  %s5579_s6 = inlined_call_operand.vmem [shape: f32[128,10], index: 6, kind: input, shape index: {}]   ;;  %s5580_s7 = inlined_call_operand.vmem [shape: f32[1,10], index: 7, kind: input, shape index: {}]   ;;  %s5581_s8 = inlined_call_operand.hbm [shape: f32[2,10], index: 8, kind: output, shape index: {0}]   ;;  %s5582_s9 = inlined_call_operand.hbm [shape: f32[2,128], index: 9, kind: output, shape index: {1}]  }
   0x1   :  { %v85_v0 = vld [vmem:[%s5575_s2 + $0xf8] sm:$0xff]  ;;  %v84_v4 = vld [vmem:[%s5575_s2 + $0xf0] sm:$0xff]  ;;  %v83_v8 = vld [vmem:[%s5575_s2 + $0xe8] sm:$0xff] }
   0x2   :  { %v117_v1 = vld [vmem:[%s5575_s2 + $0x1f8] sm:$0xff]  ;;  %2536 = vmatprep.subr.mxu0 %v85_v0  ;;  %v116_v5 = vld [vmem:[%s5575_s2 + $0x1f0] sm:$0xff]  ;;  %v115_v9 = vld [vmem:[%s5575_s2 + $0x1e8] sm:$0xff] }
   0x3   :  { %v69_v2 = vld [vmem:[%s5575_s2 + $0x78] sm:$0xff]  ;;  %2571 = vmatprep.subr.mxu1 %v117_v1  ;;  %v68_v6 = vld [vmem:[%s5575_s2 + $0x70] sm:$0xff]  ;;  %v67_v10 = vld [vmem:[%s5575_s2 + $0x68] sm:$0xff] }
   0x4   :  { %v101_v3 = vld [vmem:[%s5575_s2 + $0x178] sm:$0xff]  ;;  %2537 = vmatpush3.msra.mxu0 %v69_v2  ;;  %v100_v7 = vld [vmem:[%s5575_s2 + $0x170] sm:$0xff]  ;;  %v99_v11 = vld [vmem:[%s5575_s2 + $0x168] sm:$0xff] }
   0x5   :  { %2572 = vmatpush3.msra.mxu1 %v101_v3  ;;  %2538 = vmatprep.subr.mxu0 %v84_v4  ;;  %v82_v12 = vld [vmem:[%s5575_s2 + $0xe0] sm:$0xff]  ;;  %v81_v16 = vld [vmem:[%s5575_s2 + $0xd8] sm:$0xff]  ;;  %v80_v20 = vld [vmem:[%s5575_s2 + $0xd0] sm:$0xff] }
   0x6   :  { %2573 = vmatprep.subr.mxu1 %v116_v5  ;;  %2539 = vmatpush3.msra.mxu0 %v68_v6  ;;  %v114_v13 = vld [vmem:[%s5575_s2 + $0x1e0] sm:$0xff]  ;;  %v113_v17 = vld [vmem:[%s5575_s2 + $0x1d8] sm:$0xff]  ;;  %v112_v21 = vld [vmem:[%s5575_s2 + $0x1d0] sm:$0xff] }
   0x7   :  { %2574 = vmatpush3.msra.mxu1 %v100_v7  ;;  %2540 = vmatprep.subr.mxu0 %v83_v8  ;;  %v66_v14 = vld [vmem:[%s5575_s2 + $0x60] sm:$0xff]  ;;  %v65_v18 = vld [vmem:[%s5575_s2 + $0x58] sm:$0xff]  ;;  %v64_v22 = vld [vmem:[%s5575_s2 + $0x50] sm:$0xff] }
   0x8   :  { %2575 = vmatprep.subr.mxu1 %v115_v9  ;;  %v98_v15 = vld [vmem:[%s5575_s2 + $0x160] sm:$0xff]  ;;  %2541 = vmatpush3.msra.mxu0 %v67_v10  ;;  %v97_v19 = vld [vmem:[%s5575_s2 + $0x158] sm:$0xff]  ;;  %v96_v23 = vld [vmem:[%s5575_s2 + $0x150] sm:$0xff] }
   0x9   :  { %2576 = vmatpush3.msra.mxu1 %v99_v11  ;;  %2542 = vmatprep.subr.mxu0 %v82_v12  ;;  %v79_v24 = vld [vmem:[%s5575_s2 + $0xc8] sm:$0xff]  ;;  %v78_v28 = vld [vmem:[%s5575_s2 + $0xc0] sm:$0xff]  ;;  %v77_v32 = vld [vmem:[%s5575_s2 + $0xb8] sm:$0xff] }
   0xa   :  { %2577 = vmatprep.subr.mxu1 %v114_v13  ;;  %2543 = vmatpush3.msra.mxu0 %v66_v14  ;;  %v111_v25 = vld [vmem:[%s5575_s2 + $0x1c8] sm:$0xff]  ;;  %v110_v29 = vld [vmem:[%s5575_s2 + $0x1c0] sm:$0xff]  ;;  %v109_v33 = vld [vmem:[%s5575_s2 + $0x1b8] sm:$0xff] }
   0xb   :  { %2578 = vmatpush3.msra.mxu1 %v98_v15  ;;  %2544 = vmatprep.subr.mxu0 %v81_v16  ;;  %v63_v26 = vld [vmem:[%s5575_s2 + $0x48] sm:$0xff]  ;;  %v62_v30 = vld [vmem:[%s5575_s2 + $0x40] sm:$0xff]  ;;  %v61_v34 = vld [vmem:[%s5575_s2 + $0x38] sm:$0xff] }
   0xc   :  { %2579 = vmatprep.subr.mxu1 %v113_v17  ;;  %2545 = vmatpush3.msra.mxu0 %v65_v18  ;;  %v95_v27 = vld [vmem:[%s5575_s2 + $0x148] sm:$0xff]  ;;  %v94_v31 = vld [vmem:[%s5575_s2 + $0x140] sm:$0xff]  ;;  %v93_v35 = vld [vmem:[%s5575_s2 + $0x138] sm:$0xff] }
   0xd   :  { %2580 = vmatpush3.msra.mxu1 %v97_v19  ;;  %2546 = vmatprep.subr.mxu0 %v80_v20  ;;  %v76_v36 = vld [vmem:[%s5575_s2 + $0xb0] sm:$0xff]  ;;  %v75_v40 = vld [vmem:[%s5575_s2 + $0xa8] sm:$0xff]  ;;  %v74_v44 = vld [vmem:[%s5575_s2 + $0xa0] sm:$0xff] }
   0xe   :  { %2581 = vmatprep.subr.mxu1 %v112_v21  ;;  %2547 = vmatpush3.msra.mxu0 %v64_v22  ;;  %v108_v37 = vld [vmem:[%s5575_s2 + $0x1b0] sm:$0xff]  ;;  %v107_v41 = vld [vmem:[%s5575_s2 + $0x1a8] sm:$0xff]  ;;  %v106_v45 = vld [vmem:[%s5575_s2 + $0x1a0] sm:$0xff] }
   0xf   :  { %2582 = vmatpush3.msra.mxu1 %v96_v23  ;;  %2548 = vmatprep.subr.mxu0 %v79_v24  ;;  %v60_v38 = vld [vmem:[%s5575_s2 + $0x30] sm:$0xff]  ;;  %v59_v42 = vld [vmem:[%s5575_s2 + $0x28] sm:$0xff]  ;;  %v58_v46 = vld [vmem:[%s5575_s2 + $0x20] sm:$0xff] }
  0x10   :  { %2583 = vmatprep.subr.mxu1 %v111_v25  ;;  %2549 = vmatpush3.msra.mxu0 %v63_v26  ;;  %v92_v39 = vld [vmem:[%s5575_s2 + $0x130] sm:$0xff]  ;;  %v91_v43 = vld [vmem:[%s5575_s2 + $0x128] sm:$0xff]  ;;  %v90_v47 = vld [vmem:[%s5575_s2 + $0x120] sm:$0xff] }
  0x11   :  { %2584 = vmatpush3.msra.mxu1 %v95_v27  ;;  %2550 = vmatprep.subr.mxu0 %v78_v28  ;;  %v73_v48 = vld [vmem:[%s5575_s2 + $0x98] sm:$0xff]  ;;  %v72_v52 = vld [vmem:[%s5575_s2 + $0x90] sm:$0xff]  ;;  %v71_v56 = vld [vmem:[%s5575_s2 + $0x88] sm:$0xff] }
  0x12   :  { %2585 = vmatprep.subr.mxu1 %v110_v29  ;;  %2551 = vmatpush3.msra.mxu0 %v62_v30  ;;  %v105_v49 = vld [vmem:[%s5575_s2 + $0x198] sm:$0xff]  ;;  %v104_v53 = vld [vmem:[%s5575_s2 + $0x190] sm:$0xff]  ;;  %v103_v57 = vld [vmem:[%s5575_s2 + $0x188] sm:$0xff] }
  0x13   :  { %2586 = vmatpush3.msra.mxu1 %v94_v31  ;;  %2552 = vmatprep.subr.mxu0 %v77_v32  ;;  %v57_v50 = vld [vmem:[%s5575_s2 + $0x18] sm:$0xff]  ;;  %v56_v54 = vld [vmem:[%s5575_s2 + $0x10] sm:$0xff]  ;;  %v55_v58 = vld [vmem:[%s5575_s2 + $0x8] sm:$0xff] }
  0x14   :  { %2587 = vmatprep.subr.mxu1 %v109_v33  ;;  %2553 = vmatpush3.msra.mxu0 %v61_v34  ;;  %v89_v51 = vld [vmem:[%s5575_s2 + $0x118] sm:$0xff]  ;;  %v88_v55 = vld [vmem:[%s5575_s2 + $0x110] sm:$0xff]  ;;  %v87_v59 = vld [vmem:[%s5575_s2 + $0x108] sm:$0xff] }
  0x15   :  { %2588 = vmatpush3.msra.mxu1 %v93_v35  ;;  %2554 = vmatprep.subr.mxu0 %v76_v36  ;;  %v70_v60 = vld [vmem:[%s5575_s2 + $0x80] sm:$0xff]  ;;  %v34_v63 = vld [vmem:[%s5573_s0 + $0x8] sm:$0x3f]  ;;  %v36_v1 = vld [vmem:[%s5573_s0 + $0x18] sm:$0x3f] }
  0x16   :  { %2589 = vmatprep.subr.mxu1 %v108_v37  ;;  %2555 = vmatpush3.msra.mxu0 %v60_v38  ;;  %v102_v61 = vld [vmem:[%s5575_s2 + $0x180] sm:$0xff]  ;;  %v35_v3 = vld [vmem:[%s5573_s0 + $0x10] sm:$0x3f]  ;;  %v149_v4 = vld [vmem:[%s5575_s2 + $0x2f8] sm:$0xff] }
  0x17   :  { %2590 = vmatpush3.msra.mxu1 %v92_v39  ;;  %2556 = vmatprep.subr.mxu0 %v75_v40  ;;  %v54_v62 = vld [vmem:[%s5575_s2] sm:$0xff]  ;;  %v181_v5 = vld [vmem:[%s5575_s2 + $0x3f8] sm:$0xff]  ;;  %v148_v8 = vld [vmem:[%s5575_s2 + $0x2f0] sm:$0xff] }
  0x18   :  { %2591 = vmatprep.subr.mxu1 %v107_v41  ;;  %2557 = vmatpush3.msra.mxu0 %v59_v42  ;;  %v86_v0 = vld [vmem:[%s5575_s2 + $0x100] sm:$0xff]  ;;  %v133_v6 = vld [vmem:[%s5575_s2 + $0x278] sm:$0xff]  ;;  %v180_v9 = vld [vmem:[%s5575_s2 + $0x3f0] sm:$0xff] }
  0x19   :  { %2592 = vmatpush3.msra.mxu1 %v91_v43  ;;  %2558 = vmatprep.subr.mxu0 %v74_v44  ;;  %v33_v2 = vld [vmem:[%s5573_s0] sm:$0x3f]  ;;  %v165_v7 = vld [vmem:[%s5575_s2 + $0x378] sm:$0xff]  ;;  %v132_v10 = vld [vmem:[%s5575_s2 + $0x270] sm:$0xff] }
  0x1a   :  { %2593 = vmatprep.subr.mxu1 %v106_v45  ;;  %2559 = vmatpush3.msra.mxu0 %v58_v46  ;;  %v164_v11 = vld [vmem:[%s5575_s2 + $0x370] sm:$0xff]  ;;  %v147_v12 = vld [vmem:[%s5575_s2 + $0x2e8] sm:$0xff]  ;;  %v146_v16 = vld [vmem:[%s5575_s2 + $0x2e0] sm:$0xff] }
  0x1b   :  { %2594 = vmatpush3.msra.mxu1 %v90_v47  ;;  %2560 = vmatprep.subr.mxu0 %v73_v48  ;;  %v179_v13 = vld [vmem:[%s5575_s2 + $0x3e8] sm:$0xff]  ;;  %v178_v17 = vld [vmem:[%s5575_s2 + $0x3e0] sm:$0xff]  ;;  %v145_v20 = vld [vmem:[%s5575_s2 + $0x2d8] sm:$0xff] }
  0x1c   :  { %2595 = vmatprep.subr.mxu1 %v105_v49  ;;  %2561 = vmatpush3.msra.mxu0 %v57_v50  ;;  %v131_v14 = vld [vmem:[%s5575_s2 + $0x268] sm:$0xff]  ;;  %v130_v18 = vld [vmem:[%s5575_s2 + $0x260] sm:$0xff]  ;;  %v177_v21 = vld [vmem:[%s5575_s2 + $0x3d8] sm:$0xff] }
  0x1d   :  { %2596 = vmatpush3.msra.mxu1 %v89_v51  ;;  %2562 = vmatprep.subr.mxu0 %v72_v52  ;;  %v163_v15 = vld [vmem:[%s5575_s2 + $0x368] sm:$0xff]  ;;  %v162_v19 = vld [vmem:[%s5575_s2 + $0x360] sm:$0xff]  ;;  %v129_v22 = vld [vmem:[%s5575_s2 + $0x258] sm:$0xff] }
  0x1e   :  { %2597 = vmatprep.subr.mxu1 %v104_v53  ;;  %2563 = vmatpush3.msra.mxu0 %v56_v54  ;;  %v161_v23 = vld [vmem:[%s5575_s2 + $0x358] sm:$0xff]  ;;  %v144_v24 = vld [vmem:[%s5575_s2 + $0x2d0] sm:$0xff]  ;;  %v143_v28 = vld [vmem:[%s5575_s2 + $0x2c8] sm:$0xff] }
  0x1f   :  { %2598 = vmatpush3.msra.mxu1 %v88_v55  ;;  %2564 = vmatprep.subr.mxu0 %v71_v56  ;;  %v176_v25 = vld [vmem:[%s5575_s2 + $0x3d0] sm:$0xff]  ;;  %v175_v29 = vld [vmem:[%s5575_s2 + $0x3c8] sm:$0xff]  ;;  %v142_v32 = vld [vmem:[%s5575_s2 + $0x2c0] sm:$0xff] }
  0x20   :  { %2599 = vmatprep.subr.mxu1 %v103_v57  ;;  %2565 = vmatpush3.msra.mxu0 %v55_v58  ;;  %v128_v26 = vld [vmem:[%s5575_s2 + $0x250] sm:$0xff]  ;;  %v127_v30 = vld [vmem:[%s5575_s2 + $0x248] sm:$0xff]  ;;  %v174_v33 = vld [vmem:[%s5575_s2 + $0x3c0] sm:$0xff] }
  0x21   :  { %2600 = vmatpush3.msra.mxu1 %v87_v59  ;;  %2566 = vmatprep.subr.mxu0 %v70_v60  ;;  %v160_v27 = vld [vmem:[%s5575_s2 + $0x350] sm:$0xff]  ;;  %v159_v31 = vld [vmem:[%s5575_s2 + $0x348] sm:$0xff]  ;;  %v126_v34 = vld [vmem:[%s5575_s2 + $0x240] sm:$0xff] }
  0x22   :  { %2601 = vmatprep.subr.mxu1 %v102_v61  ;;  %2567 = vmatpush3.msra.mxu0 %v54_v62  ;;  %v158_v35 = vld [vmem:[%s5575_s2 + $0x340] sm:$0xff]  ;;  %v141_v36 = vld [vmem:[%s5575_s2 + $0x2b8] sm:$0xff]  ;;  %v140_v40 = vld [vmem:[%s5575_s2 + $0x2b0] sm:$0xff] }
  0x23   :  { %453 = vmatprep.mubr.f32.mxu0 %v34_v63  ;;  %2602 = vmatpush3.msra.mxu1 %v86_v0  ;;  %v173_v37 = vld [vmem:[%s5575_s2 + $0x3b8] sm:$0xff]  ;;  %v172_v41 = vld [vmem:[%s5575_s2 + $0x3b0] sm:$0xff]  ;;  %v139_v44 = vld [vmem:[%s5575_s2 + $0x2a8] sm:$0xff] }
  0x24   :  { %523 = vmatprep.mubr.f32.mxu1 %v36_v1  ;;  %454 = vmatmul.mubr.f32.vlgmr.msra.gmra.mxu0 %v33_v2  ;;  %v125_v38 = vld [vmem:[%s5575_s2 + $0x238] sm:$0xff]  ;;  %v124_v42 = vld [vmem:[%s5575_s2 + $0x230] sm:$0xff]  ;;  %v171_v45 = vld [vmem:[%s5575_s2 + $0x3a8] sm:$0xff] }
  0x25   :  { %524 = vmatmul.mubr.f32.vlgmr.msra.gmra.mxu1 %v35_v3  ;;  %2606 = vmatprep.subr.mxu0 %v149_v4  ;;  %v157_v39 = vld [vmem:[%s5575_s2 + $0x338] sm:$0xff]  ;;  %v156_v43 = vld [vmem:[%s5575_s2 + $0x330] sm:$0xff]  ;;  %v123_v46 = vld [vmem:[%s5575_s2 + $0x228] sm:$0xff] }
  0x26   :  { %2641 = vmatprep.subr.mxu1 %v181_v5  ;;  %2607 = vmatpush3.msra.mxu0 %v133_v6  ;;  %v155_v47 = vld [vmem:[%s5575_s2 + $0x328] sm:$0xff]  ;;  %v138_v48 = vld [vmem:[%s5575_s2 + $0x2a0] sm:$0xff]  ;;  %v137_v52 = vld [vmem:[%s5575_s2 + $0x298] sm:$0xff] }
  0x27   :  { %2642 = vmatpush3.msra.mxu1 %v165_v7  ;;  %2608 = vmatprep.subr.mxu0 %v148_v8  ;;  %v170_v49 = vld [vmem:[%s5575_s2 + $0x3a0] sm:$0xff]  ;;  %v169_v53 = vld [vmem:[%s5575_s2 + $0x398] sm:$0xff]  ;;  %v136_v56 = vld [vmem:[%s5575_s2 + $0x290] sm:$0xff] }
  0x28   :  { %2643 = vmatprep.subr.mxu1 %v180_v9  ;;  %2609 = vmatpush3.msra.mxu0 %v132_v10  ;;  %v122_v50 = vld [vmem:[%s5575_s2 + $0x220] sm:$0xff]  ;;  %v121_v54 = vld [vmem:[%s5575_s2 + $0x218] sm:$0xff]  ;;  %v168_v57 = vld [vmem:[%s5575_s2 + $0x390] sm:$0xff] }
  0x29   :  { %2644 = vmatpush3.msra.mxu1 %v164_v11  ;;  %2610 = vmatprep.subr.mxu0 %v147_v12  ;;  %v154_v51 = vld [vmem:[%s5575_s2 + $0x320] sm:$0xff]  ;;  %v153_v55 = vld [vmem:[%s5575_s2 + $0x318] sm:$0xff]  ;;  %v120_v58 = vld [vmem:[%s5575_s2 + $0x210] sm:$0xff] }
  0x2a   :  { %2645 = vmatprep.subr.mxu1 %v179_v13  ;;  %2611 = vmatpush3.msra.mxu0 %v131_v14  ;;  %v152_v59 = vld [vmem:[%s5575_s2 + $0x310] sm:$0xff]  ;;  %v135_v60 = vld [vmem:[%s5575_s2 + $0x288] sm:$0xff]  ;;  %v134_v0 = vld [vmem:[%s5575_s2 + $0x280] sm:$0xff] }
  0x2b   :  { %2646 = vmatpush3.msra.mxu1 %v163_v15  ;;  %2612 = vmatprep.subr.mxu0 %v146_v16  ;;  %v167_v61 = vld [vmem:[%s5575_s2 + $0x388] sm:$0xff]  ;;  %v166_v1 = vld [vmem:[%s5575_s2 + $0x380] sm:$0xff]  ;;  %v40_v5 = vld [vmem:[%s5573_s0 + $0x38] sm:$0x3f] }
  0x2c   :  { %2647 = vmatprep.subr.mxu1 %v178_v17  ;;  %2613 = vmatpush3.msra.mxu0 %v130_v18  ;;  %v119_v62 = vld [vmem:[%s5575_s2 + $0x208] sm:$0xff]  ;;  %v118_v2 = vld [vmem:[%s5575_s2 + $0x200] sm:$0xff]  ;;  %v39_v7 = vld [vmem:[%s5573_s0 + $0x30] sm:$0x3f] }
  0x2d   :  { %2648 = vmatpush3.msra.mxu1 %v162_v19  ;;  %2614 = vmatprep.subr.mxu0 %v145_v20  ;;  %v151_v63 = vld [vmem:[%s5575_s2 + $0x308] sm:$0xff]  ;;  %v150_v4 = vld [vmem:[%s5575_s2 + $0x300] sm:$0xff]  ;;  %v213_v8 = vld [vmem:[%s5575_s2 + $0x4f8] sm:$0xff] }
  0x2e   :  { %2649 = vmatprep.subr.mxu1 %v177_v21  ;;  %2615 = vmatpush3.msra.mxu0 %v129_v22  ;;  %v38_v3 = vld [vmem:[%s5573_s0 + $0x28] sm:$0x3f]  ;;  %v37_v6 = vld [vmem:[%s5573_s0 + $0x20] sm:$0x3f]  ;;  %v245_v9 = vld [vmem:[%s5575_s2 + $0x5f8] sm:$0xff] }
  0x2f   :  { %2650 = vmatpush3.msra.mxu1 %v161_v23  ;;  %2616 = vmatprep.subr.mxu0 %v144_v24  ;;  %v197_v10 = vld [vmem:[%s5575_s2 + $0x478] sm:$0xff]  ;;  %v212_v12 = vld [vmem:[%s5575_s2 + $0x4f0] sm:$0xff]  ;;  %v211_v16 = vld [vmem:[%s5575_s2 + $0x4e8] sm:$0xff] }
  0x30   :  { %2651 = vmatprep.subr.mxu1 %v176_v25  ;;  %2617 = vmatpush3.msra.mxu0 %v128_v26  ;;  %v229_v11 = vld [vmem:[%s5575_s2 + $0x578] sm:$0xff]  ;;  %v244_v13 = vld [vmem:[%s5575_s2 + $0x5f0] sm:$0xff]  ;;  %v243_v17 = vld [vmem:[%s5575_s2 + $0x5e8] sm:$0xff] }
  0x31   :  { %2652 = vmatpush3.msra.mxu1 %v160_v27  ;;  %2618 = vmatprep.subr.mxu0 %v143_v28  ;;  %v196_v14 = vld [vmem:[%s5575_s2 + $0x470] sm:$0xff]  ;;  %v195_v18 = vld [vmem:[%s5575_s2 + $0x468] sm:$0xff]  ;;  %v210_v20 = vld [vmem:[%s5575_s2 + $0x4e0] sm:$0xff] }
  0x32   :  { %2653 = vmatprep.subr.mxu1 %v175_v29  ;;  %2619 = vmatpush3.msra.mxu0 %v127_v30  ;;  %v228_v15 = vld [vmem:[%s5575_s2 + $0x570] sm:$0xff]  ;;  %v227_v19 = vld [vmem:[%s5575_s2 + $0x568] sm:$0xff]  ;;  %v242_v21 = vld [vmem:[%s5575_s2 + $0x5e0] sm:$0xff] }
  0x33   :  { %2654 = vmatpush3.msra.mxu1 %v159_v31  ;;  %2620 = vmatprep.subr.mxu0 %v142_v32  ;;  %v194_v22 = vld [vmem:[%s5575_s2 + $0x460] sm:$0xff]  ;;  %v209_v24 = vld [vmem:[%s5575_s2 + $0x4d8] sm:$0xff]  ;;  %v208_v28 = vld [vmem:[%s5575_s2 + $0x4d0] sm:$0xff] }
  0x34   :  { %2655 = vmatprep.subr.mxu1 %v174_v33  ;;  %2621 = vmatpush3.msra.mxu0 %v126_v34  ;;  %v226_v23 = vld [vmem:[%s5575_s2 + $0x560] sm:$0xff]  ;;  %v241_v25 = vld [vmem:[%s5575_s2 + $0x5d8] sm:$0xff]  ;;  %v240_v29 = vld [vmem:[%s5575_s2 + $0x5d0] sm:$0xff] }
  0x35   :  { %2656 = vmatpush3.msra.mxu1 %v158_v35  ;;  %2622 = vmatprep.subr.mxu0 %v141_v36  ;;  %v193_v26 = vld [vmem:[%s5575_s2 + $0x458] sm:$0xff]  ;;  %v192_v30 = vld [vmem:[%s5575_s2 + $0x450] sm:$0xff]  ;;  %v207_v32 = vld [vmem:[%s5575_s2 + $0x4c8] sm:$0xff] }
  0x36   :  { %2657 = vmatprep.subr.mxu1 %v173_v37  ;;  %2623 = vmatpush3.msra.mxu0 %v125_v38  ;;  %v225_v27 = vld [vmem:[%s5575_s2 + $0x558] sm:$0xff]  ;;  %v224_v31 = vld [vmem:[%s5575_s2 + $0x550] sm:$0xff]  ;;  %v239_v33 = vld [vmem:[%s5575_s2 + $0x5c8] sm:$0xff] }
  0x37   :  { %2658 = vmatpush3.msra.mxu1 %v157_v39  ;;  %2624 = vmatprep.subr.mxu0 %v140_v40  ;;  %v191_v34 = vld [vmem:[%s5575_s2 + $0x448] sm:$0xff]  ;;  %v206_v36 = vld [vmem:[%s5575_s2 + $0x4c0] sm:$0xff]  ;;  %v205_v40 = vld [vmem:[%s5575_s2 + $0x4b8] sm:$0xff] }
  0x38   :  { %2659 = vmatprep.subr.mxu1 %v172_v41  ;;  %2625 = vmatpush3.msra.mxu0 %v124_v42  ;;  %v223_v35 = vld [vmem:[%s5575_s2 + $0x548] sm:$0xff]  ;;  %v238_v37 = vld [vmem:[%s5575_s2 + $0x5c0] sm:$0xff]  ;;  %v237_v41 = vld [vmem:[%s5575_s2 + $0x5b8] sm:$0xff] }
  0x39   :  { %2660 = vmatpush3.msra.mxu1 %v156_v43  ;;  %2626 = vmatprep.subr.mxu0 %v139_v44  ;;  %v190_v38 = vld [vmem:[%s5575_s2 + $0x440] sm:$0xff]  ;;  %v189_v42 = vld [vmem:[%s5575_s2 + $0x438] sm:$0xff]  ;;  %v204_v44 = vld [vmem:[%s5575_s2 + $0x4b0] sm:$0xff] }
  0x3a   :  { %2661 = vmatprep.subr.mxu1 %v171_v45  ;;  %2627 = vmatpush3.msra.mxu0 %v123_v46  ;;  %v222_v39 = vld [vmem:[%s5575_s2 + $0x540] sm:$0xff]  ;;  %v221_v43 = vld [vmem:[%s5575_s2 + $0x538] sm:$0xff]  ;;  %v236_v45 = vld [vmem:[%s5575_s2 + $0x5b0] sm:$0xff] }
  0x3b   :  { %2662 = vmatpush3.msra.mxu1 %v155_v47  ;;  %2628 = vmatprep.subr.mxu0 %v138_v48  ;;  %v188_v46 = vld [vmem:[%s5575_s2 + $0x430] sm:$0xff]  ;;  %v203_v48 = vld [vmem:[%s5575_s2 + $0x4a8] sm:$0xff] }
  0x3c   :  { %2663 = vmatprep.subr.mxu1 %v170_v49  ;;  %2629 = vmatpush3.msra.mxu0 %v122_v50  ;;  %v220_v47 = vld [vmem:[%s5575_s2 + $0x530] sm:$0xff]  ;;  %v235_v49 = vld [vmem:[%s5575_s2 + $0x5a8] sm:$0xff] }
  0x3d   :  { %2664 = vmatpush3.msra.mxu1 %v154_v51  ;;  %2630 = vmatprep.subr.mxu0 %v137_v52  ;;  %v187_v50 = vld [vmem:[%s5575_s2 + $0x428] sm:$0xff]  ;;  %v202_v52 = vld [vmem:[%s5575_s2 + $0x4a0] sm:$0xff] }
  0x3e   :  { %2665 = vmatprep.subr.mxu1 %v169_v53  ;;  %2631 = vmatpush3.msra.mxu0 %v121_v54  ;;  %v219_v51 = vld [vmem:[%s5575_s2 + $0x528] sm:$0xff]  ;;  %v234_v53 = vld [vmem:[%s5575_s2 + $0x5a0] sm:$0xff] }
  0x3f   :  { %2666 = vmatpush3.msra.mxu1 %v153_v55  ;;  %2632 = vmatprep.subr.mxu0 %v136_v56  ;;  %v186_v54 = vld [vmem:[%s5575_s2 + $0x420] sm:$0xff]  ;;  %v201_v56 = vld [vmem:[%s5575_s2 + $0x498] sm:$0xff] }
  0x40   :  { %2667 = vmatprep.subr.mxu1 %v168_v57  ;;  %2633 = vmatpush3.msra.mxu0 %v120_v58  ;;  %v218_v55 = vld [vmem:[%s5575_s2 + $0x520] sm:$0xff]  ;;  %v233_v57 = vld [vmem:[%s5575_s2 + $0x598] sm:$0xff] }
  0x41   :  { %2668 = vmatpush3.msra.mxu1 %v152_v59  ;;  %2634 = vmatprep.subr.mxu0 %v135_v60  ;;  %v185_v58 = vld [vmem:[%s5575_s2 + $0x418] sm:$0xff]  ;;  %v200_v60 = vld [vmem:[%s5575_s2 + $0x490] sm:$0xff] }
  0x42   :  { %2669 = vmatprep.subr.mxu1 %v167_v61  ;;  %2635 = vmatpush3.msra.mxu0 %v119_v62  ;;  %v217_v59 = vld [vmem:[%s5575_s2 + $0x518] sm:$0xff]  ;;  %v232_v61 = vld [vmem:[%s5575_s2 + $0x590] sm:$0xff] }
  0x43   :  { %2670 = vmatpush3.msra.mxu1 %v151_v63  ;;  %2636 = vmatprep.subr.mxu0 %v134_v0  ;;  %v184_v62 = vld [vmem:[%s5575_s2 + $0x410] sm:$0xff]  ;;  %v199_v0 = vld [vmem:[%s5575_s2 + $0x488] sm:$0xff] }
  0x44   :  { %2671 = vmatprep.subr.mxu1 %v166_v1  ;;  %2637 = vmatpush3.msra.mxu0 %v118_v2  ;;  %v216_v63 = vld [vmem:[%s5575_s2 + $0x510] sm:$0xff]  ;;  %v231_v1 = vld [vmem:[%s5575_s2 + $0x588] sm:$0xff] }
  0x45   :  { %593 = vmatprep.mubr.f32.mxu0 %v38_v3  ;;  %2672 = vmatpush3.msra.mxu1 %v150_v4  ;;  %v183_v2 = vld [vmem:[%s5575_s2 + $0x408] sm:$0xff]  ;;  %v198_v4 = vld [vmem:[%s5575_s2 + $0x480] sm:$0xff] }
  0x46   :  { %663 = vmatprep.mubr.f32.mxu1 %v40_v5  ;;  %594 = vmatmul.mubr.f32.vlgmr.msra.gmra.mxu0 %v37_v6  ;;  %v215_v3 = vld [vmem:[%s5575_s2 + $0x508] sm:$0xff]  ;;  %v230_v5 = vld [vmem:[%s5575_s2 + $0x580] sm:$0xff] }
  0x47   :  { %664 = vmatmul.mubr.f32.vlgmr.msra.gmra.mxu1 %v39_v7  ;;  %2676 = vmatprep.subr.mxu0 %v213_v8  ;;  %v182_v6 = vld [vmem:[%s5575_s2 + $0x400] sm:$0xff]  ;;  %v42_v7 = vld [vmem:[%s5573_s0 + $0x48] sm:$0x3f] }
  0x48   :  { %2711 = vmatprep.subr.mxu1 %v245_v9  ;;  %2677 = vmatpush3.msra.mxu0 %v197_v10  ;;  %v214_v8 = vld [vmem:[%s5575_s2 + $0x500] sm:$0xff]  ;;  %v44_v9 = vld [vmem:[%s5573_s0 + $0x58] sm:$0x3f] }
  0x49   :  { %2712 = vmatpush3.msra.mxu1 %v229_v11  ;;  %2678 = vmatprep.subr.mxu0 %v212_v12  ;;  %v41_v10 = vld [vmem:[%s5573_s0 + $0x40] sm:$0x3f]  ;;  %v43_v11 = vld [vmem:[%s5573_s0 + $0x50] sm:$0x3f]  ;;  %v277_v12 = vld [vmem:[%s5575_s2 + $0x6f8] sm:$0xff] }
  0x4a   :  { %2713 = vmatprep.subr.mxu1 %v244_v13  ;;  %2679 = vmatpush3.msra.mxu0 %v196_v14  ;;  %v309_v13 = vld [vmem:[%s5575_s2 + $0x7f8] sm:$0xff] }
  0x4b   :  { %2714 = vmatpush3.msra.mxu1 %v228_v15  ;;  %2680 = vmatprep.subr.mxu0 %v211_v16  ;;  %v261_v14 = vld [vmem:[%s5575_s2 + $0x678] sm:$0xff]  ;;  %v276_v16 = vld [vmem:[%s5575_s2 + $0x6f0] sm:$0xff] }
  0x4c   :  { %2715 = vmatprep.subr.mxu1 %v243_v17  ;;  %2681 = vmatpush3.msra.mxu0 %v195_v18  ;;  %v293_v15 = vld [vmem:[%s5575_s2 + $0x778] sm:$0xff]  ;;  %v308_v17 = vld [vmem:[%s5575_s2 + $0x7f0] sm:$0xff] }
  0x4d   :  { %2716 = vmatpush3.msra.mxu1 %v227_v19  ;;  %2682 = vmatprep.subr.mxu0 %v210_v20  ;;  %v260_v18 = vld [vmem:[%s5575_s2 + $0x670] sm:$0xff]  ;;  %v275_v20 = vld [vmem:[%s5575_s2 + $0x6e8] sm:$0xff] }
  0x4e   :  { %2717 = vmatprep.subr.mxu1 %v242_v21  ;;  %2683 = vmatpush3.msra.mxu0 %v194_v22  ;;  %v292_v19 = vld [vmem:[%s5575_s2 + $0x770] sm:$0xff]  ;;  %v307_v21 = vld [vmem:[%s5575_s2 + $0x7e8] sm:$0xff] }
  0x4f   :  { %2718 = vmatpush3.msra.mxu1 %v226_v23  ;;  %2684 = vmatprep.subr.mxu0 %v209_v24  ;;  %v259_v22 = vld [vmem:[%s5575_s2 + $0x668] sm:$0xff]  ;;  %v274_v24 = vld [vmem:[%s5575_s2 + $0x6e0] sm:$0xff] }
  0x50   :  { %2719 = vmatprep.subr.mxu1 %v241_v25  ;;  %2685 = vmatpush3.msra.mxu0 %v193_v26  ;;  %v291_v23 = vld [vmem:[%s5575_s2 + $0x768] sm:$0xff]  ;;  %v306_v25 = vld [vmem:[%s5575_s2 + $0x7e0] sm:$0xff] }
  0x51   :  { %2720 = vmatpush3.msra.mxu1 %v225_v27  ;;  %2686 = vmatprep.subr.mxu0 %v208_v28  ;;  %v258_v26 = vld [vmem:[%s5575_s2 + $0x660] sm:$0xff]  ;;  %v273_v28 = vld [vmem:[%s5575_s2 + $0x6d8] sm:$0xff] }
  0x52   :  { %2721 = vmatprep.subr.mxu1 %v240_v29  ;;  %2687 = vmatpush3.msra.mxu0 %v192_v30  ;;  %v290_v27 = vld [vmem:[%s5575_s2 + $0x760] sm:$0xff]  ;;  %v305_v29 = vld [vmem:[%s5575_s2 + $0x7d8] sm:$0xff] }
  0x53   :  { %2722 = vmatpush3.msra.mxu1 %v224_v31  ;;  %2688 = vmatprep.subr.mxu0 %v207_v32  ;;  %v257_v30 = vld [vmem:[%s5575_s2 + $0x658] sm:$0xff]  ;;  %v272_v32 = vld [vmem:[%s5575_s2 + $0x6d0] sm:$0xff] }
  0x54   :  { %2723 = vmatprep.subr.mxu1 %v239_v33  ;;  %2689 = vmatpush3.msra.mxu0 %v191_v34  ;;  %v289_v31 = vld [vmem:[%s5575_s2 + $0x758] sm:$0xff]  ;;  %v304_v33 = vld [vmem:[%s5575_s2 + $0x7d0] sm:$0xff] }
  0x55   :  { %2724 = vmatpush3.msra.mxu1 %v223_v35  ;;  %2690 = vmatprep.subr.mxu0 %v206_v36  ;;  %v256_v34 = vld [vmem:[%s5575_s2 + $0x650] sm:$0xff]  ;;  %v271_v36 = vld [vmem:[%s5575_s2 + $0x6c8] sm:$0xff] }
  0x56   :  { %2725 = vmatprep.subr.mxu1 %v238_v37  ;;  %2691 = vmatpush3.msra.mxu0 %v190_v38  ;;  %v288_v35 = vld [vmem:[%s5575_s2 + $0x750] sm:$0xff]  ;;  %v303_v37 = vld [vmem:[%s5575_s2 + $0x7c8] sm:$0xff] }
  0x57   :  { %2726 = vmatpush3.msra.mxu1 %v222_v39  ;;  %2692 = vmatprep.subr.mxu0 %v205_v40  ;;  %v255_v38 = vld [vmem:[%s5575_s2 + $0x648] sm:$0xff]  ;;  %v270_v40 = vld [vmem:[%s5575_s2 + $0x6c0] sm:$0xff] }
  0x58   :  { %2727 = vmatprep.subr.mxu1 %v237_v41  ;;  %2693 = vmatpush3.msra.mxu0 %v189_v42  ;;  %v287_v39 = vld [vmem:[%s5575_s2 + $0x748] sm:$0xff]  ;;  %v302_v41 = vld [vmem:[%s5575_s2 + $0x7c0] sm:$0xff] }
  0x59   :  { %2728 = vmatpush3.msra.mxu1 %v221_v43  ;;  %2694 = vmatprep.subr.mxu0 %v204_v44  ;;  %v254_v42 = vld [vmem:[%s5575_s2 + $0x640] sm:$0xff]  ;;  %v269_v44 = vld [vmem:[%s5575_s2 + $0x6b8] sm:$0xff] }
  0x5a   :  { %2729 = vmatprep.subr.mxu1 %v236_v45  ;;  %2695 = vmatpush3.msra.mxu0 %v188_v46  ;;  %v286_v43 = vld [vmem:[%s5575_s2 + $0x740] sm:$0xff]  ;;  %v301_v45 = vld [vmem:[%s5575_s2 + $0x7b8] sm:$0xff] }
  0x5b   :  { %2730 = vmatpush3.msra.mxu1 %v220_v47  ;;  %2696 = vmatprep.subr.mxu0 %v203_v48  ;;  %v253_v46 = vld [vmem:[%s5575_s2 + $0x638] sm:$0xff]  ;;  %v268_v48 = vld [vmem:[%s5575_s2 + $0x6b0] sm:$0xff] }
  0x5c   :  { %2731 = vmatprep.subr.mxu1 %v235_v49  ;;  %2697 = vmatpush3.msra.mxu0 %v187_v50  ;;  %v285_v47 = vld [vmem:[%s5575_s2 + $0x738] sm:$0xff]  ;;  %v300_v49 = vld [vmem:[%s5575_s2 + $0x7b0] sm:$0xff] }
  0x5d   :  { %2732 = vmatpush3.msra.mxu1 %v219_v51  ;;  %2698 = vmatprep.subr.mxu0 %v202_v52  ;;  %v252_v50 = vld [vmem:[%s5575_s2 + $0x630] sm:$0xff]  ;;  %v267_v52 = vld [vmem:[%s5575_s2 + $0x6a8] sm:$0xff] }
  0x5e   :  { %2733 = vmatprep.subr.mxu1 %v234_v53  ;;  %2699 = vmatpush3.msra.mxu0 %v186_v54  ;;  %v284_v51 = vld [vmem:[%s5575_s2 + $0x730] sm:$0xff]  ;;  %v299_v53 = vld [vmem:[%s5575_s2 + $0x7a8] sm:$0xff] }
  0x5f   :  { %2734 = vmatpush3.msra.mxu1 %v218_v55  ;;  %2700 = vmatprep.subr.mxu0 %v201_v56  ;;  %v251_v54 = vld [vmem:[%s5575_s2 + $0x628] sm:$0xff]  ;;  %v266_v56 = vld [vmem:[%s5575_s2 + $0x6a0] sm:$0xff] }
  0x60   :  { %2735 = vmatprep.subr.mxu1 %v233_v57  ;;  %2701 = vmatpush3.msra.mxu0 %v185_v58  ;;  %v283_v55 = vld [vmem:[%s5575_s2 + $0x728] sm:$0xff]  ;;  %v298_v57 = vld [vmem:[%s5575_s2 + $0x7a0] sm:$0xff] }
  0x61   :  { %2736 = vmatpush3.msra.mxu1 %v217_v59  ;;  %2702 = vmatprep.subr.mxu0 %v200_v60  ;;  %v250_v58 = vld [vmem:[%s5575_s2 + $0x620] sm:$0xff]  ;;  %v265_v60 = vld [vmem:[%s5575_s2 + $0x698] sm:$0xff] }
  0x62   :  { %2737 = vmatprep.subr.mxu1 %v232_v61  ;;  %2703 = vmatpush3.msra.mxu0 %v184_v62  ;;  %v282_v59 = vld [vmem:[%s5575_s2 + $0x720] sm:$0xff]  ;;  %v297_v61 = vld [vmem:[%s5575_s2 + $0x798] sm:$0xff] }
  0x63   :  { %2738 = vmatpush3.msra.mxu1 %v216_v63  ;;  %2704 = vmatprep.subr.mxu0 %v199_v0  ;;  %v249_v62 = vld [vmem:[%s5575_s2 + $0x618] sm:$0xff]  ;;  %v264_v0 = vld [vmem:[%s5575_s2 + $0x690] sm:$0xff] }
  0x64   :  { %2739 = vmatprep.subr.mxu1 %v231_v1  ;;  %2705 = vmatpush3.msra.mxu0 %v183_v2  ;;  %v281_v63 = vld [vmem:[%s5575_s2 + $0x718] sm:$0xff]  ;;  %v296_v1 = vld [vmem:[%s5575_s2 + $0x790] sm:$0xff] }
  0x65   :  { %2740 = vmatpush3.msra.mxu1 %v215_v3  ;;  %2706 = vmatprep.subr.mxu0 %v198_v4  ;;  %v248_v2 = vld [vmem:[%s5575_s2 + $0x610] sm:$0xff]  ;;  %v263_v4 = vld [vmem:[%s5575_s2 + $0x688] sm:$0xff] }
  0x66   :  { %2741 = vmatprep.subr.mxu1 %v230_v5  ;;  %2707 = vmatpush3.msra.mxu0 %v182_v6  ;;  %v280_v3 = vld [vmem:[%s5575_s2 + $0x710] sm:$0xff]  ;;  %v295_v5 = vld [vmem:[%s5575_s2 + $0x788] sm:$0xff] }
  0x67   :  { %733 = vmatprep.mubr.f32.mxu0 %v42_v7  ;;  %2742 = vmatpush3.msra.mxu1 %v214_v8  ;;  %v247_v6 = vld [vmem:[%s5575_s2 + $0x608] sm:$0xff]  ;;  %v262_v8 = vld [vmem:[%s5575_s2 + $0x680] sm:$0xff] }
  0x68   :  { %803 = vmatprep.mubr.f32.mxu1 %v44_v9  ;;  %734 = vmatmul.mubr.f32.vlgmr.msra.gmra.mxu0 %v41_v10  ;;  %v279_v7 = vld [vmem:[%s5575_s2 + $0x708] sm:$0xff]  ;;  %v294_v9 = vld [vmem:[%s5575_s2 + $0x780] sm:$0xff] }
  0x69   :  { %804 = vmatmul.mubr.f32.vlgmr.msra.gmra.mxu1 %v43_v11  ;;  %2746 = vmatprep.subr.mxu0 %v277_v12  ;;  %v246_v10 = vld [vmem:[%s5575_s2 + $0x600] sm:$0xff]  ;;  %v46_v11 = vld [vmem:[%s5573_s0 + $0x68] sm:$0x3f] }
  0x6a   :  { %2781 = vmatprep.subr.mxu1 %v309_v13  ;;  %2747 = vmatpush3.msra.mxu0 %v261_v14  ;;  %v278_v12 = vld [vmem:[%s5575_s2 + $0x700] sm:$0xff]  ;;  %v48_v13 = vld [vmem:[%s5573_s0 + $0x78] sm:$0x3f] }
  0x6b   :  { %2782 = vmatpush3.msra.mxu1 %v293_v15  ;;  %2748 = vmatprep.subr.mxu0 %v276_v16  ;;  %v45_v14 = vld [vmem:[%s5573_s0 + $0x60] sm:$0x3f]  ;;  %v47_v15 = vld [vmem:[%s5573_s0 + $0x70] sm:$0x3f]  ;;  %v341_v16 = vld [vmem:[%s5575_s2 + $0x8f8] sm:$0xff] }
  0x6c   :  { %2783 = vmatprep.subr.mxu1 %v308_v17  ;;  %2749 = vmatpush3.msra.mxu0 %v260_v18  ;;  %v373_v17 = vld [vmem:[%s5575_s2 + $0x9f8] sm:$0xff] }
  0x6d   :  { %2784 = vmatpush3.msra.mxu1 %v292_v19  ;;  %2750 = vmatprep.subr.mxu0 %v275_v20  ;;  %v325_v18 = vld [vmem:[%s5575_s2 + $0x878] sm:$0xff]  ;;  %v340_v20 = vld [vmem:[%s5575_s2 + $0x8f0] sm:$0xff] }
  0x6e   :  { %2785 = vmatprep.subr.mxu1 %v307_v21  ;;  %2751 = vmatpush3.msra.mxu0 %v259_v22  ;;  %v357_v19 = vld [vmem:[%s5575_s2 + $0x978] sm:$0xff]  ;;  %v372_v21 = vld [vmem:[%s5575_s2 + $0x9f0] sm:$0xff] }
  0x6f   :  { %2786 = vmatpush3.msra.mxu1 %v291_v23  ;;  %2752 = vmatprep.subr.mxu0 %v274_v24  ;;  %v324_v22 = vld [vmem:[%s5575_s2 + $0x870] sm:$0xff]  ;;  %v339_v24 = vld [vmem:[%s5575_s2 + $0x8e8] sm:$0xff] }
  0x70   :  { %2787 = vmatprep.subr.mxu1 %v306_v25  ;;  %2753 = vmatpush3.msra.mxu0 %v258_v26  ;;  %v356_v23 = vld [vmem:[%s5575_s2 + $0x970] sm:$0xff]  ;;  %v371_v25 = vld [vmem:[%s5575_s2 + $0x9e8] sm:$0xff] }
  0x71   :  { %2788 = vmatpush3.msra.mxu1 %v290_v27  ;;  %2754 = vmatprep.subr.mxu0 %v273_v28  ;;  %v323_v26 = vld [vmem:[%s5575_s2 + $0x868] sm:$0xff]  ;;  %v338_v28 = vld [vmem:[%s5575_s2 + $0x8e0] sm:$0xff] }
  0x72   :  { %2789 = vmatprep.subr.mxu1 %v305_v29  ;;  %2755 = vmatpush3.msra.mxu0 %v257_v30  ;;  %v355_v27 = vld [vmem:[%s5575_s2 + $0x968] sm:$0xff]  ;;  %v370_v29 = vld [vmem:[%s5575_s2 + $0x9e0] sm:$0xff] }
  0x73   :  { %2790 = vmatpush3.msra.mxu1 %v289_v31  ;;  %2756 = vmatprep.subr.mxu0 %v272_v32  ;;  %v322_v30 = vld [vmem:[%s5575_s2 + $0x860] sm:$0xff]  ;;  %v337_v32 = vld [vmem:[%s5575_s2 + $0x8d8] sm:$0xff] }
  0x74   :  { %2791 = vmatprep.subr.mxu1 %v304_v33  ;;  %2757 = vmatpush3.msra.mxu0 %v256_v34  ;;  %v354_v31 = vld [vmem:[%s5575_s2 + $0x960] sm:$0xff]  ;;  %v369_v33 = vld [vmem:[%s5575_s2 + $0x9d8] sm:$0xff] }
  0x75   :  { %2792 = vmatpush3.msra.mxu1 %v288_v35  ;;  %2758 = vmatprep.subr.mxu0 %v271_v36  ;;  %v321_v34 = vld [vmem:[%s5575_s2 + $0x858] sm:$0xff]  ;;  %v336_v36 = vld [vmem:[%s5575_s2 + $0x8d0] sm:$0xff] }
  0x76   :  { %2793 = vmatprep.subr.mxu1 %v303_v37  ;;  %2759 = vmatpush3.msra.mxu0 %v255_v38  ;;  %v353_v35 = vld [vmem:[%s5575_s2 + $0x958] sm:$0xff]  ;;  %v368_v37 = vld [vmem:[%s5575_s2 + $0x9d0] sm:$0xff] }
  0x77   :  { %2794 = vmatpush3.msra.mxu1 %v287_v39  ;;  %2760 = vmatprep.subr.mxu0 %v270_v40  ;;  %v320_v38 = vld [vmem:[%s5575_s2 + $0x850] sm:$0xff]  ;;  %v335_v40 = vld [vmem:[%s5575_s2 + $0x8c8] sm:$0xff] }
  0x78   :  { %2795 = vmatprep.subr.mxu1 %v302_v41  ;;  %2761 = vmatpush3.msra.mxu0 %v254_v42  ;;  %v352_v39 = vld [vmem:[%s5575_s2 + $0x950] sm:$0xff]  ;;  %v367_v41 = vld [vmem:[%s5575_s2 + $0x9c8] sm:$0xff] }
  0x79   :  { %2796 = vmatpush3.msra.mxu1 %v286_v43  ;;  %2762 = vmatprep.subr.mxu0 %v269_v44  ;;  %v319_v42 = vld [vmem:[%s5575_s2 + $0x848] sm:$0xff]  ;;  %v334_v44 = vld [vmem:[%s5575_s2 + $0x8c0] sm:$0xff] }
  0x7a   :  { %2797 = vmatprep.subr.mxu1 %v301_v45  ;;  %2763 = vmatpush3.msra.mxu0 %v253_v46  ;;  %v351_v43 = vld [vmem:[%s5575_s2 + $0x948] sm:$0xff]  ;;  %v366_v45 = vld [vmem:[%s5575_s2 + $0x9c0] sm:$0xff] }
  0x7b   :  { %2798 = vmatpush3.msra.mxu1 %v285_v47  ;;  %2764 = vmatprep.subr.mxu0 %v268_v48  ;;  %v318_v46 = vld [vmem:[%s5575_s2 + $0x840] sm:$0xff]  ;;  %v333_v48 = vld [vmem:[%s5575_s2 + $0x8b8] sm:$0xff] }
  0x7c   :  { %2799 = vmatprep.subr.mxu1 %v300_v49  ;;  %2765 = vmatpush3.msra.mxu0 %v252_v50  ;;  %v350_v47 = vld [vmem:[%s5575_s2 + $0x940] sm:$0xff]  ;;  %v365_v49 = vld [vmem:[%s5575_s2 + $0x9b8] sm:$0xff] }
  0x7d   :  { %2800 = vmatpush3.msra.mxu1 %v284_v51  ;;  %2766 = vmatprep.subr.mxu0 %v267_v52  ;;  %v317_v50 = vld [vmem:[%s5575_s2 + $0x838] sm:$0xff]  ;;  %v332_v52 = vld [vmem:[%s5575_s2 + $0x8b0] sm:$0xff] }
  0x7e   :  { %2801 = vmatprep.subr.mxu1 %v299_v53  ;;  %2767 = vmatpush3.msra.mxu0 %v251_v54  ;;  %v349_v51 = vld [vmem:[%s5575_s2 + $0x938] sm:$0xff]  ;;  %v364_v53 = vld [vmem:[%s5575_s2 + $0x9b0] sm:$0xff] }
  0x7f   :  { %2802 = vmatpush3.msra.mxu1 %v283_v55  ;;  %2768 = vmatprep.subr.mxu0 %v266_v56  ;;  %v316_v54 = vld [vmem:[%s5575_s2 + $0x830] sm:$0xff]  ;;  %v331_v56 = vld [vmem:[%s5575_s2 + $0x8a8] sm:$0xff] }
  0x80   :  { %2803 = vmatprep.subr.mxu1 %v298_v57  ;;  %2769 = vmatpush3.msra.mxu0 %v250_v58  ;;  %v348_v55 = vld [vmem:[%s5575_s2 + $0x930] sm:$0xff]  ;;  %v363_v57 = vld [vmem:[%s5575_s2 + $0x9a8] sm:$0xff] }
  0x81   :  { %2804 = vmatpush3.msra.mxu1 %v282_v59  ;;  %2770 = vmatprep.subr.mxu0 %v265_v60  ;;  %v315_v58 = vld [vmem:[%s5575_s2 + $0x828] sm:$0xff]  ;;  %v330_v60 = vld [vmem:[%s5575_s2 + $0x8a0] sm:$0xff] }
  0x82   :  { %2805 = vmatprep.subr.mxu1 %v297_v61  ;;  %2771 = vmatpush3.msra.mxu0 %v249_v62  ;;  %v347_v59 = vld [vmem:[%s5575_s2 + $0x928] sm:$0xff]  ;;  %v362_v61 = vld [vmem:[%s5575_s2 + $0x9a0] sm:$0xff] }
  0x83   :  { %2806 = vmatpush3.msra.mxu1 %v281_v63  ;;  %2772 = vmatprep.subr.mxu0 %v264_v0  ;;  %v314_v62 = vld [vmem:[%s5575_s2 + $0x820] sm:$0xff]  ;;  %v329_v0 = vld [vmem:[%s5575_s2 + $0x898] sm:$0xff] }
  0x84   :  { %2807 = vmatprep.subr.mxu1 %v296_v1  ;;  %2773 = vmatpush3.msra.mxu0 %v248_v2  ;;  %v346_v63 = vld [vmem:[%s5575_s2 + $0x920] sm:$0xff]  ;;  %v361_v1 = vld [vmem:[%s5575_s2 + $0x998] sm:$0xff] }
  0x85   :  { %2808 = vmatpush3.msra.mxu1 %v280_v3  ;;  %2774 = vmatprep.subr.mxu0 %v263_v4  ;;  %v313_v2 = vld [vmem:[%s5575_s2 + $0x818] sm:$0xff]  ;;  %v328_v4 = vld [vmem:[%s5575_s2 + $0x890] sm:$0xff] }
  0x86   :  { %2809 = vmatprep.subr.mxu1 %v295_v5  ;;  %2775 = vmatpush3.msra.mxu0 %v247_v6  ;;  %v345_v3 = vld [vmem:[%s5575_s2 + $0x918] sm:$0xff]  ;;  %v360_v5 = vld [vmem:[%s5575_s2 + $0x990] sm:$0xff] }
  0x87   :  { %2810 = vmatpush3.msra.mxu1 %v279_v7  ;;  %2776 = vmatprep.subr.mxu0 %v262_v8  ;;  %v312_v6 = vld [vmem:[%s5575_s2 + $0x810] sm:$0xff]  ;;  %v327_v8 = vld [vmem:[%s5575_s2 + $0x888] sm:$0xff] }
  0x88   :  { %2811 = vmatprep.subr.mxu1 %v294_v9  ;;  %2777 = vmatpush3.msra.mxu0 %v246_v10  ;;  %v344_v7 = vld [vmem:[%s5575_s2 + $0x910] sm:$0xff]  ;;  %v359_v9 = vld [vmem:[%s5575_s2 + $0x988] sm:$0xff] }
  0x89   :  { %873 = vmatprep.mubr.f32.mxu0 %v46_v11  ;;  %2812 = vmatpush3.msra.mxu1 %v278_v12  ;;  %v311_v10 = vld [vmem:[%s5575_s2 + $0x808] sm:$0xff]  ;;  %v326_v12 = vld [vmem:[%s5575_s2 + $0x880] sm:$0xff] }
  0x8a   :  { %943 = vmatprep.mubr.f32.mxu1 %v48_v13  ;;  %874 = vmatmul.mubr.f32.vlgmr.msra.gmra.mxu0 %v45_v14  ;;  %v343_v11 = vld [vmem:[%s5575_s2 + $0x908] sm:$0xff]  ;;  %v358_v13 = vld [vmem:[%s5575_s2 + $0x980] sm:$0xff] }
  0x8b   :  { %944 = vmatmul.mubr.f32.vlgmr.msra.gmra.mxu1 %v47_v15  ;;  %2816 = vmatprep.subr.mxu0 %v341_v16  ;;  %v310_v14 = vld [vmem:[%s5575_s2 + $0x800] sm:$0xff]  ;;  %v50_v15 = vld [vmem:[%s5573_s0 + $0x88] sm:$0x3f] }
  0x8c   :  { %2851 = vmatprep.subr.mxu1 %v373_v17  ;;  %2817 = vmatpush3.msra.mxu0 %v325_v18  ;;  %v342_v16 = vld [vmem:[%s5575_s2 + $0x900] sm:$0xff]  ;;  %v52_v17 = vld [vmem:[%s5573_s0 + $0x98] sm:$0x3f] }
  0x8d   :  { %2852 = vmatpush3.msra.mxu1 %v357_v19  ;;  %2818 = vmatprep.subr.mxu0 %v340_v20  ;;  %v49_v18 = vld [vmem:[%s5573_s0 + $0x80] sm:$0x3f]  ;;  %v51_v19 = vld [vmem:[%s5573_s0 + $0x90] sm:$0x3f]  ;;  %v377_v20 = vld [vmem:[%s5575_s2 + $0xa18] sm:$0xff] }
  0x8e   :  { %2853 = vmatprep.subr.mxu1 %v372_v21  ;;  %2819 = vmatpush3.msra.mxu0 %v324_v22  ;;  %v1229_v21 = vld [vmem:[%s5577_s4 + $0x1f8] sm:$0xff] }
  0x8f   :  { %2854 = vmatpush3.msra.mxu1 %v356_v23  ;;  %2820 = vmatprep.subr.mxu0 %v339_v24  ;;  %v1213_v22 = vld [vmem:[%s5577_s4 + $0x178] sm:$0xff]  ;;  %v3377_v23 = vmov 0.0   ;;  %v376_v24 = vld [vmem:[%s5575_s2 + $0xa10] sm:$0xff] }
  0x90   :  { %2855 = vmatprep.subr.mxu1 %v371_v25  ;;  %2821 = vmatpush3.msra.mxu0 %v323_v26  ;;  %v1228_v25 = vld [vmem:[%s5577_s4 + $0x1f0] sm:$0xff] }
  0x91   :  { %2856 = vmatpush3.msra.mxu1 %v355_v27  ;;  %2822 = vmatprep.subr.mxu0 %v338_v28  ;;  %v1212_v26 = vld [vmem:[%s5577_s4 + $0x170] sm:$0xff]  ;;  %v375_v27 = vld [vmem:[%s5575_s2 + $0xa08] sm:$0xff] }
  0x92   :  { %2857 = vmatprep.subr.mxu1 %v370_v29  ;;  %2823 = vmatpush3.msra.mxu0 %v322_v30  ;;  %v1227_v28 = vld [vmem:[%s5577_s4 + $0x1e8] sm:$0xff]  ;;  %v374_v30 = vld [vmem:[%s5575_s2 + $0xa00] sm:$0xff] }
  0x93   :  { %2858 = vmatpush3.msra.mxu1 %v354_v31  ;;  %2824 = vmatprep.subr.mxu0 %v337_v32  ;;  %v1211_v29 = vld [vmem:[%s5577_s4 + $0x168] sm:$0xff]  ;;  %v1226_v31 = vld [vmem:[%s5577_s4 + $0x1e0] sm:$0xff] }
  0x94   :  { %2859 = vmatprep.subr.mxu1 %v369_v33  ;;  %2825 = vmatpush3.msra.mxu0 %v321_v34  ;;  %v53_v32 = vld [vmem:[%s5573_s0 + $0xa0] sm:$0x3f]  ;;  %v1197_v33 = vld [vmem:[%s5577_s4 + $0xf8] sm:$0xff] }
  0x95   :  { %2860 = vmatpush3.msra.mxu1 %v353_v35  ;;  %2826 = vmatprep.subr.mxu0 %v336_v36  ;;  %v1181_v34 = vld [vmem:[%s5577_s4 + $0x78] sm:$0xff]  ;;  %v1210_v35 = vld [vmem:[%s5577_s4 + $0x160] sm:$0xff]  ;;  %v1196_v36 = vld [vmem:[%s5577_s4 + $0xf0] sm:$0xff] }
  0x96   :  { %2861 = vmatprep.subr.mxu1 %v368_v37  ;;  %2827 = vmatpush3.msra.mxu0 %v320_v38  ;;  %v1225_v37 = vld [vmem:[%s5577_s4 + $0x1d8] sm:$0xff]  ;;  %v1180_v38 = vld [vmem:[%s5577_s4 + $0x70] sm:$0xff] }
  0x97   :  { %2862 = vmatpush3.msra.mxu1 %v352_v39  ;;  %2828 = vmatprep.subr.mxu0 %v335_v40  ;;  %v1209_v39 = vld [vmem:[%s5577_s4 + $0x158] sm:$0xff]  ;;  %v1195_v40 = vld [vmem:[%s5577_s4 + $0xe8] sm:$0xff] }
  0x98   :  { %2863 = vmatprep.subr.mxu1 %v367_v41  ;;  %2829 = vmatpush3.msra.mxu0 %v319_v42  ;;  %v1224_v41 = vld [vmem:[%s5577_s4 + $0x1d0] sm:$0xff]  ;;  %v1179_v42 = vld [vmem:[%s5577_s4 + $0x68] sm:$0xff] }
  0x99   :  { %2864 = vmatpush3.msra.mxu1 %v351_v43  ;;  %2830 = vmatprep.subr.mxu0 %v334_v44  ;;  %v1208_v43 = vld [vmem:[%s5577_s4 + $0x150] sm:$0xff]  ;;  %v1194_v44 = vld [vmem:[%s5577_s4 + $0xe0] sm:$0xff] }
  0x9a   :  { %2865 = vmatprep.subr.mxu1 %v366_v45  ;;  %2831 = vmatpush3.msra.mxu0 %v318_v46  ;;  %v1223_v45 = vld [vmem:[%s5577_s4 + $0x1c8] sm:$0xff]  ;;  %v1178_v46 = vld [vmem:[%s5577_s4 + $0x60] sm:$0xff] }
  0x9b   :  { %2866 = vmatpush3.msra.mxu1 %v350_v47  ;;  %2832 = vmatprep.subr.mxu0 %v333_v48  ;;  %v1207_v47 = vld [vmem:[%s5577_s4 + $0x148] sm:$0xff]  ;;  %v1193_v48 = vld [vmem:[%s5577_s4 + $0xd8] sm:$0xff] }
  0x9c   :  { %2867 = vmatprep.subr.mxu1 %v365_v49  ;;  %2833 = vmatpush3.msra.mxu0 %v317_v50  ;;  %v1222_v49 = vld [vmem:[%s5577_s4 + $0x1c0] sm:$0xff]  ;;  %v3379_v50 = vmov 1983009808  }
  0x9d   :  { %2868 = vmatpush3.msra.mxu1 %v349_v51  ;;  %2834 = vmatprep.subr.mxu0 %v332_v52  ;;  %v1505_v51 = vunpack.c.l.s4 %v3379_v50  ;;  %v1507_v52 = vlaneseq  ;;  %v1290_v50 = vld [vmem:[%s5577_s4 + $0x3e0] sm:$0xff] }
  0x9e   :  { %2869 = vmatprep.subr.mxu1 %v364_v53  ;;  %2835 = vmatpush3.msra.mxu0 %v316_v54  ;;  %v1177_v53 = vld [vmem:[%s5577_s4 + $0x58] sm:$0xff]  ;;  %v1206_v54 = vld [vmem:[%s5577_s4 + $0x140] sm:$0xff] }
  0x9f   :  { %2870 = vmatpush3.msra.mxu1 %v348_v55  ;;  %2836 = vmatprep.subr.mxu0 %v331_v56  ;;  %v1192_v55 = vld [vmem:[%s5577_s4 + $0xd0] sm:$0xff]  ;;  %v1221_v56 = vld [vmem:[%s5577_s4 + $0x1b8] sm:$0xff] }
  0xa0   :  { %2871 = vmatprep.subr.mxu1 %v363_v57  ;;  %2837 = vmatpush3.msra.mxu0 %v315_v58  ;;  %v1176_v57 = vld [vmem:[%s5577_s4 + $0x50] sm:$0xff]  ;;  %v1205_v58 = vld [vmem:[%s5577_s4 + $0x138] sm:$0xff] }
  0xa1   :  { %2872 = vmatpush3.msra.mxu1 %v347_v59  ;;  %2838 = vmatprep.subr.mxu0 %v330_v60  ;;  %v1191_v59 = vld [vmem:[%s5577_s4 + $0xc8] sm:$0xff]  ;;  %v1220_v60 = vld [vmem:[%s5577_s4 + $0x1b0] sm:$0xff] }
  0xa2   :  { %2873 = vmatprep.subr.mxu1 %v362_v61  ;;  %2839 = vmatpush3.msra.mxu0 %v314_v62  ;;  %v1506_v61 = vunpack.c.0.s8 %v1505_v51  ;;  %v1508_v62 = vshrl.u32 %v1507_v52, 7  ;;  %v1243_v51 = vld [vmem:[%s5577_s4 + $0x268] sm:$0xff]  ;;  %v1274_v52 = vld [vmem:[%s5577_s4 + $0x360] sm:$0xff] }
  0xa3   :  { %2874 = vmatpush3.msra.mxu1 %v346_v63  ;;  %2840 = vmatprep.subr.mxu0 %v329_v0  ;;  %v1175_v63 = vld [vmem:[%s5577_s4 + $0x48] sm:$0xff]  ;;  %v1204_v0 = vld [vmem:[%s5577_s4 + $0x130] sm:$0xff] }
  0xa4   :  { %2875 = vmatprep.subr.mxu1 %v361_v1  ;;  %2841 = vmatpush3.msra.mxu0 %v313_v2  ;;  %v1190_v1 = vld [vmem:[%s5577_s4 + $0xc0] sm:$0xff]  ;;  %v1219_v2 = vld [vmem:[%s5577_s4 + $0x1a8] sm:$0xff] }
  0xa5   :  { %2876 = vmatpush3.msra.mxu1 %v345_v3  ;;  %2842 = vmatprep.subr.mxu0 %v328_v4  ;;  %v1174_v3 = vld [vmem:[%s5577_s4 + $0x40] sm:$0xff]  ;;  %v1203_v4 = vld [vmem:[%s5577_s4 + $0x128] sm:$0xff] }
  0xa6   :  { %2877 = vmatprep.subr.mxu1 %v360_v5  ;;  %2843 = vmatpush3.msra.mxu0 %v312_v6  ;;  %v1160_v5 = vld [vmem:[%s5574_s1] sm:$0xff]  ;;  %v1189_v6 = vld [vmem:[%s5577_s4 + $0xb8] sm:$0xff] }
  0xa7   :  { %2878 = vmatpush3.msra.mxu1 %v344_v7  ;;  %2844 = vmatprep.subr.mxu0 %v327_v8  ;;  %v1218_v7 = vld [vmem:[%s5577_s4 + $0x1a0] sm:$0xff]  ;;  %v4600_v8 = vsub.s32 %v1506_v61, %v1508_v62  ;;  %v1256_v61 = vld [vmem:[%s5577_s4 + $0x2d0] sm:$0xff]  ;;  %v1287_v62 = vld [vmem:[%s5577_s4 + $0x3c8] sm:$0xff] }
  0xa8   :  { %2879 = vmatprep.subr.mxu1 %v359_v9  ;;  %2845 = vmatpush3.msra.mxu0 %v311_v10  ;;  %v1173_v9 = vld [vmem:[%s5577_s4 + $0x38] sm:$0xff]  ;;  %v1202_v10 = vld [vmem:[%s5577_s4 + $0x120] sm:$0xff] }
  0xa9   :  { %2880 = vmatpush3.msra.mxu1 %v343_v11  ;;  %2846 = vmatprep.subr.mxu0 %v326_v12  ;;  %v1188_v11 = vld [vmem:[%s5577_s4 + $0xb0] sm:$0xff]  ;;  %v1217_v12 = vld [vmem:[%s5577_s4 + $0x198] sm:$0xff] }
  0xaa   :  { %2881 = vmatprep.subr.mxu1 %v358_v13  ;;  %2847 = vmatpush3.msra.mxu0 %v310_v14  ;;  %v1503_v13 = vcombine.high %v1160_v5, %v1160_v5  ;;  %v1172_v14 = vld [vmem:[%s5577_s4 + $0x30] sm:$0xff] }
  0xab   :  { %1013 = vmatprep.mubr.f32.mxu0 %v50_v15  ;;  %2882 = vmatpush3.msra.mxu1 %v342_v16  ;;  %v1201_v15 = vld [vmem:[%s5577_s4 + $0x118] sm:$0xff]  ;;  %v1187_v16 = vld [vmem:[%s5577_s4 + $0xa8] sm:$0xff] }
  0xac   :  { %1083 = vmatprep.mubr.f32.mxu1 %v52_v17  ;;  %1014 = vmatmul.mubr.f32.vlgmr.msra.gmra.mxu0 %v49_v18  ;;  %v1216_v17 = vld [vmem:[%s5577_s4 + $0x190] sm:$0xff]  ;;  %v1510_v18 = vrot.slane %v1160_v5, %v4600_v8  ;;  %v1254_v5 = vld [vmem:[%s5577_s4 + $0x2c0] sm:$0xff] }
  0xad   :  { %1084 = vmatmul.mubr.f32.vlgmr.msra.gmra.mxu1 %v51_v19  ;;  %3263 = vmatprep.subr.mxu1 %v3377_v23  ;;  %v1171_v19 = vld [vmem:[%s5577_s4 + $0x28] sm:$0xff] }
  0xae   :  { %3271 = vmatprep.mubr.msk.f32.mxu1 %vm3378_vm0, %v3377_v23  ;;  %3264 = vmatpush3.msra.mxu1 %v377_v20  ;;  %v1200_v20 = vld [vmem:[%s5577_s4 + $0x110] sm:$0xff] }
  0xaf   :  { %2926 = vmatprep.subr.mxu0 %v1229_v21  ;;  %3265 = vmatprep.subr.mxu1 %v3377_v23  ;;  %v1186_v21 = vld [vmem:[%s5577_s4 + $0xa0] sm:$0xff] }
  0xb0   :  { %2927 = vmatpush3.msra.mxu0 %v1213_v22  ;;  %3266 = vmatpush3.msra.mxu1 %v376_v24  ;;  %v1215_v22 = vld [vmem:[%s5577_s4 + $0x188] sm:$0xff]  ;;  %v1517_v24 = vrot.slane %v1503_v13, %v4600_v8  ;;  %v1268_v13 = vld [vmem:[%s5577_s4 + $0x330] sm:$0xff] }
  0xb1   :  { %2928 = vmatprep.subr.mxu0 %v1228_v25  ;;  %3267 = vmatprep.subr.mxu1 %v3377_v23  ;;  %v1170_v25 = vld [vmem:[%s5577_s4 + $0x20] sm:$0xff] }
  0xb2   :  { %2929 = vmatpush3.msra.mxu0 %v1212_v26  ;;  %3268 = vmatpush3.msra.mxu1 %v375_v27  ;;  %v1199_v26 = vld [vmem:[%s5577_s4 + $0x108] sm:$0xff]  ;;  %v1185_v27 = vld [vmem:[%s5577_s4 + $0x98] sm:$0xff] }
  0xb3   :  { %2930 = vmatprep.subr.mxu0 %v1227_v28  ;;  %3269 = vmatprep.subr.mxu1 %v3377_v23  ;;  %v1214_v28 = vld [vmem:[%s5577_s4 + $0x180] sm:$0xff] }
  0xb4   :  { %2931 = vmatpush3.msra.mxu0 %v1211_v29  ;;  %3270 = vmatpush3.msra.mxu1 %v374_v30  ;;  %v1518_v29 = vcombine.high %v1510_v18, %v1510_v18  ;;  %v1169_v30 = vld [vmem:[%s5577_s4 + $0x18] sm:$0xff] }
  0xb5   :  { %2932 = vmatprep.subr.mxu0 %v1226_v31  ;;  %3272 = vmatmul.mubr.msk.f32.vlgmr.msra.gmra.mxu1 %vm385_vm1, %v53_v32  ;;  %v1184_v31 = vld [vmem:[%s5577_s4 + $0x90] sm:$0xff]  ;;  %v1198_v32 = vld [vmem:[%s5577_s4 + $0x100] sm:$0xff] }
  0xb6   :  { %2891 = vmatprep.subr.mxu1 %v1197_v33  ;;  %2933 = vmatpush3.msra.mxu0 %v1210_v35  ;;  %v1519_v33 = vcombine.high %v1517_v24, %v1517_v24  ;;  %v1183_v35 = vld [vmem:[%s5577_s4 + $0x88] sm:$0xff] }
  0xb7   :  { %2892 = vmatpush3.msra.mxu1 %v1181_v34  ;;  %2934 = vmatprep.subr.mxu0 %v1225_v37  ;;  %v1168_v34 = vld [vmem:[%s5577_s4 + $0x10] sm:$0xff]  ;;  %v1167_v37 = vld [vmem:[%s5577_s4 + $0x8] sm:$0xff] }
  0xb8   :  { %2893 = vmatprep.subr.mxu1 %v1196_v36  ;;  %2935 = vmatpush3.msra.mxu0 %v1209_v39  ;;  %v1293_v36 = vld [vmem:[%s5577_s4 + $0x3f8] sm:$0xff] }
  0xb9   :  { %2894 = vmatpush3.msra.mxu1 %v1180_v38  ;;  %2936 = vmatprep.subr.mxu0 %v1224_v41  ;;  %v1182_v38 = vld [vmem:[%s5577_s4 + $0x80] sm:$0xff]  ;;  %v1277_v39 = vld [vmem:[%s5577_s4 + $0x378] sm:$0xff]  ;;  %v1292_v41 = vld [vmem:[%s5577_s4 + $0x3f0] sm:$0xff] }
  0xba   :  { %2895 = vmatprep.subr.mxu1 %v1195_v40  ;;  %2937 = vmatpush3.msra.mxu0 %v1208_v43  ;;  %v1166_v40 = vld [vmem:[%s5577_s4] sm:$0xff]  ;;  %v1245_v43 = vld [vmem:[%s5577_s4 + $0x278] sm:$0xff] }
  0xbb   :  { %2896 = vmatpush3.msra.mxu1 %v1179_v42  ;;  %2938 = vmatprep.subr.mxu0 %v1223_v45  ;;  %v1261_v42 = vld [vmem:[%s5577_s4 + $0x2f8] sm:$0xff]  ;;  %v1260_v45 = vld [vmem:[%s5577_s4 + $0x2f0] sm:$0xff] }
  0xbc   :  { %2897 = vmatprep.subr.mxu1 %v1194_v44  ;;  %2939 = vmatpush3.msra.mxu0 %v1207_v47  ;;  %v1276_v44 = vld [vmem:[%s5577_s4 + $0x370] sm:$0xff] }
  0xbd   :  { %2898 = vmatpush3.msra.mxu1 %v1178_v46  ;;  %2940 = vmatprep.subr.mxu0 %v1222_v49  ;;  %v1291_v46 = vld [vmem:[%s5577_s4 + $0x3e8] sm:$0xff]  ;;  %v1244_v47 = vld [vmem:[%s5577_s4 + $0x270] sm:$0xff] }
  0xbe   :  { %2899 = vmatprep.subr.mxu1 %v1193_v48  ;;  %2941 = vmatpush3.msra.mxu0 %v1206_v54  ;;  %v1275_v48 = vld [vmem:[%s5577_s4 + $0x368] sm:$0xff]  ;;  %v1289_v54 = vld [vmem:[%s5577_s4 + $0x3d8] sm:$0xff] }
  0xbf   :  { %2900 = vmatpush3.msra.mxu1 %v1177_v53  ;;  %2942 = vmatprep.subr.mxu0 %v1221_v56  ;;  %v1259_v49 = vld [vmem:[%s5577_s4 + $0x2e8] sm:$0xff]  ;;  %v1258_v53 = vld [vmem:[%s5577_s4 + $0x2e0] sm:$0xff]  ;;  %v1273_v56 = vld [vmem:[%s5577_s4 + $0x358] sm:$0xff] }
  0xc0   :  { %2901 = vmatprep.subr.mxu1 %v1192_v55  ;;  %2943 = vmatpush3.msra.mxu0 %v1205_v58  ;;  %v1242_v55 = vld [vmem:[%s5577_s4 + $0x260] sm:$0xff]  ;;  %v1288_v58 = vld [vmem:[%s5577_s4 + $0x3d0] sm:$0xff] }
  0xc1   :  { %2902 = vmatpush3.msra.mxu1 %v1176_v57  ;;  %2944 = vmatprep.subr.mxu0 %v1220_v60  ;;  %v1257_v57 = vld [vmem:[%s5577_s4 + $0x2d8] sm:$0xff]  ;;  %v1272_v60 = vld [vmem:[%s5577_s4 + $0x350] sm:$0xff] }
  0xc2   :  { %2903 = vmatprep.subr.mxu1 %v1191_v59  ;;  %2945 = vmatpush3.msra.mxu0 %v1204_v0  ;;  %v1241_v59 = vld [vmem:[%s5577_s4 + $0x258] sm:$0xff]  ;;  %v1271_v0 = vld [vmem:[%s5577_s4 + $0x348] sm:$0xff] }
  0xc3   :  { %2904 = vmatpush3.msra.mxu1 %v1175_v63  ;;  %2946 = vmatprep.subr.mxu0 %v1219_v2  ;;  %v1240_v63 = vld [vmem:[%s5577_s4 + $0x250] sm:$0xff]  ;;  %v1286_v2 = vld [vmem:[%s5577_s4 + $0x3c0] sm:$0xff] }
  0xc4   :  { %2905 = vmatprep.subr.mxu1 %v1190_v1  ;;  %2947 = vmatpush3.msra.mxu0 %v1203_v4  ;;  %v1255_v1 = vld [vmem:[%s5577_s4 + $0x2c8] sm:$0xff]  ;;  %v1270_v4 = vld [vmem:[%s5577_s4 + $0x340] sm:$0xff] }
  0xc5   :  { %2906 = vmatpush3.msra.mxu1 %v1174_v3  ;;  %2948 = vmatprep.subr.mxu0 %v1218_v7  ;;  %v1239_v3 = vld [vmem:[%s5577_s4 + $0x248] sm:$0xff]  ;;  %v1238_v7 = vld [vmem:[%s5577_s4 + $0x240] sm:$0xff] }
  0xc6   :  { %2907 = vmatprep.subr.mxu1 %v1189_v6  ;;  %2949 = vmatpush3.msra.mxu0 %v1202_v10  ;;  %v1285_v6 = vld [vmem:[%s5577_s4 + $0x3b8] sm:$0xff] }
  0xc7   :  { %2908 = vmatpush3.msra.mxu1 %v1173_v9  ;;  %2950 = vmatprep.subr.mxu0 %v1217_v12  ;;  %v1269_v9 = vld [vmem:[%s5577_s4 + $0x338] sm:$0xff] }
  0xc8   :  { %2909 = vmatprep.subr.mxu1 %v1188_v11  ;;  %2951 = vmatpush3.msra.mxu0 %v1201_v15  ;;  %v1253_v10 = vld [vmem:[%s5577_s4 + $0x2b8] sm:$0xff]  ;;  %v1284_v11 = vld [vmem:[%s5577_s4 + $0x3b0] sm:$0xff] }
  0xc9   :  { %2910 = vmatpush3.msra.mxu1 %v1172_v14  ;;  %2952 = vmatprep.subr.mxu0 %v1216_v17  ;;  %v1237_v12 = vld [vmem:[%s5577_s4 + $0x238] sm:$0xff] }
  0xca   :  { %2911 = vmatprep.subr.mxu1 %v1187_v16  ;;  %2953 = vmatpush3.msra.mxu0 %v1200_v20 }
  0xcb   :  { %2912 = vmatpush3.msra.mxu1 %v1171_v19  ;;  %2954 = vmatprep.subr.mxu0 %v1215_v22 }
  0xcc   :  { %2913 = vmatprep.subr.mxu1 %v1186_v21  ;;  %2955 = vmatpush3.msra.mxu0 %v1199_v26 }
  0xcd   :  { %2914 = vmatpush3.msra.mxu1 %v1170_v25  ;;  %2956 = vmatprep.subr.mxu0 %v1214_v28 }
  0xce   :  { %2915 = vmatprep.subr.mxu1 %v1185_v27  ;;  %1681 = vmatprep.mubr.f32.mxu1 %v1518_v29 }
  0xcf   :  { %2916 = vmatpush3.msra.mxu1 %v1169_v30  ;;  %2957 = vmatpush3.msra.mxu0 %v1198_v32 }
  0xd0   :  { %2917 = vmatprep.subr.mxu1 %v1184_v31  ;;  %1751 = vmatprep.mubr.f32.mxu0 %v1519_v33 }
  0xd1   :  { %2918 = vmatpush3.msra.mxu1 %v1168_v34  ;;  %2996 = vmatprep.subr.mxu0 %v1293_v36 }
  0xd2   :  { %2919 = vmatprep.subr.mxu1 %v1183_v35  ;;  %1752 = vmatmul.mubr.f32.vlgmr.msra.gmra.mxu0 %v1517_v24 }
  0xd3   :  { %2920 = vmatpush3.msra.mxu1 %v1167_v37  ;;  %2997 = vmatpush3.msra.mxu0 %v1277_v39 }
  0xd4   :  { %2921 = vmatprep.subr.mxu1 %v1182_v38  ;;  %2998 = vmatprep.subr.mxu0 %v1292_v41 }
  0xd5   :  { %2922 = vmatpush3.msra.mxu1 %v1166_v40  ;;  %2999 = vmatpush3.msra.mxu0 %v1276_v44 }
  0xd6   :  { %1682 = vmatmul.mubr.f32.vlgmr.msra.gmra.mxu1 %v1510_v18  ;;  %2961 = vmatprep.subr.mxu1 %v1261_v42 }
  0xd7   :  { %2962 = vmatpush3.msra.mxu1 %v1245_v43  ;;  %3000 = vmatprep.subr.mxu0 %v1291_v46 }
  0xd8   :  { %2963 = vmatprep.subr.mxu1 %v1260_v45  ;;  %3001 = vmatpush3.msra.mxu0 %v1275_v48 }
  0xd9   :  { %2964 = vmatpush3.msra.mxu1 %v1244_v47  ;;  %3002 = vmatprep.subr.mxu0 %v1290_v50 }
  0xda   :  { %2965 = vmatprep.subr.mxu1 %v1259_v49  ;;  %3003 = vmatpush3.msra.mxu0 %v1274_v52 }
  0xdb   :  { %2966 = vmatpush3.msra.mxu1 %v1243_v51  ;;  %3004 = vmatprep.subr.mxu0 %v1289_v54 }
  0xdc   :  { %2967 = vmatprep.subr.mxu1 %v1258_v53  ;;  %3005 = vmatpush3.msra.mxu0 %v1273_v56 }
  0xdd   :  { %2968 = vmatpush3.msra.mxu1 %v1242_v55  ;;  %3006 = vmatprep.subr.mxu0 %v1288_v58 }
  0xde   :  { %2969 = vmatprep.subr.mxu1 %v1257_v57  ;;  %3007 = vmatpush3.msra.mxu0 %v1272_v60 }
  0xdf   :  { %2970 = vmatpush3.msra.mxu1 %v1241_v59  ;;  %3008 = vmatprep.subr.mxu0 %v1287_v62 }
  0xe0   :  { %2971 = vmatprep.subr.mxu1 %v1256_v61  ;;  %3009 = vmatpush3.msra.mxu0 %v1271_v0 }
  0xe1   :  { %2972 = vmatpush3.msra.mxu1 %v1240_v63  ;;  %3010 = vmatprep.subr.mxu0 %v1286_v2 }
  0xe2   :  { %2973 = vmatprep.subr.mxu1 %v1255_v1  ;;  %3011 = vmatpush3.msra.mxu0 %v1270_v4 }
  0xe3   :  { %2974 = vmatpush3.msra.mxu1 %v1239_v3  ;;  %3012 = vmatprep.subr.mxu0 %v1285_v6 }
  0xe4   :  { %2975 = vmatprep.subr.mxu1 %v1254_v5 }
  0xe5   :  { %16 = vsyncpa [#allocation5], 0  ;;  %2976 = vmatpush3.msra.mxu1 %v1238_v7  ;;  %3013 = vmatpush3.msra.mxu0 %v1269_v9  ;;  %v1252_v14 = vld [vmem:[%s5577_s4 + $0x2b0] sm:$0xff]  ;;  %v1283_v15 = vld [vmem:[%s5577_s4 + $0x3a8] sm:$0xff]  ;;  %s3382_s28 = smov 96   ;;  %vm2402_vm2 = vcmask 523264  }
  0xe6   :  { %2977 = vmatprep.subr.mxu1 %v1253_v10  ;;  %3014 = vmatprep.subr.mxu0 %v1284_v11  ;;  %v1236_v16 = vld [vmem:[%s5577_s4 + $0x230] sm:$0xff]  ;;  %v1267_v17 = vld [vmem:[%s5577_s4 + $0x328] sm:$0xff]  ;;  %v1282_v20 = vld [vmem:[%s5577_s4 + $0x3a0] sm:$0xff]  ;;  %vm2404_vm3 = vcmask 785408  }
  0xe7   :  { %v1161_v18 = vld [vmem:[%s5574_s1 + $0x8] sm:$0xff]  ;;  %2978 = vmatpush3.msra.mxu1 %v1237_v12  ;;  %3015 = vmatpush3.msra.mxu0 %v1268_v13  ;;  %v1266_v22 = vld [vmem:[%s5577_s4 + $0x320] sm:$0xff]  ;;  %v1281_v25 = vld [vmem:[%s5577_s4 + $0x398] sm:$0xff] }
  0xe8   :  { %v1251_v19 = vld [vmem:[%s5577_s4 + $0x2a8] sm:$0xff]  ;;  %2979 = vmatprep.subr.mxu1 %v1252_v14  ;;  %3016 = vmatprep.subr.mxu0 %v1283_v15  ;;  %v1250_v24 = vld [vmem:[%s5577_s4 + $0x2a0] sm:$0xff]  ;;  %v1520_v26 = vcombine.high %v1161_v18, %v1161_v18  ;;  %v1265_v28 = vld [vmem:[%s5577_s4 + $0x318] sm:$0xff]  ;;  %v1527_v31 = vrot.slane %v1161_v18, %v4600_v8 }
  0xe9   :  { %v1235_v21 = vld [vmem:[%s5577_s4 + $0x228] sm:$0xff]  ;;  %2980 = vmatpush3.msra.mxu1 %v1236_v16  ;;  %3017 = vmatpush3.msra.mxu0 %v1267_v17  ;;  %v1234_v27 = vld [vmem:[%s5577_s4 + $0x220] sm:$0xff]  ;;  %v1249_v29 = vld [vmem:[%s5577_s4 + $0x298] sm:$0xff] }
  0xea   :  { %2981 = vmatprep.subr.mxu1 %v1251_v19  ;;  %3018 = vmatprep.subr.mxu0 %v1282_v20  ;;  %v1280_v30 = vld [vmem:[%s5577_s4 + $0x390] sm:$0xff]  ;;  %v1233_v32 = vld [vmem:[%s5577_s4 + $0x218] sm:$0xff]  ;;  %v1279_v35 = vld [vmem:[%s5577_s4 + $0x388] sm:$0xff]  ;;  %v1534_v36 = vrot.slane %v1520_v26, %v4600_v8  ;;  %v1535_v41 = vcombine.high %v1527_v31, %v1527_v31 }
  0xeb   :  { %2982 = vmatpush3.msra.mxu1 %v1235_v21  ;;  %3019 = vmatpush3.msra.mxu0 %v1266_v22  ;;  %v1264_v33 = vld [vmem:[%s5577_s4 + $0x310] sm:$0xff]  ;;  %v1263_v38 = vld [vmem:[%s5577_s4 + $0x308] sm:$0xff]  ;;  %v1278_v40 = vld [vmem:[%s5577_s4 + $0x380] sm:$0xff] }
  0xec   :  { %2983 = vmatprep.subr.mxu1 %v1250_v24  ;;  %3020 = vmatprep.subr.mxu0 %v1281_v25  ;;  %v1248_v34 = vld [vmem:[%s5577_s4 + $0x290] sm:$0xff]  ;;  %v1247_v39 = vld [vmem:[%s5577_s4 + $0x288] sm:$0xff]  ;;  %v1246_v43 = vld [vmem:[%s5577_s4 + $0x280] sm:$0xff]  ;;  %v1536_v45 = vcombine.high %v1534_v36, %v1534_v36 }
  0xed   :  { %2984 = vmatpush3.msra.mxu1 %v1234_v27  ;;  %3021 = vmatpush3.msra.mxu0 %v1265_v28  ;;  %v1232_v37 = vld [vmem:[%s5577_s4 + $0x210] sm:$0xff]  ;;  %v1231_v42 = vld [vmem:[%s5577_s4 + $0x208] sm:$0xff]  ;;  %v1262_v44 = vld [vmem:[%s5577_s4 + $0x300] sm:$0xff] }
  0xee   :  { %2985 = vmatprep.subr.mxu1 %v1249_v29  ;;  %3022 = vmatprep.subr.mxu0 %v1280_v30  ;;  %v1230_v46 = vld [vmem:[%s5577_s4 + $0x200] sm:$0xff]  ;;  %v1325_v47 = vld [vmem:[%s5577_s4 + $0x4f8] sm:$0xff]  ;;  %v1324_v51 = vld [vmem:[%s5577_s4 + $0x4f0] sm:$0xff] }
  0xef   :  { %2986 = vmatpush3.msra.mxu1 %v1233_v32  ;;  %3023 = vmatpush3.msra.mxu0 %v1264_v33  ;;  %v1357_v48 = vld [vmem:[%s5577_s4 + $0x5f8] sm:$0xff]  ;;  %v1356_v52 = vld [vmem:[%s5577_s4 + $0x5f0] sm:$0xff]  ;;  %v1323_v55 = vld [vmem:[%s5577_s4 + $0x4e8] sm:$0xff] }
  0xf0   :  { %2987 = vmatprep.subr.mxu1 %v1248_v34  ;;  %3024 = vmatprep.subr.mxu0 %v1279_v35  ;;  %v1309_v49 = vld [vmem:[%s5577_s4 + $0x478] sm:$0xff]  ;;  %v1308_v53 = vld [vmem:[%s5577_s4 + $0x470] sm:$0xff]  ;;  %v1355_v56 = vld [vmem:[%s5577_s4 + $0x5e8] sm:$0xff] }
  0xf1   :  { %2988 = vmatpush3.msra.mxu1 %v1232_v37  ;;  %3025 = vmatpush3.msra.mxu0 %v1263_v38  ;;  %v1341_v50 = vld [vmem:[%s5577_s4 + $0x578] sm:$0xff]  ;;  %v1340_v54 = vld [vmem:[%s5577_s4 + $0x570] sm:$0xff]  ;;  %v1307_v57 = vld [vmem:[%s5577_s4 + $0x468] sm:$0xff] }
  0xf2   :  { %2989 = vmatprep.subr.mxu1 %v1247_v39  ;;  %3026 = vmatprep.subr.mxu0 %v1278_v40  ;;  %v1339_v58 = vld [vmem:[%s5577_s4 + $0x568] sm:$0xff]  ;;  %v1322_v59 = vld [vmem:[%s5577_s4 + $0x4e0] sm:$0xff]  ;;  %v1321_v63 = vld [vmem:[%s5577_s4 + $0x4d8] sm:$0xff] }
  0xf3   :  { %2990 = vmatpush3.msra.mxu1 %v1231_v42  ;;  %1821 = vmatprep.mubr.f32.mxu1 %v1535_v41  ;;  %v1354_v60 = vld [vmem:[%s5577_s4 + $0x5e0] sm:$0xff]  ;;  %v1353_v0 = vld [vmem:[%s5577_s4 + $0x5d8] sm:$0xff]  ;;  %v1320_v3 = vld [vmem:[%s5577_s4 + $0x4d0] sm:$0xff] }
  0xf4   :  { %2991 = vmatprep.subr.mxu1 %v1246_v43  ;;  %3027 = vmatpush3.msra.mxu0 %v1262_v44  ;;  %v1306_v61 = vld [vmem:[%s5577_s4 + $0x460] sm:$0xff]  ;;  %v1305_v1 = vld [vmem:[%s5577_s4 + $0x458] sm:$0xff]  ;;  %v1352_v4 = vld [vmem:[%s5577_s4 + $0x5d0] sm:$0xff] }
  0xf5   :  { %2992 = vmatpush3.msra.mxu1 %v1230_v46  ;;  %1891 = vmatprep.mubr.f32.mxu0 %v1536_v45  ;;  %v1338_v62 = vld [vmem:[%s5577_s4 + $0x560] sm:$0xff]  ;;  %v1337_v2 = vld [vmem:[%s5577_s4 + $0x558] sm:$0xff]  ;;  %v1304_v5 = vld [vmem:[%s5577_s4 + $0x450] sm:$0xff] }
  0xf6   :  { %1822 = vmatmul.mubr.f32.vlgmr.msra.gmra.mxu1 %v1527_v31  ;;  %3031 = vmatprep.subr.mxu1 %v1325_v47  ;;  %v1336_v6 = vld [vmem:[%s5577_s4 + $0x550] sm:$0xff]  ;;  %v1319_v7 = vld [vmem:[%s5577_s4 + $0x4c8] sm:$0xff]  ;;  %v1318_v12 = vld [vmem:[%s5577_s4 + $0x4c0] sm:$0xff] }
  0xf7   :  { %3066 = vmatprep.subr.mxu0 %v1357_v48  ;;  %1892 = vmatmul.mubr.f32.vlgmr.msra.gmra.mxu0 %v1534_v36  ;;  %v1351_v9 = vld [vmem:[%s5577_s4 + $0x5c8] sm:$0xff]  ;;  %v1350_v13 = vld [vmem:[%s5577_s4 + $0x5c0] sm:$0xff]  ;;  %v1317_v16 = vld [vmem:[%s5577_s4 + $0x4b8] sm:$0xff] }
  0xf8   :  { %3032 = vmatpush3.msra.mxu1 %v1309_v49  ;;  %3067 = vmatpush3.msra.mxu0 %v1341_v50  ;;  %v1303_v10 = vld [vmem:[%s5577_s4 + $0x448] sm:$0xff]  ;;  %v1302_v14 = vld [vmem:[%s5577_s4 + $0x440] sm:$0xff]  ;;  %v1349_v17 = vld [vmem:[%s5577_s4 + $0x5b8] sm:$0xff] }
  0xf9   :  { %3033 = vmatprep.subr.mxu1 %v1324_v51  ;;  %3068 = vmatprep.subr.mxu0 %v1356_v52  ;;  %v1335_v11 = vld [vmem:[%s5577_s4 + $0x548] sm:$0xff]  ;;  %v1334_v15 = vld [vmem:[%s5577_s4 + $0x540] sm:$0xff]  ;;  %v1301_v18 = vld [vmem:[%s5577_s4 + $0x438] sm:$0xff] }
  0xfa   :  { %3034 = vmatpush3.msra.mxu1 %v1308_v53  ;;  %3069 = vmatpush3.msra.mxu0 %v1340_v54  ;;  %v1333_v19 = vld [vmem:[%s5577_s4 + $0x538] sm:$0xff]  ;;  %v1316_v20 = vld [vmem:[%s5577_s4 + $0x4b0] sm:$0xff]  ;;  %v1315_v25 = vld [vmem:[%s5577_s4 + $0x4a8] sm:$0xff] }
  0xfb   :  { %3035 = vmatprep.subr.mxu1 %v1323_v55  ;;  %3070 = vmatprep.subr.mxu0 %v1355_v56  ;;  %v1348_v21 = vld [vmem:[%s5577_s4 + $0x5b0] sm:$0xff]  ;;  %v1347_v26 = vld [vmem:[%s5577_s4 + $0x5a8] sm:$0xff]  ;;  %v1314_v30 = vld [vmem:[%s5577_s4 + $0x4a0] sm:$0xff] }
  0xfc   :  { %3036 = vmatpush3.msra.mxu1 %v1307_v57  ;;  %3071 = vmatpush3.msra.mxu0 %v1339_v58  ;;  %v1300_v22 = vld [vmem:[%s5577_s4 + $0x430] sm:$0xff]  ;;  %v1299_v27 = vld [vmem:[%s5577_s4 + $0x428] sm:$0xff]  ;;  %v1346_v31 = vld [vmem:[%s5577_s4 + $0x5a0] sm:$0xff] }
  0xfd   :  { %3037 = vmatprep.subr.mxu1 %v1322_v59  ;;  %3072 = vmatprep.subr.mxu0 %v1354_v60  ;;  %v1332_v24 = vld [vmem:[%s5577_s4 + $0x530] sm:$0xff]  ;;  %v1331_v28 = vld [vmem:[%s5577_s4 + $0x528] sm:$0xff]  ;;  %v1298_v32 = vld [vmem:[%s5577_s4 + $0x420] sm:$0xff] }
  0xfe   :  { %3038 = vmatpush3.msra.mxu1 %v1306_v61  ;;  %3073 = vmatpush3.msra.mxu0 %v1338_v62  ;;  %v1162_v29 = vld [vmem:[%s5574_s1 + $0x10] sm:$0xff]  ;;  %v1330_v33 = vld [vmem:[%s5577_s4 + $0x520] sm:$0xff]  ;;  %v1313_v34 = vld [vmem:[%s5577_s4 + $0x498] sm:$0xff] }
  0xff   :  { %3039 = vmatprep.subr.mxu1 %v1321_v63  ;;  %3074 = vmatprep.subr.mxu0 %v1353_v0  ;;  %v1345_v35 = vld [vmem:[%s5577_s4 + $0x598] sm:$0xff]  ;;  %v1537_v36 = vcombine.high %v1162_v29, %v1162_v29  ;;  %v1312_v39 = vld [vmem:[%s5577_s4 + $0x490] sm:$0xff]  ;;  %v1544_v41 = vrot.slane %v1162_v29, %v4600_v8  ;;  %v1311_v44 = vld [vmem:[%s5577_s4 + $0x488] sm:$0xff] }
 0x100   :  { %3040 = vmatpush3.msra.mxu1 %v1305_v1  ;;  %3075 = vmatpush3.msra.mxu0 %v1337_v2  ;;  %v1297_v37 = vld [vmem:[%s5577_s4 + $0x418] sm:$0xff]  ;;  %v1344_v40 = vld [vmem:[%s5577_s4 + $0x590] sm:$0xff]  ;;  %v1343_v45 = vld [vmem:[%s5577_s4 + $0x588] sm:$0xff] }
 0x101   :  { %3041 = vmatprep.subr.mxu1 %v1320_v3  ;;  %3076 = vmatprep.subr.mxu0 %v1352_v4  ;;  %v1329_v38 = vld [vmem:[%s5577_s4 + $0x518] sm:$0xff]  ;;  %v1296_v42 = vld [vmem:[%s5577_s4 + $0x410] sm:$0xff]  ;;  %v1551_v46 = vrot.slane %v1537_v36, %v4600_v8  ;;  %v1295_v47 = vld [vmem:[%s5577_s4 + $0x408] sm:$0xff]  ;;  %v1552_v51 = vcombine.high %v1544_v41, %v1544_v41 }
 0x102   :  { %3042 = vmatpush3.msra.mxu1 %v1304_v5  ;;  %3077 = vmatpush3.msra.mxu0 %v1336_v6  ;;  %v1328_v43 = vld [vmem:[%s5577_s4 + $0x510] sm:$0xff]  ;;  %v1327_v48 = vld [vmem:[%s5577_s4 + $0x508] sm:$0xff]  ;;  %v1310_v49 = vld [vmem:[%s5577_s4 + $0x480] sm:$0xff] }
 0x103   :  { %3043 = vmatprep.subr.mxu1 %v1319_v7  ;;  %3078 = vmatprep.subr.mxu0 %v1351_v9  ;;  %v1342_v50 = vld [vmem:[%s5577_s4 + $0x580] sm:$0xff]  ;;  %v1553_v54 = vcombine.high %v1551_v46, %v1551_v46  ;;  %v1389_v55 = vld [vmem:[%s5577_s4 + $0x6f8] sm:$0xff]  ;;  %v1388_v59 = vld [vmem:[%s5577_s4 + $0x6f0] sm:$0xff] }
 0x104   :  { %3044 = vmatpush3.msra.mxu1 %v1303_v10  ;;  %3079 = vmatpush3.msra.mxu0 %v1335_v11  ;;  %v1294_v52 = vld [vmem:[%s5577_s4 + $0x400] sm:$0xff]  ;;  %v1421_v56 = vld [vmem:[%s5577_s4 + $0x7f8] sm:$0xff]  ;;  %v1420_v60 = vld [vmem:[%s5577_s4 + $0x7f0] sm:$0xff] }
 0x105   :  { %3045 = vmatprep.subr.mxu1 %v1318_v12  ;;  %3080 = vmatprep.subr.mxu0 %v1350_v13  ;;  %v1326_v53 = vld [vmem:[%s5577_s4 + $0x500] sm:$0xff]  ;;  %v1373_v57 = vld [vmem:[%s5577_s4 + $0x678] sm:$0xff]  ;;  %v1372_v61 = vld [vmem:[%s5577_s4 + $0x670] sm:$0xff] }
 0x106   :  { %3046 = vmatpush3.msra.mxu1 %v1302_v14  ;;  %3081 = vmatpush3.msra.mxu0 %v1334_v15  ;;  %v1405_v58 = vld [vmem:[%s5577_s4 + $0x778] sm:$0xff]  ;;  %v1404_v62 = vld [vmem:[%s5577_s4 + $0x770] sm:$0xff]  ;;  %v1387_v63 = vld [vmem:[%s5577_s4 + $0x6e8] sm:$0xff] }
 0x107   :  { %3047 = vmatprep.subr.mxu1 %v1317_v16  ;;  %3082 = vmatprep.subr.mxu0 %v1349_v17  ;;  %v1419_v0 = vld [vmem:[%s5577_s4 + $0x7e8] sm:$0xff]  ;;  %v1386_v3 = vld [vmem:[%s5577_s4 + $0x6e0] sm:$0xff]  ;;  %v1385_v7 = vld [vmem:[%s5577_s4 + $0x6d8] sm:$0xff] }
 0x108   :  { %3048 = vmatpush3.msra.mxu1 %v1301_v18  ;;  %3083 = vmatpush3.msra.mxu0 %v1333_v19  ;;  %v1371_v1 = vld [vmem:[%s5577_s4 + $0x668] sm:$0xff]  ;;  %v1418_v4 = vld [vmem:[%s5577_s4 + $0x7e0] sm:$0xff]  ;;  %v1417_v9 = vld [vmem:[%s5577_s4 + $0x7d8] sm:$0xff] }
 0x109   :  { %3049 = vmatprep.subr.mxu1 %v1316_v20  ;;  %3084 = vmatprep.subr.mxu0 %v1348_v21  ;;  %v1403_v2 = vld [vmem:[%s5577_s4 + $0x768] sm:$0xff]  ;;  %v1370_v5 = vld [vmem:[%s5577_s4 + $0x660] sm:$0xff]  ;;  %v1369_v10 = vld [vmem:[%s5577_s4 + $0x658] sm:$0xff] }
 0x10a   :  { %3050 = vmatpush3.msra.mxu1 %v1300_v22  ;;  %3085 = vmatpush3.msra.mxu0 %v1332_v24  ;;  %v1402_v6 = vld [vmem:[%s5577_s4 + $0x760] sm:$0xff]  ;;  %v1401_v11 = vld [vmem:[%s5577_s4 + $0x758] sm:$0xff]  ;;  %v1384_v12 = vld [vmem:[%s5577_s4 + $0x6d0] sm:$0xff] }
 0x10b   :  { %3051 = vmatprep.subr.mxu1 %v1315_v25  ;;  %3086 = vmatprep.subr.mxu0 %v1347_v26  ;;  %v1416_v13 = vld [vmem:[%s5577_s4 + $0x7d0] sm:$0xff]  ;;  %v1383_v16 = vld [vmem:[%s5577_s4 + $0x6c8] sm:$0xff]  ;;  %v1382_v20 = vld [vmem:[%s5577_s4 + $0x6c0] sm:$0xff] }
 0x10c   :  { %3052 = vmatpush3.msra.mxu1 %v1299_v27  ;;  %3087 = vmatpush3.msra.mxu0 %v1331_v28  ;;  %v1368_v14 = vld [vmem:[%s5577_s4 + $0x650] sm:$0xff]  ;;  %v1415_v17 = vld [vmem:[%s5577_s4 + $0x7c8] sm:$0xff]  ;;  %v1414_v21 = vld [vmem:[%s5577_s4 + $0x7c0] sm:$0xff] }
 0x10d   :  { %3053 = vmatprep.subr.mxu1 %v1314_v30  ;;  %3088 = vmatprep.subr.mxu0 %v1346_v31  ;;  %v1400_v15 = vld [vmem:[%s5577_s4 + $0x750] sm:$0xff]  ;;  %v1367_v18 = vld [vmem:[%s5577_s4 + $0x648] sm:$0xff]  ;;  %v1366_v22 = vld [vmem:[%s5577_s4 + $0x640] sm:$0xff] }
 0x10e   :  { %3054 = vmatpush3.msra.mxu1 %v1298_v32  ;;  %3089 = vmatpush3.msra.mxu0 %v1330_v33  ;;  %v1399_v19 = vld [vmem:[%s5577_s4 + $0x748] sm:$0xff]  ;;  %v1398_v24 = vld [vmem:[%s5577_s4 + $0x740] sm:$0xff]  ;;  %v1381_v25 = vld [vmem:[%s5577_s4 + $0x6b8] sm:$0xff] }
 0x10f   :  { %3055 = vmatprep.subr.mxu1 %v1313_v34  ;;  %3090 = vmatprep.subr.mxu0 %v1345_v35  ;;  %v1413_v26 = vld [vmem:[%s5577_s4 + $0x7b8] sm:$0xff]  ;;  %v1380_v29 = vld [vmem:[%s5577_s4 + $0x6b0] sm:$0xff]  ;;  %v1379_v33 = vld [vmem:[%s5577_s4 + $0x6a8] sm:$0xff] }
 0x110   :  { %3056 = vmatpush3.msra.mxu1 %v1297_v37  ;;  %3091 = vmatpush3.msra.mxu0 %v1329_v38  ;;  %v1365_v27 = vld [vmem:[%s5577_s4 + $0x638] sm:$0xff]  ;;  %v1412_v30 = vld [vmem:[%s5577_s4 + $0x7b0] sm:$0xff]  ;;  %v1411_v34 = vld [vmem:[%s5577_s4 + $0x7a8] sm:$0xff] }
 0x111   :  { %3057 = vmatprep.subr.mxu1 %v1312_v39  ;;  %3092 = vmatprep.subr.mxu0 %v1344_v40  ;;  %v1397_v28 = vld [vmem:[%s5577_s4 + $0x738] sm:$0xff]  ;;  %v1364_v31 = vld [vmem:[%s5577_s4 + $0x630] sm:$0xff]  ;;  %v1363_v35 = vld [vmem:[%s5577_s4 + $0x628] sm:$0xff] }
 0x112   :  { %3058 = vmatpush3.msra.mxu1 %v1296_v42  ;;  %3093 = vmatpush3.msra.mxu0 %v1328_v43  ;;  %v1396_v32 = vld [vmem:[%s5577_s4 + $0x730] sm:$0xff]  ;;  %v1395_v36 = vld [vmem:[%s5577_s4 + $0x728] sm:$0xff]  ;;  %v1163_v37 = vld [vmem:[%s5574_s1 + $0x18] sm:$0xff] }
 0x113   :  { %3059 = vmatprep.subr.mxu1 %v1311_v44  ;;  %3094 = vmatprep.subr.mxu0 %v1343_v45  ;;  %v1378_v38 = vld [vmem:[%s5577_s4 + $0x6a0] sm:$0xff]  ;;  %v1377_v42 = vld [vmem:[%s5577_s4 + $0x698] sm:$0xff]  ;;  %v1554_v44 = vcombine.high %v1163_v37, %v1163_v37 }
 0x114   :  { %3060 = vmatpush3.msra.mxu1 %v1295_v47  ;;  %3095 = vmatpush3.msra.mxu0 %v1327_v48  ;;  %v1410_v39 = vld [vmem:[%s5577_s4 + $0x7a0] sm:$0xff]  ;;  %v1409_v43 = vld [vmem:[%s5577_s4 + $0x798] sm:$0xff]  ;;  %v1376_v47 = vld [vmem:[%s5577_s4 + $0x690] sm:$0xff] }
 0x115   :  { %3061 = vmatprep.subr.mxu1 %v1310_v49  ;;  %3096 = vmatprep.subr.mxu0 %v1342_v50  ;;  %v1362_v40 = vld [vmem:[%s5577_s4 + $0x620] sm:$0xff]  ;;  %v1361_v45 = vld [vmem:[%s5577_s4 + $0x618] sm:$0xff]  ;;  %v1408_v48 = vld [vmem:[%s5577_s4 + $0x790] sm:$0xff]  ;;  %v1561_v49 = vrot.slane %v1163_v37, %v4600_v8 }
 0x116   :  { %3062 = vmatpush3.msra.mxu1 %v1294_v52  ;;  %1961 = vmatprep.mubr.f32.mxu1 %v1552_v51  ;;  %v1360_v50 = vld [vmem:[%s5577_s4 + $0x610] sm:$0xff]  ;;  %v1375_v52 = vld [vmem:[%s5577_s4 + $0x688] sm:$0xff] }
 0x117   :  { %3097 = vmatpush3.msra.mxu0 %v1326_v53  ;;  %1962 = vmatmul.mubr.f32.vlgmr.msra.gmra.mxu1 %v1544_v41  ;;  %v1394_v41 = vld [vmem:[%s5577_s4 + $0x720] sm:$0xff]  ;;  %v1392_v51 = vld [vmem:[%s5577_s4 + $0x710] sm:$0xff]  ;;  %v1407_v53 = vld [vmem:[%s5577_s4 + $0x788] sm:$0xff] }
 0x118   :  { %2031 = vmatprep.mubr.f32.mxu0 %v1553_v54  ;;  %3101 = vmatprep.subr.mxu1 %v1389_v55  ;;  %v1568_v54 = vrot.slane %v1554_v44, %v4600_v8  ;;  %v1359_v55 = vld [vmem:[%s5577_s4 + $0x608] sm:$0xff]  ;;  %v1444_v37 = vld [vmem:[%s5577_s4 + $0x8b0] sm:$0xff] }
 0x119   :  { %3136 = vmatprep.subr.mxu0 %v1421_v56  ;;  %2032 = vmatmul.mubr.f32.vlgmr.msra.gmra.mxu0 %v1551_v46  ;;  %v1393_v46 = vld [vmem:[%s5577_s4 + $0x718] sm:$0xff]  ;;  %v1391_v56 = vld [vmem:[%s5577_s4 + $0x708] sm:$0xff] }
 0x11a   :  { %3102 = vmatpush3.msra.mxu1 %v1373_v57  ;;  %3137 = vmatpush3.msra.mxu0 %v1405_v58  ;;  %v1374_v57 = vld [vmem:[%s5577_s4 + $0x680] sm:$0xff]  ;;  %v1427_v44 = vld [vmem:[%s5577_s4 + $0x828] sm:$0xff] }
 0x11b   :  { %3103 = vmatprep.subr.mxu1 %v1388_v59  ;;  %3138 = vmatprep.subr.mxu0 %v1420_v60  ;;  %v1406_v58 = vld [vmem:[%s5577_s4 + $0x780] sm:$0xff]  ;;  %v1569_v59 = vcombine.high %v1561_v49, %v1561_v49 }
 0x11c   :  { %3104 = vmatpush3.msra.mxu1 %v1372_v61  ;;  %3139 = vmatpush3.msra.mxu0 %v1404_v62  ;;  %v1358_v60 = vld [vmem:[%s5577_s4 + $0x600] sm:$0xff]  ;;  %v1570_v62 = vcombine.high %v1568_v54, %v1568_v54 }
 0x11d   :  { %3105 = vmatprep.subr.mxu1 %v1387_v63  ;;  %3140 = vmatprep.subr.mxu0 %v1419_v0  ;;  %v1390_v61 = vld [vmem:[%s5577_s4 + $0x700] sm:$0xff]  ;;  %v1453_v63 = vld [vmem:[%s5577_s4 + $0x8f8] sm:$0xff] }
 0x11e   :  { %3106 = vmatpush3.msra.mxu1 %v1371_v1  ;;  %3141 = vmatpush3.msra.mxu0 %v1403_v2  ;;  %v1485_v0 = vld [vmem:[%s5577_s4 + $0x9f8] sm:$0xff] }
 0x11f   :  { %3107 = vmatprep.subr.mxu1 %v1386_v3  ;;  %3142 = vmatprep.subr.mxu0 %v1418_v4  ;;  %v1437_v1 = vld [vmem:[%s5577_s4 + $0x878] sm:$0xff]  ;;  %v1452_v3 = vld [vmem:[%s5577_s4 + $0x8f0] sm:$0xff] }
 0x120   :  { %3108 = vmatpush3.msra.mxu1 %v1370_v5  ;;  %3143 = vmatpush3.msra.mxu0 %v1402_v6  ;;  %v1469_v2 = vld [vmem:[%s5577_s4 + $0x978] sm:$0xff]  ;;  %v1484_v4 = vld [vmem:[%s5577_s4 + $0x9f0] sm:$0xff] }
 0x121   :  { %3109 = vmatprep.subr.mxu1 %v1385_v7  ;;  %3144 = vmatprep.subr.mxu0 %v1417_v9  ;;  %v1436_v5 = vld [vmem:[%s5577_s4 + $0x870] sm:$0xff]  ;;  %v1451_v7 = vld [vmem:[%s5577_s4 + $0x8e8] sm:$0xff] }
 0x122   :  { %3110 = vmatpush3.msra.mxu1 %v1369_v10  ;;  %3145 = vmatpush3.msra.mxu0 %v1401_v11  ;;  %v1468_v6 = vld [vmem:[%s5577_s4 + $0x970] sm:$0xff]  ;;  %v1483_v9 = vld [vmem:[%s5577_s4 + $0x9e8] sm:$0xff] }
 0x123   :  { %3111 = vmatprep.subr.mxu1 %v1384_v12  ;;  %3146 = vmatprep.subr.mxu0 %v1416_v13  ;;  %v1435_v10 = vld [vmem:[%s5577_s4 + $0x868] sm:$0xff]  ;;  %v1450_v12 = vld [vmem:[%s5577_s4 + $0x8e0] sm:$0xff] }
 0x124   :  { %3112 = vmatpush3.msra.mxu1 %v1368_v14  ;;  %3147 = vmatpush3.msra.mxu0 %v1400_v15  ;;  %v1467_v11 = vld [vmem:[%s5577_s4 + $0x968] sm:$0xff]  ;;  %v1482_v13 = vld [vmem:[%s5577_s4 + $0x9e0] sm:$0xff] }
 0x125   :  { %3113 = vmatprep.subr.mxu1 %v1383_v16  ;;  %3148 = vmatprep.subr.mxu0 %v1415_v17  ;;  %v1434_v14 = vld [vmem:[%s5577_s4 + $0x860] sm:$0xff]  ;;  %v1449_v16 = vld [vmem:[%s5577_s4 + $0x8d8] sm:$0xff] }
 0x126   :  { %3114 = vmatpush3.msra.mxu1 %v1367_v18  ;;  %3149 = vmatpush3.msra.mxu0 %v1399_v19  ;;  %v1466_v15 = vld [vmem:[%s5577_s4 + $0x960] sm:$0xff]  ;;  %v1481_v17 = vld [vmem:[%s5577_s4 + $0x9d8] sm:$0xff] }
 0x127   :  { %3115 = vmatprep.subr.mxu1 %v1382_v20  ;;  %3150 = vmatprep.subr.mxu0 %v1414_v21  ;;  %v1433_v18 = vld [vmem:[%s5577_s4 + $0x858] sm:$0xff]  ;;  %v1448_v20 = vld [vmem:[%s5577_s4 + $0x8d0] sm:$0xff] }
 0x128   :  { %3116 = vmatpush3.msra.mxu1 %v1366_v22  ;;  %3151 = vmatpush3.msra.mxu0 %v1398_v24  ;;  %v1465_v19 = vld [vmem:[%s5577_s4 + $0x958] sm:$0xff]  ;;  %v1480_v21 = vld [vmem:[%s5577_s4 + $0x9d0] sm:$0xff] }
 0x129   :  { %3117 = vmatprep.subr.mxu1 %v1381_v25  ;;  %3152 = vmatprep.subr.mxu0 %v1413_v26  ;;  %v1432_v22 = vld [vmem:[%s5577_s4 + $0x850] sm:$0xff]  ;;  %v1447_v25 = vld [vmem:[%s5577_s4 + $0x8c8] sm:$0xff] }
 0x12a   :  { %3118 = vmatpush3.msra.mxu1 %v1365_v27  ;;  %3153 = vmatpush3.msra.mxu0 %v1397_v28  ;;  %v1464_v24 = vld [vmem:[%s5577_s4 + $0x950] sm:$0xff]  ;;  %v1479_v26 = vld [vmem:[%s5577_s4 + $0x9c8] sm:$0xff] }
 0x12b   :  { %3119 = vmatprep.subr.mxu1 %v1380_v29  ;;  %3154 = vmatprep.subr.mxu0 %v1412_v30  ;;  %v1431_v27 = vld [vmem:[%s5577_s4 + $0x848] sm:$0xff]  ;;  %v1446_v29 = vld [vmem:[%s5577_s4 + $0x8c0] sm:$0xff] }
 0x12c   :  { %3120 = vmatpush3.msra.mxu1 %v1364_v31  ;;  %3155 = vmatpush3.msra.mxu0 %v1396_v32  ;;  %v1463_v28 = vld [vmem:[%s5577_s4 + $0x948] sm:$0xff]  ;;  %v1478_v30 = vld [vmem:[%s5577_s4 + $0x9c0] sm:$0xff] }
 0x12d   :  { %3121 = vmatprep.subr.mxu1 %v1379_v33  ;;  %3156 = vmatprep.subr.mxu0 %v1411_v34  ;;  %v1430_v31 = vld [vmem:[%s5577_s4 + $0x840] sm:$0xff]  ;;  %v1445_v33 = vld [vmem:[%s5577_s4 + $0x8b8] sm:$0xff] }
 0x12e   :  { %3122 = vmatpush3.msra.mxu1 %v1363_v35  ;;  %3157 = vmatpush3.msra.mxu0 %v1395_v36  ;;  %v1462_v32 = vld [vmem:[%s5577_s4 + $0x940] sm:$0xff]  ;;  %v1477_v34 = vld [vmem:[%s5577_s4 + $0x9b8] sm:$0xff] }
 0x12f   :  { %3123 = vmatprep.subr.mxu1 %v1378_v38  ;;  %3158 = vmatprep.subr.mxu0 %v1410_v39  ;;  %v1429_v35 = vld [vmem:[%s5577_s4 + $0x838] sm:$0xff]  ;;  %v1476_v38 = vld [vmem:[%s5577_s4 + $0x9b0] sm:$0xff] }
 0x130   :  { %3124 = vmatpush3.msra.mxu1 %v1362_v40  ;;  %3159 = vmatpush3.msra.mxu0 %v1394_v41  ;;  %v1461_v36 = vld [vmem:[%s5577_s4 + $0x938] sm:$0xff]  ;;  %v1428_v39 = vld [vmem:[%s5577_s4 + $0x830] sm:$0xff]  ;;  %v1443_v41 = vld [vmem:[%s5577_s4 + $0x8a8] sm:$0xff] }
 0x131   :  { %3125 = vmatprep.subr.mxu1 %v1377_v42  ;;  %3160 = vmatprep.subr.mxu0 %v1409_v43  ;;  %v1460_v40 = vld [vmem:[%s5577_s4 + $0x930] sm:$0xff]  ;;  %v1475_v42 = vld [vmem:[%s5577_s4 + $0x9a8] sm:$0xff]  ;;  %v1164_v43 = vld [vmem:[%s5574_s1 + $0x20] sm:$0xff] }
 0x132   :  { %3126 = vmatpush3.msra.mxu1 %v1361_v45  ;;  %3161 = vmatpush3.msra.mxu0 %v1393_v46  ;;  %v1459_v45 = vld [vmem:[%s5577_s4 + $0x928] sm:$0xff]  ;;  %v1442_v46 = vld [vmem:[%s5577_s4 + $0x8a0] sm:$0xff] }
 0x133   :  { %3127 = vmatprep.subr.mxu1 %v1376_v47  ;;  %3162 = vmatprep.subr.mxu0 %v1408_v48  ;;  %v1474_v47 = vld [vmem:[%s5577_s4 + $0x9a0] sm:$0xff]  ;;  %v2568_v48 = vpop.f32.mrf.mxu0 }
 0x134   :  { %3128 = vmatpush3.msra.mxu1 %v1360_v50  ;;  %3163 = vmatpush3.msra.mxu0 %v1392_v51  ;;  %v1458_v50 = vld [vmem:[%s5577_s4 + $0x920] sm:$0xff]  ;;  %v1571_v51 = vcombine.high %v1164_v43, %v1164_v43 }
 0x135   :  { %3129 = vmatprep.subr.mxu1 %v1375_v52  ;;  %3164 = vmatprep.subr.mxu0 %v1407_v53  ;;  %v1441_v52 = vld [vmem:[%s5577_s4 + $0x898] sm:$0xff] }
 0x136   :  { %3130 = vmatpush3.msra.mxu1 %v1359_v55  ;;  %3165 = vmatpush3.msra.mxu0 %v1391_v56  ;;  %v1473_v53 = vld [vmem:[%s5577_s4 + $0x998] sm:$0xff]  ;;  %v1440_v56 = vld [vmem:[%s5577_s4 + $0x890] sm:$0xff] }
 0x137   :  { %3131 = vmatprep.subr.mxu1 %v1374_v57  ;;  %3166 = vmatprep.subr.mxu0 %v1406_v58  ;;  %v1457_v55 = vld [vmem:[%s5577_s4 + $0x918] sm:$0xff]  ;;  %v1472_v57 = vld [vmem:[%s5577_s4 + $0x990] sm:$0xff]  ;;  %v1578_v58 = vrot.slane %v1164_v43, %v4600_v8 }
 0x138   :  { %3132 = vmatpush3.msra.mxu1 %v1358_v60  ;;  %2101 = vmatprep.mubr.f32.mxu1 %v1569_v59  ;;  %v2569_v59 = vpop.f32.mrf.mxu0  ;;  %v1424_v60 = vld [vmem:[%s5577_s4 + $0x810] sm:$0xff] }
 0x139   :  { %3167 = vmatpush3.msra.mxu0 %v1390_v61  ;;  %2102 = vmatmul.mubr.f32.vlgmr.msra.gmra.mxu1 %v1561_v49  ;;  %v1426_v49 = vld [vmem:[%s5577_s4 + $0x820] sm:$0xff]  ;;  %v1456_v61 = vld [vmem:[%s5577_s4 + $0x910] sm:$0xff] }
 0x13a   :  { %2171 = vmatprep.mubr.f32.mxu0 %v1570_v62  ;;  %3171 = vmatprep.subr.mxu1 %v1453_v63  ;;  %v1585_v62 = vrot.slane %v1571_v51, %v4600_v8  ;;  %v1439_v63 = vld [vmem:[%s5577_s4 + $0x888] sm:$0xff] }
 0x13b   :  { %3206 = vmatprep.subr.mxu0 %v1485_v0  ;;  %2172 = vmatmul.mubr.f32.vlgmr.msra.gmra.mxu0 %v1568_v54  ;;  %v1425_v54 = vld [vmem:[%s5577_s4 + $0x818] sm:$0xff]  ;;  %v1471_v0 = vld [vmem:[%s5577_s4 + $0x988] sm:$0xff] }
 0x13c   :  { %3172 = vmatpush3.msra.mxu1 %v1437_v1  ;;  %3207 = vmatpush3.msra.mxu0 %v1469_v2  ;;  %v2603_v1 = vpop.f32.mrf.mxu1  ;;  %v2638_v2 = vpop.f32.mrf.mxu0  ;;  %v1455_v8 = vld [vmem:[%s5577_s4 + $0x908] sm:$0xff] }
 0x13d   :  { %3173 = vmatprep.subr.mxu1 %v1452_v3  ;;  %3208 = vmatprep.subr.mxu0 %v1484_v4  ;;  %v1423_v3 = vld [vmem:[%s5577_s4 + $0x808] sm:$0xff]  ;;  %v2570_v4 = vadd.f32 %v2569_v59, %v2568_v48 }
 0x13e   :  { %3174 = vmatpush3.msra.mxu1 %v1436_v5  ;;  %3209 = vmatpush3.msra.mxu0 %v1468_v6  ;;  %v1438_v5 = vld [vmem:[%s5577_s4 + $0x880] sm:$0xff] }
 0x13f   :  { %3175 = vmatprep.subr.mxu1 %v1451_v7  ;;  %3210 = vmatprep.subr.mxu0 %v1483_v9  ;;  %v1470_v6 = vld [vmem:[%s5577_s4 + $0x980] sm:$0xff]  ;;  %v1586_v7 = vcombine.high %v1578_v58, %v1578_v58 }
 0x140   :  { %3176 = vmatpush3.msra.mxu1 %v1435_v10  ;;  %3211 = vmatpush3.msra.mxu0 %v1467_v11  ;;  %v2530_v9 = vld [vmem:[%s5576_s3] ss:$0 sm:$0xff]  ;;  %v1587_v11 = vcombine.high %v1585_v62, %v1585_v62 }
 0x141   :  { %3177 = vmatprep.subr.mxu1 %v1450_v12  ;;  %3212 = vmatprep.subr.mxu0 %v1482_v13  ;;  %v1422_v10 = vld [vmem:[%s5577_s4 + $0x800] sm:$0xff]  ;;  %v2604_v13 = vpop.f32.mrf.mxu1 }
 0x142   :  { %3178 = vmatpush3.msra.mxu1 %v1434_v14  ;;  %3213 = vmatpush3.msra.mxu0 %v1466_v15  ;;  %v1454_v12 = vld [vmem:[%s5577_s4 + $0x900] sm:$0xff]  ;;  %v2639_v14 = vpop.f32.mrf.mxu0  ;;  %v456_v15 = vadd.f32 %v2570_v4, %v2530_v9  ;;  %v2413_v4 = vld [vmem:[%s5579_s6 + $0x30] sm:$0xff] }
 0x143   :  { %3179 = vmatprep.subr.mxu1 %v1449_v16  ;;  %3214 = vmatprep.subr.mxu0 %v1481_v17  ;;  %v2673_v16 = vpop.f32.mrf.mxu1  ;;  %v2409_v9 = vld [vmem:[%s5579_s6 + $0x10] sm:$0xff] }
 0x144   :  { %3180 = vmatpush3.msra.mxu1 %v1433_v18  ;;  %3215 = vmatpush3.msra.mxu0 %v1465_v19  ;;  %v2708_v17 = vpop.f32.mrf.mxu0  ;;  %v1489_v18 = vld [vmem:[%s5577_s4 + $0xa18] sm:$0xff]  ;;  %v2605_v19 = vadd.f32 %v2604_v13, %v2603_v1  ;;  %v2417_v1 = vld [vmem:[%s5579_s6 + $0x50] sm:$0xff] }
 0x145   :  { %3181 = vmatprep.subr.mxu1 %v1448_v20  ;;  %3216 = vmatprep.subr.mxu0 %v1480_v21  ;;  %v2640_v20 = vadd.f32 %v2639_v14, %v2638_v2  ;;  %v1488_v21 = vld [vmem:[%s5577_s4 + $0xa10] sm:$0xff]  ;;  %v2416_v2 = vld [vmem:[%s5579_s6 + $0x48] sm:$0xff] }
 0x146   :  { %3182 = vmatpush3.msra.mxu1 %v1432_v22  ;;  %3217 = vmatpush3.msra.mxu0 %v1464_v24  ;;  %v526_v22 = vadd.f32 %v2605_v19, %v456_v15  ;;  %v2674_v24 = vpop.f32.mrf.mxu1 }
 0x147   :  { %3183 = vmatprep.subr.mxu1 %v1447_v25  ;;  %3218 = vmatprep.subr.mxu0 %v1479_v26  ;;  %v2709_v25 = vpop.f32.mrf.mxu0  ;;  %v1487_v26 = vld [vmem:[%s5577_s4 + $0xa08] sm:$0xff] }
 0x148   :  { %3184 = vmatpush3.msra.mxu1 %v1431_v27  ;;  %3219 = vmatpush3.msra.mxu0 %v1463_v28  ;;  %v596_v27 = vadd.f32 %v2640_v20, %v526_v22  ;;  %v2743_v28 = vpop.f32.mrf.mxu1 }
 0x149   :  { %3185 = vmatprep.subr.mxu1 %v1446_v29  ;;  %3220 = vmatprep.subr.mxu0 %v1478_v30  ;;  %v1486_v30 = vld [vmem:[%s5577_s4 + $0xa00] sm:$0xff]  ;;  %s3381_s4 = smov 64  }
 0x14a   :  { %3186 = vmatpush3.msra.mxu1 %v1430_v31  ;;  %3221 = vmatpush3.msra.mxu0 %v1462_v32  ;;  %v2778_v29 = vpop.f32.mrf.mxu0  ;;  %v2675_v31 = vadd.f32 %v2674_v24, %v2673_v16  ;;  %v2710_v32 = vadd.f32 %v2709_v25, %v2708_v17  ;;  %v2532_v16 = vld [vmem:[%s5578_s5] ss:$0 sm:$0xff] }
 0x14b   :  { %3187 = vmatprep.subr.mxu1 %v1445_v33  ;;  %3222 = vmatprep.subr.mxu0 %v1477_v34  ;;  %v2533_v33 = vld.sshfl [vmem:[%s5574_s1 + $0x28] sm:$0x3 pattern:$0x76325410]  ;;  %s3380_s1 = smov 32  }
 0x14c   :  { %3188 = vmatpush3.msra.mxu1 %v1429_v35  ;;  %3223 = vmatpush3.msra.mxu0 %v1461_v36  ;;  %v666_v34 = vadd.f32 %v2675_v31, %v596_v27  ;;  %v2744_v35 = vpop.f32.mrf.mxu1  ;;  %v2779_v36 = vpop.f32.mrf.mxu0 }
 0x14d   :  { %3189 = vmatprep.subr.mxu1 %v1444_v37  ;;  %3224 = vmatprep.subr.mxu0 %v1476_v38 }
 0x14e   :  { %3190 = vmatpush3.msra.mxu1 %v1428_v39  ;;  %3225 = vmatpush3.msra.mxu0 %v1460_v40  ;;  %v736_v37 = vadd.f32 %v2710_v32, %v666_v34  ;;  %v2813_v38 = vpop.f32.mrf.mxu1  ;;  %v2745_v39 = vadd.f32 %v2744_v35, %v2743_v28  ;;  %v2780_v40 = vadd.f32 %v2779_v36, %v2778_v29 }
 0x14f   :  { %3191 = vmatprep.subr.mxu1 %v1443_v41  ;;  %3226 = vmatprep.subr.mxu0 %v1475_v42 }
 0x150   :  { %3192 = vmatpush3.msra.mxu1 %v1427_v44  ;;  %3227 = vmatpush3.msra.mxu0 %v1459_v45  ;;  %v806_v41 = vadd.f32 %v2745_v39, %v736_v37  ;;  %v2814_v42 = vpop.f32.mrf.mxu1 }
 0x151   :  { %3193 = vmatprep.subr.mxu1 %v1442_v46  ;;  %3228 = vmatprep.subr.mxu0 %v1474_v47  ;;  %v2815_v46 = vadd.f32 %v2814_v42, %v2813_v38 }
 0x152   :  { %3194 = vmatpush3.msra.mxu1 %v1426_v49  ;;  %3229 = vmatpush3.msra.mxu0 %v1458_v50  ;;  %v876_v43 = vadd.f32 %v2780_v40, %v806_v41 }
 0x153   :  { %3195 = vmatprep.subr.mxu1 %v1441_v52  ;;  %3230 = vmatprep.subr.mxu0 %v1473_v53 }
 0x154   :  { %3196 = vmatpush3.msra.mxu1 %v1425_v54  ;;  %3231 = vmatpush3.msra.mxu0 %v1457_v55  ;;  %v946_v49 = vadd.f32 %v2815_v46, %v876_v43 }
 0x155   :  { %3197 = vmatprep.subr.mxu1 %v1440_v56  ;;  %3232 = vmatprep.subr.mxu0 %v1472_v57 }
 0x156   :  { %3198 = vmatpush3.msra.mxu1 %v1424_v60  ;;  %3233 = vmatpush3.msra.mxu0 %v1456_v61  ;;  %v2422_v60 = vld [vmem:[%s5579_s6 + $0x78] sm:$0xff]  ;;  %v2421_v61 = vld [vmem:[%s5579_s6 + $0x70] sm:$0xff] }
 0x157   :  { %3199 = vmatprep.subr.mxu1 %v1439_v63  ;;  %3234 = vmatprep.subr.mxu0 %v1471_v0  ;;  %v2419_v63 = vld [vmem:[%s5579_s6 + $0x60] sm:$0xff]  ;;  %v2418_v0 = vld [vmem:[%s5579_s6 + $0x58] sm:$0xff] }
 0x158   :  { %3200 = vmatpush3.msra.mxu1 %v1423_v3  ;;  %3235 = vmatpush3.msra.mxu0 %v1455_v8  ;;  %v2415_v3 = vld [vmem:[%s5579_s6 + $0x40] sm:$0xff]  ;;  %v2414_v8 = vld [vmem:[%s5579_s6 + $0x38] sm:$0xff] }
 0x159   :  { %3201 = vmatprep.subr.mxu1 %v1438_v5  ;;  %3236 = vmatprep.subr.mxu0 %v1470_v6  ;;  %v2412_v5 = vld [vmem:[%s5579_s6 + $0x28] sm:$0xff]  ;;  %v2411_v6 = vld [vmem:[%s5579_s6 + $0x20] sm:$0xff] }
 0x15a   :  { %3202 = vmatpush3.msra.mxu1 %v1422_v10  ;;  %2241 = vmatprep.mubr.f32.mxu1 %v1586_v7  ;;  %v2410_v7 = vld [vmem:[%s5579_s6 + $0x18] sm:$0xff]  ;;  %v2408_v10 = vld [vmem:[%s5579_s6 + $0x8] sm:$0xff] }
 0x15b   :  { %3237 = vmatpush3.msra.mxu0 %v1454_v12  ;;  %2311 = vmatprep.mubr.f32.mxu0 %v1587_v11 }
 0x15c   :  { %2242 = vmatmul.mubr.f32.vlgmr.msra.gmra.mxu1 %v1578_v58  ;;  %2312 = vmatmul.mubr.f32.vlgmr.msra.gmra.mxu0 %v1585_v62  ;;  %v2420_v62 = vld [vmem:[%s5579_s6 + $0x68] sm:$0xff] }
 0x15d   :  { %3274 = vmatprep.subr.mxu1 %v3377_v23  ;;  %3282 = vmatprep.mubr.msk.f32.mxu1 %vm3378_vm0, %v3377_v23 }
 0x15e   :  { %3275 = vmatpush3.msra.mxu1 %v1489_v18  ;;  %3285 = vmatprep.subr.mxu0 %v3377_v23 }
 0x15f   :  { %3276 = vmatprep.subr.mxu1 %v3377_v23  ;;  %3317 = vmatprep.mubr.msk.f32.mxu0 %vm3378_vm0, %v3377_v23 }
 0x160   :  { %3277 = vmatpush3.msra.mxu1 %v1488_v21  ;;  %3286 = vmatpush3.msra.mxu0 %v2422_v60 }
 0x161   :  { %3278 = vmatprep.subr.mxu1 %v3377_v23  ;;  %3287 = vmatprep.subr.mxu0 %v3377_v23 }
 0x162   :  { %3279 = vmatpush3.msra.mxu1 %v1487_v26  ;;  %3288 = vmatpush3.msra.mxu0 %v2421_v61 }
 0x163   :  { %3280 = vmatprep.subr.mxu1 %v3377_v23  ;;  %3289 = vmatprep.subr.mxu0 %v3377_v23 }
 0x164   :  { %3281 = vmatpush3.msra.mxu1 %v1486_v30  ;;  %3290 = vmatpush3.msra.mxu0 %v2420_v62 }
 0x165   :  { %3283 = vmatmul.mubr.msk.f32.vlgmr.msra.gmra.mxu1 %vm385_vm1, %v2533_v33  ;;  %3291 = vmatprep.subr.mxu0 %v3377_v23 }
 0x166   :  { %3292 = vmatpush3.msra.mxu0 %v2419_v63 }
 0x167   :  { %3293 = vmatprep.subr.mxu0 %v3377_v23 }
 0x168   :  { %3294 = vmatpush3.msra.mxu0 %v2418_v0 }
 0x169   :  { %3295 = vmatprep.subr.mxu0 %v3377_v23 }
 0x16a   :  { %3296 = vmatpush3.msra.mxu0 %v2417_v1 }
 0x16b   :  { %3297 = vmatprep.subr.mxu0 %v3377_v23 }
 0x16c   :  { %v2848_v44 = vpop.f32.mrf.mxu0  ;;  %3298 = vmatpush3.msra.mxu0 %v2416_v2 }
 0x16d   :  { %v2883_v45 = vpop.f32.mrf.mxu1  ;;  %3299 = vmatprep.subr.mxu0 %v3377_v23 }
 0x16e   :  { %v2849_v47 = vpop.f32.mrf.mxu0  ;;  %3300 = vmatpush3.msra.mxu0 %v2415_v3 }
 0x16f   :  { %v2884_v48 = vpop.f32.mrf.mxu1  ;;  %v2850_v50 = vadd.f32 %v2849_v47, %v2848_v44  ;;  %3301 = vmatprep.subr.mxu0 %v3377_v23 }
 0x170   :  { %v2885_v52 = vadd.f32 %v2884_v48, %v2883_v45  ;;  %3302 = vmatpush3.msra.mxu0 %v2414_v8  ;;  %v2407_v45 = vld [vmem:[%s5579_s6] sm:$0xff]  ;;  %s3383_s6 = smov [#allocation4]  }
 0x171   :  { %v1016_v51 = vadd.f32 %v2850_v50, %v946_v49  ;;  %3303 = vmatprep.subr.mxu0 %v3377_v23  ;;  %s2518_s29 = sshll.u32 %s3383_s6, 4  ;;  %s2519_s29 = int_to_ptr.vmem [resolvable:$true] %s2518_s29 }
 0x172   :  { %3304 = vmatpush3.msra.mxu0 %v2413_v4  ;;  %s3333_s30 = scalar_lea.vmem %s2519_s29, 32  ;;  %p3338_p1 = scmp.lt.s32.totalorder %s2519_s29, %s2519_s29 }
 0x173   :  { %v1086_v53 = vadd.f32 %v2885_v52, %v1016_v51  ;;  %3305 = vmatprep.subr.mxu0 %v3377_v23  ;;  %p3334_p0 = scmp.ne.s32.totalorder %s2519_s29, %s3333_s30  ;;  %p3339_p2 = scmp.lt.s32.totalorder %s3333_s30, %s3333_s30 }
 0x174   :  { %3306 = vmatpush3.msra.mxu0 %v2412_v5 }
 0x175   :  { %v1155_v54 = vpop.f32.mrf.mxu1  ;;  %3307 = vmatprep.subr.mxu0 %v3377_v23  ;;  %p3340_p3 = por %p3339_p2, %p3338_p1 }
 0x176   :  { %v1156_v55 = vadd.f32 %v1155_v54, %v1086_v53  ;;  %3308 = vmatpush3.msra.mxu0 %v2411_v6 }
 0x177   :  { %v3273_v56 = vpop.f32.mrf.mxu1  ;;  %3309 = vmatprep.subr.mxu0 %v3377_v23  ;;  %p3341_p4 = pnand %p3340_p3, %p3334_p0 }
 0x178   :  { %v5492_v57 = vmax.f32 %v1156_v55, 0.0  ;;  %3310 = vmatpush3.msra.mxu0 %v2410_v7 }
 0x179   :  { %3311 = vmatprep.subr.mxu0 %v3377_v23 }
 0x17a   :  { %v2389_v58 = vrot.slane %v5492_v57, 2  ;;  %v2393_v59 = vrot.slane %v5492_v57, 4  ;;  %3312 = vmatpush3.msra.mxu0 %v2409_v9 }
 0x17b   :  { %3313 = vmatprep.subr.mxu0 %v3377_v23 }
 0x17c   :  { %2390 = vrot.lane.b32.xlu0 %v2389_v58, %s3380_s1  ;;  %3314 = vmatpush3.msra.mxu0 %v2408_v10 }
 0x17d   :  { %3315 = vmatprep.subr.mxu0 %v3377_v23 }
 0x17e   :  { %3316 = vmatpush3.msra.mxu0 %v2407_v45 }
 0x180   :  { %2394 = vrot.lane.b32.xlu0 %v2393_v59, %s3381_s4 }
 0x192   :  { %v2958_v12 = vpop.f32.mrf.mxu0 }
 0x194   :  { %v2959_v17 = vpop.f32.mrf.mxu0 }
 0x195   :  { %v2960_v21 = vadd.f32 %v2959_v17, %v2958_v12 }
 0x196   :  { %v2923_v11 = vpop.f32.mrf.mxu1 }
 0x198   :  { %v2924_v13 = vpop.f32.mrf.mxu1 }
 0x199   :  { %v2925_v15 = vadd.f32 %v2924_v13, %v2923_v11 }
 0x19b   :  { %v1684_v20 = vadd.f32 %v2925_v15, %v2532_v16 }
 0x19d   :  { %v1754_v26 = vadd.f32 %v2960_v21, %v1684_v20 }
 0x1b6   :  { %v2993_v14 = vpop.f32.mrf.mxu1 }
 0x1b7   :  { %v3028_v18 = vpop.f32.mrf.mxu0 }
 0x1b8   :  { %v2994_v19 = vpop.f32.mrf.mxu1 }
 0x1b9   :  { %v2995_v24 = vadd.f32 %v2994_v19, %v2993_v14  ;;  %v3029_v25 = vpop.f32.mrf.mxu0 }
 0x1ba   :  { %v3030_v29 = vadd.f32 %v3029_v25, %v3028_v18 }
 0x1bb   :  { %v1824_v28 = vadd.f32 %v2995_v24, %v1754_v26 }
 0x1bd   :  { %v1894_v33 = vadd.f32 %v3030_v29, %v1824_v28 }
 0x1d7   :  { %v3063_v22 = vpop.f32.mrf.mxu1 }
 0x1d9   :  { %v3098_v27 = vpop.f32.mrf.mxu0  ;;  %v3064_v23 = vpop.f32.mrf.mxu1 }
 0x1da   :  { %v3065_v31 = vadd.f32 %v3064_v23, %v3063_v22 }
 0x1db   :  { %v3099_v32 = vpop.f32.mrf.mxu0 }
 0x1dc   :  { %v1964_v36 = vadd.f32 %v3065_v31, %v1894_v33  ;;  %v3100_v37 = vadd.f32 %v3099_v32, %v3098_v27 }
 0x1de   :  { %v2034_v40 = vadd.f32 %v3100_v37, %v1964_v36 }
 0x1ee   :  { %v2391_v58 = vpop.permute.xlu0 %2390 }
 0x1ef   :  { %v2401_v60 = vsel %vm385_vm1, %v5492_v57, %v2391_v58 }
 0x1f2   :  { %v2395_v59 = vpop.permute.xlu0 %2394 }
 0x1f3   :  { %v2403_v61 = vsel %vm2402_vm2, %v2401_v60, %v2395_v59 }
 0x1f9   :  { %v3133_v30 = vpop.f32.mrf.mxu1 }
 0x1fb   :  { %v3168_v34 = vpop.f32.mrf.mxu0  ;;  %v3134_v35 = vpop.f32.mrf.mxu1 }
 0x1fc   :  { %v3135_v38 = vadd.f32 %v3134_v35, %v3133_v30 }
 0x1fd   :  { %v3169_v39 = vpop.f32.mrf.mxu0 }
 0x1fe   :  { %v2104_v41 = vadd.f32 %v3135_v38, %v2034_v40  ;;  %v3170_v42 = vadd.f32 %v3169_v39, %v3168_v34 }
 0x200   :  { %v2174_v48 = vadd.f32 %v3170_v42, %v2104_v41 }
 0x21c   :  { %v3203_v43 = vpop.f32.mrf.mxu1  ;;  %v3238_v44 = vpop.f32.mrf.mxu0 }
 0x21e   :  { %v3204_v46 = vpop.f32.mrf.mxu1  ;;  %v3239_v47 = vpop.f32.mrf.mxu0 }
 0x21f   :  { %v3205_v49 = vadd.f32 %v3204_v46, %v3203_v43  ;;  %v3240_v51 = vadd.f32 %v3239_v47, %v3238_v44 }
 0x221   :  { %v2244_v50 = vadd.f32 %v3205_v49, %v2174_v48 }
 0x223   :  { %v2314_v52 = vadd.f32 %v3240_v51, %v2244_v50 }
 0x225   :  { %v2383_v53 = vpop.f32.mrf.mxu1 }
 0x226   :  { %v2384_v54 = vadd.f32 %v2383_v53, %v2314_v52 }
 0x227   :  { %v3284_v55 = vpop.f32.mrf.mxu1 }
 0x228   :  { %v2387_v56 = vmax.f32 %v2384_v54, 0.0 }
 0x22a   :  { %2398 = vrot.lane.b32.xlu1 %v2387_v56, %s3382_s28 }
 0x29c   :  { %v2399_v62 = vpop.permute.xlu1 %2398 }
 0x29d   :  { %v2405_v63 = vsel %vm2404_vm3, %v2403_v61, %v2399_v62 }
 0x29e   :  { %2406 = vst [vmem:[#allocation4] sm:$0x3] %v2405_v63  ;;  %3318 = vmatmul.mubr.f32.vlgmr.msra.gmra.mxu0 %v2405_v63 }
 0x29f   :  { %3344 = shalt.err (!%p3341_p4)
}
 0x2a0   :  { %2521 = dma.vmem_to_hbm [thread:$0]  %s2519_s29, 32, %s5582_s9, [#allocation5]   ;;  %v2535_v57 = vld [vmem:[%s5580_s7] ss:$0 sm:$0xff]  ;;  %vm2500_vm4 = vcmask 74752  }
 0x2a1   :  { %s3384_s3 = smov [#allocation2]  }
 0x2a2   :  { %s2508_s14 = sshll.u32 %s3384_s3, 4  ;;  %s2509_s14 = int_to_ptr.vmem [resolvable:$true] %s2508_s14 }
 0x2a3   :  { %s3353_s15 = scalar_lea.vmem %s2509_s14, 32  ;;  %p3358_p6 = scmp.lt.s32.totalorder %s2509_s14, %s2509_s14 }
 0x2a4   :  { %p3354_p5 = scmp.ne.s32.totalorder %s2509_s14, %s3353_s15  ;;  %p3359_p7 = scmp.lt.s32.totalorder %s3353_s15, %s3353_s15 }
 0x2a6   :  { %p3360_p8 = por %p3359_p7, %p3358_p6 }
 0x2a8   :  { %p3361_p9 = pnand %p3360_p8, %p3354_p5 }
 0x35e   :  { %v2496_v0 = vpop.f32.mrf.mxu0 }
 0x35f   :  { %v2497_v1 = vadd.f32 %v2535_v57, %v2496_v0 }
 0x360   :  { %v3319_v2 = vpop.f32.mrf.mxu0 }
 0x361   :  { %2501 = vst.msk [vmem:[#allocation2] sm:$0x3] %vm2500_vm4, %v2497_v1 }
 0x362   :  { %3364 = shalt.err (!%p3361_p9)
}
 0x363   :  { %2511 = dma.vmem_to_hbm [thread:$0]  %s2509_s14, 32, %s5581_s8, [#allocation3]  }
 0x364   :  { %3373 = dma.done.wait [#allocation3], 32  }
 0x365   :  { %3374 = vsyncadd [#allocation3], 4294967264 }
 0x366   :  { %3375 = dma.done.wait [#allocation5], 32  }
 0x367   :  { %3376 = vsyncadd [#allocation5], 4294967264 }
 0x368   :  { %2528 = vsyncpa [#allocation3], 1 }
 0x369   :  { %2529 = vsyncpa [#allocation5], 1 }

// kernel: swae_forward.2
= control target key start
LH: loop header
LB: loop body
LE: loop exit
PB: predicated region body
PF: predicated region fallthrough
CT: control target
= control target key end

     0   :  { %s6264_s17 = smov 0   ;;  %s10425_s0 = inlined_call_operand.vmem [shape: f32[6,240,87], index: 0, kind: input, shape index: {}]   ;;  %s10426_s1 = inlined_call_operand.vmem [shape: f32[3,384,240], index: 1, kind: input, shape index: {}]   ;;  %s10427_s2 = inlined_call_operand.vmem [shape: f32[384,1], index: 2, kind: input, shape index: {}]   ;;  %s10428_s3 = inlined_call_operand.vmem [shape: f32[64,64], index: 3, kind: input, shape index: {}]   ;;  %s10429_s4 = inlined_call_operand.vmem [shape: f32[64,1], index: 4, kind: input, shape index: {}]   ;;  %s10430_s5 = inlined_call_operand.vmem [shape: f32[32,32], index: 5, kind: input, shape index: {}]   ;;  %s10431_s6 = inlined_call_operand.vmem [shape: f32[32,32], index: 6, kind: input, shape index: {}]   ;;  %s10432_s7 = inlined_call_operand.vmem [shape: f32[32,1], index: 7, kind: input, shape index: {}]   ;;  %s10433_s8 = inlined_call_operand.vmem [shape: f32[81,27], index: 8, kind: input, shape index: {}]   ;;  %s10434_s9 = inlined_call_operand.vmem [shape: f32[81,27], index: 9, kind: input, shape index: {}]   ;;  %s10435_s10 = inlined_call_operand.vmem [shape: f32[6,32,81], index: 10, kind: output, shape index: {0}]   ;;  %s10436_s11 = inlined_call_operand.vmem [shape: f32[6,32,27], index: 11, kind: output, shape index: {1}]  }
   0x1 LB: > { %s5522_s18 = sadd.s32 4294967295, %s6197_s17   ;;  %p5526_p0 = scmp.ge.s32.totalorder %s6197_s17, 1  ;;  %s6197_s17 = sphi %s6264_s17, %s22_s17  }
   0x2   : > { %p340_p1 = scmp.lt.s32.totalorder %s6197_s17, 7 }
   0x4   : > { %p341_p2 = pnand %p5526_p0, %p340_p1 }
   0x6   : > { %344 = sbr.rel (%p341_p2) target bundleno = 2189 (0x88d), region = 60 }
   0xb   : > { %p385_p3 = scmp.lt.s32.totalorder %s5522_s18, 5  ;;  %v6199_v0 = vmov 0.0   ;;  %s6200_s23 = smov 127   ;;  %v5533_v27 = vld [vmem:[%s10426_s1 + $0x308] sm:$0xff]  ;;  %vm743_vm0 = vcmask 916480   ;;  %v5599_v28 = vld [vmem:[%s10426_s1 + $0x518] sm:$0xff] }
   0xc   : > { %888 = vmatprep.subr.mxu0 %v6199_v0  ;;  %6072 = vmatprep.subr.mxu1 %v6199_v0  ;;  %s6201_s28 = smov 126   ;;  %v5532_v63 = vld [vmem:[%s10426_s1 + $0x300] sm:$0xff]  ;;  %vm2662_vm1 = vcmask 695296   ;;  %s6203_s20 = smov 125   ;;  %vm4820_vm2 = vcmask 523264   ;;  %vm3175_vm3 = vcmask 670720  }
   0xd   : > { %s11006_s18 = smov (!%p385_p3, %s5522_s18), 5  ;;  %5628 = vmatprep.mubr.msk.f32.mxu0 %vm743_vm0, %v5533_v27  ;;  %5661 = vmatprep.mubr.msk.f32.mxu1 %vm743_vm0, %v5599_v28  ;;  %v5598_v27 = vld [vmem:[%s10426_s1 + $0x510] sm:$0xff]  ;;  %v5535_v28 = vld [vmem:[%s10426_s1 + $0x318] sm:$0xff]  ;;  %vm5006_vm4 = vcmask 1040384   ;;  %vm4978_vm5 = vcmask 662528   ;;  %vm5202_vm6 = vcmask 261120  }
   0xe   : > { %s6132_s19 = smul.u32 240, %s11006_s18  ;;  %vm5429_vm7 = vcmask 220160  }
  0x10   : > { %s6280_s22 = scalar_lea.vmem %s10425_s0, %s6132_s19 }
  0x11   : > { %v6283_v1 = vld [vmem:[%s6280_s22 + $0x78] sm:$0xff]  ;;  %v6286_v2 = vld [vmem:[%s6280_s22 + $0x68] sm:$0xff]  ;;  %v6293_v3 = vld [vmem:[%s6280_s22 + $0x70] sm:$0xff] }
  0x12   : > { %683 = vrot.lane.b32.xlu0 %v6283_v1, %s6200_s23  ;;  %679 = vrot.lane.b32.xlu1 %v6286_v2, %s6200_s23  ;;  %v6296_v4 = vld [vmem:[%s6280_s22 + $0x60] sm:$0xff]  ;;  %v6303_v5 = vld [vmem:[%s6280_s22 + $0x58] sm:$0xff] }
  0x13   : > { %v6306_v6 = vld [vmem:[%s6280_s22 + $0x50] sm:$0xff]  ;;  %v6313_v7 = vld [vmem:[%s6280_s22 + $0x48] sm:$0xff]  ;;  %v6316_v8 = vld [vmem:[%s6280_s22 + $0x40] sm:$0xff] }
  0x14   : > { %v6323_v9 = vld [vmem:[%s6280_s22 + $0x38] sm:$0xff]  ;;  %v6326_v10 = vld [vmem:[%s6280_s22 + $0x30] sm:$0xff]  ;;  %v6333_v11 = vld [vmem:[%s6280_s22 + $0x28] sm:$0xff] }
  0x15   : > { %v6336_v12 = vld [vmem:[%s6280_s22 + $0x20] sm:$0xff]  ;;  %v6343_v13 = vld [vmem:[%s6280_s22 + $0x18] sm:$0xff]  ;;  %v6346_v14 = vld [vmem:[%s6280_s22 + $0x10] sm:$0xff] }
  0x16   : > { %681 = vrot.lane.b32.xlu0 %v6293_v3, %s6200_s23  ;;  %677 = vrot.lane.b32.xlu1 %v6296_v4, %s6200_s23  ;;  %v6353_v15 = vld [vmem:[%s6280_s22 + $0x8] sm:$0xff]  ;;  %v6356_v16 = vld [vmem:[%s6280_s22] sm:$0xff] }
  0x17   : > { %v6363_v17 = vld [vmem:[%s6280_s22 + $0xe8] sm:$0xff]  ;;  %v6366_v18 = vld [vmem:[%s6280_s22 + $0xe0] sm:$0xff]  ;;  %v6373_v19 = vld [vmem:[%s6280_s22 + $0xd8] sm:$0xff] }
  0x18   : > { %v6376_v20 = vld [vmem:[%s6280_s22 + $0xd0] sm:$0xff]  ;;  %v6383_v21 = vld [vmem:[%s6280_s22 + $0xc8] sm:$0xff]  ;;  %v6386_v22 = vld [vmem:[%s6280_s22 + $0xc0] sm:$0xff] }
  0x19   : > { %v6393_v23 = vld [vmem:[%s6280_s22 + $0xb8] sm:$0xff]  ;;  %v6396_v24 = vld [vmem:[%s6280_s22 + $0xb0] sm:$0xff]  ;;  %v6403_v25 = vld [vmem:[%s6280_s22 + $0xa8] sm:$0xff] }
  0x1a   : > { %675 = vrot.lane.b32.xlu0 %v6303_v5, %s6200_s23  ;;  %673 = vrot.lane.b32.xlu1 %v6306_v6, %s6200_s23  ;;  %v6406_v26 = vld [vmem:[%s6280_s22 + $0xa0] sm:$0xff]  ;;  %v6421_v29 = vld [vmem:[%s6280_s22 + $0x98] sm:$0xff] }
  0x1b   : > { %v6424_v30 = vld [vmem:[%s6280_s22 + $0x90] sm:$0xff]  ;;  %v6431_v31 = vld [vmem:[%s6280_s22 + $0x88] sm:$0xff]  ;;  %v6434_v32 = vld [vmem:[%s6280_s22 + $0x80] sm:$0xff] }
  0x1e   : > { %671 = vrot.lane.b32.xlu0 %v6313_v7, %s6200_s23  ;;  %669 = vrot.lane.b32.xlu1 %v6316_v8, %s6200_s23 }
  0x22   : > { %667 = vrot.lane.b32.xlu0 %v6323_v9, %s6200_s23  ;;  %665 = vrot.lane.b32.xlu1 %v6326_v10, %s6200_s23 }
  0x26   : > { %663 = vrot.lane.b32.xlu0 %v6333_v11, %s6200_s23  ;;  %661 = vrot.lane.b32.xlu1 %v6336_v12, %s6200_s23 }
  0x2a   : > { %659 = vrot.lane.b32.xlu0 %v6343_v13, %s6200_s23  ;;  %657 = vrot.lane.b32.xlu1 %v6346_v14, %s6200_s23 }
  0x2e   : > { %655 = vrot.lane.b32.xlu0 %v6353_v15, %s6200_s23  ;;  %653 = vrot.lane.b32.xlu1 %v6356_v16, %s6200_s23 }
  0x32   : > { %711 = vrot.lane.b32.xlu0 %v6363_v17, %s6200_s23  ;;  %709 = vrot.lane.b32.xlu1 %v6366_v18, %s6200_s23 }
  0x36   : > { %707 = vrot.lane.b32.xlu0 %v6373_v19, %s6200_s23  ;;  %705 = vrot.lane.b32.xlu1 %v6376_v20, %s6200_s23 }
  0x3a   : > { %703 = vrot.lane.b32.xlu0 %v6383_v21, %s6200_s23  ;;  %701 = vrot.lane.b32.xlu1 %v6386_v22, %s6200_s23 }
  0x3e   : > { %699 = vrot.lane.b32.xlu0 %v6393_v23, %s6200_s23  ;;  %697 = vrot.lane.b32.xlu1 %v6396_v24, %s6200_s23 }
  0x42   : > { %695 = vrot.lane.b32.xlu0 %v6403_v25, %s6200_s23  ;;  %693 = vrot.lane.b32.xlu1 %v6406_v26, %s6200_s23 }
  0x46   : > { %691 = vrot.lane.b32.xlu0 %v6421_v29, %s6200_s23  ;;  %689 = vrot.lane.b32.xlu1 %v6424_v30, %s6200_s23 }
  0x4a   : > { %687 = vrot.lane.b32.xlu0 %v6431_v31, %s6200_s23  ;;  %685 = vrot.lane.b32.xlu1 %v6434_v32, %s6200_s23 }
  0x4e   : > { %1769 = vrot.lane.b32.xlu0 %v6283_v1, %s6201_s28  ;;  %1767 = vrot.lane.b32.xlu1 %v6293_v3, %s6201_s28 }
  0x52   : > { %1765 = vrot.lane.b32.xlu0 %v6286_v2, %s6201_s28  ;;  %1763 = vrot.lane.b32.xlu1 %v6296_v4, %s6201_s28 }
  0x56   : > { %1761 = vrot.lane.b32.xlu0 %v6303_v5, %s6201_s28  ;;  %1759 = vrot.lane.b32.xlu1 %v6306_v6, %s6201_s28 }
  0x5a   : > { %1757 = vrot.lane.b32.xlu0 %v6313_v7, %s6201_s28  ;;  %1755 = vrot.lane.b32.xlu1 %v6316_v8, %s6201_s28 }
  0x5e   : > { %1753 = vrot.lane.b32.xlu0 %v6323_v9, %s6201_s28  ;;  %1751 = vrot.lane.b32.xlu1 %v6326_v10, %s6201_s28 }
  0x62   : > { %1749 = vrot.lane.b32.xlu0 %v6333_v11, %s6201_s28  ;;  %1747 = vrot.lane.b32.xlu1 %v6336_v12, %s6201_s28 }
  0x66   : > { %1745 = vrot.lane.b32.xlu0 %v6343_v13, %s6201_s28  ;;  %1743 = vrot.lane.b32.xlu1 %v6346_v14, %s6201_s28 }
  0x6a   : > { %1741 = vrot.lane.b32.xlu0 %v6353_v15, %s6201_s28  ;;  %1739 = vrot.lane.b32.xlu1 %v6356_v16, %s6201_s28 }
  0x6e   : > { %1797 = vrot.lane.b32.xlu0 %v6363_v17, %s6201_s28  ;;  %1795 = vrot.lane.b32.xlu1 %v6366_v18, %s6201_s28 }
  0x72   : > { %1793 = vrot.lane.b32.xlu0 %v6373_v19, %s6201_s28  ;;  %1791 = vrot.lane.b32.xlu1 %v6376_v20, %s6201_s28 }
  0x76   : > { %1789 = vrot.lane.b32.xlu0 %v6383_v21, %s6201_s28  ;;  %1787 = vrot.lane.b32.xlu1 %v6386_v22, %s6201_s28 }
  0x7a   : > { %1785 = vrot.lane.b32.xlu0 %v6393_v23, %s6201_s28  ;;  %1783 = vrot.lane.b32.xlu1 %v6396_v24, %s6201_s28 }
  0x7e   : > { %1781 = vrot.lane.b32.xlu0 %v6403_v25, %s6201_s28  ;;  %1779 = vrot.lane.b32.xlu1 %v6406_v26, %s6201_s28 }
  0x82   : > { %1777 = vrot.lane.b32.xlu0 %v6421_v29, %s6201_s28  ;;  %1775 = vrot.lane.b32.xlu1 %v6424_v30, %s6201_s28 }
  0x84   : > { %v684_v33 = vpop.permute.xlu0 %683  ;;  %v680_v34 = vpop.permute.xlu1 %679 }
  0x85   : > { %889 = vmatpush1.msra.mxu0 %v684_v33  ;;  %6102 = vmatpush1.msra.mxu1 %v684_v33  ;;  %v5601_v33 = vld [vmem:[%s10426_s1 + $0x528] sm:$0xff] }
  0x86   : > { %890 = vmatprep.subr.mxu0 %v6199_v0  ;;  %6073 = vmatprep.subr.mxu1 %v6199_v0 }
  0x87   : > { %1773 = vrot.lane.b32.xlu0 %v6431_v31, %s6201_s28  ;;  %1771 = vrot.lane.b32.xlu1 %v6434_v32, %s6201_s28 }
  0x88   : > { %v682_v35 = vpop.permute.xlu0 %681  ;;  %v678_v36 = vpop.permute.xlu1 %677 }
  0x89   : > { %891 = vmatpush1.msra.mxu0 %v682_v35  ;;  %6103 = vmatpush1.msra.mxu1 %v682_v35  ;;  %v5600_v35 = vld [vmem:[%s10426_s1 + $0x520] sm:$0xff] }
  0x8a   : > { %892 = vmatprep.subr.mxu0 %v6199_v0  ;;  %6074 = vmatprep.subr.mxu1 %v6199_v0 }
  0x8b   : > { %893 = vmatpush1.msra.mxu0 %v680_v34  ;;  %6104 = vmatpush1.msra.mxu1 %v680_v34  ;;  %v5534_v34 = vld [vmem:[%s10426_s1 + $0x310] sm:$0xff] }
  0x8c   : > { %894 = vmatprep.subr.mxu0 %v6199_v0  ;;  %6075 = vmatprep.subr.mxu1 %v6199_v0  ;;  %v676_v37 = vpop.permute.xlu0 %675  ;;  %v674_v38 = vpop.permute.xlu1 %673 }
  0x8d   : > { %895 = vmatpush1.msra.mxu0 %v678_v36  ;;  %6105 = vmatpush1.msra.mxu1 %v678_v36  ;;  %v5537_v36 = vld [vmem:[%s10426_s1 + $0x328] sm:$0xff] }
  0x8e   : > { %896 = vmatprep.subr.mxu0 %v6199_v0  ;;  %6076 = vmatprep.subr.mxu1 %v6199_v0 }
  0x8f   : > { %897 = vmatpush1.msra.mxu0 %v676_v37  ;;  %6106 = vmatpush1.msra.mxu1 %v676_v37  ;;  %v5536_v37 = vld [vmem:[%s10426_s1 + $0x320] sm:$0xff] }
  0x90   : > { %898 = vmatprep.subr.mxu0 %v6199_v0  ;;  %6077 = vmatprep.subr.mxu1 %v6199_v0  ;;  %v672_v39 = vpop.permute.xlu0 %671  ;;  %v670_v40 = vpop.permute.xlu1 %669 }
  0x91   : > { %899 = vmatpush1.msra.mxu0 %v674_v38  ;;  %6107 = vmatpush1.msra.mxu1 %v674_v38  ;;  %v5539_v38 = vld [vmem:[%s10426_s1 + $0x338] sm:$0xff] }
  0x92   : > { %900 = vmatprep.subr.mxu0 %v6199_v0  ;;  %6078 = vmatprep.subr.mxu1 %v6199_v0 }
  0x93   : > { %901 = vmatpush1.msra.mxu0 %v672_v39  ;;  %6108 = vmatpush1.msra.mxu1 %v672_v39  ;;  %v5538_v39 = vld [vmem:[%s10426_s1 + $0x330] sm:$0xff] }
  0x94   : > { %902 = vmatprep.subr.mxu0 %v6199_v0  ;;  %6079 = vmatprep.subr.mxu1 %v6199_v0  ;;  %v668_v41 = vpop.permute.xlu0 %667  ;;  %v666_v42 = vpop.permute.xlu1 %665 }
  0x95   : > { %903 = vmatpush1.msra.mxu0 %v670_v40  ;;  %6109 = vmatpush1.msra.mxu1 %v670_v40  ;;  %v5541_v40 = vld [vmem:[%s10426_s1 + $0x348] sm:$0xff] }
  0x96   : > { %904 = vmatprep.subr.mxu0 %v6199_v0  ;;  %6080 = vmatprep.subr.mxu1 %v6199_v0 }
  0x97   : > { %905 = vmatpush1.msra.mxu0 %v668_v41  ;;  %6110 = vmatpush1.msra.mxu1 %v668_v41  ;;  %v5540_v41 = vld [vmem:[%s10426_s1 + $0x340] sm:$0xff] }
  0x98   : > { %906 = vmatprep.subr.mxu0 %v6199_v0  ;;  %6081 = vmatprep.subr.mxu1 %v6199_v0  ;;  %v664_v43 = vpop.permute.xlu0 %663  ;;  %v662_v44 = vpop.permute.xlu1 %661 }
  0x99   : > { %907 = vmatpush1.msra.mxu0 %v666_v42  ;;  %6111 = vmatpush1.msra.mxu1 %v666_v42  ;;  %v5543_v42 = vld [vmem:[%s10426_s1 + $0x358] sm:$0xff] }
  0x9a   : > { %908 = vmatprep.subr.mxu0 %v6199_v0  ;;  %6082 = vmatprep.subr.mxu1 %v6199_v0 }
  0x9b   : > { %909 = vmatpush1.msra.mxu0 %v664_v43  ;;  %6112 = vmatpush1.msra.mxu1 %v664_v43  ;;  %v5542_v43 = vld [vmem:[%s10426_s1 + $0x350] sm:$0xff] }
  0x9c   : > { %910 = vmatprep.subr.mxu0 %v6199_v0  ;;  %6083 = vmatprep.subr.mxu1 %v6199_v0  ;;  %v660_v45 = vpop.permute.xlu0 %659  ;;  %v658_v46 = vpop.permute.xlu1 %657 }
  0x9d   : > { %911 = vmatpush1.msra.mxu0 %v662_v44  ;;  %6113 = vmatpush1.msra.mxu1 %v662_v44  ;;  %v5545_v44 = vld [vmem:[%s10426_s1 + $0x368] sm:$0xff] }
  0x9e   : > { %912 = vmatprep.subr.mxu0 %v6199_v0  ;;  %6084 = vmatprep.subr.mxu1 %v6199_v0 }
  0x9f   : > { %913 = vmatpush1.msra.mxu0 %v660_v45  ;;  %6114 = vmatpush1.msra.mxu1 %v660_v45  ;;  %v5544_v45 = vld [vmem:[%s10426_s1 + $0x360] sm:$0xff] }
  0xa0   : > { %914 = vmatprep.subr.mxu0 %v6199_v0  ;;  %6085 = vmatprep.subr.mxu1 %v6199_v0  ;;  %v656_v47 = vpop.permute.xlu0 %655  ;;  %v654_v48 = vpop.permute.xlu1 %653 }
  0xa1   : > { %915 = vmatpush1.msra.mxu0 %v658_v46  ;;  %6115 = vmatpush1.msra.mxu1 %v658_v46  ;;  %v5547_v46 = vld [vmem:[%s10426_s1 + $0x378] sm:$0xff] }
  0xa2   : > { %916 = vmatprep.subr.mxu0 %v6199_v0  ;;  %6086 = vmatprep.subr.mxu1 %v6199_v0 }
  0xa3   : > { %917 = vmatpush1.msra.mxu0 %v656_v47  ;;  %6116 = vmatpush1.msra.mxu1 %v656_v47  ;;  %v5546_v47 = vld [vmem:[%s10426_s1 + $0x370] sm:$0xff] }
  0xa4   : > { %918 = vmatprep.subr.mxu0 %v6199_v0  ;;  %6087 = vmatprep.subr.mxu1 %v6199_v0  ;;  %v712_v49 = vpop.permute.xlu0 %711  ;;  %v710_v50 = vpop.permute.xlu1 %709 }
  0xa5   : > { %919 = vmatpush1.msra.mxu0 %v654_v48  ;;  %6117 = vmatpush1.msra.mxu1 %v654_v48  ;;  %v5549_v48 = vld [vmem:[%s10426_s1 + $0x388] sm:$0xff] }
  0xa6   : > { %924 = vmatprep.subr.mxu0 %v6199_v0  ;;  %6088 = vmatprep.subr.mxu1 %v6199_v0 }
  0xa7   : > { %925 = vmatpush2.msra.mxu0 %v712_v49  ;;  %6118 = vmatpush2.msra.mxu1 %v712_v49  ;;  %v5548_v49 = vld [vmem:[%s10426_s1 + $0x380] sm:$0xff] }
  0xa8   : > { %926 = vmatprep.subr.mxu0 %v6199_v0  ;;  %6089 = vmatprep.subr.mxu1 %v6199_v0  ;;  %v708_v51 = vpop.permute.xlu0 %707  ;;  %v706_v52 = vpop.permute.xlu1 %705 }
  0xa9   : > { %927 = vmatpush2.msra.mxu0 %v710_v50  ;;  %6119 = vmatpush2.msra.mxu1 %v710_v50  ;;  %v5551_v50 = vld [vmem:[%s10426_s1 + $0x398] sm:$0xff] }
  0xaa   : > { %928 = vmatprep.subr.mxu0 %v6199_v0  ;;  %6090 = vmatprep.subr.mxu1 %v6199_v0 }
  0xab   : > { %929 = vmatpush2.msra.mxu0 %v708_v51  ;;  %6120 = vmatpush2.msra.mxu1 %v708_v51  ;;  %v5550_v51 = vld [vmem:[%s10426_s1 + $0x390] sm:$0xff] }
  0xac   : > { %930 = vmatprep.subr.mxu0 %v6199_v0  ;;  %6091 = vmatprep.subr.mxu1 %v6199_v0  ;;  %v704_v53 = vpop.permute.xlu0 %703  ;;  %v702_v54 = vpop.permute.xlu1 %701 }
  0xad   : > { %931 = vmatpush2.msra.mxu0 %v706_v52  ;;  %6121 = vmatpush2.msra.mxu1 %v706_v52  ;;  %v5553_v52 = vld [vmem:[%s10426_s1 + $0x3a8] sm:$0xff] }
  0xae   : > { %932 = vmatprep.subr.mxu0 %v6199_v0  ;;  %6092 = vmatprep.subr.mxu1 %v6199_v0 }
  0xaf   : > { %933 = vmatpush2.msra.mxu0 %v704_v53  ;;  %6122 = vmatpush2.msra.mxu1 %v704_v53  ;;  %v5552_v53 = vld [vmem:[%s10426_s1 + $0x3a0] sm:$0xff] }
  0xb0   : > { %934 = vmatprep.subr.mxu0 %v6199_v0  ;;  %6093 = vmatprep.subr.mxu1 %v6199_v0  ;;  %v700_v55 = vpop.permute.xlu0 %699  ;;  %v698_v56 = vpop.permute.xlu1 %697 }
  0xb1   : > { %935 = vmatpush2.msra.mxu0 %v702_v54  ;;  %6123 = vmatpush2.msra.mxu1 %v702_v54  ;;  %v5555_v54 = vld [vmem:[%s10426_s1 + $0x3b8] sm:$0xff] }
  0xb2   : > { %936 = vmatprep.subr.mxu0 %v6199_v0  ;;  %6094 = vmatprep.subr.mxu1 %v6199_v0 }
  0xb3   : > { %937 = vmatpush2.msra.mxu0 %v700_v55  ;;  %6124 = vmatpush2.msra.mxu1 %v700_v55  ;;  %v5554_v55 = vld [vmem:[%s10426_s1 + $0x3b0] sm:$0xff] }
  0xb4   : > { %938 = vmatprep.subr.mxu0 %v6199_v0  ;;  %6095 = vmatprep.subr.mxu1 %v6199_v0  ;;  %v696_v57 = vpop.permute.xlu0 %695  ;;  %v694_v58 = vpop.permute.xlu1 %693 }
  0xb5   : > { %939 = vmatpush2.msra.mxu0 %v698_v56  ;;  %6125 = vmatpush2.msra.mxu1 %v698_v56 }
  0xb6   : > { %940 = vmatprep.subr.mxu0 %v6199_v0  ;;  %6096 = vmatprep.subr.mxu1 %v6199_v0 }
  0xb7   : > { %941 = vmatpush2.msra.mxu0 %v696_v57  ;;  %6126 = vmatpush2.msra.mxu1 %v696_v57  ;;  %v5557_v57 = vld [vmem:[%s10426_s1 + $0x3c8] sm:$0xff] }
  0xb8   : > { %942 = vmatprep.subr.mxu0 %v6199_v0  ;;  %6097 = vmatprep.subr.mxu1 %v6199_v0  ;;  %v692_v59 = vpop.permute.xlu0 %691  ;;  %v690_v60 = vpop.permute.xlu1 %689 }
  0xb9   : > { %943 = vmatpush2.msra.mxu0 %v694_v58  ;;  %6127 = vmatpush2.msra.mxu1 %v694_v58 }
  0xba   : > { %944 = vmatprep.subr.mxu0 %v6199_v0  ;;  %6098 = vmatprep.subr.mxu1 %v6199_v0 }
  0xbb   : > { %945 = vmatpush2.msra.mxu0 %v692_v59  ;;  %6128 = vmatpush2.msra.mxu1 %v692_v59  ;;  %v5556_v59 = vld [vmem:[%s10426_s1 + $0x3c0] sm:$0xff] }
  0xbc   : > { %946 = vmatprep.subr.mxu0 %v6199_v0  ;;  %6099 = vmatprep.subr.mxu1 %v6199_v0  ;;  %v688_v61 = vpop.permute.xlu0 %687  ;;  %v686_v62 = vpop.permute.xlu1 %685 }
  0xbd   : > { %947 = vmatpush2.msra.mxu0 %v690_v60  ;;  %6129 = vmatpush2.msra.mxu1 %v690_v60  ;;  %v5559_v60 = vld [vmem:[%s10426_s1 + $0x3d8] sm:$0xff] }
  0xbe   : > { %948 = vmatprep.subr.mxu0 %v6199_v0  ;;  %6100 = vmatprep.subr.mxu1 %v6199_v0 }
  0xbf   : > { %949 = vmatpush2.msra.mxu0 %v688_v61  ;;  %6130 = vmatpush2.msra.mxu1 %v688_v61 }
  0xc0   : > { %950 = vmatprep.subr.mxu0 %v6199_v0  ;;  %6101 = vmatprep.subr.mxu1 %v6199_v0  ;;  %v6760_v56 = vpop.permute.xlu0 %1769  ;;  %v6771_v58 = vpop.permute.xlu1 %1767 }
  0xc1   : > { %951 = vmatpush2.msra.mxu0 %v686_v62  ;;  %6131 = vmatpush2.msra.mxu1 %v686_v62  ;;  %v5558_v62 = vld [vmem:[%s10426_s1 + $0x3d0] sm:$0xff] }
  0xc2   : > { %953 = vmatmul.mubr.f32.vlgmr.msra.gmra.mxu0 %v5532_v63  ;;  %1118 = vmatmul.mubr.f32.vlgmr.msra.gmra.mxu1 %v5598_v27  ;;  %v5561_v27 = vld [vmem:[%s10426_s1 + $0x3e8] sm:$0xff] }
  0xc3   : > { %1337 = vmatprep.subr.mxu1 %v6199_v0  ;;  %5629 = vmatprep.mubr.msk.f32.mxu0 %vm743_vm0, %v5535_v28  ;;  %v5560_v28 = vld [vmem:[%s10426_s1 + $0x3e0] sm:$0xff] }
  0xc4   : > { %1338 = vmatpush1.msra.mxu1 %v6283_v1  ;;  %5662 = vmatprep.mubr.msk.f32.mxu1 %vm743_vm0, %v5601_v33  ;;  %v5603_v1 = vld [vmem:[%s10426_s1 + $0x538] sm:$0xff]  ;;  %v6791_v61 = vpop.permute.xlu0 %1765  ;;  %v6802_v63 = vpop.permute.xlu1 %1763 }
  0xc5   : > { %1339 = vmatprep.subr.mxu1 %v6199_v0  ;;  %1973 = vmatprep.subr.mxu0 %v6199_v0 }
  0xc6   : > { %1340 = vmatpush1.msra.mxu1 %v6293_v3  ;;  %958 = vmatmul.mubr.f32.gmra.mxu0 %v5534_v34  ;;  %v5602_v3 = vld [vmem:[%s10426_s1 + $0x530] sm:$0xff]  ;;  %v5563_v34 = vld [vmem:[%s10426_s1 + $0x3f8] sm:$0xff] }
  0xc7   : > { %1123 = vmatmul.mubr.f32.gmra.mxu1 %v5600_v35  ;;  %1341 = vmatprep.subr.mxu1 %v6199_v0 }
  0xc8   : > { %1342 = vmatpush1.msra.mxu1 %v6286_v2  ;;  %5630 = vmatprep.mubr.msk.f32.mxu0 %vm743_vm0, %v5537_v36  ;;  %v5605_v2 = vld [vmem:[%s10426_s1 + $0x548] sm:$0xff]  ;;  %v6822_v33 = vpop.permute.xlu0 %1761  ;;  %v6833_v35 = vpop.permute.xlu1 %1759  ;;  %v5562_v36 = vld [vmem:[%s10426_s1 + $0x3f0] sm:$0xff] }
  0xc9   : > { %1343 = vmatprep.subr.mxu1 %v6199_v0  ;;  %5663 = vmatprep.mubr.msk.f32.mxu1 %vm743_vm0, %v5603_v1  ;;  %v5565_v1 = vld [vmem:[%s10426_s1 + $0x408] sm:$0xff] }
  0xca   : > { %1344 = vmatpush1.msra.mxu1 %v6296_v4  ;;  %963 = vmatmul.mubr.f32.gmra.mxu0 %v5536_v37  ;;  %v5604_v4 = vld [vmem:[%s10426_s1 + $0x540] sm:$0xff]  ;;  %v433_v37 = vld [vmem:[%s10426_s1 + $0x18] sm:$0xff] }
  0xcb   : > { %1128 = vmatmul.mubr.f32.gmra.mxu1 %v5602_v3  ;;  %1345 = vmatprep.subr.mxu1 %v6199_v0  ;;  %v5564_v3 = vld [vmem:[%s10426_s1 + $0x400] sm:$0xff] }
  0xcc   : > { %1346 = vmatpush1.msra.mxu1 %v6303_v5  ;;  %5631 = vmatprep.mubr.msk.f32.mxu0 %vm743_vm0, %v5539_v38  ;;  %v5607_v5 = vld [vmem:[%s10426_s1 + $0x558] sm:$0xff]  ;;  %v2326_v38 = vld [vmem:[%s10427_s2] sm:$0xff] }
  0xcd   : > { %1347 = vmatprep.subr.mxu1 %v6199_v0  ;;  %5664 = vmatprep.mubr.msk.f32.mxu1 %vm743_vm0, %v5605_v2  ;;  %v5567_v2 = vld [vmem:[%s10426_s1 + $0x418] sm:$0xff] }
  0xce   : > { %1348 = vmatpush1.msra.mxu1 %v6306_v6  ;;  %968 = vmatmul.mubr.f32.gmra.mxu0 %v5538_v39  ;;  %v5606_v6 = vld [vmem:[%s10426_s1 + $0x550] sm:$0xff]  ;;  %v6870_v39 = vpop.permute.xlu1 %1755 }
  0xcf   : > { %1133 = vmatmul.mubr.f32.gmra.mxu1 %v5604_v4  ;;  %1349 = vmatprep.subr.mxu1 %v6199_v0  ;;  %v435_v4 = vld [vmem:[%s10426_s1 + $0x28] sm:$0xff] }
  0xd0   : > { %1350 = vmatpush1.msra.mxu1 %v6313_v7  ;;  %5632 = vmatprep.mubr.msk.f32.mxu0 %vm743_vm0, %v5541_v40  ;;  %v5609_v7 = vld [vmem:[%s10426_s1 + $0x568] sm:$0xff]  ;;  %v6202_v40 = vmov 0  }
  0xd1   : > { %1351 = vmatprep.subr.mxu1 %v6199_v0  ;;  %5665 = vmatprep.mubr.msk.f32.mxu1 %vm743_vm0, %v5607_v5  ;;  %v5566_v5 = vld [vmem:[%s10426_s1 + $0x410] sm:$0xff] }
  0xd2   : > { %1352 = vmatpush1.msra.mxu1 %v6316_v8  ;;  %973 = vmatmul.mubr.f32.gmra.mxu0 %v5540_v41  ;;  %v5608_v8 = vld [vmem:[%s10426_s1 + $0x560] sm:$0xff]  ;;  %v2329_v41 = vld [vmem:[%s10427_s2 + $0x18] sm:$0xff] }
  0xd3   : > { %1138 = vmatmul.mubr.f32.gmra.mxu1 %v5606_v6  ;;  %1353 = vmatprep.subr.mxu1 %v6199_v0  ;;  %v434_v6 = vld [vmem:[%s10426_s1 + $0x20] sm:$0xff] }
  0xd4   : > { %1354 = vmatpush1.msra.mxu1 %v6323_v9  ;;  %5633 = vmatprep.mubr.msk.f32.mxu0 %vm743_vm0, %v5543_v42  ;;  %v5611_v9 = vld [vmem:[%s10426_s1 + $0x578] sm:$0xff]  ;;  %v5569_v42 = vld [vmem:[%s10426_s1 + $0x428] sm:$0xff] }
  0xd5   : > { %1355 = vmatprep.subr.mxu1 %v6199_v0  ;;  %5666 = vmatprep.mubr.msk.f32.mxu1 %vm743_vm0, %v5609_v7 }
  0xd6   : > { %1356 = vmatpush1.msra.mxu1 %v6326_v10  ;;  %978 = vmatmul.mubr.f32.gmra.mxu0 %v5542_v43  ;;  %v5610_v10 = vld [vmem:[%s10426_s1 + $0x570] sm:$0xff]  ;;  %v437_v43 = vld [vmem:[%s10426_s1 + $0x38] sm:$0xff] }
  0xd7   : > { %1143 = vmatmul.mubr.f32.gmra.mxu1 %v5608_v8  ;;  %1357 = vmatprep.subr.mxu1 %v6199_v0  ;;  %v6897_v8 = vpop.permute.xlu1 %1751 }
  0xd8   : > { %1358 = vmatpush1.msra.mxu1 %v6333_v11  ;;  %5634 = vmatprep.mubr.msk.f32.mxu0 %vm743_vm0, %v5545_v44  ;;  %v5613_v11 = vld [vmem:[%s10426_s1 + $0x588] sm:$0xff] }
  0xd9   : > { %1359 = vmatprep.subr.mxu1 %v6199_v0  ;;  %5667 = vmatprep.mubr.msk.f32.mxu1 %vm743_vm0, %v5611_v9  ;;  %v2327_v44 = vld [vmem:[%s10427_s2 + $0x8] sm:$0xff]  ;;  %v5568_v9 = vld [vmem:[%s10426_s1 + $0x420] sm:$0xff] }
  0xda   : > { %1360 = vmatpush1.msra.mxu1 %v6336_v12  ;;  %983 = vmatmul.mubr.f32.gmra.mxu0 %v5544_v45  ;;  %v5612_v12 = vld [vmem:[%s10426_s1 + $0x580] sm:$0xff]  ;;  %v2331_v45 = vld [vmem:[%s10427_s2 + $0x28] sm:$0xff] }
  0xdb   : > { %1148 = vmatmul.mubr.f32.gmra.mxu1 %v5610_v10  ;;  %1361 = vmatprep.subr.mxu1 %v6199_v0  ;;  %v436_v10 = vld [vmem:[%s10426_s1 + $0x30] sm:$0xff] }
  0xdc   : > { %1362 = vmatpush1.msra.mxu1 %v6343_v13  ;;  %5635 = vmatprep.mubr.msk.f32.mxu0 %vm743_vm0, %v5547_v46  ;;  %v5615_v13 = vld [vmem:[%s10426_s1 + $0x598] sm:$0xff] }
  0xdd   : > { %1363 = vmatprep.subr.mxu1 %v6199_v0  ;;  %5668 = vmatprep.mubr.msk.f32.mxu1 %vm743_vm0, %v5613_v11  ;;  %v5571_v46 = vld [vmem:[%s10426_s1 + $0x438] sm:$0xff]  ;;  %v439_v11 = vld [vmem:[%s10426_s1 + $0x48] sm:$0xff] }
  0xde   : > { %1364 = vmatpush1.msra.mxu1 %v6346_v14  ;;  %988 = vmatmul.mubr.f32.gmra.mxu0 %v5546_v47  ;;  %v5614_v14 = vld [vmem:[%s10426_s1 + $0x590] sm:$0xff] }
  0xdf   : > { %1153 = vmatmul.mubr.f32.gmra.mxu1 %v5612_v12  ;;  %1365 = vmatprep.subr.mxu1 %v6199_v0  ;;  %v2328_v12 = vld [vmem:[%s10427_s2 + $0x10] sm:$0xff] }
  0xe0   : > { %1366 = vmatpush1.msra.mxu1 %v6353_v15  ;;  %5636 = vmatprep.mubr.msk.f32.mxu0 %vm743_vm0, %v5549_v48  ;;  %v5617_v15 = vld [vmem:[%s10426_s1 + $0x5a8] sm:$0xff]  ;;  %v5570_v48 = vld [vmem:[%s10426_s1 + $0x430] sm:$0xff] }
  0xe1   : > { %1367 = vmatprep.subr.mxu1 %v6199_v0  ;;  %5669 = vmatprep.mubr.msk.f32.mxu1 %vm743_vm0, %v5615_v13  ;;  %v2333_v13 = vld [vmem:[%s10427_s2 + $0x38] sm:$0xff] }
  0xe2   : > { %1368 = vmatpush1.msra.mxu1 %v6356_v16  ;;  %993 = vmatmul.mubr.f32.gmra.mxu0 %v5548_v49  ;;  %v5616_v16 = vld [vmem:[%s10426_s1 + $0x5a0] sm:$0xff] }
  0xe3   : > { %1158 = vmatmul.mubr.f32.gmra.mxu1 %v5614_v14  ;;  %1373 = vmatprep.subr.mxu1 %v6199_v0  ;;  %v438_v49 = vld [vmem:[%s10426_s1 + $0x40] sm:$0xff]  ;;  %v5573_v14 = vld [vmem:[%s10426_s1 + $0x448] sm:$0xff] }
  0xe4   : > { %1374 = vmatpush2.msra.mxu1 %v6363_v17  ;;  %5637 = vmatprep.mubr.msk.f32.mxu0 %vm743_vm0, %v5551_v50  ;;  %v5619_v17 = vld [vmem:[%s10426_s1 + $0x5b8] sm:$0xff]  ;;  %v6941_v50 = vpop.permute.xlu1 %1747 }
  0xe5   : > { %1375 = vmatprep.subr.mxu1 %v6199_v0  ;;  %5670 = vmatprep.mubr.msk.f32.mxu1 %vm743_vm0, %v5617_v15  ;;  %v441_v15 = vld [vmem:[%s10426_s1 + $0x58] sm:$0xff] }
  0xe6   : > { %1376 = vmatpush2.msra.mxu1 %v6366_v18  ;;  %998 = vmatmul.mubr.f32.gmra.mxu0 %v5550_v51  ;;  %v5618_v18 = vld [vmem:[%s10426_s1 + $0x5b0] sm:$0xff]  ;;  %v2330_v51 = vld [vmem:[%s10427_s2 + $0x20] sm:$0xff] }
  0xe7   : > { %1163 = vmatmul.mubr.f32.gmra.mxu1 %v5616_v16  ;;  %1377 = vmatprep.subr.mxu1 %v6199_v0  ;;  %v5572_v16 = vld [vmem:[%s10426_s1 + $0x440] sm:$0xff] }
  0xe8   : > { %1378 = vmatpush2.msra.mxu1 %v6373_v19  ;;  %5638 = vmatprep.mubr.msk.f32.mxu0 %vm743_vm0, %v5553_v52  ;;  %v5621_v19 = vld [vmem:[%s10426_s1 + $0x5c8] sm:$0xff] }
  0xe9   : > { %1379 = vmatprep.subr.mxu1 %v6199_v0  ;;  %5671 = vmatprep.mubr.msk.f32.mxu1 %vm743_vm0, %v5619_v17  ;;  %v2335_v52 = vld [vmem:[%s10427_s2 + $0x48] sm:$0xff]  ;;  %v440_v17 = vld [vmem:[%s10426_s1 + $0x50] sm:$0xff] }
  0xea   : > { %1380 = vmatpush2.msra.mxu1 %v6376_v20  ;;  %1003 = vmatmul.mubr.f32.gmra.mxu0 %v5552_v53  ;;  %v5620_v20 = vld [vmem:[%s10426_s1 + $0x5c0] sm:$0xff]  ;;  %v5575_v53 = vld [vmem:[%s10426_s1 + $0x458] sm:$0xff] }
  0xeb   : > { %1168 = vmatmul.mubr.f32.gmra.mxu1 %v5618_v18  ;;  %1381 = vmatprep.subr.mxu1 %v6199_v0 }
  0xec   : > { %1382 = vmatpush2.msra.mxu1 %v6383_v21  ;;  %5639 = vmatprep.mubr.msk.f32.mxu0 %vm743_vm0, %v5555_v54  ;;  %v5623_v21 = vld [vmem:[%s10426_s1 + $0x5d8] sm:$0xff]  ;;  %v443_v54 = vld [vmem:[%s10426_s1 + $0x68] sm:$0xff] }
  0xed   : > { %1383 = vmatprep.subr.mxu1 %v6199_v0  ;;  %5672 = vmatprep.mubr.msk.f32.mxu1 %vm743_vm0, %v5621_v19  ;;  %v6969_v19 = vpop.permute.xlu1 %1743 }
  0xee   : > { %1384 = vmatpush2.msra.mxu1 %v6386_v22  ;;  %1008 = vmatmul.mubr.f32.gmra.mxu0 %v5554_v55  ;;  %v5622_v22 = vld [vmem:[%s10426_s1 + $0x5d0] sm:$0xff] }
  0xef   : > { %1173 = vmatmul.mubr.f32.gmra.mxu1 %v5620_v20  ;;  %1385 = vmatprep.subr.mxu1 %v6199_v0  ;;  %v2332_v55 = vld [vmem:[%s10427_s2 + $0x30] sm:$0xff] }
  0xf0   : > { %1386 = vmatpush2.msra.mxu1 %v6393_v23  ;;  %5640 = vmatprep.mubr.msk.f32.mxu0 %vm743_vm0, %v5557_v57  ;;  %v5625_v23 = vld [vmem:[%s10426_s1 + $0x5e8] sm:$0xff]  ;;  %v5574_v20 = vld [vmem:[%s10426_s1 + $0x450] sm:$0xff]  ;;  %v442_v57 = vld [vmem:[%s10426_s1 + $0x60] sm:$0xff] }
  0xf1   : > { %1387 = vmatprep.subr.mxu1 %v6199_v0  ;;  %5673 = vmatprep.mubr.msk.f32.mxu1 %vm743_vm0, %v5623_v21  ;;  %v5577_v21 = vld [vmem:[%s10426_s1 + $0x468] sm:$0xff] }
  0xf2   : > { %1388 = vmatpush2.msra.mxu1 %v6396_v24  ;;  %1013 = vmatmul.mubr.f32.gmra.mxu0 %v5556_v59  ;;  %v5624_v24 = vld [vmem:[%s10426_s1 + $0x5e0] sm:$0xff] }
  0xf3   : > { %1178 = vmatmul.mubr.f32.gmra.mxu1 %v5622_v22  ;;  %1389 = vmatprep.subr.mxu1 %v6199_v0  ;;  %v5576_v22 = vld [vmem:[%s10426_s1 + $0x460] sm:$0xff] }
  0xf4   : > { %1390 = vmatpush2.msra.mxu1 %v6403_v25  ;;  %5641 = vmatprep.mubr.msk.f32.mxu0 %vm743_vm0, %v5559_v60  ;;  %v5627_v25 = vld [vmem:[%s10426_s1 + $0x5f8] sm:$0xff]  ;;  %v444_v60 = vld [vmem:[%s10426_s1 + $0x70] sm:$0xff] }
  0xf5   : > { %1391 = vmatprep.subr.mxu1 %v6199_v0  ;;  %5674 = vmatprep.mubr.msk.f32.mxu1 %vm743_vm0, %v5625_v23  ;;  %v1740_v23 = vpop.permute.xlu1 %1739 }
  0xf6   : > { %1392 = vmatpush2.msra.mxu1 %v6406_v26  ;;  %1018 = vmatmul.mubr.f32.gmra.mxu0 %v5558_v62  ;;  %v5626_v26 = vld [vmem:[%s10426_s1 + $0x5f0] sm:$0xff]  ;;  %v447_v62 = vld [vmem:[%s10426_s1 + $0x88] sm:$0xff] }
  0xf7   : > { %1183 = vmatmul.mubr.f32.gmra.mxu1 %v5624_v24  ;;  %1393 = vmatprep.subr.mxu1 %v6199_v0  ;;  %v5578_v24 = vld [vmem:[%s10426_s1 + $0x470] sm:$0xff] }
  0xf8   : > { %1394 = vmatpush2.msra.mxu1 %v6421_v29  ;;  %5642 = vmatprep.mubr.msk.f32.mxu0 %vm743_vm0, %v5561_v27  ;;  %v431_v29 = vld [vmem:[%s10426_s1 + $0x8] sm:$0xff] }
  0xf9   : > { %1395 = vmatprep.subr.mxu1 %v6199_v0  ;;  %5675 = vmatprep.mubr.msk.f32.mxu1 %vm743_vm0, %v5627_v25  ;;  %v5581_v25 = vld [vmem:[%s10426_s1 + $0x488] sm:$0xff] }
  0xfa   : > { %1396 = vmatpush2.msra.mxu1 %v6424_v30  ;;  %1023 = vmatmul.mubr.f32.gmra.mxu0 %v5560_v28  ;;  %v430_v30 = vld [vmem:[%s10426_s1] sm:$0xff]  ;;  %v449_v28 = vld [vmem:[%s10426_s1 + $0x98] sm:$0xff] }
  0xfb   : > { %1188 = vmatmul.mubr.f32.gmra.mxu1 %v5626_v26  ;;  %1397 = vmatprep.subr.mxu1 %v6199_v0  ;;  %v1796_v26 = vpop.permute.xlu1 %1795 }
  0xfc   : > { %1398 = vmatpush2.msra.mxu1 %v6431_v31  ;;  %5643 = vmatprep.mubr.msk.f32.mxu0 %vm743_vm0, %v5563_v34  ;;  %v6853_v31 = vpop.permute.xlu0 %1757  ;;  %v448_v34 = vld [vmem:[%s10426_s1 + $0x90] sm:$0xff] }
  0xfd   : > { %1399 = vmatprep.subr.mxu1 %v6199_v0  ;;  %5676 = vmatprep.mubr.msk.f32.mxu1 %vm743_vm0, %v431_v29  ;;  %v5583_v29 = vld [vmem:[%s10426_s1 + $0x498] sm:$0xff] }
  0xfe   : > { %1400 = vmatpush2.msra.mxu1 %v6434_v32  ;;  %1028 = vmatmul.mubr.f32.gmra.mxu0 %v5562_v36  ;;  %v432_v32 = vld [vmem:[%s10426_s1 + $0x10] sm:$0xff] }
  0xff   : > { %1402 = vmatmul.mubr.f32.vlgmr.msra.gmra.mxu1 %v430_v30  ;;  %5644 = vmatprep.mubr.msk.f32.mxu0 %vm743_vm0, %v5565_v1  ;;  %v5582_v30 = vld [vmem:[%s10426_s1 + $0x490] sm:$0xff]  ;;  %v450_v1 = vld [vmem:[%s10426_s1 + $0xa0] sm:$0xff] }
 0x100   : > { %5677 = vmatprep.mubr.msk.f32.mxu1 %vm743_vm0, %v433_v37  ;;  %1974 = vmatpush1.msra.mxu0 %v6760_v56  ;;  %v6891_v7 = vpop.permute.xlu0 %1753  ;;  %v2337_v56 = vld [vmem:[%s10427_s2 + $0x58] sm:$0xff]  ;;  %v1792_v37 = vpop.permute.xlu1 %1791 }
 0x101   : > { %1975 = vmatprep.subr.mxu0 %v6199_v0  ;;  %6146 = vset.pattern.permute.xlu0 %v6202_v40 }
 0x102   : > { %1033 = vmatmul.mubr.f32.gmra.mxu0 %v5564_v3  ;;  %2376 = vperm.xlu0 %6146, %v2326_v38   ;;  %v453_v3 = vld [vmem:[%s10426_s1 + $0xb8] sm:$0xff]  ;;  %v5584_v38 = vld [vmem:[%s10426_s1 + $0x4a0] sm:$0xff] }
 0x103   : > { %1407 = vmatmul.mubr.f32.gmra.mxu1 %v432_v32  ;;  %5645 = vmatprep.mubr.msk.f32.mxu0 %vm743_vm0, %v5567_v2  ;;  %v452_v32 = vld [vmem:[%s10426_s1 + $0xb0] sm:$0xff] }
 0x104   : > { %5678 = vmatprep.mubr.msk.f32.mxu1 %vm743_vm0, %v435_v4  ;;  %1976 = vmatpush1.msra.mxu0 %v6771_v58  ;;  %v6921_v47 = vpop.permute.xlu0 %1749  ;;  %v445_v58 = vld [vmem:[%s10426_s1 + $0x78] sm:$0xff]  ;;  %v455_v4 = vld [vmem:[%s10426_s1 + $0xc8] sm:$0xff] }
 0x105   : > { %1977 = vmatprep.subr.mxu0 %v6199_v0  ;;  %6147 = vset.pattern.permute.xlu1 %v6202_v40  ;;  %v1788_v40 = vpop.permute.xlu1 %1787 }
 0x106   : > { %1038 = vmatmul.mubr.f32.gmra.mxu0 %v5566_v5  ;;  %2391 = vperm.xlu0 %6146, %v2329_v41   ;;  %v5586_v5 = vld [vmem:[%s10426_s1 + $0x4b0] sm:$0xff]  ;;  %v454_v41 = vld [vmem:[%s10426_s1 + $0xc0] sm:$0xff] }
 0x107   : > { %1412 = vmatmul.mubr.f32.gmra.mxu1 %v434_v6  ;;  %5646 = vmatprep.mubr.msk.f32.mxu0 %vm743_vm0, %v5569_v42  ;;  %v5589_v6 = vld [vmem:[%s10426_s1 + $0x4c8] sm:$0xff]  ;;  %v457_v42 = vld [vmem:[%s10426_s1 + $0xd8] sm:$0xff] }
 0x108   : > { %5679 = vmatprep.mubr.msk.f32.mxu1 %vm743_vm0, %v437_v43  ;;  %1978 = vmatpush1.msra.mxu0 %v6791_v61  ;;  %v1746_v18 = vpop.permute.xlu0 %1745  ;;  %v5579_v61 = vld [vmem:[%s10426_s1 + $0x478] sm:$0xff]  ;;  %v5588_v43 = vld [vmem:[%s10426_s1 + $0x4c0] sm:$0xff] }
 0x109   : > { %1979 = vmatprep.subr.mxu0 %v6199_v0  ;;  %2381 = vperm.xlu1 %6147, %v2327_v44   ;;  %v1784_v44 = vpop.permute.xlu1 %1783 }
 0x10a   : > { %1043 = vmatmul.mubr.f32.gmra.mxu0 %v5568_v9  ;;  %2401 = vperm.xlu0 %6146, %v2331_v45   ;;  %v5591_v9 = vld [vmem:[%s10426_s1 + $0x4d8] sm:$0xff]  ;;  %v459_v45 = vld [vmem:[%s10426_s1 + $0xe8] sm:$0xff] }
 0x10b   : > { %1417 = vmatmul.mubr.f32.gmra.mxu1 %v436_v10  ;;  %5647 = vmatprep.mubr.msk.f32.mxu0 %vm743_vm0, %v5571_v46  ;;  %v5590_v10 = vld [vmem:[%s10426_s1 + $0x4d0] sm:$0xff]  ;;  %v458_v46 = vld [vmem:[%s10426_s1 + $0xe0] sm:$0xff] }
 0x10c   : > { %5680 = vmatprep.mubr.msk.f32.mxu1 %vm743_vm0, %v439_v11  ;;  %1980 = vmatpush1.msra.mxu0 %v6802_v63  ;;  %v1742_v59 = vpop.permute.xlu0 %1741  ;;  %v446_v63 = vld [vmem:[%s10426_s1 + $0x80] sm:$0xff] }
 0x10d   : > { %1981 = vmatprep.subr.mxu0 %v6199_v0  ;;  %2386 = vperm.xlu1 %6147, %v2328_v12   ;;  %v461_v12 = vld [vmem:[%s10426_s1 + $0xf8] sm:$0xff] }
 0x10e   : > { %1048 = vmatmul.mubr.f32.gmra.mxu0 %v5570_v48  ;;  %2411 = vperm.xlu0 %6146, %v2333_v13   ;;  %v1780_v48 = vpop.permute.xlu1 %1779  ;;  %v5592_v13 = vld [vmem:[%s10426_s1 + $0x4e0] sm:$0xff] }
 0x10f   : > { %1422 = vmatmul.mubr.f32.gmra.mxu1 %v438_v49  ;;  %5648 = vmatprep.mubr.msk.f32.mxu0 %vm743_vm0, %v5573_v14  ;;  %v460_v49 = vld [vmem:[%s10426_s1 + $0xf0] sm:$0xff]  ;;  %v5595_v14 = vld [vmem:[%s10426_s1 + $0x4f8] sm:$0xff] }
 0x110   : > { %5681 = vmatprep.mubr.msk.f32.mxu1 %vm743_vm0, %v441_v15  ;;  %1982 = vmatpush1.msra.mxu0 %v6822_v33  ;;  %v1798_v27 = vpop.permute.xlu0 %1797  ;;  %v5580_v33 = vld [vmem:[%s10426_s1 + $0x480] sm:$0xff] }
 0x111   : > { %1983 = vmatprep.subr.mxu0 %v6199_v0  ;;  %2396 = vperm.xlu1 %6147, %v2330_v51   ;;  %v5594_v51 = vld [vmem:[%s10426_s1 + $0x4f0] sm:$0xff] }
 0x112   : > { %1053 = vmatmul.mubr.f32.gmra.mxu0 %v5572_v16  ;;  %2421 = vperm.xlu0 %6146, %v2335_v52   ;;  %v462_v16 = vld [vmem:[%s10426_s1 + $0x100] sm:$0xff]  ;;  %v1776_v52 = vpop.permute.xlu1 %1775 }
 0x113   : > { %1427 = vmatmul.mubr.f32.gmra.mxu1 %v440_v17  ;;  %5649 = vmatprep.mubr.msk.f32.mxu0 %vm743_vm0, %v5575_v53  ;;  %v5597_v17 = vld [vmem:[%s10426_s1 + $0x508] sm:$0xff]  ;;  %v465_v53 = vld [vmem:[%s10426_s1 + $0x118] sm:$0xff] }
 0x114   : > { %5682 = vmatprep.mubr.msk.f32.mxu1 %vm743_vm0, %v443_v54  ;;  %1984 = vmatpush1.msra.mxu0 %v6833_v35  ;;  %v451_v35 = vld [vmem:[%s10426_s1 + $0xa8] sm:$0xff]  ;;  %v1794_v36 = vpop.permute.xlu0 %1793 }
 0x115   : > { %1985 = vmatprep.subr.mxu0 %v6199_v0  ;;  %2406 = vperm.xlu1 %6147, %v2332_v55   ;;  %v467_v55 = vld [vmem:[%s10426_s1 + $0x128] sm:$0xff] }
 0x116   : > { %1058 = vmatmul.mubr.f32.gmra.mxu0 %v5574_v20  ;;  %2431 = vperm.xlu0 %6146, %v2337_v56   ;;  %v1772_v20 = vpop.permute.xlu1 %1771  ;;  %v5725_v56 = vld [vmem:[%s10426_s1 + $0x608] sm:$0xff] }
 0x117   : > { %1432 = vmatmul.mubr.f32.gmra.mxu1 %v442_v57  ;;  %1986 = vmatpush1.msra.mxu0 %v6853_v31  ;;  %v5585_v31 = vld [vmem:[%s10426_s1 + $0x4a8] sm:$0xff]  ;;  %v5724_v57 = vld [vmem:[%s10426_s1 + $0x600] sm:$0xff] }
 0x118   : > { %1987 = vmatprep.subr.mxu0 %v6199_v0  ;;  %5650 = vmatprep.mubr.msk.f32.mxu0 %vm743_vm0, %v5577_v21  ;;  %v1790_v2 = vpop.permute.xlu0 %1789  ;;  %v2339_v21 = vld [vmem:[%s10427_s2 + $0x68] sm:$0xff] }
 0x119   : > { %5683 = vmatprep.mubr.msk.f32.mxu1 %vm743_vm0, %v445_v58  ;;  %1988 = vmatpush1.msra.mxu0 %v6870_v39  ;;  %v5587_v39 = vld [vmem:[%s10426_s1 + $0x4b8] sm:$0xff]  ;;  %v466_v58 = vld [vmem:[%s10426_s1 + $0x120] sm:$0xff] }
 0x11a   : > { %1063 = vmatmul.mubr.f32.gmra.mxu0 %v5576_v22  ;;  %1989 = vmatprep.subr.mxu0 %v6199_v0  ;;  %v469_v22 = vld [vmem:[%s10426_s1 + $0x138] sm:$0xff] }
 0x11b   : > { %1437 = vmatmul.mubr.f32.gmra.mxu1 %v444_v60  ;;  %1990 = vmatpush1.msra.mxu0 %v6891_v7  ;;  %v5726_v60 = vld [vmem:[%s10426_s1 + $0x610] sm:$0xff] }
 0x11c   : > { %1991 = vmatprep.subr.mxu0 %v6199_v0  ;;  %5651 = vmatprep.mubr.msk.f32.mxu0 %vm743_vm0, %v5579_v61  ;;  %v1786_v7 = vpop.permute.xlu0 %1785  ;;  %v468_v61 = vld [vmem:[%s10426_s1 + $0x130] sm:$0xff] }
 0x11d   : > { %5684 = vmatprep.mubr.msk.f32.mxu1 %vm743_vm0, %v447_v62  ;;  %1992 = vmatpush1.msra.mxu0 %v6897_v8  ;;  %v456_v8 = vld [vmem:[%s10426_s1 + $0xd0] sm:$0xff] }
 0x11e   : > { %1068 = vmatmul.mubr.f32.gmra.mxu0 %v5578_v24  ;;  %1993 = vmatprep.subr.mxu0 %v6199_v0  ;;  %v2336_v62 = vld [vmem:[%s10427_s2 + $0x50] sm:$0xff]  ;;  %v471_v24 = vld [vmem:[%s10426_s1 + $0x148] sm:$0xff] }
 0x11f   : > { %1442 = vmatmul.mubr.f32.gmra.mxu1 %v446_v63  ;;  %1994 = vmatpush1.msra.mxu0 %v6921_v47  ;;  %v5593_v47 = vld [vmem:[%s10426_s1 + $0x4e8] sm:$0xff] }
 0x120   : > { %1995 = vmatprep.subr.mxu0 %v6199_v0  ;;  %5652 = vmatprep.mubr.msk.f32.mxu0 %vm743_vm0, %v5581_v25  ;;  %v1782_v11 = vpop.permute.xlu0 %1781  ;;  %v5729_v63 = vld [vmem:[%s10426_s1 + $0x628] sm:$0xff]  ;;  %v2342_v25 = vld [vmem:[%s10427_s2 + $0x80] sm:$0xff] }
 0x121   : > { %5685 = vmatprep.mubr.msk.f32.mxu1 %vm743_vm0, %v449_v28  ;;  %1996 = vmatpush1.msra.mxu0 %v6941_v50  ;;  %v463_v50 = vld [vmem:[%s10426_s1 + $0x108] sm:$0xff]  ;;  %v470_v28 = vld [vmem:[%s10426_s1 + $0x140] sm:$0xff] }
 0x122   : > { %1073 = vmatmul.mubr.f32.gmra.mxu0 %v5580_v33  ;;  %1997 = vmatprep.subr.mxu0 %v6199_v0  ;;  %v473_v33 = vld [vmem:[%s10426_s1 + $0x158] sm:$0xff] }
 0x123   : > { %1447 = vmatmul.mubr.f32.gmra.mxu1 %v448_v34  ;;  %1998 = vmatpush1.msra.mxu0 %v1746_v18  ;;  %v5596_v18 = vld [vmem:[%s10426_s1 + $0x500] sm:$0xff]  ;;  %v5731_v34 = vld [vmem:[%s10426_s1 + $0x638] sm:$0xff] }
 0x124   : > { %1999 = vmatprep.subr.mxu0 %v6199_v0  ;;  %5653 = vmatprep.mubr.msk.f32.mxu0 %vm743_vm0, %v5583_v29  ;;  %v1778_v15 = vpop.permute.xlu0 %1777  ;;  %v5730_v29 = vld [vmem:[%s10426_s1 + $0x630] sm:$0xff] }
 0x125   : > { %5686 = vmatprep.mubr.msk.f32.mxu1 %vm743_vm0, %v451_v35  ;;  %2000 = vmatpush1.msra.mxu0 %v6969_v19  ;;  %v464_v19 = vld [vmem:[%s10426_s1 + $0x110] sm:$0xff] }
 0x126   : > { %1078 = vmatmul.mubr.f32.gmra.mxu0 %v5582_v30  ;;  %2001 = vmatprep.subr.mxu0 %v6199_v0  ;;  %v2344_v35 = vld [vmem:[%s10427_s2 + $0x90] sm:$0xff]  ;;  %v2341_v30 = vld [vmem:[%s10427_s2 + $0x78] sm:$0xff] }
 0x127   : > { %1452 = vmatmul.mubr.f32.gmra.mxu1 %v450_v1  ;;  %2002 = vmatpush1.msra.mxu0 %v1742_v59  ;;  %v2334_v59 = vld [vmem:[%s10427_s2 + $0x40] sm:$0xff]  ;;  %v475_v1 = vld [vmem:[%s10426_s1 + $0x168] sm:$0xff] }
 0x128   : > { %2003 = vmatprep.subr.mxu0 %v6199_v0  ;;  %5654 = vmatprep.mubr.msk.f32.mxu0 %vm743_vm0, %v5585_v31  ;;  %v1774_v54 = vpop.permute.xlu0 %1773  ;;  %v5732_v31 = vld [vmem:[%s10426_s1 + $0x640] sm:$0xff] }
 0x129   : > { %5687 = vmatprep.mubr.msk.f32.mxu1 %vm743_vm0, %v453_v3  ;;  %2004 = vmatpush1.msra.mxu0 %v1740_v23  ;;  %v2340_v23 = vld [vmem:[%s10427_s2 + $0x70] sm:$0xff]  ;;  %v2346_v3 = vld [vmem:[%s10427_s2 + $0xa0] sm:$0xff] }
 0x12a   : > { %1083 = vmatmul.mubr.f32.gmra.mxu0 %v5584_v38  ;;  %2009 = vmatprep.subr.mxu0 %v6199_v0  ;;  %v474_v38 = vld [vmem:[%s10426_s1 + $0x160] sm:$0xff] }
 0x12b   : > { %1457 = vmatmul.mubr.f32.gmra.mxu1 %v452_v32  ;;  %2010 = vmatpush2.msra.mxu0 %v1798_v27  ;;  %v5728_v27 = vld [vmem:[%s10426_s1 + $0x620] sm:$0xff]  ;;  %v2343_v32 = vld [vmem:[%s10427_s2 + $0x88] sm:$0xff] }
 0x12c   : > { %2011 = vmatprep.subr.mxu0 %v6199_v0  ;;  %5655 = vmatprep.mubr.msk.f32.mxu0 %vm743_vm0, %v5587_v39  ;;  %v5735_v39 = vld [vmem:[%s10426_s1 + $0x658] sm:$0xff] }
 0x12d   : > { %5688 = vmatprep.mubr.msk.f32.mxu1 %vm743_vm0, %v455_v4  ;;  %2012 = vmatpush2.msra.mxu0 %v1796_v26  ;;  %v2338_v26 = vld [vmem:[%s10427_s2 + $0x60] sm:$0xff]  ;;  %v5734_v4 = vld [vmem:[%s10426_s1 + $0x650] sm:$0xff] }
 0x12e   : > { %1088 = vmatmul.mubr.f32.gmra.mxu0 %v5586_v5  ;;  %2013 = vmatprep.subr.mxu0 %v6199_v0  ;;  %v476_v5 = vld [vmem:[%s10426_s1 + $0x170] sm:$0xff] }
 0x12f   : > { %1462 = vmatmul.mubr.f32.gmra.mxu1 %v454_v41  ;;  %2014 = vmatpush2.msra.mxu0 %v1794_v36  ;;  %v472_v36 = vld [vmem:[%s10426_s1 + $0x150] sm:$0xff]  ;;  %v2345_v41 = vld [vmem:[%s10427_s2 + $0x98] sm:$0xff] }
 0x130   : > { %2015 = vmatprep.subr.mxu0 %v6199_v0  ;;  %5656 = vmatprep.mubr.msk.f32.mxu0 %vm743_vm0, %v5589_v6  ;;  %v479_v6 = vld [vmem:[%s10426_s1 + $0x188] sm:$0xff] }
 0x131   : > { %5689 = vmatprep.mubr.msk.f32.mxu1 %vm743_vm0, %v457_v42  ;;  %2016 = vmatpush2.msra.mxu0 %v1792_v37  ;;  %v5733_v37 = vld [vmem:[%s10426_s1 + $0x648] sm:$0xff] }
 0x132   : > { %1093 = vmatmul.mubr.f32.gmra.mxu0 %v5588_v43  ;;  %2017 = vmatprep.subr.mxu0 %v6199_v0  ;;  %v5737_v42 = vld [vmem:[%s10426_s1 + $0x668] sm:$0xff]  ;;  %v2350_v43 = vld [vmem:[%s10427_s2 + $0xc0] sm:$0xff] }
 0x133   : > { %1467 = vmatmul.mubr.f32.gmra.mxu1 %v456_v8  ;;  %2018 = vmatpush2.msra.mxu0 %v1790_v2  ;;  %v477_v2 = vld [vmem:[%s10426_s1 + $0x178] sm:$0xff]  ;;  %v478_v8 = vld [vmem:[%s10426_s1 + $0x180] sm:$0xff] }
 0x134   : > { %2019 = vmatprep.subr.mxu0 %v6199_v0  ;;  %5657 = vmatprep.mubr.msk.f32.mxu0 %vm743_vm0, %v5591_v9  ;;  %v481_v9 = vld [vmem:[%s10426_s1 + $0x198] sm:$0xff] }
 0x135   : > { %5690 = vmatprep.mubr.msk.f32.mxu1 %vm743_vm0, %v459_v45  ;;  %2020 = vmatpush2.msra.mxu0 %v1788_v40  ;;  %v2348_v40 = vld [vmem:[%s10427_s2 + $0xb0] sm:$0xff]  ;;  %v5739_v45 = vld [vmem:[%s10426_s1 + $0x678] sm:$0xff] }
 0x136   : > { %1098 = vmatmul.mubr.f32.gmra.mxu0 %v5590_v10  ;;  %2021 = vmatprep.subr.mxu0 %v6199_v0  ;;  %v5738_v10 = vld [vmem:[%s10426_s1 + $0x670] sm:$0xff] }
 0x137   : > { %1472 = vmatmul.mubr.f32.gmra.mxu1 %v458_v46  ;;  %2022 = vmatpush2.msra.mxu0 %v1786_v7  ;;  %v5736_v7 = vld [vmem:[%s10426_s1 + $0x660] sm:$0xff]  ;;  %v2352_v46 = vld [vmem:[%s10427_s2 + $0xd0] sm:$0xff] }
 0x138   : > { %2023 = vmatprep.subr.mxu0 %v6199_v0  ;;  %5658 = vmatprep.mubr.msk.f32.mxu0 %vm743_vm0, %v5593_v47  ;;  %v2349_v47 = vld [vmem:[%s10427_s2 + $0xb8] sm:$0xff] }
 0x139   : > { %5691 = vmatprep.mubr.msk.f32.mxu1 %vm743_vm0, %v461_v12  ;;  %2024 = vmatpush2.msra.mxu0 %v1784_v44  ;;  %v2347_v44 = vld [vmem:[%s10427_s2 + $0xa8] sm:$0xff] }
 0x13a   : > { %1103 = vmatmul.mubr.f32.gmra.mxu0 %v5592_v13  ;;  %2025 = vmatprep.subr.mxu0 %v6199_v0  ;;  %v483_v12 = vld [vmem:[%s10426_s1 + $0x1a8] sm:$0xff]  ;;  %v5740_v13 = vld [vmem:[%s10426_s1 + $0x680] sm:$0xff] }
 0x13b   : > { %1477 = vmatmul.mubr.f32.gmra.mxu1 %v460_v49  ;;  %2026 = vmatpush2.msra.mxu0 %v1782_v11  ;;  %v480_v11 = vld [vmem:[%s10426_s1 + $0x190] sm:$0xff]  ;;  %v2354_v49 = vld [vmem:[%s10427_s2 + $0xe0] sm:$0xff] }
 0x13c   : > { %2027 = vmatprep.subr.mxu0 %v6199_v0  ;;  %5659 = vmatprep.mubr.msk.f32.mxu0 %vm743_vm0, %v5595_v14  ;;  %v482_v14 = vld [vmem:[%s10426_s1 + $0x1a0] sm:$0xff] }
 0x13d   : > { %5692 = vmatprep.mubr.msk.f32.mxu1 %vm743_vm0, %v463_v50  ;;  %2028 = vmatpush2.msra.mxu0 %v1780_v48  ;;  %v5741_v48 = vld [vmem:[%s10426_s1 + $0x688] sm:$0xff] }
 0x13e   : > { %1108 = vmatmul.mubr.f32.gmra.mxu0 %v5594_v51  ;;  %2029 = vmatprep.subr.mxu0 %v6199_v0  ;;  %v2351_v50 = vld [vmem:[%s10427_s2 + $0xc8] sm:$0xff]  ;;  %v5743_v51 = vld [vmem:[%s10426_s1 + $0x698] sm:$0xff] }
 0x13f   : > { %1482 = vmatmul.mubr.f32.gmra.mxu1 %v462_v16  ;;  %2030 = vmatpush2.msra.mxu0 %v1778_v15  ;;  %v485_v15 = vld [vmem:[%s10426_s1 + $0x1b8] sm:$0xff]  ;;  %v5742_v16 = vld [vmem:[%s10426_s1 + $0x690] sm:$0xff] }
 0x140   : > { %2031 = vmatprep.subr.mxu0 %v6199_v0  ;;  %5660 = vmatprep.mubr.msk.f32.mxu0 %vm743_vm0, %v5597_v17  ;;  %v484_v17 = vld [vmem:[%s10426_s1 + $0x1b0] sm:$0xff] }
 0x141   : > { %5693 = vmatprep.mubr.msk.f32.mxu1 %vm743_vm0, %v465_v53  ;;  %2032 = vmatpush2.msra.mxu0 %v1776_v52  ;;  %v2356_v52 = vld [vmem:[%s10427_s2 + $0xf0] sm:$0xff]  ;;  %v2353_v53 = vld [vmem:[%s10427_s2 + $0xd8] sm:$0xff] }
 0x142   : > { %1113 = vmatmul.mubr.f32.gmra.mxu0 %v5596_v18  ;;  %2033 = vmatprep.subr.mxu0 %v6199_v0  ;;  %v487_v18 = vld [vmem:[%s10426_s1 + $0x1c8] sm:$0xff] }
 0x143   : > { %1487 = vmatmul.mubr.f32.gmra.mxu1 %v464_v19  ;;  %2034 = vmatpush2.msra.mxu0 %v1774_v54  ;;  %v5745_v54 = vld [vmem:[%s10426_s1 + $0x6a8] sm:$0xff]  ;;  %v5744_v19 = vld [vmem:[%s10426_s1 + $0x6a0] sm:$0xff] }
 0x144   : > { %2035 = vmatprep.subr.mxu0 %v6199_v0  ;;  %5694 = vmatprep.mubr.msk.f32.mxu1 %vm743_vm0, %v467_v55  ;;  %v5727_v0 = vld [vmem:[%s10426_s1 + $0x618] sm:$0xff]  ;;  %v2358_v55 = vld [vmem:[%s10427_s2 + $0x100] sm:$0xff] }
 0x145   : > { %2036 = vmatpush2.msra.mxu0 %v1772_v20  ;;  %5820 = vmatprep.mubr.msk.f32.mxu0 %vm743_vm0, %v5725_v56  ;;  %v486_v20 = vld [vmem:[%s10426_s1 + $0x1c0] sm:$0xff]  ;;  %v2355_v56 = vld [vmem:[%s10427_s2 + $0xe8] sm:$0xff] }
 0x146   : > { %2038 = vmatmul.mubr.f32.vlgmr.msra.gmra.mxu0 %v5724_v57  ;;  %2441 = vperm.xlu0 %6146, %v2339_v21   ;;  %v489_v57 = vld [vmem:[%s10426_s1 + $0x1d8] sm:$0xff] }
 0x147   : > { %1492 = vmatmul.mubr.f32.gmra.mxu1 %v466_v58  ;;  %2416 = vperm.xlu1 %6147, %v2334_v59   ;;  %v5747_v21 = vld [vmem:[%s10426_s1 + $0x6b8] sm:$0xff]  ;;  %v5746_v58 = vld [vmem:[%s10426_s1 + $0x6b0] sm:$0xff] }
 0x148   : > { %5695 = vmatprep.mubr.msk.f32.mxu1 %vm743_vm0, %v469_v22  ;;  %5821 = vmatprep.mubr.msk.f32.mxu0 %vm743_vm0, %v5727_v0  ;;  %v2360_v59 = vld [vmem:[%s10427_s2 + $0x110] sm:$0xff]  ;;  %v2357_v0 = vld [vmem:[%s10427_s2 + $0xf8] sm:$0xff] }
 0x149   : > { %v488_v22 = vld [vmem:[%s10426_s1 + $0x1d0] sm:$0xff] }
 0x14a   : > { %2043 = vmatmul.mubr.f32.gmra.mxu0 %v5726_v60  ;;  %2446 = vperm.xlu0 %6146, %v2340_v23   ;;  %v491_v60 = vld [vmem:[%s10426_s1 + $0x1e8] sm:$0xff] }
 0x14b   : > { %1497 = vmatmul.mubr.f32.gmra.mxu1 %v468_v61  ;;  %2426 = vperm.xlu1 %6147, %v2336_v62   ;;  %v5749_v23 = vld [vmem:[%s10426_s1 + $0x6c8] sm:$0xff]  ;;  %v5748_v61 = vld [vmem:[%s10426_s1 + $0x6c0] sm:$0xff] }
 0x14c   : > { %5696 = vmatprep.mubr.msk.f32.mxu1 %vm743_vm0, %v471_v24  ;;  %5822 = vmatprep.mubr.msk.f32.mxu0 %vm743_vm0, %v5729_v63  ;;  %v2362_v62 = vld [vmem:[%s10427_s2 + $0x120] sm:$0xff]  ;;  %v2359_v63 = vld [vmem:[%s10427_s2 + $0x108] sm:$0xff] }
 0x14d   : > { %v490_v24 = vld [vmem:[%s10426_s1 + $0x1e0] sm:$0xff] }
 0x14e   : > { %2048 = vmatmul.mubr.f32.gmra.mxu0 %v5728_v27  ;;  %2456 = vperm.xlu0 %6146, %v2342_v25   ;;  %v493_v27 = vld [vmem:[%s10426_s1 + $0x1f8] sm:$0xff] }
 0x14f   : > { %1502 = vmatmul.mubr.f32.gmra.mxu1 %v470_v28  ;;  %2436 = vperm.xlu1 %6147, %v2338_v26   ;;  %v5751_v25 = vld [vmem:[%s10426_s1 + $0x6d8] sm:$0xff]  ;;  %v5750_v28 = vld [vmem:[%s10426_s1 + $0x6d0] sm:$0xff] }
 0x150   : > { %5697 = vmatprep.mubr.msk.f32.mxu1 %vm743_vm0, %v473_v33  ;;  %5823 = vmatprep.mubr.msk.f32.mxu0 %vm743_vm0, %v5731_v34  ;;  %v2364_v26 = vld [vmem:[%s10427_s2 + $0x130] sm:$0xff]  ;;  %v2361_v34 = vld [vmem:[%s10427_s2 + $0x118] sm:$0xff] }
 0x151   : > { %v492_v33 = vld [vmem:[%s10426_s1 + $0x1f0] sm:$0xff] }
 0x152   : > { %2053 = vmatmul.mubr.f32.gmra.mxu0 %v5730_v29  ;;  %2466 = vperm.xlu0 %6146, %v2344_v35   ;;  %v495_v29 = vld [vmem:[%s10426_s1 + $0x208] sm:$0xff] }
 0x153   : > { %1507 = vmatmul.mubr.f32.gmra.mxu1 %v472_v36  ;;  %2451 = vperm.xlu1 %6147, %v2341_v30   ;;  %v5753_v35 = vld [vmem:[%s10426_s1 + $0x6e8] sm:$0xff]  ;;  %v5752_v36 = vld [vmem:[%s10426_s1 + $0x6e0] sm:$0xff] }
 0x154   : > { %5698 = vmatprep.mubr.msk.f32.mxu1 %vm743_vm0, %v475_v1  ;;  %5824 = vmatprep.mubr.msk.f32.mxu0 %vm743_vm0, %v5733_v37  ;;  %v2366_v30 = vld [vmem:[%s10427_s2 + $0x140] sm:$0xff]  ;;  %v2363_v37 = vld [vmem:[%s10427_s2 + $0x128] sm:$0xff] }
 0x155   : > { %v494_v1 = vld [vmem:[%s10426_s1 + $0x200] sm:$0xff] }
 0x156   : > { %2058 = vmatmul.mubr.f32.gmra.mxu0 %v5732_v31  ;;  %2476 = vperm.xlu0 %6146, %v2346_v3   ;;  %v497_v31 = vld [vmem:[%s10426_s1 + $0x218] sm:$0xff] }
 0x157   : > { %1512 = vmatmul.mubr.f32.gmra.mxu1 %v474_v38  ;;  %2461 = vperm.xlu1 %6147, %v2343_v32   ;;  %v5755_v3 = vld [vmem:[%s10426_s1 + $0x6f8] sm:$0xff]  ;;  %v5754_v38 = vld [vmem:[%s10426_s1 + $0x6f0] sm:$0xff] }
 0x158   : > { %5699 = vmatprep.mubr.msk.f32.mxu1 %vm743_vm0, %v477_v2  ;;  %5825 = vmatprep.mubr.msk.f32.mxu0 %vm743_vm0, %v5735_v39  ;;  %v2368_v32 = vld [vmem:[%s10427_s2 + $0x150] sm:$0xff]  ;;  %v2365_v39 = vld [vmem:[%s10427_s2 + $0x138] sm:$0xff] }
 0x159   : > { %v496_v2 = vld [vmem:[%s10426_s1 + $0x210] sm:$0xff] }
 0x15a   : > { %2063 = vmatmul.mubr.f32.gmra.mxu0 %v5734_v4  ;;  %2486 = vperm.xlu0 %6146, %v2348_v40   ;;  %v499_v4 = vld [vmem:[%s10426_s1 + $0x228] sm:$0xff] }
 0x15b   : > { %1517 = vmatmul.mubr.f32.gmra.mxu1 %v476_v5  ;;  %2471 = vperm.xlu1 %6147, %v2345_v41   ;;  %v5757_v40 = vld [vmem:[%s10426_s1 + $0x708] sm:$0xff] }
 0x15c   : > { %5700 = vmatprep.mubr.msk.f32.mxu1 %vm743_vm0, %v479_v6  ;;  %5826 = vmatprep.mubr.msk.f32.mxu0 %vm743_vm0, %v5737_v42  ;;  %v5756_v6 = vld [vmem:[%s10426_s1 + $0x700] sm:$0xff] }
 0x15d   : > { %v2370_v42 = vld [vmem:[%s10427_s2 + $0x160] sm:$0xff] }
 0x15e   : > { %2068 = vmatmul.mubr.f32.gmra.mxu0 %v5736_v7  ;;  %2496 = vperm.xlu0 %6146, %v2350_v43  }
 0x15f   : > { %1522 = vmatmul.mubr.f32.gmra.mxu1 %v478_v8  ;;  %2481 = vperm.xlu1 %6147, %v2347_v44   ;;  %v498_v8 = vld [vmem:[%s10426_s1 + $0x220] sm:$0xff]  ;;  %v2367_v44 = vld [vmem:[%s10427_s2 + $0x148] sm:$0xff] }
 0x160   : > { %5701 = vmatprep.mubr.msk.f32.mxu1 %vm743_vm0, %v481_v9  ;;  %5827 = vmatprep.mubr.msk.f32.mxu0 %vm743_vm0, %v5739_v45  ;;  %v501_v9 = vld [vmem:[%s10426_s1 + $0x238] sm:$0xff] }
 0x161   : > { %v5759_v45 = vld [vmem:[%s10426_s1 + $0x718] sm:$0xff] }
 0x162   : > { %2073 = vmatmul.mubr.f32.gmra.mxu0 %v5738_v10  ;;  %2506 = vperm.xlu0 %6146, %v2352_v46  }
 0x163   : > { %1527 = vmatmul.mubr.f32.gmra.mxu1 %v480_v11  ;;  %2491 = vperm.xlu1 %6147, %v2349_v47   ;;  %v5758_v11 = vld [vmem:[%s10426_s1 + $0x710] sm:$0xff] }
 0x164   : > { %5702 = vmatprep.mubr.msk.f32.mxu1 %vm743_vm0, %v483_v12  ;;  %5828 = vmatprep.mubr.msk.f32.mxu0 %vm743_vm0, %v5741_v48  ;;  %v2372_v47 = vld [vmem:[%s10427_s2 + $0x170] sm:$0xff] }
 0x165   : > { %v500_v48 = vld [vmem:[%s10426_s1 + $0x230] sm:$0xff] }
 0x166   : > { %2078 = vmatmul.mubr.f32.gmra.mxu0 %v5740_v13  ;;  %2516 = vperm.xlu0 %6146, %v2354_v49   ;;  %v2369_v13 = vld [vmem:[%s10427_s2 + $0x158] sm:$0xff] }
 0x167   : > { %1532 = vmatmul.mubr.f32.gmra.mxu1 %v482_v14  ;;  %2501 = vperm.xlu1 %6147, %v2351_v50   ;;  %v503_v14 = vld [vmem:[%s10426_s1 + $0x248] sm:$0xff] }
 0x168   : > { %5703 = vmatprep.mubr.msk.f32.mxu1 %vm743_vm0, %v485_v15  ;;  %5829 = vmatprep.mubr.msk.f32.mxu0 %vm743_vm0, %v5743_v51  ;;  %v5761_v50 = vld [vmem:[%s10426_s1 + $0x728] sm:$0xff] }
 0x16a   : > { %2083 = vmatmul.mubr.f32.gmra.mxu0 %v5742_v16  ;;  %2526 = vperm.xlu0 %6146, %v2356_v52   ;;  %v5760_v16 = vld [vmem:[%s10426_s1 + $0x720] sm:$0xff] }
 0x16b   : > { %1537 = vmatmul.mubr.f32.gmra.mxu1 %v484_v17  ;;  %2511 = vperm.xlu1 %6147, %v2353_v53   ;;  %v502_v17 = vld [vmem:[%s10426_s1 + $0x240] sm:$0xff]  ;;  %v2371_v53 = vld [vmem:[%s10427_s2 + $0x168] sm:$0xff] }
 0x16c   : > { %5704 = vmatprep.mubr.msk.f32.mxu1 %vm743_vm0, %v487_v18  ;;  %5830 = vmatprep.mubr.msk.f32.mxu0 %vm743_vm0, %v5745_v54  ;;  %v505_v54 = vld [vmem:[%s10426_s1 + $0x258] sm:$0xff] }
 0x16e   : > { %2088 = vmatmul.mubr.f32.gmra.mxu0 %v5744_v19  ;;  %2536 = vperm.xlu0 %6146, %v2358_v55   ;;  %v5763_v19 = vld [vmem:[%s10426_s1 + $0x738] sm:$0xff] }
 0x16f   : > { %1542 = vmatmul.mubr.f32.gmra.mxu1 %v486_v20  ;;  %2521 = vperm.xlu1 %6147, %v2355_v56   ;;  %v5762_v56 = vld [vmem:[%s10426_s1 + $0x730] sm:$0xff] }
 0x170   : > { %5705 = vmatprep.mubr.msk.f32.mxu1 %vm743_vm0, %v489_v57  ;;  %5831 = vmatprep.mubr.msk.f32.mxu0 %vm743_vm0, %v5747_v21  ;;  %v504_v21 = vld [vmem:[%s10426_s1 + $0x250] sm:$0xff] }
 0x172   : > { %2093 = vmatmul.mubr.f32.gmra.mxu0 %v5746_v58  ;;  %2546 = vperm.xlu0 %6146, %v2360_v59   ;;  %v2373_v58 = vld [vmem:[%s10427_s2 + $0x178] sm:$0xff] }
 0x173   : > { %1547 = vmatmul.mubr.f32.gmra.mxu1 %v488_v22  ;;  %2531 = vperm.xlu1 %6147, %v2357_v0   ;;  %v507_v22 = vld [vmem:[%s10426_s1 + $0x268] sm:$0xff] }
 0x174   : > { %5706 = vmatprep.mubr.msk.f32.mxu1 %vm743_vm0, %v491_v60  ;;  %5832 = vmatprep.mubr.msk.f32.mxu0 %vm743_vm0, %v5749_v23  ;;  %v5765_v0 = vld [vmem:[%s10426_s1 + $0x748] sm:$0xff] }
 0x176   : > { %2098 = vmatmul.mubr.f32.gmra.mxu0 %v5748_v61  ;;  %2556 = vperm.xlu0 %6146, %v2362_v62   ;;  %v5764_v61 = vld [vmem:[%s10426_s1 + $0x740] sm:$0xff] }
 0x177   : > { %1552 = vmatmul.mubr.f32.gmra.mxu1 %v490_v24  ;;  %2541 = vperm.xlu1 %6147, %v2359_v63   ;;  %v506_v24 = vld [vmem:[%s10426_s1 + $0x260] sm:$0xff]  ;;  %v5767_v63 = vld [vmem:[%s10426_s1 + $0x758] sm:$0xff] }
 0x178   : > { %5707 = vmatprep.mubr.msk.f32.mxu1 %vm743_vm0, %v493_v27  ;;  %5833 = vmatprep.mubr.msk.f32.mxu0 %vm743_vm0, %v5751_v25  ;;  %v509_v25 = vld [vmem:[%s10426_s1 + $0x278] sm:$0xff] }
 0x17a   : > { %2103 = vmatmul.mubr.f32.gmra.mxu0 %v5750_v28  ;;  %2566 = vperm.xlu0 %6146, %v2364_v26  }
 0x17b   : > { %1557 = vmatmul.mubr.f32.gmra.mxu1 %v492_v33  ;;  %2551 = vperm.xlu1 %6147, %v2361_v34   ;;  %v5766_v33 = vld [vmem:[%s10426_s1 + $0x750] sm:$0xff] }
 0x17c   : > { %5708 = vmatprep.mubr.msk.f32.mxu1 %vm743_vm0, %v495_v29  ;;  %5834 = vmatprep.mubr.msk.f32.mxu0 %vm743_vm0, %v5753_v35  ;;  %v508_v29 = vld [vmem:[%s10426_s1 + $0x270] sm:$0xff]  ;;  %v5769_v35 = vld [vmem:[%s10426_s1 + $0x768] sm:$0xff] }
 0x17e   : > { %2108 = vmatmul.mubr.f32.gmra.mxu0 %v5752_v36  ;;  %2576 = vperm.xlu0 %6146, %v2366_v30   ;;  %v511_v30 = vld [vmem:[%s10426_s1 + $0x288] sm:$0xff] }
 0x17f   : > { %1562 = vmatmul.mubr.f32.gmra.mxu1 %v494_v1  ;;  %2561 = vperm.xlu1 %6147, %v2363_v37  }
 0x180   : > { %5709 = vmatprep.mubr.msk.f32.mxu1 %vm743_vm0, %v497_v31  ;;  %5835 = vmatprep.mubr.msk.f32.mxu0 %vm743_vm0, %v5755_v3  ;;  %v5768_v31 = vld [vmem:[%s10426_s1 + $0x760] sm:$0xff] }
 0x182   : > { %v7497_v5 = vpop.f32.mrf.mxu0  ;;  %v7499_v41 = vpop.f32.mrf.mxu1  ;;  %2113 = vmatmul.mubr.f32.gmra.mxu0 %v5754_v38  ;;  %2586 = vperm.xlu0 %6146, %v2368_v32   ;;  %v510_v38 = vld [vmem:[%s10426_s1 + $0x280] sm:$0xff]  ;;  %v5771_v32 = vld [vmem:[%s10426_s1 + $0x778] sm:$0xff] }
 0x183   : > { %1567 = vmatmul.mubr.f32.gmra.mxu1 %v496_v2  ;;  %2571 = vperm.xlu1 %6147, %v2365_v39   ;;  %v513_v39 = vld [vmem:[%s10426_s1 + $0x298] sm:$0xff] }
 0x184   : > { %v956_v7 = vpop.f32.mrf.mxu0  ;;  %v1121_v43 = vpop.f32.mrf.mxu1  ;;  %5710 = vmatprep.mubr.msk.f32.mxu1 %vm743_vm0, %v499_v4  ;;  %5836 = vmatprep.mubr.msk.f32.mxu0 %vm743_vm0, %v5757_v40 }
 0x185   : > { %v512_v7 = vld [vmem:[%s10426_s1 + $0x290] sm:$0xff]  ;;  %v5773_v43 = vld [vmem:[%s10426_s1 + $0x788] sm:$0xff] }
 0x186   : > { %v7521_v10 = vpop.f32.mrf.mxu0  ;;  %2118 = vmatmul.mubr.f32.gmra.mxu0 %v5756_v6  ;;  %2596 = vperm.xlu0 %6146, %v2370_v42   ;;  %v5770_v6 = vld [vmem:[%s10426_s1 + $0x770] sm:$0xff] }
 0x187   : > { %v7523_v46 = vpop.f32.mrf.mxu1  ;;  %1572 = vmatmul.mubr.f32.gmra.mxu1 %v498_v8  ;;  %2581 = vperm.xlu1 %6147, %v2367_v44   ;;  %v515_v44 = vld [vmem:[%s10426_s1 + $0x2a8] sm:$0xff] }
 0x188   : > { %v961_v12 = vpop.f32.mrf.mxu0  ;;  %5711 = vmatprep.mubr.msk.f32.mxu1 %vm743_vm0, %v501_v9  ;;  %5837 = vmatprep.mubr.msk.f32.mxu0 %vm743_vm0, %v5759_v45 }
 0x189   : > { %v1126_v49 = vpop.f32.mrf.mxu1  ;;  %v514_v12 = vld [vmem:[%s10426_s1 + $0x2a0] sm:$0xff] }
 0x18a   : > { %v7545_v15 = vpop.f32.mrf.mxu0  ;;  %2123 = vmatmul.mubr.f32.gmra.mxu0 %v5758_v11  ;;  %2606 = vperm.xlu0 %6146, %v2372_v47   ;;  %v5772_v11 = vld [vmem:[%s10426_s1 + $0x780] sm:$0xff]  ;;  %v517_v49 = vld [vmem:[%s10426_s1 + $0x2b8] sm:$0xff] }
 0x18b   : > { %v7547_v51 = vpop.f32.mrf.mxu1  ;;  %1577 = vmatmul.mubr.f32.gmra.mxu1 %v500_v48  ;;  %2591 = vperm.xlu1 %6147, %v2369_v13   ;;  %v5775_v48 = vld [vmem:[%s10426_s1 + $0x798] sm:$0xff] }
 0x18c   : > { %v966_v52 = vpop.f32.mrf.mxu0  ;;  %5712 = vmatprep.mubr.msk.f32.mxu1 %vm743_vm0, %v503_v14  ;;  %5838 = vmatprep.mubr.msk.f32.mxu0 %vm743_vm0, %v5761_v50 }
 0x18d   : > { %v1131_v18 = vpop.f32.mrf.mxu1 }
 0x18e   : > { %v7566_v55 = vpop.f32.mrf.mxu0  ;;  %2128 = vmatmul.mubr.f32.gmra.mxu0 %v5760_v16  ;;  %v5774_v16 = vld [vmem:[%s10426_s1 + $0x790] sm:$0xff] }
 0x18f   : > { %v7568_v20 = vpop.f32.mrf.mxu1  ;;  %1582 = vmatmul.mubr.f32.gmra.mxu1 %v502_v17  ;;  %2601 = vperm.xlu1 %6147, %v2371_v53   ;;  %v516_v17 = vld [vmem:[%s10426_s1 + $0x2b0] sm:$0xff]  ;;  %v5777_v53 = vld [vmem:[%s10426_s1 + $0x7a8] sm:$0xff] }
 0x190   : > { %v971_v57 = vpop.f32.mrf.mxu0  ;;  %5713 = vmatprep.mubr.msk.f32.mxu1 %vm743_vm0, %v505_v54  ;;  %5839 = vmatprep.mubr.msk.f32.mxu0 %vm743_vm0, %v5763_v19  ;;  %v519_v54 = vld [vmem:[%s10426_s1 + $0x2c8] sm:$0xff] }
 0x191   : > { %v1136_v59 = vpop.f32.mrf.mxu1  ;;  %v5776_v57 = vld [vmem:[%s10426_s1 + $0x7a0] sm:$0xff] }
 0x192   : > { %v7587_v60 = vpop.f32.mrf.mxu0  ;;  %2133 = vmatmul.mubr.f32.gmra.mxu0 %v5762_v56  ;;  %v5779_v59 = vld [vmem:[%s10426_s1 + $0x7b8] sm:$0xff] }
 0x193   : > { %v7589_v23 = vpop.f32.mrf.mxu1  ;;  %1587 = vmatmul.mubr.f32.gmra.mxu1 %v504_v21  ;;  %2611 = vperm.xlu1 %6147, %v2373_v58   ;;  %v518_v58 = vld [vmem:[%s10426_s1 + $0x2c0] sm:$0xff] }
 0x194   : > { %v976_v62 = vpop.f32.mrf.mxu0  ;;  %5714 = vmatprep.mubr.msk.f32.mxu1 %vm743_vm0, %v507_v22  ;;  %5840 = vmatprep.mubr.msk.f32.mxu0 %vm743_vm0, %v5765_v0  ;;  %v521_v0 = vld [vmem:[%s10426_s1 + $0x2d8] sm:$0xff] }
 0x195   : > { %v1141_v27 = vpop.f32.mrf.mxu1 }
 0x196   : > { %v7605_v28 = vpop.f32.mrf.mxu0  ;;  %2138 = vmatmul.mubr.f32.gmra.mxu0 %v5764_v61  ;;  %v520_v27 = vld [vmem:[%s10426_s1 + $0x2d0] sm:$0xff] }
 0x197   : > { %v7607_v26 = vpop.f32.mrf.mxu1  ;;  %1592 = vmatmul.mubr.f32.gmra.mxu1 %v506_v24  ;;  %5841 = vmatprep.mubr.msk.f32.mxu0 %vm743_vm0, %v5767_v63  ;;  %v5778_v24 = vld [vmem:[%s10426_s1 + $0x7b0] sm:$0xff] }
 0x198   : > { %v981_v34 = vpop.f32.mrf.mxu0  ;;  %5715 = vmatprep.mubr.msk.f32.mxu1 %vm743_vm0, %v509_v25  ;;  %v5781_v25 = vld [vmem:[%s10426_s1 + $0x7c8] sm:$0xff] }
 0x199   : > { %v1146_v36 = vpop.f32.mrf.mxu1  ;;  %v523_v34 = vld [vmem:[%s10426_s1 + $0x2e8] sm:$0xff] }
 0x19a   : > { %v7623_v1 = vpop.f32.mrf.mxu0  ;;  %2143 = vmatmul.mubr.f32.gmra.mxu0 %v5766_v33  ;;  %v5780_v36 = vld [vmem:[%s10426_s1 + $0x7c0] sm:$0xff] }
 0x19b   : > { %v7625_v37 = vpop.f32.mrf.mxu1  ;;  %1597 = vmatmul.mubr.f32.gmra.mxu1 %v508_v29  ;;  %5842 = vmatprep.mubr.msk.f32.mxu0 %vm743_vm0, %v5769_v35 }
 0x19c   : > { %v986_v3 = vpop.f32.mrf.mxu0  ;;  %5716 = vmatprep.mubr.msk.f32.mxu1 %vm743_vm0, %v511_v30 }
 0x19d   : > { %v1151_v2 = vpop.f32.mrf.mxu1  ;;  %v5783_v3 = vld [vmem:[%s10426_s1 + $0x7d8] sm:$0xff] }
 0x19e   : > { %v7641_v4 = vpop.f32.mrf.mxu0  ;;  %2148 = vmatmul.mubr.f32.gmra.mxu0 %v5768_v31  ;;  %v522_v31 = vld [vmem:[%s10426_s1 + $0x2e0] sm:$0xff] }
 0x19f   : > { %v7643_v40 = vpop.f32.mrf.mxu1  ;;  %1602 = vmatmul.mubr.f32.gmra.mxu1 %v510_v38  ;;  %5843 = vmatprep.mubr.msk.f32.mxu0 %vm743_vm0, %v5771_v32  ;;  %v525_v32 = vld [vmem:[%s10426_s1 + $0x2f8] sm:$0xff] }
 0x1a0   : > { %v991_v42 = vpop.f32.mrf.mxu0  ;;  %5717 = vmatprep.mubr.msk.f32.mxu1 %vm743_vm0, %v513_v39 }
 0x1a1   : > { %v1156_v8 = vpop.f32.mrf.mxu1 }
 0x1a2   : > { %v7659_v9 = vpop.f32.mrf.mxu0  ;;  %2153 = vmatmul.mubr.f32.gmra.mxu0 %v5770_v6  ;;  %v5782_v6 = vld [vmem:[%s10426_s1 + $0x7d0] sm:$0xff] }
 0x1a3   : > { %v7661_v45 = vpop.f32.mrf.mxu1  ;;  %1607 = vmatmul.mubr.f32.gmra.mxu1 %v512_v7  ;;  %5844 = vmatprep.mubr.msk.f32.mxu0 %vm743_vm0, %v5773_v43  ;;  %v524_v7 = vld [vmem:[%s10426_s1 + $0x2f0] sm:$0xff]  ;;  %v5785_v43 = vld [vmem:[%s10426_s1 + $0x7e8] sm:$0xff] }
 0x1a4   : > { %v996_v47 = vpop.f32.mrf.mxu0  ;;  %5718 = vmatprep.mubr.msk.f32.mxu1 %vm743_vm0, %v515_v44 }
 0x1a5   : > { %v1161_v13 = vpop.f32.mrf.mxu1  ;;  %v5784_v47 = vld [vmem:[%s10426_s1 + $0x7e0] sm:$0xff] }
 0x1a6   : > { %v7677_v14 = vpop.f32.mrf.mxu0  ;;  %2158 = vmatmul.mubr.f32.gmra.mxu0 %v5772_v11 }
 0x1a7   : > { %v7679_v50 = vpop.f32.mrf.mxu1  ;;  %1612 = vmatmul.mubr.f32.gmra.mxu1 %v514_v12  ;;  %5845 = vmatprep.mubr.msk.f32.mxu0 %vm743_vm0, %v5775_v48  ;;  %v5787_v48 = vld [vmem:[%s10426_s1 + $0x7f8] sm:$0xff] }
 0x1a8   : > { %v1001_v52 = vpop.f32.mrf.mxu0  ;;  %5719 = vmatprep.mubr.msk.f32.mxu1 %vm743_vm0, %v517_v49 }
 0x1a9   : > { %v1166_v18 = vpop.f32.mrf.mxu1  ;;  %v5786_v52 = vld [vmem:[%s10426_s1 + $0x7f0] sm:$0xff] }
 0x1aa   : > { %v7695_v19 = vpop.f32.mrf.mxu0  ;;  %2163 = vmatmul.mubr.f32.gmra.mxu0 %v5774_v16  ;;  %v5789_v18 = vld [vmem:[%s10426_s1 + $0x808] sm:$0xff] }
 0x1ab   : > { %v7697_v56 = vpop.f32.mrf.mxu1  ;;  %1617 = vmatmul.mubr.f32.gmra.mxu1 %v516_v17  ;;  %5846 = vmatprep.mubr.msk.f32.mxu0 %vm743_vm0, %v5777_v53 }
 0x1ac   : > { %v1006_v21 = vpop.f32.mrf.mxu0  ;;  %5720 = vmatprep.mubr.msk.f32.mxu1 %vm743_vm0, %v519_v54 }
 0x1ad   : > { %v1171_v22 = vpop.f32.mrf.mxu1 }
 0x1ae   : > { %v7713_v61 = vpop.f32.mrf.mxu0  ;;  %2168 = vmatmul.mubr.f32.gmra.mxu0 %v5776_v57  ;;  %v5791_v22 = vld [vmem:[%s10426_s1 + $0x818] sm:$0xff] }
 0x1af   : > { %v7715_v62 = vpop.f32.mrf.mxu1  ;;  %1622 = vmatmul.mubr.f32.gmra.mxu1 %v518_v58  ;;  %5847 = vmatprep.mubr.msk.f32.mxu0 %vm743_vm0, %v5779_v59  ;;  %v5788_v58 = vld [vmem:[%s10426_s1 + $0x800] sm:$0xff] }
 0x1b0   : > { %10461 = vst [vmem:[#allocation4_spill] sm:$0xff] %v7715_v62  ;;  %v1011_v63 = vpop.f32.mrf.mxu0  ;;  %5721 = vmatprep.mubr.msk.f32.mxu1 %vm743_vm0, %v521_v0 }
 0x1b1   : > { %v1176_v33 = vpop.f32.mrf.mxu1 }
 0x1b2   : > { %v7731_v29 = vpop.f32.mrf.mxu0  ;;  %2173 = vmatmul.mubr.f32.gmra.mxu0 %v5778_v24  ;;  %v5793_v33 = vld [vmem:[%s10426_s1 + $0x828] sm:$0xff] }
 0x1b3   : > { %v7733_v35 = vpop.f32.mrf.mxu1  ;;  %1627 = vmatmul.mubr.f32.gmra.mxu1 %v520_v27  ;;  %5848 = vmatprep.mubr.msk.f32.mxu0 %vm743_vm0, %v5781_v25  ;;  %v5790_v27 = vld [vmem:[%s10426_s1 + $0x810] sm:$0xff] }
 0x1b4   : > { %10462 = vst [vmem:[#allocation5_spill] sm:$0xff] %v7733_v35  ;;  %v1016_v30 = vpop.f32.mrf.mxu0  ;;  %5722 = vmatprep.mubr.msk.f32.mxu1 %vm743_vm0, %v523_v34 }
 0x1b5   : > { %v1181_v38 = vpop.f32.mrf.mxu1 }
 0x1b6   : > { %v7749_v2 = vpop.f32.mrf.mxu0  ;;  %2178 = vmatmul.mubr.f32.gmra.mxu0 %v5780_v36  ;;  %v5795_v38 = vld [vmem:[%s10426_s1 + $0x838] sm:$0xff] }
 0x1b7   : > { %v7751_v39 = vpop.f32.mrf.mxu1  ;;  %1632 = vmatmul.mubr.f32.gmra.mxu1 %v522_v31  ;;  %5849 = vmatprep.mubr.msk.f32.mxu0 %vm743_vm0, %v5783_v3  ;;  %v5792_v31 = vld [vmem:[%s10426_s1 + $0x820] sm:$0xff] }
 0x1b8   : > { %10463 = vst [vmem:[#allocation6_spill] sm:$0xff] %v7751_v39  ;;  %v1021_v42 = vpop.f32.mrf.mxu0  ;;  %5723 = vmatprep.mubr.msk.f32.mxu1 %vm743_vm0, %v525_v32 }
 0x1b9   : > { %v1186_v8 = vpop.f32.mrf.mxu1 }
 0x1ba   : > { %v7764_v44 = vpop.f32.mrf.mxu0  ;;  %2183 = vmatmul.mubr.f32.gmra.mxu0 %v5782_v6  ;;  %v5797_v8 = vld [vmem:[%s10426_s1 + $0x848] sm:$0xff] }
 0x1bb   : > { %v7766_v11 = vpop.f32.mrf.mxu1  ;;  %1637 = vmatmul.mubr.f32.gmra.mxu1 %v524_v7  ;;  %5850 = vmatprep.mubr.msk.f32.mxu0 %vm743_vm0, %v5785_v43  ;;  %v5794_v7 = vld [vmem:[%s10426_s1 + $0x830] sm:$0xff] }
 0x1bc   : > { %10464 = vst [vmem:[#allocation7_spill] sm:$0xff] %v7766_v11  ;;  %v1026_v12 = vpop.f32.mrf.mxu0 }
 0x1bd   : > { %v1191_v13 = vpop.f32.mrf.mxu1 }
 0x1be   : > { %v7775_v49 = vpop.f32.mrf.mxu0  ;;  %2188 = vmatmul.mubr.f32.gmra.mxu0 %v5784_v47  ;;  %v5796_v13 = vld [vmem:[%s10426_s1 + $0x840] sm:$0xff] }
 0x1bf   : > { %v1403_v16 = vpop.f32.mrf.mxu1  ;;  %5851 = vmatprep.mubr.msk.f32.mxu0 %vm743_vm0, %v5787_v48 }
 0x1c0   : > { %v7782_v17 = vadd.f32 %v1403_v16, %v7497_v5  ;;  %v1031_v53 = vpop.f32.mrf.mxu0 }
 0x1c1   : > { %v1405_v54 = vpop.f32.mrf.mxu1 }
 0x1c2   : > { %v7787_v57 = vpop.f32.mrf.mxu0  ;;  %2193 = vmatmul.mubr.f32.gmra.mxu0 %v5786_v52  ;;  %v5799_v52 = vld [vmem:[%s10426_s1 + $0x858] sm:$0xff] }
 0x1c3   : > { %v1408_v21 = vpop.f32.mrf.mxu1  ;;  %5852 = vmatprep.mubr.msk.f32.mxu0 %vm743_vm0, %v5789_v18 }
 0x1c4   : > { %v7794_v59 = vadd.f32 %v1408_v21, %v7521_v10  ;;  %v1036_v5 = vpop.f32.mrf.mxu0  ;;  %v5798_v21 = vld [vmem:[%s10426_s1 + $0x850] sm:$0xff] }
 0x1c5   : > { %v1410_v0 = vpop.f32.mrf.mxu1  ;;  %v5801_v5 = vld [vmem:[%s10426_s1 + $0x868] sm:$0xff] }
 0x1c6   : > { %v7799_v24 = vpop.f32.mrf.mxu0  ;;  %2198 = vmatmul.mubr.f32.gmra.mxu0 %v5788_v58 }
 0x1c7   : > { %v1413_v63 = vpop.f32.mrf.mxu1  ;;  %5853 = vmatprep.mubr.msk.f32.mxu0 %vm743_vm0, %v5791_v22 }
 0x1c8   : > { %v7806_v25 = vadd.f32 %v1413_v63, %v7545_v15  ;;  %v1041_v10 = vpop.f32.mrf.mxu0 }
 0x1c9   : > { %v1415_v34 = vpop.f32.mrf.mxu1 }
 0x1ca   : > { %v7811_v36 = vpop.f32.mrf.mxu0  ;;  %2203 = vmatmul.mubr.f32.gmra.mxu0 %v5790_v27  ;;  %v5800_v27 = vld [vmem:[%s10426_s1 + $0x860] sm:$0xff] }
 0x1cb   : > { %v1418_v30 = vpop.f32.mrf.mxu1  ;;  %5854 = vmatprep.mubr.msk.f32.mxu0 %vm743_vm0, %v5793_v33  ;;  %v5803_v33 = vld [vmem:[%s10426_s1 + $0x878] sm:$0xff] }
 0x1cc   : > { %v7818_v3 = vadd.f32 %v1418_v30, %v7566_v55  ;;  %v1046_v15 = vpop.f32.mrf.mxu0 }
 0x1cd   : > { %v1420_v32 = vpop.f32.mrf.mxu1  ;;  %v5802_v15 = vld [vmem:[%s10426_s1 + $0x870] sm:$0xff] }
 0x1ce   : > { %v7823_v6 = vpop.f32.mrf.mxu0  ;;  %2208 = vmatmul.mubr.f32.gmra.mxu0 %v5792_v31  ;;  %v5805_v32 = vld [vmem:[%s10426_s1 + $0x888] sm:$0xff] }
 0x1cf   : > { %v1423_v42 = vpop.f32.mrf.mxu1  ;;  %5855 = vmatprep.mubr.msk.f32.mxu0 %vm743_vm0, %v5795_v38 }
 0x1d0   : > { %v7830_v43 = vadd.f32 %v1423_v42, %v7587_v60  ;;  %v1051_v55 = vpop.f32.mrf.mxu0 }
 0x1d1   : > { %v1425_v47 = vpop.f32.mrf.mxu1 }
 0x1d2   : > { %v7835_v12 = vpop.f32.mrf.mxu0  ;;  %2213 = vmatmul.mubr.f32.gmra.mxu0 %v5794_v7 }
 0x1d3   : > { %v1428_v48 = vpop.f32.mrf.mxu1  ;;  %5856 = vmatprep.mubr.msk.f32.mxu0 %vm743_vm0, %v5797_v8  ;;  %v5804_v8 = vld [vmem:[%s10426_s1 + $0x880] sm:$0xff] }
 0x1d4   : > { %v7842_v16 = vadd.f32 %v1428_v48, %v7605_v28  ;;  %v1056_v60 = vpop.f32.mrf.mxu0  ;;  %v5807_v48 = vld [vmem:[%s10426_s1 + $0x898] sm:$0xff] }
 0x1d5   : > { %v1430_v53 = vpop.f32.mrf.mxu1 }
 0x1d6   : > { %v7847_v18 = vpop.f32.mrf.mxu0  ;;  %2218 = vmatmul.mubr.f32.gmra.mxu0 %v5796_v13  ;;  %v5806_v53 = vld [vmem:[%s10426_s1 + $0x890] sm:$0xff] }
 0x1d7   : > { %v1433_v54 = vpop.f32.mrf.mxu1  ;;  %5857 = vmatprep.mubr.msk.f32.mxu0 %vm743_vm0, %v5799_v52 }
 0x1d8   : > { %v7854_v58 = vadd.f32 %v1433_v54, %v7623_v1  ;;  %v1061_v28 = vpop.f32.mrf.mxu0 }
 0x1d9   : > { %v1435_v22 = vpop.f32.mrf.mxu1 }
 0x1da   : > { %v7859_v0 = vpop.f32.mrf.mxu0  ;;  %2223 = vmatmul.mubr.f32.gmra.mxu0 %v5798_v21  ;;  %v5809_v21 = vld [vmem:[%s10426_s1 + $0x8a8] sm:$0xff] }
 0x1db   : > { %v1438_v63 = vpop.f32.mrf.mxu1  ;;  %5858 = vmatprep.mubr.msk.f32.mxu0 %vm743_vm0, %v5801_v5 }
 0x1dc   : > { %v7866_v10 = vadd.f32 %v1438_v63, %v7641_v4  ;;  %v1066_v1 = vpop.f32.mrf.mxu0  ;;  %v5808_v63 = vld [vmem:[%s10426_s1 + $0x8a0] sm:$0xff] }
 0x1dd   : > { %v1440_v34 = vpop.f32.mrf.mxu1  ;;  %v5811_v1 = vld [vmem:[%s10426_s1 + $0x8b8] sm:$0xff] }
 0x1de   : > { %v7871_v30 = vpop.f32.mrf.mxu0  ;;  %2228 = vmatmul.mubr.f32.gmra.mxu0 %v5800_v27 }
 0x1df   : > { %v1443_v31 = vpop.f32.mrf.mxu1  ;;  %5859 = vmatprep.mubr.msk.f32.mxu0 %vm743_vm0, %v5803_v33 }
 0x1e0   : > { %v7878_v38 = vadd.f32 %v1443_v31, %v7659_v9  ;;  %v1071_v4 = vpop.f32.mrf.mxu0 }
 0x1e1   : > { %v1445_v42 = vpop.f32.mrf.mxu1 }
 0x1e2   : > { %v7883_v7 = vpop.f32.mrf.mxu0  ;;  %2233 = vmatmul.mubr.f32.gmra.mxu0 %v5802_v15  ;;  %v5810_v15 = vld [vmem:[%s10426_s1 + $0x8b0] sm:$0xff] }
 0x1e3   : > { %v1448_v55 = vpop.f32.mrf.mxu1  ;;  %5860 = vmatprep.mubr.msk.f32.mxu0 %vm743_vm0, %v5805_v32  ;;  %v5813_v32 = vld [vmem:[%s10426_s1 + $0x8c8] sm:$0xff] }
 0x1e4   : > { %v7890_v47 = vadd.f32 %v1448_v55, %v7677_v14  ;;  %v1076_v9 = vpop.f32.mrf.mxu0 }
 0x1e5   : > { %v1450_v13 = vpop.f32.mrf.mxu1  ;;  %v5812_v9 = vld [vmem:[%s10426_s1 + $0x8c0] sm:$0xff] }
 0x1e6   : > { %v7895_v60 = vpop.f32.mrf.mxu0  ;;  %2238 = vmatmul.mubr.f32.gmra.mxu0 %v5804_v8  ;;  %v5815_v13 = vld [vmem:[%s10426_s1 + $0x8d8] sm:$0xff] }
 0x1e7   : > { %v1453_v52 = vpop.f32.mrf.mxu1  ;;  %5861 = vmatprep.mubr.msk.f32.mxu0 %vm743_vm0, %v5807_v48 }
 0x1e8   : > { %v7902_v54 = vadd.f32 %v1453_v52, %v7695_v19  ;;  %v1081_v14 = vpop.f32.mrf.mxu0 }
 0x1e9   : > { %v1455_v28 = vpop.f32.mrf.mxu1 }
 0x1ea   : > { %v7907_v5 = vpop.f32.mrf.mxu0  ;;  %2243 = vmatmul.mubr.f32.gmra.mxu0 %v5806_v53  ;;  %v2377_v53 = vpop.permute.xlu0 %2376 }
 0x1eb   : > { %v1458_v22 = vpop.f32.mrf.mxu1  ;;  %5862 = vmatprep.mubr.msk.f32.mxu0 %vm743_vm0, %v5809_v21  ;;  %v2382_v21 = vpop.permute.xlu1 %2381 }
 0x1ec   : > { %v7914_v27 = vadd.f32 %v1458_v22, %v7713_v61  ;;  %v1086_v19 = vpop.f32.mrf.mxu0  ;;  %v5814_v22 = vld [vmem:[%s10426_s1 + $0x8d0] sm:$0xff] }
 0x1ed   : > { %v1460_v33 = vpop.f32.mrf.mxu1  ;;  %v5817_v19 = vld [vmem:[%s10426_s1 + $0x8e8] sm:$0xff] }
 0x1ee   : > { %v7919_v34 = vpop.f32.mrf.mxu0  ;;  %2248 = vmatmul.mubr.f32.gmra.mxu0 %v5808_v63 }
 0x1ef   : > { %v1463_v31 = vpop.f32.mrf.mxu1  ;;  %5863 = vmatprep.mubr.msk.f32.mxu0 %vm743_vm0, %v5811_v1 }
 0x1f0   : > { %v7926_v4 = vadd.f32 %v1463_v31, %v7731_v29  ;;  %v1091_v61 = vpop.f32.mrf.mxu0 }
 0x1f1   : > { %v1465_v42 = vpop.f32.mrf.mxu1  ;;  %v2392_v61 = vpop.permute.xlu0 %2391 }
 0x1f2   : > { %v7931_v55 = vpop.f32.mrf.mxu0  ;;  %2253 = vmatmul.mubr.f32.gmra.mxu0 %v5810_v15  ;;  %v5816_v15 = vld [vmem:[%s10426_s1 + $0x8e0] sm:$0xff]  ;;  %v5819_v42 = vld [vmem:[%s10426_s1 + $0x8f8] sm:$0xff] }
 0x1f3   : > { %v1468_v8 = vpop.f32.mrf.mxu1  ;;  %5864 = vmatprep.mubr.msk.f32.mxu0 %vm743_vm0, %v5813_v32 }
 0x1f4   : > { %v7938_v48 = vadd.f32 %v1468_v8, %v7749_v2  ;;  %v1096_v29 = vpop.f32.mrf.mxu0  ;;  %v2387_v8 = vpop.permute.xlu1 %2386 }
 0x1f5   : > { %v1470_v52 = vpop.f32.mrf.mxu1 }
 0x1f6   : > { %v7943_v14 = vpop.f32.mrf.mxu0  ;;  %2258 = vmatmul.mubr.f32.gmra.mxu0 %v5812_v9  ;;  %v5818_v52 = vld [vmem:[%s10426_s1 + $0x8f0] sm:$0xff] }
 0x1f7   : > { %v1473_v28 = vpop.f32.mrf.mxu1  ;;  %5865 = vmatprep.mubr.msk.f32.mxu0 %vm743_vm0, %v5815_v13 }
 0x1f8   : > { %v7950_v2 = vadd.f32 %v1473_v28, %v7764_v44  ;;  %v1101_v63 = vpop.f32.mrf.mxu0 }
 0x1f9   : > { %v1475_v1 = vpop.f32.mrf.mxu1  ;;  %v7976_v63 = vpop.permute.xlu0 %2401 }
 0x1fa   : > { %v7955_v33 = vpop.f32.mrf.mxu0  ;;  %2263 = vmatmul.mubr.f32.gmra.mxu0 %v5814_v22  ;;  %v2397_v1 = vpop.permute.xlu1 %2396 }
 0x1fb   : > { %v1478_v31 = vpop.f32.mrf.mxu1  ;;  %5866 = vmatprep.mubr.msk.f32.mxu0 %vm743_vm0, %v5817_v19 }
 0x1fc   : > { %v7962_v44 = vadd.f32 %v1478_v31, %v7775_v49  ;;  %v1106_v32 = vpop.f32.mrf.mxu0 }
 0x1fd   : > { %v1480_v9 = vpop.f32.mrf.mxu1 }
 0x1fe   : > { %v7967_v29 = vpop.f32.mrf.mxu0  ;;  %2268 = vmatmul.mubr.f32.gmra.mxu0 %v5816_v15 }
 0x1ff   : > { %v1483_v13 = vpop.f32.mrf.mxu1  ;;  %5867 = vmatprep.mubr.msk.f32.mxu0 %vm743_vm0, %v5819_v42 }
 0x200   : > { %v7974_v49 = vadd.f32 %v1483_v13, %v7787_v57  ;;  %v1111_v28 = vpop.f32.mrf.mxu0  ;;  %v7984_v57 = vpop.permute.xlu0 %2411 }
 0x201   : > { %v1485_v22 = vpop.f32.mrf.mxu1 }
 0x202   : > { %v7978_v19 = vpop.f32.mrf.mxu0  ;;  %2273 = vmatmul.mubr.f32.gmra.mxu0 %v5818_v52  ;;  %v7989_v22 = vpop.permute.xlu1 %2406 }
 0x203   : > { %v1488_v31 = vpop.f32.mrf.mxu1 }
 0x204   : > { %v7981_v15 = vadd.f32 %v1488_v31, %v7799_v24  ;;  %v1116_v32 = vpop.f32.mrf.mxu0 }
 0x205   : > { %v1490_v42 = vpop.f32.mrf.mxu1 }
 0x206   : > { %v2039_v9 = vpop.f32.mrf.mxu0 }
 0x207   : > { %v1493_v11 = vpop.f32.mrf.mxu1  ;;  %v2278_v39 = vadd.f32 %v2039_v9, %v7782_v17 }
 0x208   : > { %v7987_v13 = vadd.f32 %v1493_v11, %v7811_v36  ;;  %v2041_v28 = vpop.f32.mrf.mxu0  ;;  %v7996_v11 = vpop.permute.xlu0 %2421 }
 0x209   : > { %v2614_v52 = vadd.f32 %v2377_v53, %v2278_v39  ;;  %v1495_v35 = vpop.f32.mrf.mxu1  ;;  %v7998_v28 = vpop.permute.xlu1 %2416 }
 0x20a   : > { %v2044_v62 = vpop.f32.mrf.mxu0 }
 0x20b   : > { %2663 = vst.msk [vmem:[#allocation2] sm:$0xff] %vm2662_vm1, %v2614_v52  ;;  %v1498_v24 = vpop.f32.mrf.mxu1  ;;  %v2279_v31 = vadd.f32 %v2044_v62, %v7794_v59 }
 0x20c   : > { %v7994_v32 = vadd.f32 %v1498_v24, %v7823_v6  ;;  %v2046_v17 = vpop.f32.mrf.mxu0 }
 0x20d   : > { %v2615_v42 = vadd.f32 %v2382_v21, %v2279_v31  ;;  %v1500_v9 = vpop.f32.mrf.mxu1  ;;  %v8009_v17 = vpop.permute.xlu0 %2431 }
 0x20e   : > { %v2049_v36 = vpop.f32.mrf.mxu0 }
 0x20f   : > { %2664 = vst.msk [vmem:[#allocation2 + $0x8] sm:$0xff] %vm2662_vm1, %v2615_v42  ;;  %v1503_v35 = vpop.f32.mrf.mxu1  ;;  %v2280_v39 = vadd.f32 %v2049_v36, %v7806_v25  ;;  %v8014_v42 = vpop.permute.xlu1 %2426 }
 0x210   : > { %v8003_v53 = vadd.f32 %v1503_v35, %v7835_v12  ;;  %v2051_v62 = vpop.f32.mrf.mxu0 }
 0x211   : > { %v2616_v59 = vadd.f32 %v2387_v8, %v2280_v39  ;;  %v1505_v6 = vpop.f32.mrf.mxu1 }
 0x212   : > { %v2711_v52 = vld [vmem:[#allocation2] sm:$0xff]  ;;  %v2054_v24 = vpop.f32.mrf.mxu0  ;;  %v8023_v6 = vpop.permute.xlu0 %2441 }
 0x213   : > { %2665 = vst.msk [vmem:[#allocation2 + $0x10] sm:$0xff] %vm2662_vm1, %v2616_v59  ;;  %v1508_v21 = vpop.f32.mrf.mxu1  ;;  %v2281_v31 = vadd.f32 %v2054_v24, %v7818_v3  ;;  %4238 = vrot.lane.b32.xlu0 %v2711_v52, %s6200_s23  ;;  %3712 = vrot.lane.b32.xlu1 %v2711_v52, %s6200_s23 }
 0x214   : > { %v8012_v25 = vadd.f32 %v1508_v21, %v7847_v18  ;;  %v2056_v12 = vpop.f32.mrf.mxu0  ;;  %v8025_v21 = vpop.permute.xlu1 %2436 }
 0x215   : > { %v2617_v8 = vadd.f32 %v2392_v61, %v2281_v31  ;;  %v1510_v9 = vpop.f32.mrf.mxu1 }
 0x216   : > { %v2059_v36 = vpop.f32.mrf.mxu0  ;;  %v2712_v61 = vld [vmem:[#allocation2 + $0x8] sm:$0xff] }
 0x217   : > { %2666 = vst.msk [vmem:[#allocation2 + $0x18] sm:$0xff] %vm2662_vm1, %v2617_v8  ;;  %v1513_v35 = vpop.f32.mrf.mxu1  ;;  %v2282_v3 = vadd.f32 %v2059_v36, %v7830_v43  ;;  %3264 = vrot.lane.b32.xlu0 %v2711_v52, %s6200_s23  ;;  %2807 = vrot.lane.b32.xlu1 %v2711_v52, %s6200_s23 }
 0x218   : > { %v8021_v39 = vadd.f32 %v1513_v35, %v7859_v0  ;;  %v2061_v18 = vpop.f32.mrf.mxu0 }
 0x219   : > { %v2618_v62 = vadd.f32 %v2397_v1, %v2282_v3  ;;  %v1515_v59 = vpop.f32.mrf.mxu1  ;;  %v8044_v18 = vpop.permute.xlu1 %2451 }
 0x21a   : > { %v2064_v24 = vpop.f32.mrf.mxu0 }
 0x21b   : > { %2667 = vst.msk [vmem:[#allocation2 + $0x20] sm:$0xff] %vm2662_vm1, %v2618_v62  ;;  %v1518_v31 = vpop.f32.mrf.mxu1  ;;  %v2283_v43 = vadd.f32 %v2064_v24, %v7842_v16  ;;  %4504 = vrot.lane.b32.xlu1 %v2711_v52, %s6201_s28  ;;  %3714 = vrot.lane.b32.xlu0 %v2712_v61, %s6200_s23  ;;  %v8039_v16 = vpop.permute.xlu0 %2446 }
 0x21c   : > { %v8032_v0 = vadd.f32 %v1518_v31, %v7871_v30  ;;  %v2066_v1 = vpop.f32.mrf.mxu0 }
 0x21d   : > { %v2619_v12 = vadd.f32 %v7976_v63, %v2283_v43  ;;  %v1520_v8 = vpop.f32.mrf.mxu1 }
 0x21e   : > { %v2069_v9 = vpop.f32.mrf.mxu0  ;;  %v8057_v8 = vpop.permute.xlu1 %2461 }
 0x21f   : > { %2668 = vst.msk [vmem:[#allocation2 + $0x28] sm:$0xff] %vm2662_vm1, %v2619_v12  ;;  %v1523_v36 = vpop.f32.mrf.mxu1  ;;  %v2284_v35 = vadd.f32 %v2069_v9, %v7854_v58  ;;  %3972 = vrot.lane.b32.xlu1 %v2711_v52, %s6201_s28  ;;  %2809 = vrot.lane.b32.xlu0 %v2712_v61, %s6200_s23  ;;  %v8055_v12 = vpop.permute.xlu0 %2456 }
 0x220   : > { %v8042_v3 = vadd.f32 %v1523_v36, %v7883_v7  ;;  %v2071_v30 = vpop.f32.mrf.mxu0 }
 0x221   : > { %v2620_v63 = vadd.f32 %v7989_v22, %v2284_v35  ;;  %v1525_v62 = vpop.f32.mrf.mxu1 }
 0x222   : > { %v2074_v59 = vpop.f32.mrf.mxu0 }
 0x223   : > { %2669 = vst.msk [vmem:[#allocation2 + $0x30] sm:$0xff] %vm2662_vm1, %v2620_v63  ;;  %v1528_v24 = vpop.f32.mrf.mxu1  ;;  %v2285_v58 = vadd.f32 %v2074_v59, %v7866_v10  ;;  %3506 = vrot.lane.b32.xlu1 %v2711_v52, %s6201_s28  ;;  %4506 = vrot.lane.b32.xlu0 %v2712_v61, %s6201_s28  ;;  %v8076_v59 = vpop.permute.xlu1 %2471 }
 0x224   : > { %v8052_v31 = vadd.f32 %v1528_v24, %v7895_v60  ;;  %v2076_v7 = vpop.f32.mrf.mxu0 }
 0x225   : > { %v2621_v43 = vadd.f32 %v7984_v57, %v2285_v58  ;;  %v1530_v1 = vpop.f32.mrf.mxu1  ;;  %v2713_v58 = vld [vmem:[#allocation2 + $0x10] sm:$0xff] }
 0x226   : > { %v2079_v22 = vpop.f32.mrf.mxu0 }
 0x227   : > { %2670 = vst.msk [vmem:[#allocation2 + $0x38] sm:$0xff] %vm2662_vm1, %v2621_v43  ;;  %v1533_v9 = vpop.f32.mrf.mxu1  ;;  %v2286_v10 = vadd.f32 %v2079_v22, %v7878_v38  ;;  %4240 = vrot.lane.b32.xlu1 %v2712_v61, %s6200_s23  ;;  %3974 = vrot.lane.b32.xlu0 %v2712_v61, %s6201_s28  ;;  %v8071_v38 = vpop.permute.xlu0 %2466 }
 0x228   : > { %v8064_v60 = vadd.f32 %v1533_v9, %v7907_v5  ;;  %v2081_v52 = vpop.f32.mrf.mxu0 }
 0x229   : > { %v2622_v57 = vadd.f32 %v7998_v28, %v2286_v10  ;;  %v1535_v36 = vpop.f32.mrf.mxu1  ;;  %v8089_v10 = vpop.permute.xlu1 %2481 }
 0x22a   : > { %v2084_v35 = vpop.f32.mrf.mxu0 }
 0x22b   : > { %2671 = vst.msk [vmem:[#allocation2 + $0x40] sm:$0xff] %vm2662_vm1, %v2622_v57  ;;  %v1538_v30 = vpop.f32.mrf.mxu1  ;;  %v2287_v63 = vadd.f32 %v2084_v35, %v7890_v47  ;;  %3266 = vrot.lane.b32.xlu1 %v2712_v61, %s6200_s23  ;;  %3508 = vrot.lane.b32.xlu0 %v2712_v61, %s6201_s28  ;;  %v2714_v35 = vld [vmem:[#allocation2 + $0x18] sm:$0xff] }
 0x22c   : > { %v8074_v62 = vadd.f32 %v1538_v30, %v7919_v34  ;;  %v2086_v5 = vpop.f32.mrf.mxu0 }
 0x22d   : > { %v2623_v28 = vadd.f32 %v7996_v11, %v2287_v63  ;;  %v1540_v24 = vpop.f32.mrf.mxu1  ;;  %v8087_v11 = vpop.permute.xlu0 %2476 }
 0x22e   : > { %v2089_v7 = vpop.f32.mrf.mxu0  ;;  %v8108_v24 = vpop.permute.xlu1 %2491 }
 0x22f   : > { %2672 = vst.msk [vmem:[#allocation2 + $0x48] sm:$0xff] %vm2662_vm1, %v2623_v28  ;;  %v1543_v47 = vpop.f32.mrf.mxu1  ;;  %v2288_v43 = vadd.f32 %v2089_v7, %v7902_v54  ;;  %4250 = vrot.lane.b32.xlu0 %v2713_v58, %s6200_s23  ;;  %3724 = vrot.lane.b32.xlu1 %v2713_v58, %s6200_s23 }
 0x230   : > { %v8084_v34 = vadd.f32 %v1543_v47, %v7931_v55  ;;  %v2091_v61 = vpop.f32.mrf.mxu0 }
 0x231   : > { %v2624_v1 = vadd.f32 %v8014_v42, %v2288_v43  ;;  %v1545_v22 = vpop.f32.mrf.mxu1 }
 0x232   : > { %v2094_v9 = vpop.f32.mrf.mxu0 }
 0x233   : > { %2673 = vst.msk [vmem:[#allocation2 + $0x50] sm:$0xff] %vm2662_vm1, %v2624_v1  ;;  %v1548_v52 = vpop.f32.mrf.mxu1  ;;  %v2289_v54 = vadd.f32 %v2094_v9, %v7914_v27  ;;  %3276 = vrot.lane.b32.xlu0 %v2713_v58, %s6200_s23  ;;  %2817 = vrot.lane.b32.xlu1 %v2713_v58, %s6200_s23  ;;  %v8103_v27 = vpop.permute.xlu0 %2486 }
 0x234   : > { %v8096_v55 = vadd.f32 %v1548_v52, %v7943_v14  ;;  %v2096_v57 = vpop.f32.mrf.mxu0  ;;  %v8121_v52 = vpop.permute.xlu1 %2501 }
 0x235   : > { %v2625_v42 = vadd.f32 %v8009_v17, %v2289_v54  ;;  %v1550_v36 = vpop.f32.mrf.mxu1 }
 0x236   : > { %v2099_v30 = vpop.f32.mrf.mxu0 }
 0x237   : > { %2674 = vst.msk [vmem:[#allocation2 + $0x58] sm:$0xff] %vm2662_vm1, %v2625_v42  ;;  %v1553_v63 = vpop.f32.mrf.mxu1  ;;  %v2290_v5 = vadd.f32 %v2099_v30, %v7926_v4  ;;  %3726 = vrot.lane.b32.xlu0 %v2714_v35, %s6200_s23  ;;  %4512 = vrot.lane.b32.xlu1 %v2713_v58, %s6201_s28  ;;  %v8119_v9 = vpop.permute.xlu0 %2496 }
 0x238   : > { %v8106_v14 = vadd.f32 %v1553_v63, %v7955_v33  ;;  %v2101_v28 = vpop.f32.mrf.mxu0 }
 0x239   : > { %v2626_v17 = vadd.f32 %v8025_v21, %v2290_v5  ;;  %v1555_v7 = vpop.f32.mrf.mxu1  ;;  %v2717_v28 = vld [vmem:[#allocation2 + $0x20] sm:$0xff] }
 0x23a   : > { %v2104_v47 = vpop.f32.mrf.mxu0 }
 0x23b   : > { %2675 = vst.msk [vmem:[#allocation2 + $0x60] sm:$0xff] %vm2662_vm1, %v2626_v17  ;;  %v1558_v43 = vpop.f32.mrf.mxu1  ;;  %v2291_v4 = vadd.f32 %v2104_v47, %v7938_v48  ;;  %2819 = vrot.lane.b32.xlu0 %v2714_v35, %s6200_s23  ;;  %3980 = vrot.lane.b32.xlu1 %v2713_v58, %s6201_s28 }
 0x23c   : > { %v8116_v61 = vadd.f32 %v1558_v43, %v7967_v29  ;;  %v2106_v33 = vpop.f32.mrf.mxu0 }
 0x23d   : > { %v2627_v1 = vadd.f32 %v8023_v6, %v2291_v4  ;;  %v1560_v22 = vpop.f32.mrf.mxu1 }
 0x23e   : > { %v2109_v21 = vpop.f32.mrf.mxu0 }
 0x23f   : > { %2676 = vst.msk [vmem:[#allocation2 + $0x68] sm:$0xff] %vm2662_vm1, %v2627_v1  ;;  %v1563_v54 = vpop.f32.mrf.mxu1  ;;  %v2292_v48 = vadd.f32 %v2109_v21, %v7950_v2  ;;  %4514 = vrot.lane.b32.xlu0 %v2714_v35, %s6201_s28  ;;  %4252 = vrot.lane.b32.xlu1 %v2714_v35, %s6200_s23  ;;  %v8137_v2 = vpop.permute.xlu0 %2506 }
 0x240   : > { %v8128_v29 = vadd.f32 %v1563_v54, %v7978_v19  ;;  %v2111_v58 = vpop.f32.mrf.mxu0  ;;  %v8139_v19 = vpop.permute.xlu1 %2511 }
 0x241   : > { %v2628_v6 = vadd.f32 %v8039_v16, %v2292_v48  ;;  %v1565_v57 = vpop.f32.mrf.mxu1 }
 0x242   : > { %v2114_v42 = vpop.f32.mrf.mxu0 }
 0x243   : > { %2677 = vst.msk [vmem:[#allocation2 + $0x70] sm:$0xff] %vm2662_vm1, %v2628_v6  ;;  %v8132_v36 = vpop.f32.mrf.mxu1  ;;  %v2293_v30 = vadd.f32 %v2114_v42, %v7962_v44  ;;  %3982 = vrot.lane.b32.xlu0 %v2714_v35, %s6201_s28  ;;  %3278 = vrot.lane.b32.xlu1 %v2714_v35, %s6200_s23  ;;  %v8149_v33 = vpop.permute.xlu0 %2516 }
 0x244   : > { %v2116_v63 = vpop.f32.mrf.mxu0  ;;  %v8151_v1 = vpop.permute.xlu1 %2521 }
 0x245   : > { %v2629_v5 = vadd.f32 %v8044_v18, %v2293_v30  ;;  %v1570_v16 = vpop.f32.mrf.mxu1  ;;  %v2718_v30 = vld [vmem:[#allocation2 + $0x28] sm:$0xff] }
 0x246   : > { %v2119_v17 = vpop.f32.mrf.mxu0 }
 0x247   : > { %2678 = vst.msk [vmem:[#allocation2 + $0x78] sm:$0xff] %vm2662_vm1, %v2629_v5  ;;  %v8143_v7 = vpop.f32.mrf.mxu1  ;;  %v2294_v44 = vadd.f32 %v2119_v17, %v7974_v49  ;;  %3516 = vrot.lane.b32.xlu0 %v2714_v35, %s6201_s28  ;;  %3736 = vrot.lane.b32.xlu1 %v2717_v28, %s6200_s23 }
 0x248   : > { %v2121_v47 = vpop.f32.mrf.mxu0  ;;  %v8168_v57 = vpop.permute.xlu1 %2531 }
 0x249   : > { %v2630_v43 = vadd.f32 %v8055_v12, %v2294_v44  ;;  %v1575_v4 = vpop.f32.mrf.mxu1 }
 0x24a   : > { %v2124_v18 = vpop.f32.mrf.mxu0 }
 0x24b   : > { %2679 = vst.msk [vmem:[#allocation2 + $0x80] sm:$0xff] %vm2662_vm1, %v2630_v43  ;;  %v8154_v22 = vpop.f32.mrf.mxu1  ;;  %v2295_v21 = vadd.f32 %v2124_v18, %v7981_v15  ;;  %4262 = vrot.lane.b32.xlu0 %v2717_v28, %s6200_s23  ;;  %2827 = vrot.lane.b32.xlu1 %v2717_v28, %s6200_s23  ;;  %v8166_v15 = vpop.permute.xlu0 %2526 }
 0x24c   : > { %v2126_v49 = vpop.f32.mrf.mxu0  ;;  %v8180_v43 = vpop.permute.xlu1 %2541 }
 0x24d   : > { %v2631_v35 = vadd.f32 %v8057_v8, %v2295_v21  ;;  %v1580_v12 = vpop.f32.mrf.mxu1 }
 0x24e   : > { %v2129_v54 = vpop.f32.mrf.mxu0 }
 0x24f   : > { %2680 = vst.msk [vmem:[#allocation2 + $0x88] sm:$0xff] %vm2662_vm1, %v2631_v35  ;;  %v8161_v48 = vpop.f32.mrf.mxu1  ;;  %v2296_v58 = vadd.f32 %v2129_v54, %v7987_v13  ;;  %3288 = vrot.lane.b32.xlu0 %v2717_v28, %s6200_s23  ;;  %4520 = vrot.lane.b32.xlu1 %v2717_v28, %s6201_s28  ;;  %v8178_v47 = vpop.permute.xlu0 %2536 }
 0x250   : > { %v2131_v6 = vpop.f32.mrf.mxu0  ;;  %v8197_v54 = vpop.permute.xlu1 %2551 }
 0x251   : > { %v2632_v42 = vadd.f32 %v8071_v38, %v2296_v58  ;;  %v1585_v8 = vpop.f32.mrf.mxu1  ;;  %v2721_v6 = vld [vmem:[#allocation2 + $0x30] sm:$0xff] }
 0x252   : > { %v2134_v63 = vpop.f32.mrf.mxu0 }
 0x253   : > { %2681 = vst.msk [vmem:[#allocation2 + $0x90] sm:$0xff] %vm2662_vm1, %v2632_v42  ;;  %v8172_v5 = vpop.f32.mrf.mxu1  ;;  %v2297_v13 = vadd.f32 %v2134_v63, %v7994_v32  ;;  %3738 = vrot.lane.b32.xlu0 %v2718_v30, %s6200_s23  ;;  %3988 = vrot.lane.b32.xlu1 %v2717_v28, %s6201_s28 }
 0x254   : > { %v2136_v16 = vpop.f32.mrf.mxu0 }
 0x255   : > { %v2633_v17 = vadd.f32 %v8076_v59, %v2297_v13  ;;  %v1590_v44 = vpop.f32.mrf.mxu1 }
 0x256   : > { %v2139_v38 = vpop.f32.mrf.mxu0  ;;  %v8209_v44 = vpop.permute.xlu1 %2561 }
 0x257   : > { %2682 = vst.msk [vmem:[#allocation2 + $0x98] sm:$0xff] %vm2662_vm1, %v2633_v17  ;;  %v8183_v4 = vpop.f32.mrf.mxu1  ;;  %v2298_v18 = vadd.f32 %v2139_v38, %v8003_v53  ;;  %2829 = vrot.lane.b32.xlu0 %v2718_v30, %s6200_s23  ;;  %4264 = vrot.lane.b32.xlu1 %v2718_v30, %s6200_s23  ;;  %v8195_v53 = vpop.permute.xlu0 %2546 }
 0x258   : > { %v2141_v32 = vpop.f32.mrf.mxu0 }
 0x259   : > { %v2634_v28 = vadd.f32 %v8087_v11, %v2298_v18  ;;  %v1595_v59 = vpop.f32.mrf.mxu1 }
 0x25a   : > { %v2144_v21 = vpop.f32.mrf.mxu0 }
 0x25b   : > { %2683 = vst.msk [vmem:[#allocation2 + $0xa0] sm:$0xff] %vm2662_vm1, %v2634_v28  ;;  %v8190_v49 = vpop.f32.mrf.mxu1  ;;  %v2299_v35 = vadd.f32 %v2144_v21, %v8012_v25  ;;  %4522 = vrot.lane.b32.xlu0 %v2718_v30, %s6201_s28  ;;  %3290 = vrot.lane.b32.xlu1 %v2718_v30, %s6200_s23  ;;  %v8207_v17 = vpop.permute.xlu0 %2556 }
 0x25c   : > { %v2146_v12 = vpop.f32.mrf.mxu0 }
 0x25d   : > { %v2635_v58 = vadd.f32 %v8089_v10, %v2299_v35  ;;  %v1600_v11 = vpop.f32.mrf.mxu1  ;;  %v8226_v35 = vpop.permute.xlu1 %2571 }
 0x25e   : > { %v2149_v42 = vpop.f32.mrf.mxu0 }
 0x25f   : > { %2684 = vst.msk [vmem:[#allocation2 + $0xa8] sm:$0xff] %vm2662_vm1, %v2635_v58  ;;  %v8201_v8 = vpop.f32.mrf.mxu1  ;;  %v2300_v25 = vadd.f32 %v2149_v42, %v8021_v39  ;;  %3990 = vrot.lane.b32.xlu0 %v2718_v30, %s6201_s28  ;;  %3748 = vrot.lane.b32.xlu1 %v2721_v6, %s6200_s23  ;;  %v2722_v58 = vld [vmem:[#allocation2 + $0x38] sm:$0xff] }
 0x260   : > { %v2151_v63 = vpop.f32.mrf.mxu0 }
 0x261   : > { %v2636_v13 = vadd.f32 %v8103_v27, %v2300_v25  ;;  %v1605_v16 = vpop.f32.mrf.mxu1 }
 0x262   : > { %v2154_v10 = vpop.f32.mrf.mxu0 }
 0x263   : > { %2685 = vst.msk [vmem:[#allocation2 + $0xb0] sm:$0xff] %vm2662_vm1, %v2636_v13  ;;  %v8212_v38 = vpop.f32.mrf.mxu1  ;;  %v2301_v18 = vadd.f32 %v2154_v10, %v8032_v0  ;;  %4274 = vrot.lane.b32.xlu0 %v2721_v6, %s6200_s23  ;;  %2837 = vrot.lane.b32.xlu1 %v2721_v6, %s6200_s23  ;;  %v8224_v0 = vpop.permute.xlu0 %2566 }
 0x264   : > { %v2156_v39 = vpop.f32.mrf.mxu0  ;;  %v8238_v10 = vpop.permute.xlu1 %2581 }
 0x265   : > { %v2637_v30 = vadd.f32 %v8108_v24, %v2301_v18  ;;  %v1610_v27 = vpop.f32.mrf.mxu1 }
 0x266   : > { %v2159_v32 = vpop.f32.mrf.mxu0 }
 0x267   : > { %2686 = vst.msk [vmem:[#allocation2 + $0xb8] sm:$0xff] %vm2662_vm1, %v2637_v30  ;;  %v8219_v28 = vpop.f32.mrf.mxu1  ;;  %v2302_v59 = vadd.f32 %v2159_v32, %v8042_v3  ;;  %3298 = vrot.lane.b32.xlu0 %v2721_v6, %s6200_s23  ;;  %4528 = vrot.lane.b32.xlu1 %v2721_v6, %s6201_s28  ;;  %v8236_v16 = vpop.permute.xlu0 %2576 }
 0x268   : > { %v2161_v21 = vpop.f32.mrf.mxu0 }
 0x269   : > { %v2638_v12 = vadd.f32 %v8119_v9, %v2302_v59  ;;  %v1615_v24 = vpop.f32.mrf.mxu1  ;;  %v8255_v21 = vpop.permute.xlu1 %2591 }
 0x26a   : > { %v2164_v11 = vpop.f32.mrf.mxu0  ;;  %v2725_v24 = vld [vmem:[#allocation2 + $0x40] sm:$0xff] }
 0x26b   : > { %2687 = vst.msk [vmem:[#allocation2 + $0xc0] sm:$0xff] %vm2662_vm1, %v2638_v12  ;;  %v8230_v42 = vpop.f32.mrf.mxu1  ;;  %v2303_v3 = vadd.f32 %v2164_v11, %v8052_v31  ;;  %3750 = vrot.lane.b32.xlu0 %v2722_v58, %s6200_s23  ;;  %3996 = vrot.lane.b32.xlu1 %v2721_v6, %s6201_s28 }
 0x26c   : > { %v2166_v25 = vpop.f32.mrf.mxu0 }
 0x26d   : > { %v2639_v63 = vadd.f32 %v8121_v52, %v2303_v3  ;;  %v1620_v13 = vpop.f32.mrf.mxu1 }
 0x26e   : > { %v2169_v9 = vpop.f32.mrf.mxu0 }
 0x26f   : > { %2688 = vst.msk [vmem:[#allocation2 + $0xc8] sm:$0xff] %vm2662_vm1, %v2639_v63  ;;  %v8241_v18 = vpop.f32.mrf.mxu1  ;;  %v2304_v39 = vadd.f32 %v2169_v9, %v8064_v60  ;;  %2839 = vrot.lane.b32.xlu0 %v2722_v58, %s6200_s23  ;;  %4276 = vrot.lane.b32.xlu1 %v2722_v58, %s6200_s23  ;;  %v8253_v60 = vpop.permute.xlu0 %2586 }
 0x270   : > { %v2171_v31 = vpop.f32.mrf.mxu0 }
 0x271   : > { %v2640_v6 = vadd.f32 %v8137_v2, %v2304_v39  ;;  %v1625_v52 = vpop.f32.mrf.mxu1  ;;  %v8269_v31 = vpop.permute.xlu1 %2601 }
 0x272   : > { %v2174_v30 = vpop.f32.mrf.mxu0 }
 0x273   : > { %2689 = vst.msk [vmem:[#allocation2 + $0xd0] sm:$0xff] %vm2662_vm1, %v2640_v6  ;;  %v8248_v27 = vpop.f32.mrf.mxu1  ;;  %v2305_v32 = vadd.f32 %v2174_v30, %v8074_v62  ;;  %4530 = vrot.lane.b32.xlu0 %v2722_v58, %s6201_s28  ;;  %3300 = vrot.lane.b32.xlu1 %v2722_v58, %s6200_s23  ;;  %v8265_v9 = vpop.permute.xlu0 %2596 }
 0x274   : > { %v2176_v59 = vpop.f32.mrf.mxu0 }
 0x275   : > { %v2641_v12 = vadd.f32 %v8139_v19, %v2305_v32  ;;  %v1630_v2 = vpop.f32.mrf.mxu1  ;;  %v8267_v19 = vld [vmem:[#allocation2 + $0x48] sm:$0xff] }
 0x276   : > { %v2179_v11 = vpop.f32.mrf.mxu0 }
 0x277   : > { %2690 = vst.msk [vmem:[#allocation2 + $0xd8] sm:$0xff] %vm2662_vm1, %v2641_v12  ;;  %v8259_v3 = vpop.f32.mrf.mxu1  ;;  %v2306_v62 = vadd.f32 %v2179_v11, %v8084_v34  ;;  %3998 = vrot.lane.b32.xlu0 %v2722_v58, %s6201_s28  ;;  %4286 = vrot.lane.b32.xlu1 %v2725_v24, %s6200_s23  ;;  %v8284_v59 = vpop.permute.xlu0 %2606 }
 0x278   : > { %v2181_v25 = vpop.f32.mrf.mxu0  ;;  %v8286_v12 = vpop.permute.xlu1 %2611 }
 0x279   : > { %v2642_v63 = vadd.f32 %v8149_v33, %v2306_v62  ;;  %v1635_v13 = vpop.f32.mrf.mxu1 }
 0x27a   : > { %v2184_v39 = vpop.f32.mrf.mxu0 }
 0x27b   : > { %2691 = vst.msk [vmem:[#allocation2 + $0xe0] sm:$0xff] %vm2662_vm1, %v2642_v63  ;;  %v8272_v6 = vpop.f32.mrf.mxu1  ;;  %v2307_v34 = vadd.f32 %v2184_v39, %v8096_v55  ;;  %3762 = vrot.lane.b32.xlu0 %v8267_v19, %s6200_s23  ;;  %3760 = vrot.lane.b32.xlu1 %v2725_v24, %s6200_s23  ;;  %v1569_v39 = vadd.f32 %v8132_v36, %v7499_v41 }
 0x27c   : > { %v2186_v33 = vpop.f32.mrf.mxu0 }
 0x27d   : > { %v2643_v58 = vadd.f32 %v8151_v1, %v2307_v34  ;;  %v1640_v52 = vpop.f32.mrf.mxu1 }
 0x27e   : > { %v2189_v30 = vpop.f32.mrf.mxu0 }
 0x27f   : > { %2692 = vst.msk [vmem:[#allocation2 + $0xe8] sm:$0xff] %vm2662_vm1, %v2643_v58  ;;  %v2308_v32 = vadd.f32 %v2189_v30, %v8106_v14  ;;  %2849 = vrot.lane.b32.xlu0 %v8267_v19, %s6200_s23  ;;  %3308 = vrot.lane.b32.xlu1 %v2725_v24, %s6200_s23  ;;  %v2730_v58 = vld [vmem:[#allocation2 + $0x58] sm:$0xff] }
 0x280   : > { %v2191_v55 = vpop.f32.mrf.mxu0 }
 0x281   : > { %v2644_v2 = vadd.f32 %v8166_v15, %v2308_v32  ;;  %v1574_v32 = vadd.f32 %v8143_v7, %v7523_v46 }
 0x282   : > { %v2194_v11 = vpop.f32.mrf.mxu0 }
 0x283   : > { %2693 = vst.msk [vmem:[#allocation2 + $0xf0] sm:$0xff] %vm2662_vm1, %v2644_v2  ;;  %v2309_v1 = vadd.f32 %v2194_v11, %v8116_v61  ;;  %4538 = vrot.lane.b32.xlu0 %v8267_v19, %s6201_s28  ;;  %2847 = vrot.lane.b32.xlu1 %v2725_v24, %s6200_s23  ;;  %v1579_v11 = vadd.f32 %v8154_v22, %v7547_v51 }
 0x284   : > { %v2196_v14 = vpop.f32.mrf.mxu0 }
 0x285   : > { %v2645_v62 = vadd.f32 %v8168_v57, %v2309_v1  ;;  %v8295_v25 = vpop.permute.xlu0 %4238  ;;  %v8297_v63 = vpop.permute.xlu1 %3712 }
 0x286   : > { %v2199_v13 = vpop.f32.mrf.mxu0 }
 0x287   : > { %2694 = vst.msk [vmem:[#allocation2 + $0xf8] sm:$0xff] %vm2662_vm1, %v2645_v62  ;;  %v2310_v15 = vadd.f32 %v2199_v13, %v8128_v29  ;;  %4006 = vrot.lane.b32.xlu0 %v8267_v19, %s6201_s28  ;;  %4536 = vrot.lane.b32.xlu1 %v2725_v24, %s6201_s28  ;;  %v1584_v13 = vadd.f32 %v8161_v48, %v7568_v20 }
 0x288   : > { %v2201_v61 = vpop.f32.mrf.mxu0  ;;  %v1589_v48 = vadd.f32 %v8172_v5, %v7589_v23 }
 0x289   : > { %v2646_v57 = vadd.f32 %v8178_v47, %v2310_v15  ;;  %v8307_v34 = vpop.permute.xlu0 %3264  ;;  %v8309_v33 = vpop.permute.xlu1 %2807  ;;  %v2729_v61 = vld [vmem:[#allocation2 + $0x50] sm:$0xff] }
 0x28a   : > { %10465 = vst [vmem:[#allocation8_spill] sm:$0xff] %v8307_v34  ;;  %10466 = vst [vmem:[#allocation9_spill] sm:$0xff] %v8309_v33  ;;  %v2204_v52 = vpop.f32.mrf.mxu0  ;;  %v8606_v33 = vld [vmem:[#allocation2 + $0xa8] sm:$0xff]  ;;  %v8807_v34 = vld [vmem:[#allocation2 + $0xf0] sm:$0xff] }
 0x28b   : > { %2695 = vst.msk [vmem:[#allocation2 + $0x100] sm:$0xff] %vm2662_vm1, %v2646_v57  ;;  %v2311_v29 = vadd.f32 %v2204_v52, %v1569_v39  ;;  %4300 = vrot.lane.b32.xlu0 %v2730_v58, %s6200_s23  ;;  %4004 = vrot.lane.b32.xlu1 %v2725_v24, %s6201_s28  ;;  %10575 = vst [vmem:[#allocation110_spill] sm:$0xff] %v8807_v34 }
 0x28c   : > { %v2206_v30 = vpop.f32.mrf.mxu0 }
 0x28d   : > { %v2647_v41 = vadd.f32 %v8180_v43, %v2311_v29  ;;  %v8317_v36 = vpop.permute.xlu0 %3714  ;;  %v8319_v47 = vpop.permute.xlu1 %4504 }
 0x28e   : > { %v2209_v55 = vpop.f32.mrf.mxu0 }
 0x28f   : > { %2696 = vst.msk [vmem:[#allocation2 + $0x108] sm:$0xff] %vm2662_vm1, %v2647_v41  ;;  %v2312_v2 = vadd.f32 %v2209_v55, %v1574_v32  ;;  %3774 = vrot.lane.b32.xlu0 %v2730_v58, %s6200_s23  ;;  %4288 = vrot.lane.b32.xlu1 %v8267_v19, %s6200_s23  ;;  %v1594_v32 = vadd.f32 %v8183_v4, %v7607_v26 }
 0x290   : > { %v2211_v24 = vpop.f32.mrf.mxu0 }
 0x291   : > { %v2648_v46 = vadd.f32 %v8195_v53, %v2312_v2  ;;  %v8328_v7 = vpop.permute.xlu0 %2809  ;;  %v8330_v43 = vpop.permute.xlu1 %3972  ;;  %v1599_v24 = vadd.f32 %v8190_v49, %v7625_v37 }
 0x292   : > { %10467 = vst [vmem:[#allocation10_spill] sm:$0xff] %v8328_v7  ;;  %v2214_v1 = vpop.f32.mrf.mxu0  ;;  %v3828_v7 = vld [vmem:[#allocation2 + $0xa0] sm:$0xff] }
 0x293   : > { %2697 = vst.msk [vmem:[#allocation2 + $0x110] sm:$0xff] %vm2662_vm1, %v2648_v46  ;;  %v2313_v14 = vadd.f32 %v2214_v1, %v1579_v11  ;;  %3320 = vrot.lane.b32.xlu0 %v2730_v58, %s6200_s23  ;;  %3310 = vrot.lane.b32.xlu1 %v8267_v19, %s6200_s23  ;;  %v2734_v46 = vld [vmem:[#allocation2 + $0x68] sm:$0xff] }
 0x294   : > { %v2216_v62 = vpop.f32.mrf.mxu0 }
 0x295   : > { %v2649_v51 = vadd.f32 %v8197_v54, %v2313_v14  ;;  %v8339_v22 = vpop.permute.xlu0 %4506  ;;  %v8341_v53 = vpop.permute.xlu1 %3506  ;;  %v1604_v14 = vadd.f32 %v8201_v8, %v7643_v40  ;;  %v1609_v8 = vadd.f32 %v8212_v38, %v7661_v45  ;;  %v8403_v45 = vld [vmem:[#allocation2 + $0x60] sm:$0xff] }
 0x296   : > { %10468 = vst [vmem:[#allocation11_spill] sm:$0xff] %v8341_v53  ;;  %v2219_v15 = vpop.f32.mrf.mxu0 }
 0x297   : > { %2698 = vst.msk [vmem:[#allocation2 + $0x118] sm:$0xff] %vm2662_vm1, %v2649_v51  ;;  %v2314_v39 = vadd.f32 %v2219_v15, %v1584_v13  ;;  %2859 = vrot.lane.b32.xlu0 %v2730_v58, %s6200_s23  ;;  %4298 = vrot.lane.b32.xlu1 %v2729_v61, %s6200_s23 }
 0x298   : > { %v2221_v19 = vpop.f32.mrf.mxu0 }
 0x299   : > { %v2650_v57 = vadd.f32 %v8207_v17, %v2314_v39  ;;  %v8347_v52 = vpop.permute.xlu0 %3974  ;;  %v8349_v20 = vpop.permute.xlu1 %4240 }
 0x29a   : > { %v2224_v54 = vpop.f32.mrf.mxu0 }
 0x29b   : > { %2699 = vst.msk [vmem:[#allocation2 + $0x120] sm:$0xff] %vm2662_vm1, %v2650_v57  ;;  %4546 = vrot.lane.b32.xlu0 %v2730_v58, %s6201_s28  ;;  %v2315_v29 = vadd.f32 %v2224_v54, %v1589_v48  ;;  %3772 = vrot.lane.b32.xlu1 %v2729_v61, %s6200_s23  ;;  %v1614_v48 = vadd.f32 %v8219_v28, %v7679_v50 }
 0x29c   : > { %v2226_v30 = vpop.f32.mrf.mxu0  ;;  %v1619_v50 = vadd.f32 %v8230_v42, %v7697_v56 }
 0x29d   : > { %v8358_v17 = vpop.permute.xlu0 %3508  ;;  %v8360_v41 = vpop.permute.xlu1 %3266  ;;  %v2651_v55 = vadd.f32 %v8209_v44, %v2315_v29 }
 0x29e   : > { %10469 = vst [vmem:[#allocation12_spill] sm:$0xff] %v8358_v17  ;;  %10470 = vst [vmem:[#allocation13_spill] sm:$0xff] %v8360_v41  ;;  %v2229_v2 = vpop.f32.mrf.mxu0  ;;  %v4342_v17 = vld [vmem:[#allocation2 + $0x90] sm:$0xff] }
 0x29f   : > { %v2316_v23 = vadd.f32 %v2229_v2, %v1594_v32  ;;  %4014 = vrot.lane.b32.xlu0 %v2730_v58, %s6201_s28  ;;  %2700 = vst.msk [vmem:[#allocation2 + $0x128] sm:$0xff] %vm2662_vm1, %v2651_v55  ;;  %3318 = vrot.lane.b32.xlu1 %v2729_v61, %s6200_s23 }
 0x2a0   : > { %v2231_v5 = vpop.f32.mrf.mxu0 }
 0x2a1   : > { %v2652_v26 = vadd.f32 %v8224_v0, %v2316_v23  ;;  %v8369_v4 = vpop.permute.xlu0 %4250  ;;  %v8371_v11 = vpop.permute.xlu1 %3724  ;;  %v10475_v5 = vld [vmem:[#allocation4_spill] sm:$0xff] }
 0x2a2   : > { %v2234_v44 = vpop.f32.mrf.mxu0 }
 0x2a3   : > { %2701 = vst.msk [vmem:[#allocation2 + $0x130] sm:$0xff] %vm2662_vm1, %v2652_v26  ;;  %v2317_v1 = vadd.f32 %v2234_v44, %v1599_v24  ;;  %4312 = vrot.lane.b32.xlu0 %v2734_v46, %s6200_s23  ;;  %2857 = vrot.lane.b32.xlu1 %v2729_v61, %s6200_s23  ;;  %v1624_v24 = vadd.f32 %v8241_v18, %v10475_v5 }
 0x2a4   : > { %v2236_v58 = vpop.f32.mrf.mxu0 }
 0x2a5   : > { %v2653_v37 = vadd.f32 %v8226_v35, %v2317_v1  ;;  %v8379_v49 = vpop.permute.xlu0 %3276  ;;  %v8381_v0 = vpop.permute.xlu1 %2817  ;;  %v10477_v58 = vld [vmem:[#allocation5_spill] sm:$0xff] }
 0x2a6   : > { %10471 = vst [vmem:[#allocation14_spill] sm:$0xff] %v8379_v49  ;;  %10472 = vst [vmem:[#allocation15_spill] sm:$0xff] %v8381_v0  ;;  %v2239_v62 = vpop.f32.mrf.mxu0  ;;  %v4355_v0 = vld [vmem:[#allocation2 + $0xa8] sm:$0xff] }
 0x2a7   : > { %2702 = vst.msk [vmem:[#allocation2 + $0x138] sm:$0xff] %vm2662_vm1, %v2653_v37  ;;  %v2318_v13 = vadd.f32 %v2239_v62, %v1604_v14  ;;  %3786 = vrot.lane.b32.xlu0 %v2734_v46, %s6200_s23  ;;  %4544 = vrot.lane.b32.xlu1 %v2729_v61, %s6201_s28  ;;  %v1629_v14 = vadd.f32 %v8248_v27, %v10477_v58  ;;  %v8438_v62 = vld [vmem:[#allocation2 + $0x78] sm:$0xff]  ;;  %v10480_v27 = vld [vmem:[#allocation6_spill] sm:$0xff] }
 0x2a8   : > { %v2241_v51 = vpop.f32.mrf.mxu0 }
 0x2a9   : > { %v2654_v15 = vadd.f32 %v8236_v16, %v2318_v13  ;;  %v8387_v39 = vpop.permute.xlu0 %3726  ;;  %v8389_v40 = vpop.permute.xlu1 %4512 }
 0x2aa   : > { %v2244_v35 = vpop.f32.mrf.mxu0 }
 0x2ab   : > { %2703 = vst.msk [vmem:[#allocation2 + $0x140] sm:$0xff] %vm2662_vm1, %v2654_v15  ;;  %3330 = vrot.lane.b32.xlu0 %v2734_v46, %s6200_s23  ;;  %v2319_v19 = vadd.f32 %v2244_v35, %v1609_v8  ;;  %4012 = vrot.lane.b32.xlu1 %v2729_v61, %s6201_s28 }
 0x2ac   : > { %v2246_v57 = vpop.f32.mrf.mxu0 }
 0x2ad   : > { %v8398_v16 = vpop.permute.xlu0 %2819  ;;  %v8400_v54 = vpop.permute.xlu1 %3980  ;;  %v2655_v29 = vadd.f32 %v8238_v10, %v2319_v19 }
 0x2ae   : > { %10473 = vst [vmem:[#allocation16_spill] sm:$0xff] %v8398_v16  ;;  %10474 = vst [vmem:[#allocation17_spill] sm:$0xff] %v8400_v54  ;;  %v2249_v30 = vpop.f32.mrf.mxu0 }
 0x2af   : > { %v2320_v38 = vadd.f32 %v2249_v30, %v1614_v48  ;;  %2869 = vrot.lane.b32.xlu0 %v2734_v46, %s6200_s23  ;;  %2704 = vst.msk [vmem:[#allocation2 + $0x148] sm:$0xff] %vm2662_vm1, %v2655_v29  ;;  %4310 = vrot.lane.b32.xlu1 %v8403_v45, %s6200_s23  ;;  %v10485_v30 = vld [vmem:[#allocation7_spill] sm:$0xff] }
 0x2b0   : > { %v2251_v61 = vpop.f32.mrf.mxu0 }
 0x2b1   : > { %v2656_v28 = vadd.f32 %v8253_v60, %v2320_v38  ;;  %v8412_v32 = vpop.permute.xlu0 %4514  ;;  %v8414_v10 = vpop.permute.xlu1 %4252  ;;  %v1639_v38 = vadd.f32 %v8272_v6, %v10485_v30 }
 0x2b2   : > { %v2254_v55 = vpop.f32.mrf.mxu0 }
 0x2b3   : > { %2705 = vst.msk [vmem:[#allocation2 + $0x150] sm:$0xff] %vm2662_vm1, %v2656_v28  ;;  %v2321_v2 = vadd.f32 %v2254_v55, %v1619_v50  ;;  %4554 = vrot.lane.b32.xlu0 %v2734_v46, %s6201_s28  ;;  %3784 = vrot.lane.b32.xlu1 %v8403_v45, %s6200_s23 }
 0x2b4   : > { %v2256_v23 = vpop.f32.mrf.mxu0 }
 0x2b5   : > { %v2657_v56 = vadd.f32 %v8255_v21, %v2321_v2  ;;  %v8423_v42 = vpop.permute.xlu0 %3982  ;;  %v8425_v60 = vpop.permute.xlu1 %3278  ;;  %v8474_v23 = vld [vmem:[#allocation2 + $0x70] sm:$0xff] }
 0x2b6   : > { %10476 = vst [vmem:[#allocation4_spill] sm:$0xff] %v8425_v60  ;;  %v2259_v26 = vpop.f32.mrf.mxu0 }
 0x2b7   : > { %2706 = vst.msk [vmem:[#allocation2 + $0x158] sm:$0xff] %vm2662_vm1, %v2657_v56  ;;  %v2322_v44 = vadd.f32 %v2259_v26, %v1624_v24  ;;  %4022 = vrot.lane.b32.xlu0 %v2734_v46, %s6201_s28  ;;  %3328 = vrot.lane.b32.xlu1 %v8403_v45, %s6200_s23  ;;  %v3792_v24 = vld [vmem:[#allocation2 + $0x70] sm:$0xff] }
 0x2b8   : > { %v2261_v1 = vpop.f32.mrf.mxu0 }
 0x2b9   : > { %v2658_v18 = vadd.f32 %v8265_v9, %v2322_v44  ;;  %v8434_v21 = vpop.permute.xlu0 %3516  ;;  %v8436_v37 = vpop.permute.xlu1 %3736  ;;  %v1634_v9 = vadd.f32 %v8259_v3, %v10480_v27  ;;  %v4331_v1 = vld [vmem:[#allocation2 + $0x88] sm:$0xff] }
 0x2ba   : > { %10478 = vst [vmem:[#allocation5_spill] sm:$0xff] %v8434_v21  ;;  %10479 = vst [vmem:[#allocation18_spill] sm:$0xff] %v8436_v37  ;;  %v2264_v13 = vpop.f32.mrf.mxu0 }
 0x2bb   : > { %2707 = vst.msk [vmem:[#allocation2 + $0x160] sm:$0xff] %vm2662_vm1, %v2658_v18  ;;  %v2323_v51 = vadd.f32 %v2264_v13, %v1629_v14  ;;  %4324 = vrot.lane.b32.xlu0 %v8438_v62, %s6200_s23  ;;  %2867 = vrot.lane.b32.xlu1 %v8403_v45, %s6200_s23 }
 0x2bc   : > { %v2266_v46 = vpop.f32.mrf.mxu0 }
 0x2bd   : > { %v2659_v15 = vadd.f32 %v8269_v31, %v2323_v51  ;;  %v8448_v8 = vpop.permute.xlu0 %4262  ;;  %v8450_v35 = vpop.permute.xlu1 %2827  ;;  %v8514_v51 = vld [vmem:[#allocation2 + $0x88] sm:$0xff] }
 0x2be   : > { %10481 = vst [vmem:[#allocation6_spill] sm:$0xff] %v8448_v8  ;;  %10482 = vst [vmem:[#allocation19_spill] sm:$0xff] %v8450_v35  ;;  %v2269_v19 = vpop.f32.mrf.mxu0  ;;  %v9291_v8 = vld [vmem:[#allocation2 + $0x68] sm:$0xff] }
 0x2bf   : > { %2708 = vst.msk [vmem:[#allocation2 + $0x168] sm:$0xff] %vm2662_vm1, %v2659_v15  ;;  %v2324_v57 = vadd.f32 %v2269_v19, %v1634_v9  ;;  %3798 = vrot.lane.b32.xlu0 %v8438_v62, %s6200_s23  ;;  %4552 = vrot.lane.b32.xlu1 %v8403_v45, %s6201_s28  ;;  %v4330_v9 = vld [vmem:[#allocation2 + $0x80] sm:$0xff] }
 0x2c0   : > { %v2271_v48 = vpop.f32.mrf.mxu0 }
 0x2c1   : > { %v2660_v29 = vadd.f32 %v8284_v59, %v2324_v57  ;;  %v8458_v3 = vpop.permute.xlu0 %3288  ;;  %v8460_v31 = vpop.permute.xlu1 %4520 }
 0x2c2   : > { %10483 = vst [vmem:[#allocation20_spill] sm:$0xff] %v8458_v3  ;;  %10484 = vst [vmem:[#allocation21_spill] sm:$0xff] %v8460_v31  ;;  %v2274_v61 = vpop.f32.mrf.mxu0 }
 0x2c3   : > { %2709 = vst.msk [vmem:[#allocation2 + $0x170] sm:$0xff] %vm2662_vm1, %v2660_v29  ;;  %3340 = vrot.lane.b32.xlu0 %v8438_v62, %s6200_s23  ;;  %v2325_v50 = vadd.f32 %v2274_v61, %v1639_v38  ;;  %4020 = vrot.lane.b32.xlu1 %v8403_v45, %s6201_s28  ;;  %v8536_v29 = vld [vmem:[#allocation2 + $0x80] sm:$0xff]  ;;  %v4343_v61 = vld [vmem:[#allocation2 + $0x98] sm:$0xff] }
 0x2c4   : > { %v2276_v28 = vpop.f32.mrf.mxu0 }
 0x2c5   : > { %v8469_v55 = vpop.permute.xlu0 %3738  ;;  %v8471_v59 = vpop.permute.xlu1 %3988  ;;  %v2661_v2 = vadd.f32 %v8286_v12, %v2325_v50 }
 0x2c6   : > { %10486 = vst [vmem:[#allocation7_spill] sm:$0xff] %v8471_v59 }
 0x2c7   : > { %2879 = vrot.lane.b32.xlu0 %v8438_v62, %s6200_s23  ;;  %2710 = vst.msk [vmem:[#allocation2 + $0x178] sm:$0xff] %vm2662_vm1, %v2661_v2  ;;  %4322 = vrot.lane.b32.xlu1 %v8474_v23, %s6200_s23 }
 0x2c9   : > { %v8481_v6 = vpop.permute.xlu0 %2829  ;;  %v8483_v5 = vpop.permute.xlu1 %4264 }
 0x2ca   : > { %10487 = vst [vmem:[#allocation22_spill] sm:$0xff] %v8481_v6  ;;  %10488 = vst [vmem:[#allocation23_spill] sm:$0xff] %v8483_v5  ;;  %v8580_v6 = vld [vmem:[#allocation2 + $0x90] sm:$0xff] }
 0x2cb   : > { %4562 = vrot.lane.b32.xlu0 %v8438_v62, %s6201_s28  ;;  %3796 = vrot.lane.b32.xlu1 %v3792_v24, %s6200_s23  ;;  %v9091_v41 = vld [vmem:[#allocation2 + $0x170] sm:$0xff] }
 0x2cc   : > { %10640 = vst [vmem:[#allocation175_spill] sm:$0xff] %v9091_v41  ;;  %v9217_v5 = vld [vmem:[#allocation2 + $0x30] sm:$0xff] }
 0x2cd   : > { %v8488_v12 = vpop.permute.xlu0 %4522  ;;  %v8490_v56 = vpop.permute.xlu1 %3290 }
 0x2ce   : > { %10489 = vst [vmem:[#allocation24_spill] sm:$0xff] %v8488_v12  ;;  %10490 = vst [vmem:[#allocation25_spill] sm:$0xff] %v8490_v56  ;;  %v9181_v12 = vld [vmem:[#allocation2 + $0x20] sm:$0xff] }
 0x2cf   : > { %4030 = vrot.lane.b32.xlu0 %v8438_v62, %s6201_s28  ;;  %3338 = vrot.lane.b32.xlu1 %v8474_v23, %s6200_s23 }
 0x2d1   : > { %v8496_v26 = vpop.permute.xlu0 %3990  ;;  %v8498_v44 = vpop.permute.xlu1 %3748 }
 0x2d2   : > { %10491 = vst [vmem:[#allocation26_spill] sm:$0xff] %v8496_v26  ;;  %10492 = vst [vmem:[#allocation27_spill] sm:$0xff] %v8498_v44 }
 0x2d3   : > { %4336 = vrot.lane.b32.xlu0 %v4331_v1, %s6200_s23  ;;  %2877 = vrot.lane.b32.xlu1 %v8474_v23, %s6200_s23 }
 0x2d5   : > { %v8503_v58 = vpop.permute.xlu0 %4274  ;;  %v8505_v14 = vpop.permute.xlu1 %2837 }
 0x2d6   : > { %10493 = vst [vmem:[#allocation28_spill] sm:$0xff] %v8503_v58  ;;  %10494 = vst [vmem:[#allocation29_spill] sm:$0xff] %v8505_v14 }
 0x2d7   : > { %3810 = vrot.lane.b32.xlu0 %v4331_v1, %s6200_s23  ;;  %4560 = vrot.lane.b32.xlu1 %v8474_v23, %s6201_s28 }
 0x2d9   : > { %v8510_v18 = vpop.permute.xlu0 %3298  ;;  %v8512_v13 = vpop.permute.xlu1 %4528 }
 0x2da   : > { %10495 = vst [vmem:[#allocation30_spill] sm:$0xff] %v8510_v18  ;;  %10496 = vst [vmem:[#allocation31_spill] sm:$0xff] %v8512_v13 }
 0x2db   : > { %3350 = vrot.lane.b32.xlu0 %v8514_v51, %s6200_s23  ;;  %4028 = vrot.lane.b32.xlu1 %v3792_v24, %s6201_s28  ;;  %v8556_v24 = vld [vmem:[#allocation2 + $0x98] sm:$0xff] }
 0x2dd   : > { %v8519_v46 = vpop.permute.xlu0 %3750  ;;  %v8521_v27 = vpop.permute.xlu1 %3996 }
 0x2de   : > { %10497 = vst [vmem:[#allocation32_spill] sm:$0xff] %v8519_v46  ;;  %10498 = vst [vmem:[#allocation33_spill] sm:$0xff] %v8521_v27  ;;  %v9035_v46 = vld [vmem:[#allocation2 + $0x150] sm:$0xff] }
 0x2df   : > { %2889 = vrot.lane.b32.xlu0 %v8514_v51, %s6200_s23  ;;  %4334 = vrot.lane.b32.xlu1 %v4330_v9, %s6200_s23 }
 0x2e1   : > { %v8526_v15 = vpop.permute.xlu0 %2839  ;;  %v8528_v19 = vpop.permute.xlu1 %4276 }
 0x2e2   : > { %10499 = vst [vmem:[#allocation34_spill] sm:$0xff] %v8526_v15  ;;  %10500 = vst [vmem:[#allocation35_spill] sm:$0xff] %v8528_v19 }
 0x2e3   : > { %4570 = vrot.lane.b32.xlu0 %v4331_v1, %s6201_s28  ;;  %3808 = vrot.lane.b32.xlu1 %v4330_v9, %s6200_s23 }
 0x2e5   : > { %v8532_v57 = vpop.permute.xlu0 %4530  ;;  %v8534_v48 = vpop.permute.xlu1 %3300 }
 0x2e6   : > { %10501 = vst [vmem:[#allocation36_spill] sm:$0xff] %v8532_v57  ;;  %10502 = vst [vmem:[#allocation37_spill] sm:$0xff] %v8534_v48  ;;  %v8658_v48 = vld [vmem:[#allocation2 + $0xb0] sm:$0xff]  ;;  %v9063_v57 = vld [vmem:[#allocation2 + $0x160] sm:$0xff] }
 0x2e7   : > { %4038 = vrot.lane.b32.xlu0 %v4331_v1, %s6201_s28  ;;  %3348 = vrot.lane.b32.xlu1 %v8536_v29, %s6200_s23 }
 0x2e9   : > { %v8541_v30 = vpop.permute.xlu0 %3998  ;;  %v8543_v38 = vpop.permute.xlu1 %4286 }
 0x2ea   : > { %10503 = vst [vmem:[#allocation38_spill] sm:$0xff] %v8541_v30  ;;  %10504 = vst [vmem:[#allocation39_spill] sm:$0xff] %v8543_v38 }
 0x2eb   : > { %4348 = vrot.lane.b32.xlu0 %v4343_v61, %s6200_s23  ;;  %2887 = vrot.lane.b32.xlu1 %v8536_v29, %s6200_s23 }
 0x2ed   : > { %v8548_v50 = vpop.permute.xlu0 %3762  ;;  %v8550_v28 = vpop.permute.xlu1 %3760 }
 0x2ee   : > { %10505 = vst [vmem:[#allocation40_spill] sm:$0xff] %v8548_v50  ;;  %10506 = vst [vmem:[#allocation41_spill] sm:$0xff] %v8550_v28 }
 0x2ef   : > { %3822 = vrot.lane.b32.xlu0 %v4343_v61, %s6200_s23  ;;  %4568 = vrot.lane.b32.xlu1 %v4330_v9, %s6201_s28 }
 0x2f1   : > { %v8554_v2 = vpop.permute.xlu0 %2849  ;;  %v8558_v1 = vpop.permute.xlu1 %3308 }
 0x2f2   : > { %10507 = vst [vmem:[#allocation42_spill] sm:$0xff] %v8554_v2  ;;  %10508 = vst [vmem:[#allocation43_spill] sm:$0xff] %v8558_v1 }
 0x2f3   : > { %3360 = vrot.lane.b32.xlu0 %v8556_v24, %s6200_s23  ;;  %4036 = vrot.lane.b32.xlu1 %v4330_v9, %s6201_s28 }
 0x2f5   : > { %v8563_v53 = vpop.permute.xlu0 %4538  ;;  %v8565_v21 = vpop.permute.xlu1 %2847 }
 0x2f6   : > { %10509 = vst [vmem:[#allocation44_spill] sm:$0xff] %v8563_v53  ;;  %10510 = vst [vmem:[#allocation45_spill] sm:$0xff] %v8565_v21 }
 0x2f7   : > { %2899 = vrot.lane.b32.xlu0 %v8556_v24, %s6200_s23  ;;  %4346 = vrot.lane.b32.xlu1 %v4342_v17, %s6200_s23 }
 0x2f9   : > { %v8570_v14 = vpop.permute.xlu0 %4006  ;;  %v8572_v2 = vpop.permute.xlu1 %4536 }
 0x2fa   : > { %10511 = vst [vmem:[#allocation46_spill] sm:$0xff] %v8570_v14  ;;  %10512 = vst [vmem:[#allocation47_spill] sm:$0xff] %v8572_v2  ;;  %v8727_v14 = vld [vmem:[#allocation2 + $0xd0] sm:$0xff]  ;;  %v8767_v2 = vld [vmem:[#allocation2 + $0xe0] sm:$0xff] }
 0x2fb   : > { %4578 = vrot.lane.b32.xlu0 %v4343_v61, %s6201_s28  ;;  %3820 = vrot.lane.b32.xlu1 %v4342_v17, %s6200_s23  ;;  %10553 = vst [vmem:[#allocation88_spill] sm:$0xff] %v8727_v14  ;;  %10564 = vst [vmem:[#allocation99_spill] sm:$0xff] %v8767_v2 }
 0x2fd   : > { %v8576_v15 = vpop.permute.xlu0 %4300  ;;  %v8578_v9 = vpop.permute.xlu1 %4004 }
 0x2fe   : > { %10513 = vst [vmem:[#allocation48_spill] sm:$0xff] %v8576_v15  ;;  %10514 = vst [vmem:[#allocation49_spill] sm:$0xff] %v8578_v9  ;;  %v8617_v9 = vld [vmem:[#allocation2 + $0xa0] sm:$0xff] }
 0x2ff   : > { %4046 = vrot.lane.b32.xlu0 %v4343_v61, %s6201_s28  ;;  %3358 = vrot.lane.b32.xlu1 %v8580_v6, %s6200_s23 }
 0x301   : > { %v8585_v21 = vpop.permute.xlu0 %3774  ;;  %v8587_v16 = vpop.permute.xlu1 %4288 }
 0x302   : > { %10515 = vst [vmem:[#allocation50_spill] sm:$0xff] %v8585_v21  ;;  %10516 = vst [vmem:[#allocation51_spill] sm:$0xff] %v8587_v16 }
 0x303   : > { %3832 = vrot.lane.b32.xlu0 %v3828_v7, %s6200_s23  ;;  %2897 = vrot.lane.b32.xlu1 %v8580_v6, %s6200_s23 }
 0x305   : > { %v8592_v35 = vpop.permute.xlu0 %3320  ;;  %v8594_v1 = vpop.permute.xlu1 %3310 }
 0x306   : > { %10517 = vst [vmem:[#allocation52_spill] sm:$0xff] %v8592_v35  ;;  %10518 = vst [vmem:[#allocation53_spill] sm:$0xff] %v8594_v1 }
 0x307   : > { %4360 = vrot.lane.b32.xlu0 %v4355_v0, %s6200_s23  ;;  %4576 = vrot.lane.b32.xlu1 %v4342_v17, %s6201_s28 }
 0x309   : > { %v8598_v61 = vpop.permute.xlu0 %2859  ;;  %v8600_v18 = vpop.permute.xlu1 %4298 }
 0x30a   : > { %10519 = vst [vmem:[#allocation54_spill] sm:$0xff] %v8598_v61  ;;  %10520 = vst [vmem:[#allocation55_spill] sm:$0xff] %v8600_v18  ;;  %v8687_v18 = vld [vmem:[#allocation2 + $0xc0] sm:$0xff] }
 0x30b   : > { %3834 = vrot.lane.b32.xlu0 %v4355_v0, %s6200_s23  ;;  %4044 = vrot.lane.b32.xlu1 %v4342_v17, %s6201_s28  ;;  %10542 = vst [vmem:[#allocation77_spill] sm:$0xff] %v8687_v18 }
 0x30d   : > { %v8604_v3 = vpop.permute.xlu0 %4546  ;;  %v8608_v35 = vpop.permute.xlu1 %3772 }
 0x30e   : > { %10521 = vst [vmem:[#allocation56_spill] sm:$0xff] %v8604_v3  ;;  %10522 = vst [vmem:[#allocation57_spill] sm:$0xff] %v8608_v35 }
 0x30f   : > { %3370 = vrot.lane.b32.xlu0 %v8606_v33, %s6200_s23  ;;  %4358 = vrot.lane.b32.xlu1 %v3828_v7, %s6200_s23 }
 0x311   : > { %v8613_v1 = vpop.permute.xlu0 %4014  ;;  %v8615_v61 = vpop.permute.xlu1 %3318 }
 0x312   : > { %10523 = vst [vmem:[#allocation58_spill] sm:$0xff] %v8613_v1  ;;  %10524 = vst [vmem:[#allocation59_spill] sm:$0xff] %v8615_v61 }
 0x313   : > { %2909 = vrot.lane.b32.xlu0 %v8606_v33, %s6200_s23  ;;  %3368 = vrot.lane.b32.xlu1 %v8617_v9, %s6200_s23 }
 0x315   : > { %v8623_v17 = vpop.permute.xlu0 %4312  ;;  %v8625_v35 = vpop.permute.xlu1 %2857 }
 0x316   : > { %10525 = vst [vmem:[#allocation60_spill] sm:$0xff] %v8623_v17  ;;  %10526 = vst [vmem:[#allocation61_spill] sm:$0xff] %v8625_v35  ;;  %v8640_v17 = vld [vmem:[#allocation2 + $0xb0] sm:$0xff] }
 0x317   : > { %4586 = vrot.lane.b32.xlu0 %v4355_v0, %s6201_s28  ;;  %2907 = vrot.lane.b32.xlu1 %v8617_v9, %s6200_s23 }
 0x319   : > { %v8630_v1 = vpop.permute.xlu0 %3786  ;;  %v8632_v61 = vpop.permute.xlu1 %4544 }
 0x31a   : > { %10527 = vst [vmem:[#allocation62_spill] sm:$0xff] %v8630_v1  ;;  %10528 = vst [vmem:[#allocation63_spill] sm:$0xff] %v8632_v61  ;;  %v4367_v61 = vld [vmem:[#allocation2 + $0xb8] sm:$0xff] }
 0x31b   : > { %4054 = vrot.lane.b32.xlu0 %v4355_v0, %s6201_s28  ;;  %4584 = vrot.lane.b32.xlu1 %v3828_v7, %s6201_s28 }
 0x31d   : > { %v8636_v49 = vpop.permute.xlu0 %3330  ;;  %v8638_v21 = vpop.permute.xlu1 %4012 }
 0x31e   : > { %10529 = vst [vmem:[#allocation64_spill] sm:$0xff] %v8636_v49  ;;  %10530 = vst [vmem:[#allocation65_spill] sm:$0xff] %v8638_v21  ;;  %v8654_v49 = vld [vmem:[#allocation2 + $0xb8] sm:$0xff] }
 0x31f   : > { %3844 = vrot.lane.b32.xlu0 %v8640_v17, %s6200_s23  ;;  %4052 = vrot.lane.b32.xlu1 %v3828_v7, %s6201_s28 }
 0x321   : > { %v8645_v35 = vpop.permute.xlu0 %2869  ;;  %v8647_v1 = vpop.permute.xlu1 %4310 }
 0x322   : > { %10531 = vst [vmem:[#allocation66_spill] sm:$0xff] %v8645_v35  ;;  %10532 = vst [vmem:[#allocation67_spill] sm:$0xff] %v8647_v1 }
 0x323   : > { %4372 = vrot.lane.b32.xlu0 %v4367_v61, %s6200_s23  ;;  %4370 = vrot.lane.b32.xlu1 %v8640_v17, %s6200_s23 }
 0x325   : > { %v8652_v0 = vpop.permute.xlu0 %4554  ;;  %v8656_v21 = vpop.permute.xlu1 %3784 }
 0x326   : > { %10533 = vst [vmem:[#allocation68_spill] sm:$0xff] %v8652_v0  ;;  %10534 = vst [vmem:[#allocation69_spill] sm:$0xff] %v8656_v21 }
 0x327   : > { %3380 = vrot.lane.b32.xlu0 %v8654_v49, %s6200_s23  ;;  %3378 = vrot.lane.b32.xlu1 %v8658_v48, %s6200_s23 }
 0x329   : > { %v8664_v7 = vpop.permute.xlu0 %4022  ;;  %v8666_v35 = vpop.permute.xlu1 %3328 }
 0x32a   : > { %10535 = vst [vmem:[#allocation70_spill] sm:$0xff] %v8664_v7  ;;  %10536 = vst [vmem:[#allocation71_spill] sm:$0xff] %v8666_v35 }
 0x32b   : > { %2919 = vrot.lane.b32.xlu0 %v8654_v49, %s6200_s23  ;;  %2917 = vrot.lane.b32.xlu1 %v8658_v48, %s6200_s23 }
 0x32d   : > { %v8672_v1 = vpop.permute.xlu0 %4324  ;;  %v8674_v21 = vpop.permute.xlu1 %2867 }
 0x32e   : > { %10537 = vst [vmem:[#allocation72_spill] sm:$0xff] %v8672_v1  ;;  %10538 = vst [vmem:[#allocation73_spill] sm:$0xff] %v8674_v21  ;;  %v4378_v21 = vld [vmem:[#allocation2 + $0xc0] sm:$0xff] }
 0x32f   : > { %4594 = vrot.lane.b32.xlu0 %v4367_v61, %s6201_s28  ;;  %4592 = vrot.lane.b32.xlu1 %v8640_v17, %s6201_s28 }
 0x331   : > { %v8679_v0 = vpop.permute.xlu0 %3798  ;;  %v8681_v7 = vpop.permute.xlu1 %4552 }
 0x332   : > { %10539 = vst [vmem:[#allocation74_spill] sm:$0xff] %v8679_v0  ;;  %10540 = vst [vmem:[#allocation75_spill] sm:$0xff] %v8681_v7  ;;  %v4379_v7 = vld [vmem:[#allocation2 + $0xc8] sm:$0xff] }
 0x333   : > { %4062 = vrot.lane.b32.xlu0 %v4367_v61, %s6201_s28  ;;  %3846 = vrot.lane.b32.xlu1 %v4367_v61, %s6200_s23 }
 0x335   : > { %v8685_v35 = vpop.permute.xlu0 %3340  ;;  %v8689_v1 = vpop.permute.xlu1 %4020 }
 0x336   : > { %10541 = vst [vmem:[#allocation76_spill] sm:$0xff] %v8685_v35  ;;  %10543 = vst [vmem:[#allocation78_spill] sm:$0xff] %v8689_v1  ;;  %v8703_v35 = vld [vmem:[#allocation2 + $0xc8] sm:$0xff] }
 0x337   : > { %3854 = vrot.lane.b32.xlu0 %v8687_v18, %s6200_s23  ;;  %4382 = vrot.lane.b32.xlu1 %v4378_v21, %s6200_s23 }
 0x339   : > { %v8694_v28 = vpop.permute.xlu0 %2879  ;;  %v8696_v0 = vpop.permute.xlu1 %4322 }
 0x33a   : > { %10544 = vst [vmem:[#allocation79_spill] sm:$0xff] %v8694_v28  ;;  %10545 = vst [vmem:[#allocation80_spill] sm:$0xff] %v8696_v0 }
 0x33b   : > { %4384 = vrot.lane.b32.xlu0 %v4379_v7, %s6200_s23  ;;  %3388 = vrot.lane.b32.xlu1 %v8687_v18, %s6200_s23 }
 0x33d   : > { %v8701_v61 = vpop.permute.xlu0 %4562  ;;  %v8705_v1 = vpop.permute.xlu1 %3796 }
 0x33e   : > { %10546 = vst [vmem:[#allocation81_spill] sm:$0xff] %v8701_v61  ;;  %10547 = vst [vmem:[#allocation82_spill] sm:$0xff] %v8705_v1 }
 0x33f   : > { %3390 = vrot.lane.b32.xlu0 %v8703_v35, %s6200_s23  ;;  %2927 = vrot.lane.b32.xlu1 %v8687_v18, %s6200_s23 }
 0x341   : > { %v8711_v28 = vpop.permute.xlu0 %4030  ;;  %v8713_v0 = vpop.permute.xlu1 %3338 }
 0x342   : > { %10548 = vst [vmem:[#allocation83_spill] sm:$0xff] %v8711_v28  ;;  %10549 = vst [vmem:[#allocation84_spill] sm:$0xff] %v8713_v0  ;;  %v4390_v0 = vld [vmem:[#allocation2 + $0xd0] sm:$0xff] }
 0x343   : > { %2929 = vrot.lane.b32.xlu0 %v8703_v35, %s6200_s23  ;;  %4600 = vrot.lane.b32.xlu1 %v4378_v21, %s6201_s28 }
 0x345   : > { %v8718_v61 = vpop.permute.xlu0 %4336  ;;  %v8720_v3 = vpop.permute.xlu1 %2877 }
 0x346   : > { %10550 = vst [vmem:[#allocation85_spill] sm:$0xff] %v8718_v61  ;;  %10551 = vst [vmem:[#allocation86_spill] sm:$0xff] %v8720_v3  ;;  %v8743_v61 = vld [vmem:[#allocation2 + $0xd8] sm:$0xff] }
 0x347   : > { %4602 = vrot.lane.b32.xlu0 %v4379_v7, %s6201_s28  ;;  %3856 = vrot.lane.b32.xlu1 %v8703_v35, %s6200_s23  ;;  %v4391_v7 = vld [vmem:[#allocation2 + $0xd8] sm:$0xff] }
 0x349   : > { %v8725_v1 = vpop.permute.xlu0 %3810  ;;  %v8729_v28 = vpop.permute.xlu1 %4560 }
 0x34a   : > { %10552 = vst [vmem:[#allocation87_spill] sm:$0xff] %v8725_v1  ;;  %10554 = vst [vmem:[#allocation89_spill] sm:$0xff] %v8729_v28 }
 0x34b   : > { %3864 = vrot.lane.b32.xlu0 %v8727_v14, %s6200_s23  ;;  %4394 = vrot.lane.b32.xlu1 %v4390_v0, %s6200_s23 }
 0x34d   : > { %v8734_v21 = vpop.permute.xlu0 %3350  ;;  %v8736_v3 = vpop.permute.xlu1 %4028 }
 0x34e   : > { %10555 = vst [vmem:[#allocation90_spill] sm:$0xff] %v8734_v21  ;;  %10556 = vst [vmem:[#allocation91_spill] sm:$0xff] %v8736_v3 }
 0x34f   : > { %4396 = vrot.lane.b32.xlu0 %v4391_v7, %s6200_s23  ;;  %3398 = vrot.lane.b32.xlu1 %v8727_v14, %s6200_s23 }
 0x351   : > { %v8741_v1 = vpop.permute.xlu0 %2889  ;;  %v8745_v28 = vpop.permute.xlu1 %4334 }
 0x352   : > { %10557 = vst [vmem:[#allocation92_spill] sm:$0xff] %v8741_v1  ;;  %10558 = vst [vmem:[#allocation93_spill] sm:$0xff] %v8745_v28 }
 0x353   : > { %3400 = vrot.lane.b32.xlu0 %v8743_v61, %s6200_s23  ;;  %2937 = vrot.lane.b32.xlu1 %v8727_v14, %s6200_s23 }
 0x355   : > { %v8751_v21 = vpop.permute.xlu0 %4570  ;;  %v8753_v3 = vpop.permute.xlu1 %3808 }
 0x356   : > { %10559 = vst [vmem:[#allocation94_spill] sm:$0xff] %v8751_v21  ;;  %10560 = vst [vmem:[#allocation95_spill] sm:$0xff] %v8753_v3  ;;  %v4402_v3 = vld [vmem:[#allocation2 + $0xe0] sm:$0xff] }
 0x357   : > { %2939 = vrot.lane.b32.xlu0 %v8743_v61, %s6200_s23  ;;  %4608 = vrot.lane.b32.xlu1 %v4390_v0, %s6201_s28 }
 0x359   : > { %v8758_v1 = vpop.permute.xlu0 %4038  ;;  %v8760_v56 = vpop.permute.xlu1 %3348 }
 0x35a   : > { %10561 = vst [vmem:[#allocation96_spill] sm:$0xff] %v8758_v1  ;;  %10562 = vst [vmem:[#allocation97_spill] sm:$0xff] %v8760_v56 }
 0x35b   : > { %4610 = vrot.lane.b32.xlu0 %v4391_v7, %s6201_s28  ;;  %3866 = vrot.lane.b32.xlu1 %v8743_v61, %s6200_s23  ;;  %v4403_v7 = vld [vmem:[#allocation2 + $0xe8] sm:$0xff] }
 0x35d   : > { %v8765_v28 = vpop.permute.xlu0 %4348  ;;  %v8769_v21 = vpop.permute.xlu1 %2887 }
 0x35e   : > { %10563 = vst [vmem:[#allocation98_spill] sm:$0xff] %v8765_v28  ;;  %10565 = vst [vmem:[#allocation100_spill] sm:$0xff] %v8769_v21  ;;  %v8783_v28 = vld [vmem:[#allocation2 + $0xe8] sm:$0xff] }
 0x35f   : > { %3874 = vrot.lane.b32.xlu0 %v8767_v2, %s6200_s23  ;;  %4406 = vrot.lane.b32.xlu1 %v4402_v3, %s6200_s23 }
 0x361   : > { %v8774_v0 = vpop.permute.xlu0 %3822  ;;  %v8776_v56 = vpop.permute.xlu1 %4568 }
 0x362   : > { %10566 = vst [vmem:[#allocation101_spill] sm:$0xff] %v8774_v0  ;;  %10567 = vst [vmem:[#allocation102_spill] sm:$0xff] %v8776_v56 }
 0x363   : > { %4408 = vrot.lane.b32.xlu0 %v4403_v7, %s6200_s23  ;;  %3408 = vrot.lane.b32.xlu1 %v8767_v2, %s6200_s23 }
 0x365   : > { %v8781_v1 = vpop.permute.xlu0 %3360  ;;  %v8785_v21 = vpop.permute.xlu1 %4036 }
 0x366   : > { %10568 = vst [vmem:[#allocation103_spill] sm:$0xff] %v8781_v1  ;;  %10569 = vst [vmem:[#allocation104_spill] sm:$0xff] %v8785_v21 }
 0x367   : > { %3410 = vrot.lane.b32.xlu0 %v8783_v28, %s6200_s23  ;;  %2947 = vrot.lane.b32.xlu1 %v8767_v2, %s6200_s23 }
 0x369   : > { %v8791_v0 = vpop.permute.xlu0 %2899  ;;  %v8793_v56 = vpop.permute.xlu1 %4346 }
 0x36a   : > { %10570 = vst [vmem:[#allocation105_spill] sm:$0xff] %v8791_v0  ;;  %10571 = vst [vmem:[#allocation106_spill] sm:$0xff] %v8793_v56 }
 0x36b   : > { %2949 = vrot.lane.b32.xlu0 %v8783_v28, %s6200_s23  ;;  %4616 = vrot.lane.b32.xlu1 %v4402_v3, %s6201_s28 }
 0x36d   : > { %v8798_v1 = vpop.permute.xlu0 %4578  ;;  %v8800_v27 = vpop.permute.xlu1 %3820 }
 0x36e   : > { %10572 = vst [vmem:[#allocation107_spill] sm:$0xff] %v8798_v1  ;;  %10573 = vst [vmem:[#allocation108_spill] sm:$0xff] %v8800_v27  ;;  %v8817_v27 = vld [vmem:[#allocation2 + $0xf8] sm:$0xff] }
 0x36f   : > { %4618 = vrot.lane.b32.xlu0 %v4403_v7, %s6201_s28  ;;  %3876 = vrot.lane.b32.xlu1 %v8783_v28, %s6200_s23 }
 0x371   : > { %v8805_v21 = vpop.permute.xlu0 %4046  ;;  %v8809_v0 = vpop.permute.xlu1 %3358 }
 0x372   : > { %10574 = vst [vmem:[#allocation109_spill] sm:$0xff] %v8805_v21  ;;  %10576 = vst [vmem:[#allocation111_spill] sm:$0xff] %v8809_v0 }
 0x373   : > { %4416 = vrot.lane.b32.xlu0 %v8807_v34, %s6200_s23  ;;  %3884 = vrot.lane.b32.xlu1 %v8807_v34, %s6200_s23 }
 0x375   : > { %v8815_v3 = vpop.permute.xlu0 %3832  ;;  %v8819_v7 = vpop.permute.xlu1 %2897 }
 0x376   : > { %10577 = vst [vmem:[#allocation112_spill] sm:$0xff] %v8815_v3  ;;  %10578 = vst [vmem:[#allocation113_spill] sm:$0xff] %v8819_v7 }
 0x377   : > { %4418 = vrot.lane.b32.xlu0 %v8817_v27, %s6200_s23  ;;  %3418 = vrot.lane.b32.xlu1 %v8807_v34, %s6200_s23 }
 0x379   : > { %v8825_v21 = vpop.permute.xlu0 %4360  ;;  %v8827_v0 = vpop.permute.xlu1 %4576 }
 0x37a   : > { %10579 = vst [vmem:[#allocation114_spill] sm:$0xff] %v8825_v21  ;;  %10580 = vst [vmem:[#allocation115_spill] sm:$0xff] %v8827_v0 }
 0x37b   : > { %3420 = vrot.lane.b32.xlu0 %v8817_v27, %s6200_s23  ;;  %2957 = vrot.lane.b32.xlu1 %v8807_v34, %s6200_s23 }
 0x37d   : > { %v8833_v3 = vpop.permute.xlu0 %3834  ;;  %v8835_v56 = vpop.permute.xlu1 %4044 }
 0x37e   : > { %10581 = vst [vmem:[#allocation116_spill] sm:$0xff] %v8833_v3  ;;  %10582 = vst [vmem:[#allocation117_spill] sm:$0xff] %v8835_v56  ;;  %v8851_v3 = vld [vmem:[#allocation2 + $0x100] sm:$0xff] }
 0x37f   : > { %2959 = vrot.lane.b32.xlu0 %v8817_v27, %s6200_s23  ;;  %4624 = vrot.lane.b32.xlu1 %v8807_v34, %s6201_s28 }
 0x381   : > { %v8841_v7 = vpop.permute.xlu0 %3370  ;;  %v8843_v21 = vpop.permute.xlu1 %4358 }
 0x382   : > { %10583 = vst [vmem:[#allocation118_spill] sm:$0xff] %v8841_v7  ;;  %10584 = vst [vmem:[#allocation119_spill] sm:$0xff] %v8843_v21  ;;  %v8861_v21 = vld [vmem:[#allocation2 + $0x108] sm:$0xff] }
 0x383   : > { %4626 = vrot.lane.b32.xlu0 %v8817_v27, %s6201_s28  ;;  %3886 = vrot.lane.b32.xlu1 %v8817_v27, %s6200_s23 }
 0x385   : > { %v8849_v0 = vpop.permute.xlu0 %2909  ;;  %v8853_v56 = vpop.permute.xlu1 %3368 }
 0x386   : > { %10585 = vst [vmem:[#allocation120_spill] sm:$0xff] %v8849_v0  ;;  %10586 = vst [vmem:[#allocation121_spill] sm:$0xff] %v8853_v56 }
 0x387   : > { %4426 = vrot.lane.b32.xlu0 %v8851_v3, %s6200_s23  ;;  %3894 = vrot.lane.b32.xlu1 %v8851_v3, %s6200_s23 }
 0x389   : > { %v8859_v7 = vpop.permute.xlu0 %4586  ;;  %v8863_v1 = vpop.permute.xlu1 %2907 }
 0x38a   : > { %10587 = vst [vmem:[#allocation122_spill] sm:$0xff] %v8859_v7  ;;  %10588 = vst [vmem:[#allocation123_spill] sm:$0xff] %v8863_v1 }
 0x38b   : > { %3896 = vrot.lane.b32.xlu0 %v8861_v21, %s6200_s23  ;;  %3428 = vrot.lane.b32.xlu1 %v8851_v3, %s6200_s23 }
 0x38d   : > { %v8869_v0 = vpop.permute.xlu0 %4054  ;;  %v8871_v56 = vpop.permute.xlu1 %4584 }
 0x38e   : > { %10589 = vst [vmem:[#allocation124_spill] sm:$0xff] %v8869_v0  ;;  %10590 = vst [vmem:[#allocation125_spill] sm:$0xff] %v8871_v56  ;;  %v8889_v56 = vld [vmem:[#allocation2 + $0x110] sm:$0xff] }
 0x38f   : > { %3430 = vrot.lane.b32.xlu0 %v8861_v21, %s6200_s23  ;;  %2967 = vrot.lane.b32.xlu1 %v8851_v3, %s6200_s23 }
 0x391   : > { %v8877_v7 = vpop.permute.xlu0 %3844  ;;  %v8879_v16 = vpop.permute.xlu1 %4052 }
 0x392   : > { %10591 = vst [vmem:[#allocation126_spill] sm:$0xff] %v8877_v7  ;;  %10592 = vst [vmem:[#allocation127_spill] sm:$0xff] %v8879_v16 }
 0x393   : > { %2969 = vrot.lane.b32.xlu0 %v8861_v21, %s6200_s23  ;;  %4428 = vrot.lane.b32.xlu1 %v8861_v21, %s6200_s23 }
 0x395   : > { %v8885_v1 = vpop.permute.xlu0 %4372  ;;  %v8887_v0 = vpop.permute.xlu1 %4370 }
 0x396   : > { %10593 = vst [vmem:[#allocation128_spill] sm:$0xff] %v8885_v1  ;;  %10594 = vst [vmem:[#allocation129_spill] sm:$0xff] %v8887_v0  ;;  %v8905_v0 = vld [vmem:[#allocation2 + $0x118] sm:$0xff] }
 0x397   : > { %4634 = vrot.lane.b32.xlu0 %v8861_v21, %s6201_s28  ;;  %3904 = vrot.lane.b32.xlu1 %v8889_v56, %s6200_s23 }
 0x399   : > { %v8895_v7 = vpop.permute.xlu0 %3380  ;;  %v8897_v16 = vpop.permute.xlu1 %3378 }
 0x39a   : > { %10595 = vst [vmem:[#allocation130_spill] sm:$0xff] %v8895_v7  ;;  %10596 = vst [vmem:[#allocation131_spill] sm:$0xff] %v8897_v16 }
 0x39b   : > { %4436 = vrot.lane.b32.xlu0 %v8889_v56, %s6200_s23  ;;  %3438 = vrot.lane.b32.xlu1 %v8889_v56, %s6200_s23 }
 0x39d   : > { %v8903_v1 = vpop.permute.xlu0 %2919  ;;  %v8907_v50 = vpop.permute.xlu1 %2917 }
 0x39e   : > { %10597 = vst [vmem:[#allocation132_spill] sm:$0xff] %v8903_v1  ;;  %10598 = vst [vmem:[#allocation133_spill] sm:$0xff] %v8907_v50  ;;  %v8925_v50 = vld [vmem:[#allocation2 + $0x120] sm:$0xff] }
 0x39f   : > { %3906 = vrot.lane.b32.xlu0 %v8905_v0, %s6200_s23  ;;  %2977 = vrot.lane.b32.xlu1 %v8889_v56, %s6200_s23 }
 0x3a1   : > { %v8913_v7 = vpop.permute.xlu0 %4594  ;;  %v8915_v16 = vpop.permute.xlu1 %4592 }
 0x3a2   : > { %10599 = vst [vmem:[#allocation134_spill] sm:$0xff] %v8913_v7  ;;  %10600 = vst [vmem:[#allocation135_spill] sm:$0xff] %v8915_v16 }
 0x3a3   : > { %3440 = vrot.lane.b32.xlu0 %v8905_v0, %s6200_s23  ;;  %4438 = vrot.lane.b32.xlu1 %v8905_v0, %s6200_s23 }
 0x3a5   : > { %v8921_v1 = vpop.permute.xlu0 %4062  ;;  %v8923_v38 = vpop.permute.xlu1 %3846 }
 0x3a6   : > { %10601 = vst [vmem:[#allocation136_spill] sm:$0xff] %v8921_v1  ;;  %10602 = vst [vmem:[#allocation137_spill] sm:$0xff] %v8923_v38  ;;  %v8941_v38 = vld [vmem:[#allocation2 + $0x128] sm:$0xff] }
 0x3a7   : > { %2979 = vrot.lane.b32.xlu0 %v8905_v0, %s6200_s23  ;;  %3914 = vrot.lane.b32.xlu1 %v8925_v50, %s6200_s23 }
 0x3a9   : > { %v8931_v7 = vpop.permute.xlu0 %3854  ;;  %v8933_v16 = vpop.permute.xlu1 %4382 }
 0x3aa   : > { %10603 = vst [vmem:[#allocation138_spill] sm:$0xff] %v8931_v7  ;;  %10604 = vst [vmem:[#allocation139_spill] sm:$0xff] %v8933_v16 }
 0x3ab   : > { %4446 = vrot.lane.b32.xlu0 %v8925_v50, %s6200_s23  ;;  %3448 = vrot.lane.b32.xlu1 %v8925_v50, %s6200_s23 }
 0x3ad   : > { %v8939_v1 = vpop.permute.xlu0 %4384  ;;  %v8943_v44 = vpop.permute.xlu1 %3388 }
 0x3ae   : > { %10605 = vst [vmem:[#allocation140_spill] sm:$0xff] %v8939_v1  ;;  %10606 = vst [vmem:[#allocation141_spill] sm:$0xff] %v8943_v44  ;;  %v8961_v44 = vld [vmem:[#allocation2 + $0x130] sm:$0xff] }
 0x3af   : > { %3916 = vrot.lane.b32.xlu0 %v8941_v38, %s6200_s23  ;;  %2987 = vrot.lane.b32.xlu1 %v8925_v50, %s6200_s23 }
 0x3b1   : > { %v8949_v7 = vpop.permute.xlu0 %3390  ;;  %v8951_v16 = vpop.permute.xlu1 %2927 }
 0x3b2   : > { %10607 = vst [vmem:[#allocation142_spill] sm:$0xff] %v8949_v7  ;;  %10608 = vst [vmem:[#allocation143_spill] sm:$0xff] %v8951_v16 }
 0x3b3   : > { %3450 = vrot.lane.b32.xlu0 %v8941_v38, %s6200_s23  ;;  %4448 = vrot.lane.b32.xlu1 %v8941_v38, %s6200_s23 }
 0x3b5   : > { %v8957_v1 = vpop.permute.xlu0 %2929  ;;  %v8959_v15 = vpop.permute.xlu1 %4600 }
 0x3b6   : > { %10609 = vst [vmem:[#allocation144_spill] sm:$0xff] %v8957_v1  ;;  %10610 = vst [vmem:[#allocation145_spill] sm:$0xff] %v8959_v15  ;;  %v8977_v15 = vld [vmem:[#allocation2 + $0x138] sm:$0xff] }
 0x3b7   : > { %2989 = vrot.lane.b32.xlu0 %v8941_v38, %s6200_s23  ;;  %3924 = vrot.lane.b32.xlu1 %v8961_v44, %s6200_s23 }
 0x3b9   : > { %v8967_v7 = vpop.permute.xlu0 %4602  ;;  %v8969_v16 = vpop.permute.xlu1 %3856 }
 0x3ba   : > { %10611 = vst [vmem:[#allocation146_spill] sm:$0xff] %v8967_v7  ;;  %10612 = vst [vmem:[#allocation147_spill] sm:$0xff] %v8969_v16 }
 0x3bb   : > { %4456 = vrot.lane.b32.xlu0 %v8961_v44, %s6200_s23  ;;  %3458 = vrot.lane.b32.xlu1 %v8961_v44, %s6200_s23 }
 0x3bd   : > { %v8975_v1 = vpop.permute.xlu0 %3864  ;;  %v8979_v30 = vpop.permute.xlu1 %4394 }
 0x3be   : > { %10613 = vst [vmem:[#allocation148_spill] sm:$0xff] %v8975_v1  ;;  %10614 = vst [vmem:[#allocation149_spill] sm:$0xff] %v8979_v30  ;;  %v8997_v30 = vld [vmem:[#allocation2 + $0x140] sm:$0xff] }
 0x3bf   : > { %3926 = vrot.lane.b32.xlu0 %v8977_v15, %s6200_s23  ;;  %2997 = vrot.lane.b32.xlu1 %v8961_v44, %s6200_s23 }
 0x3c1   : > { %v8985_v7 = vpop.permute.xlu0 %4396  ;;  %v8987_v16 = vpop.permute.xlu1 %3398 }
 0x3c2   : > { %10615 = vst [vmem:[#allocation150_spill] sm:$0xff] %v8985_v7  ;;  %10616 = vst [vmem:[#allocation151_spill] sm:$0xff] %v8987_v16  ;;  %v9005_v16 = vld [vmem:[#allocation2 + $0x148] sm:$0xff] }
 0x3c3   : > { %3460 = vrot.lane.b32.xlu0 %v8977_v15, %s6200_s23  ;;  %4458 = vrot.lane.b32.xlu1 %v8977_v15, %s6200_s23 }
 0x3c5   : > { %v8993_v1 = vpop.permute.xlu0 %3400  ;;  %v8995_v60 = vpop.permute.xlu1 %2937 }
 0x3c6   : > { %10617 = vst [vmem:[#allocation152_spill] sm:$0xff] %v8993_v1  ;;  %10618 = vst [vmem:[#allocation153_spill] sm:$0xff] %v8995_v60 }
 0x3c7   : > { %2999 = vrot.lane.b32.xlu0 %v8977_v15, %s6200_s23  ;;  %4466 = vrot.lane.b32.xlu1 %v8997_v30, %s6200_s23 }
 0x3c9   : > { %v9003_v7 = vpop.permute.xlu0 %2939  ;;  %v9007_v13 = vpop.permute.xlu1 %4608 }
 0x3ca   : > { %10619 = vst [vmem:[#allocation154_spill] sm:$0xff] %v9003_v7  ;;  %10620 = vst [vmem:[#allocation155_spill] sm:$0xff] %v9007_v13 }
 0x3cb   : > { %3936 = vrot.lane.b32.xlu0 %v9005_v16, %s6200_s23  ;;  %3934 = vrot.lane.b32.xlu1 %v8997_v30, %s6200_s23 }
 0x3cd   : > { %v9013_v60 = vpop.permute.xlu0 %4610  ;;  %v9015_v1 = vpop.permute.xlu1 %3866 }
 0x3ce   : > { %10621 = vst [vmem:[#allocation156_spill] sm:$0xff] %v9013_v60  ;;  %10622 = vst [vmem:[#allocation157_spill] sm:$0xff] %v9015_v1  ;;  %v9031_v60 = vld [vmem:[#allocation2 + $0x158] sm:$0xff] }
 0x3cf   : > { %3470 = vrot.lane.b32.xlu0 %v9005_v16, %s6200_s23  ;;  %3468 = vrot.lane.b32.xlu1 %v8997_v30, %s6200_s23  ;;  %10626 = vst [vmem:[#allocation161_spill] sm:$0xff] %v9031_v60 }
 0x3d1   : > { %v9021_v7 = vpop.permute.xlu0 %3874  ;;  %v9023_v53 = vpop.permute.xlu1 %4406 }
 0x3d2   : > { %10623 = vst [vmem:[#allocation158_spill] sm:$0xff] %v9021_v7  ;;  %10624 = vst [vmem:[#allocation159_spill] sm:$0xff] %v9023_v53 }
 0x3d3   : > { %3009 = vrot.lane.b32.xlu0 %v9005_v16, %s6200_s23  ;;  %4468 = vrot.lane.b32.xlu1 %v9005_v16, %s6200_s23 }
 0x3d5   : > { %v9029_v13 = vpop.permute.xlu0 %4408  ;;  %v9033_v1 = vpop.permute.xlu1 %3408 }
 0x3d6   : > { %10625 = vst [vmem:[#allocation160_spill] sm:$0xff] %v9029_v13  ;;  %10627 = vst [vmem:[#allocation162_spill] sm:$0xff] %v9033_v1 }
 0x3d7   : > { %4478 = vrot.lane.b32.xlu0 %v9031_v60, %s6200_s23  ;;  %4476 = vrot.lane.b32.xlu1 %v9035_v46, %s6200_s23 }
 0x3d9   : > { %v9041_v53 = vpop.permute.xlu0 %3410  ;;  %v9043_v7 = vpop.permute.xlu1 %2947 }
 0x3da   : > { %10628 = vst [vmem:[#allocation163_spill] sm:$0xff] %v9041_v53  ;;  %10629 = vst [vmem:[#allocation164_spill] sm:$0xff] %v9043_v7  ;;  %v9059_v53 = vld [vmem:[#allocation2 + $0x168] sm:$0xff] }
 0x3db   : > { %3946 = vrot.lane.b32.xlu0 %v9031_v60, %s6200_s23  ;;  %3944 = vrot.lane.b32.xlu1 %v9035_v46, %s6200_s23 }
 0x3dd   : > { %v9049_v13 = vpop.permute.xlu0 %2949  ;;  %v9051_v1 = vpop.permute.xlu1 %4616 }
 0x3de   : > { %10630 = vst [vmem:[#allocation165_spill] sm:$0xff] %v9049_v13  ;;  %10631 = vst [vmem:[#allocation166_spill] sm:$0xff] %v9051_v1 }
 0x3df   : > { %3480 = vrot.lane.b32.xlu0 %v9031_v60, %s6200_s23  ;;  %3478 = vrot.lane.b32.xlu1 %v9035_v46, %s6200_s23 }
 0x3e1   : > { %v9057_v58 = vpop.permute.xlu0 %4618  ;;  %v9061_v7 = vpop.permute.xlu1 %3876 }
 0x3e2   : > { %10632 = vst [vmem:[#allocation167_spill] sm:$0xff] %v9057_v58  ;;  %10633 = vst [vmem:[#allocation168_spill] sm:$0xff] %v9061_v7 }
 0x3e3   : > { %4488 = vrot.lane.b32.xlu0 %v9059_v53, %s6200_s23  ;;  %4486 = vrot.lane.b32.xlu1 %v9063_v57, %s6200_s23 }
 0x3e5   : > { %v9069_v13 = vpop.permute.xlu0 %4416  ;;  %v9071_v1 = vpop.permute.xlu1 %3884 }
 0x3e6   : > { %10634 = vst [vmem:[#allocation169_spill] sm:$0xff] %v9069_v13  ;;  %10635 = vst [vmem:[#allocation170_spill] sm:$0xff] %v9071_v1  ;;  %v9087_v13 = vld [vmem:[#allocation2 + $0x178] sm:$0xff] }
 0x3e7   : > { %3956 = vrot.lane.b32.xlu0 %v9059_v53, %s6200_s23  ;;  %3954 = vrot.lane.b32.xlu1 %v9063_v57, %s6200_s23 }
 0x3e9   : > { %v9077_v58 = vpop.permute.xlu0 %4418  ;;  %v9079_v7 = vpop.permute.xlu1 %3418 }
 0x3ea   : > { %10636 = vst [vmem:[#allocation171_spill] sm:$0xff] %v9077_v58  ;;  %10637 = vst [vmem:[#allocation172_spill] sm:$0xff] %v9079_v7 }
 0x3eb   : > { %3490 = vrot.lane.b32.xlu0 %v9059_v53, %s6200_s23  ;;  %3488 = vrot.lane.b32.xlu1 %v9063_v57, %s6200_s23 }
 0x3ed   : > { %v9085_v26 = vpop.permute.xlu0 %3420  ;;  %v9089_v1 = vpop.permute.xlu1 %2957 }
 0x3ee   : > { %10638 = vst [vmem:[#allocation173_spill] sm:$0xff] %v9085_v26  ;;  %10639 = vst [vmem:[#allocation174_spill] sm:$0xff] %v9089_v1 }
 0x3ef   : > { %4498 = vrot.lane.b32.xlu0 %v9087_v13, %s6200_s23  ;;  %4496 = vrot.lane.b32.xlu1 %v9091_v41, %s6200_s23 }
 0x3f1   : > { %v9097_v58 = vpop.permute.xlu0 %2959  ;;  %v9099_v7 = vpop.permute.xlu1 %4624 }
 0x3f2   : > { %10641 = vst [vmem:[#allocation176_spill] sm:$0xff] %v9097_v58  ;;  %10642 = vst [vmem:[#allocation177_spill] sm:$0xff] %v9099_v7 }
 0x3f3   : > { %3966 = vrot.lane.b32.xlu0 %v9087_v13, %s6200_s23  ;;  %3964 = vrot.lane.b32.xlu1 %v9091_v41, %s6200_s23 }
 0x3f5   : > { %v9105_v26 = vpop.permute.xlu0 %4626  ;;  %v9107_v1 = vpop.permute.xlu1 %3886 }
 0x3f6   : > { %10643 = vst [vmem:[#allocation178_spill] sm:$0xff] %v9105_v26  ;;  %10644 = vst [vmem:[#allocation179_spill] sm:$0xff] %v9107_v1 }
 0x3f7   : > { %3500 = vrot.lane.b32.xlu0 %v9087_v13, %s6200_s23  ;;  %3498 = vrot.lane.b32.xlu1 %v9091_v41, %s6200_s23 }
 0x3f9   : > { %v9113_v19 = vpop.permute.xlu0 %4426  ;;  %v9115_v58 = vpop.permute.xlu1 %3894 }
 0x3fa   : > { %10645 = vst [vmem:[#allocation180_spill] sm:$0xff] %v9113_v19  ;;  %10646 = vst [vmem:[#allocation181_spill] sm:$0xff] %v9115_v58 }
 0x3fb   : > { %4070 = vrot.lane.b32.xlu0 %v8703_v35, %s6201_s28  ;;  %4060 = vrot.lane.b32.xlu1 %v8640_v17, %s6201_s28 }
 0x3fd   : > { %v9121_v7 = vpop.permute.xlu0 %3896  ;;  %v9123_v26 = vpop.permute.xlu1 %3428 }
 0x3fe   : > { %10647 = vst [vmem:[#allocation182_spill] sm:$0xff] %v9121_v7  ;;  %10648 = vst [vmem:[#allocation183_spill] sm:$0xff] %v9123_v26  ;;  %v9141_v7 = vld [vmem:[#allocation2 + $0x28] sm:$0xff]  ;;  %v9145_v26 = vld [vmem:[#allocation2 + $0x10] sm:$0xff] }
 0x3ff   : > { %4642 = vrot.lane.b32.xlu0 %v8905_v0, %s6201_s28  ;;  %4632 = vrot.lane.b32.xlu1 %v8851_v3, %s6201_s28 }
 0x401   : > { %v9129_v1 = vpop.permute.xlu0 %3430  ;;  %v9131_v19 = vpop.permute.xlu1 %2967 }
 0x402   : > { %10649 = vst [vmem:[#allocation184_spill] sm:$0xff] %v9129_v1  ;;  %10650 = vst [vmem:[#allocation185_spill] sm:$0xff] %v9131_v19 }
 0x403   : > { %3019 = vrot.lane.b32.xlu0 %v9031_v60, %s6200_s23  ;;  %3007 = vrot.lane.b32.xlu1 %v8997_v30, %s6200_s23 }
 0x405   : > { %v9137_v17 = vpop.permute.xlu0 %2969  ;;  %v9139_v58 = vpop.permute.xlu1 %4428 }
 0x406   : > { %10651 = vst [vmem:[#allocation186_spill] sm:$0xff] %v9137_v17  ;;  %10652 = vst [vmem:[#allocation187_spill] sm:$0xff] %v9139_v58 }
 0x407   : > { %3524 = vrot.lane.b32.xlu0 %v9141_v7, %s6201_s28  ;;  %3514 = vrot.lane.b32.xlu1 %v9145_v26, %s6201_s28 }
 0x409   : > { %v9149_v19 = vpop.permute.xlu0 %4634  ;;  %v9151_v1 = vpop.permute.xlu1 %3904 }
 0x40a   : > { %10653 = vst [vmem:[#allocation188_spill] sm:$0xff] %v9149_v19  ;;  %10654 = vst [vmem:[#allocation189_spill] sm:$0xff] %v9151_v1 }
 0x40b   : > { %4078 = vrot.lane.b32.xlu0 %v8743_v61, %s6201_s28  ;;  %4068 = vrot.lane.b32.xlu1 %v8687_v18, %s6201_s28 }
 0x40d   : > { %v9157_v17 = vpop.permute.xlu0 %4436  ;;  %v9159_v58 = vpop.permute.xlu1 %3438 }
 0x40e   : > { %10655 = vst [vmem:[#allocation190_spill] sm:$0xff] %v9157_v17  ;;  %10656 = vst [vmem:[#allocation191_spill] sm:$0xff] %v9159_v58  ;;  %v9177_v58 = vld [vmem:[#allocation2 + $0x38] sm:$0xff] }
 0x40f   : > { %4650 = vrot.lane.b32.xlu0 %v8941_v38, %s6201_s28  ;;  %4640 = vrot.lane.b32.xlu1 %v8889_v56, %s6201_s28 }
 0x411   : > { %v9165_v59 = vpop.permute.xlu0 %3906  ;;  %v9167_v19 = vpop.permute.xlu1 %2977 }
 0x412   : > { %10657 = vst [vmem:[#allocation192_spill] sm:$0xff] %v9165_v59  ;;  %10658 = vst [vmem:[#allocation193_spill] sm:$0xff] %v9167_v19 }
 0x413   : > { %3029 = vrot.lane.b32.xlu0 %v9059_v53, %s6200_s23  ;;  %3017 = vrot.lane.b32.xlu1 %v9035_v46, %s6200_s23 }
 0x415   : > { %v9173_v1 = vpop.permute.xlu0 %3440  ;;  %v9175_v17 = vpop.permute.xlu1 %4438 }
 0x416   : > { %10659 = vst [vmem:[#allocation194_spill] sm:$0xff] %v9173_v1  ;;  %10660 = vst [vmem:[#allocation195_spill] sm:$0xff] %v9175_v17 }
 0x417   : > { %3532 = vrot.lane.b32.xlu0 %v9177_v58, %s6201_s28  ;;  %3522 = vrot.lane.b32.xlu1 %v9181_v12, %s6201_s28 }
 0x419   : > { %v9185_v19 = vpop.permute.xlu0 %2979  ;;  %v9187_v59 = vpop.permute.xlu1 %3914 }
 0x41a   : > { %10661 = vst [vmem:[#allocation196_spill] sm:$0xff] %v9185_v19  ;;  %10662 = vst [vmem:[#allocation197_spill] sm:$0xff] %v9187_v59 }
 0x41b   : > { %4086 = vrot.lane.b32.xlu0 %v8783_v28, %s6201_s28  ;;  %4076 = vrot.lane.b32.xlu1 %v8727_v14, %s6201_s28 }
 0x41d   : > { %v9193_v17 = vpop.permute.xlu0 %4446  ;;  %v9195_v1 = vpop.permute.xlu1 %3448 }
 0x41e   : > { %10663 = vst [vmem:[#allocation198_spill] sm:$0xff] %v9193_v17  ;;  %10664 = vst [vmem:[#allocation199_spill] sm:$0xff] %v9195_v1  ;;  %v9213_v1 = vld [vmem:[#allocation2 + $0x48] sm:$0xff] }
 0x41f   : > { %4658 = vrot.lane.b32.xlu0 %v8977_v15, %s6201_s28  ;;  %4648 = vrot.lane.b32.xlu1 %v8925_v50, %s6201_s28 }
 0x421   : > { %v9201_v31 = vpop.permute.xlu0 %3916  ;;  %v9203_v19 = vpop.permute.xlu1 %2987 }
 0x422   : > { %10665 = vst [vmem:[#allocation200_spill] sm:$0xff] %v9201_v31  ;;  %10666 = vst [vmem:[#allocation201_spill] sm:$0xff] %v9203_v19 }
 0x423   : > { %3039 = vrot.lane.b32.xlu0 %v9087_v13, %s6200_s23  ;;  %3027 = vrot.lane.b32.xlu1 %v9063_v57, %s6200_s23 }
 0x425   : > { %v9209_v59 = vpop.permute.xlu0 %3450  ;;  %v9211_v17 = vpop.permute.xlu1 %4448 }
 0x426   : > { %10667 = vst [vmem:[#allocation202_spill] sm:$0xff] %v9209_v59  ;;  %10668 = vst [vmem:[#allocation203_spill] sm:$0xff] %v9211_v17 }
 0x427   : > { %3540 = vrot.lane.b32.xlu0 %v9213_v1, %s6201_s28  ;;  %3530 = vrot.lane.b32.xlu1 %v9217_v5, %s6201_s28 }
 0x429   : > { %v9221_v19 = vpop.permute.xlu0 %2989  ;;  %v9223_v31 = vpop.permute.xlu1 %3924 }
 0x42a   : > { %10669 = vst [vmem:[#allocation204_spill] sm:$0xff] %v9221_v19  ;;  %10670 = vst [vmem:[#allocation205_spill] sm:$0xff] %v9223_v31  ;;  %v9241_v31 = vld [vmem:[#allocation2 + $0x8] sm:$0xff] }
 0x42b   : > { %4094 = vrot.lane.b32.xlu0 %v8817_v27, %s6201_s28  ;;  %4084 = vrot.lane.b32.xlu1 %v8767_v2, %s6201_s28  ;;  %v9251_v2 = vld [vmem:[#allocation2 + $0x58] sm:$0xff] }
 0x42d   : > { %v9229_v17 = vpop.permute.xlu0 %4456  ;;  %v9231_v59 = vpop.permute.xlu1 %3458 }
 0x42e   : > { %10671 = vst [vmem:[#allocation206_spill] sm:$0xff] %v9229_v17  ;;  %10672 = vst [vmem:[#allocation207_spill] sm:$0xff] %v9231_v59 }
 0x42f   : > { %4666 = vrot.lane.b32.xlu0 %v9005_v16, %s6201_s28  ;;  %4656 = vrot.lane.b32.xlu1 %v8961_v44, %s6201_s28 }
 0x431   : > { %v9237_v37 = vpop.permute.xlu0 %3926  ;;  %v9239_v19 = vpop.permute.xlu1 %2997 }
 0x432   : > { %10673 = vst [vmem:[#allocation208_spill] sm:$0xff] %v9237_v37  ;;  %10674 = vst [vmem:[#allocation209_spill] sm:$0xff] %v9239_v19  ;;  %v9255_v37 = vld [vmem:[#allocation2 + $0x40] sm:$0xff] }
 0x433   : > { %3047 = vrot.lane.b32.xlu0 %v9241_v31, %s6201_s28  ;;  %3037 = vrot.lane.b32.xlu1 %v9091_v41, %s6200_s23 }
 0x435   : > { %v9247_v17 = vpop.permute.xlu0 %3460  ;;  %v9249_v59 = vpop.permute.xlu1 %4458 }
 0x436   : > { %10675 = vst [vmem:[#allocation210_spill] sm:$0xff] %v9247_v17  ;;  %10676 = vst [vmem:[#allocation211_spill] sm:$0xff] %v9249_v59 }
 0x437   : > { %3548 = vrot.lane.b32.xlu0 %v9251_v2, %s6201_s28  ;;  %3538 = vrot.lane.b32.xlu1 %v9255_v37, %s6201_s28 }
 0x439   : > { %v9259_v19 = vpop.permute.xlu0 %2999  ;;  %v9261_v54 = vpop.permute.xlu1 %4466 }
 0x43a   : > { %10677 = vst [vmem:[#allocation212_spill] sm:$0xff] %v9259_v19  ;;  %10678 = vst [vmem:[#allocation213_spill] sm:$0xff] %v9261_v54  ;;  %v9279_v54 = vld [vmem:[#allocation2 + $0x18] sm:$0xff] }
 0x43b   : > { %4102 = vrot.lane.b32.xlu0 %v8861_v21, %s6201_s28  ;;  %4092 = vrot.lane.b32.xlu1 %v8807_v34, %s6201_s28  ;;  %v9283_v34 = vld [vmem:[#allocation2] sm:$0xff] }
 0x43d   : > { %v9267_v59 = vpop.permute.xlu0 %3936  ;;  %v9269_v17 = vpop.permute.xlu1 %3934 }
 0x43e   : > { %10679 = vst [vmem:[#allocation214_spill] sm:$0xff] %v9267_v59  ;;  %10680 = vst [vmem:[#allocation215_spill] sm:$0xff] %v9269_v17 }
 0x43f   : > { %4674 = vrot.lane.b32.xlu0 %v9031_v60, %s6201_s28  ;;  %4664 = vrot.lane.b32.xlu1 %v8997_v30, %s6201_s28 }
 0x441   : > { %v9275_v14 = vpop.permute.xlu0 %3470  ;;  %v9277_v19 = vpop.permute.xlu1 %3468 }
 0x442   : > { %10681 = vst [vmem:[#allocation216_spill] sm:$0xff] %v9275_v14  ;;  %10682 = vst [vmem:[#allocation217_spill] sm:$0xff] %v9277_v19  ;;  %v9295_v19 = vld [vmem:[#allocation2 + $0x50] sm:$0xff] }
 0x443   : > { %3055 = vrot.lane.b32.xlu0 %v9279_v54, %s6201_s28  ;;  %3045 = vrot.lane.b32.xlu1 %v9283_v34, %s6201_s28 }
 0x445   : > { %v9287_v17 = vpop.permute.xlu0 %3009  ;;  %v9289_v59 = vpop.permute.xlu1 %4468 }
 0x446   : > { %10683 = vst [vmem:[#allocation218_spill] sm:$0xff] %v9287_v17  ;;  %10684 = vst [vmem:[#allocation219_spill] sm:$0xff] %v9289_v59 }
 0x447   : > { %3556 = vrot.lane.b32.xlu0 %v9291_v8, %s6201_s28  ;;  %3546 = vrot.lane.b32.xlu1 %v9295_v19, %s6201_s28 }
 0x449   : > { %v9299_v14 = vpop.permute.xlu0 %4478  ;;  %v9301_v18 = vpop.permute.xlu1 %4476 }
 0x44a   : > { %10685 = vst [vmem:[#allocation220_spill] sm:$0xff] %v9299_v14  ;;  %10686 = vst [vmem:[#allocation221_spill] sm:$0xff] %v9301_v18 }
 0x44b   : > { %4110 = vrot.lane.b32.xlu0 %v8905_v0, %s6201_s28  ;;  %4100 = vrot.lane.b32.xlu1 %v8851_v3, %s6201_s28 }
 0x44d   : > { %v9307_v17 = vpop.permute.xlu0 %3946  ;;  %v9309_v59 = vpop.permute.xlu1 %3944 }
 0x44e   : > { %10687 = vst [vmem:[#allocation222_spill] sm:$0xff] %v9307_v17  ;;  %10688 = vst [vmem:[#allocation223_spill] sm:$0xff] %v9309_v59 }
 0x44f   : > { %4682 = vrot.lane.b32.xlu0 %v9059_v53, %s6201_s28  ;;  %4672 = vrot.lane.b32.xlu1 %v9035_v46, %s6201_s28 }
 0x451   : > { %v9315_v60 = vpop.permute.xlu0 %3480  ;;  %v9317_v14 = vpop.permute.xlu1 %3478 }
 0x452   : > { %10689 = vst [vmem:[#allocation224_spill] sm:$0xff] %v9315_v60  ;;  %10690 = vst [vmem:[#allocation225_spill] sm:$0xff] %v9317_v14 }
 0x453   : > { %3063 = vrot.lane.b32.xlu0 %v9141_v7, %s6201_s28  ;;  %3053 = vrot.lane.b32.xlu1 %v9145_v26, %s6201_s28 }
 0x455   : > { %v9323_v18 = vpop.permute.xlu0 %4488  ;;  %v9325_v17 = vpop.permute.xlu1 %4486 }
 0x456   : > { %10691 = vst [vmem:[#allocation226_spill] sm:$0xff] %v9323_v18  ;;  %10692 = vst [vmem:[#allocation227_spill] sm:$0xff] %v9325_v17 }
 0x457   : > { %3564 = vrot.lane.b32.xlu0 %v8438_v62, %s6201_s28  ;;  %3554 = vrot.lane.b32.xlu1 %v8403_v45, %s6201_s28 }
 0x459   : > { %v9331_v59 = vpop.permute.xlu0 %3956  ;;  %v9333_v60 = vpop.permute.xlu1 %3954 }
 0x45a   : > { %10693 = vst [vmem:[#allocation228_spill] sm:$0xff] %v9331_v59  ;;  %10694 = vst [vmem:[#allocation229_spill] sm:$0xff] %v9333_v60 }
 0x45b   : > { %4118 = vrot.lane.b32.xlu0 %v8941_v38, %s6201_s28  ;;  %4108 = vrot.lane.b32.xlu1 %v8889_v56, %s6201_s28 }
 0x45d   : > { %v9339_v14 = vpop.permute.xlu0 %3490  ;;  %v9341_v18 = vpop.permute.xlu1 %3488 }
 0x45e   : > { %10695 = vst [vmem:[#allocation230_spill] sm:$0xff] %v9339_v14  ;;  %10696 = vst [vmem:[#allocation231_spill] sm:$0xff] %v9341_v18 }
 0x45f   : > { %4690 = vrot.lane.b32.xlu0 %v9087_v13, %s6201_s28  ;;  %4680 = vrot.lane.b32.xlu1 %v9063_v57, %s6201_s28 }
 0x461   : > { %v9347_v45 = vpop.permute.xlu0 %4498  ;;  %v9349_v62 = vpop.permute.xlu1 %4496 }
 0x462   : > { %10697 = vst [vmem:[#allocation232_spill] sm:$0xff] %v9347_v45  ;;  %10698 = vst [vmem:[#allocation233_spill] sm:$0xff] %v9349_v62 }
 0x463   : > { %3071 = vrot.lane.b32.xlu0 %v9177_v58, %s6201_s28  ;;  %3061 = vrot.lane.b32.xlu1 %v9181_v12, %s6201_s28 }
 0x465   : > { %v9355_v17 = vpop.permute.xlu0 %3966  ;;  %v9357_v60 = vpop.permute.xlu1 %3964 }
 0x466   : > { %10699 = vst [vmem:[#allocation234_spill] sm:$0xff] %v9355_v17  ;;  %10700 = vst [vmem:[#allocation235_spill] sm:$0xff] %v9357_v60 }
 0x467   : > { %3572 = vrot.lane.b32.xlu0 %v8514_v51, %s6201_s28  ;;  %3562 = vrot.lane.b32.xlu1 %v8474_v23, %s6201_s28 }
 0x469   : > { %v9363_v59 = vpop.permute.xlu0 %3500  ;;  %v9365_v45 = vpop.permute.xlu1 %3498 }
 0x46a   : > { %10701 = vst [vmem:[#allocation236_spill] sm:$0xff] %v9363_v59  ;;  %10702 = vst [vmem:[#allocation237_spill] sm:$0xff] %v9365_v45  ;;  %v3183_v45 = vmax.f32 %v9177_v58, %v9213_v1 }
 0x46b   : > { %4126 = vrot.lane.b32.xlu0 %v8977_v15, %s6201_s28  ;;  %4116 = vrot.lane.b32.xlu1 %v8925_v50, %s6201_s28 }
 0x46c   : > { %v3187_v18 = vmax.f32 %v3183_v45, %v9251_v2 }
 0x46d   : > { %v9371_v62 = vpop.permute.xlu0 %4070  ;;  %v9373_v17 = vpop.permute.xlu1 %4060 }
 0x46e   : > { %10703 = vst [vmem:[#allocation238_spill] sm:$0xff] %v9371_v62  ;;  %10704 = vst [vmem:[#allocation239_spill] sm:$0xff] %v9373_v17  ;;  %v4209_v17 = vmax.f32 %v8339_v22, %v8905_v0  ;;  %v4208_v22 = vmax.f32 %v8319_v47, %v8295_v25 }
 0x46f   : > { %4698 = vrot.lane.b32.xlu0 %v9241_v31, %s6203_s20  ;;  %4688 = vrot.lane.b32.xlu1 %v9091_v41, %s6201_s28 }
 0x471   : > { %v9379_v23 = vpop.permute.xlu0 %4642  ;;  %v9381_v60 = vpop.permute.xlu1 %4632 }
 0x472   : > { %10705 = vst [vmem:[#allocation240_spill] sm:$0xff] %v9379_v23  ;;  %10706 = vst [vmem:[#allocation241_spill] sm:$0xff] %v9381_v60  ;;  %v3191_v60 = vmax.f32 %v3187_v18, %v9291_v8  ;;  %v4213_v23 = vmax.f32 %v4209_v17, %v8349_v20  ;;  %v3182_v20 = vmax.f32 %v9217_v5, %v9255_v37 }
 0x473   : > { %3079 = vrot.lane.b32.xlu0 %v9213_v1, %s6201_s28  ;;  %3069 = vrot.lane.b32.xlu1 %v9217_v5, %s6201_s28  ;;  %v4212_v17 = vmax.f32 %v4208_v22, %v8889_v56 }
 0x474   : > { %v4217_v41 = vmax.f32 %v4213_v23, %v8941_v38 }
 0x475   : > { %v9391_v62 = vpop.permute.xlu0 %3019  ;;  %v9394_v59 = vpop.permute.xlu1 %3007 }
 0x476   : > { %10707 = vst [vmem:[#allocation242_spill] sm:$0xff] %v9391_v62  ;;  %10708 = vst [vmem:[#allocation243_spill] sm:$0xff] %v9394_v59  ;;  %v9406_v62 = vld [vmem:[#allocation2 + $0x78] sm:$0xff]  ;;  %v3687_v59 = vmax.f32 %v8347_v52, %v8317_v36  ;;  %v3186_v36 = vmax.f32 %v3182_v20, %v9295_v19  ;;  %v4216_v52 = vmax.f32 %v4212_v17, %v8925_v50  ;;  %v9444_v17 = vld [vmem:[#allocation2 + $0x70] sm:$0xff] }
 0x477   : > { %3580 = vrot.lane.b32.xlu0 %v8556_v24, %s6201_s28  ;;  %3570 = vrot.lane.b32.xlu1 %v8536_v29, %s6201_s28  ;;  %v3195_v45 = vmax.f32 %v3191_v60, %v9406_v62  ;;  %v4221_v60 = vmax.f32 %v4217_v41, %v8977_v15  ;;  %v3667_v20 = vmax.f32 %v8703_v35, %v8743_v61 }
 0x478   : > { %v3691_v47 = vmax.f32 %v3687_v59, %v8941_v38  ;;  %v4220_v41 = vmax.f32 %v4216_v52, %v8961_v44 }
 0x479   : > { %v9404_v14 = vpop.permute.xlu0 %3524  ;;  %v9412_v18 = vpop.permute.xlu1 %3514  ;;  %v3199_v25 = vmax.f32 %v3195_v45, %v8514_v51  ;;  %v9432_v51 = vld [vmem:[#allocation2 + $0x60] sm:$0xff] }
 0x47a   : > { %10709 = vst [vmem:[#allocation244_spill] sm:$0xff] %v9404_v14  ;;  %10710 = vst [vmem:[#allocation245_spill] sm:$0xff] %v9412_v18  ;;  %v3695_v18 = vmax.f32 %v3691_v47, %v8977_v15  ;;  %v3190_v59 = vmax.f32 %v3186_v36, %v9432_v51  ;;  %v3690_v47 = vmax.f32 %v8330_v43, %v8297_v63 }
 0x47b   : > { %4134 = vrot.lane.b32.xlu0 %v9005_v16, %s6201_s28  ;;  %4124 = vrot.lane.b32.xlu1 %v8961_v44, %s6201_s28  ;;  %v3203_v22 = vmax.f32 %v3199_v25, %v8556_v24  ;;  %10713 = vst [vmem:[#allocation248_spill] sm:$0xff] %v9432_v51  ;;  %v4225_v24 = vmax.f32 %v4221_v60, %v8412_v32 }
 0x47c   : > { %v3194_v25 = vmax.f32 %v3190_v59, %v9444_v17  ;;  %v3694_v60 = vmax.f32 %v3690_v47, %v8961_v44  ;;  %v4224_v51 = vmax.f32 %v4220_v41, %v8369_v4 }
 0x47d   : > { %v9426_v23 = vpop.permute.xlu0 %4078  ;;  %v9430_v14 = vpop.permute.xlu1 %4068  ;;  %v3207_v45 = vmax.f32 %v3203_v22, %v8606_v33  ;;  %v3671_v22 = vmax.f32 %v3667_v20, %v8783_v28  ;;  %v4229_v59 = vmax.f32 %v4225_v24, %v8414_v10 }
 0x47e   : > { %10711 = vst [vmem:[#allocation246_spill] sm:$0xff] %v9426_v23  ;;  %10712 = vst [vmem:[#allocation247_spill] sm:$0xff] %v9430_v14  ;;  %v3699_v14 = vmax.f32 %v3695_v18, %v8387_v39  ;;  %v3198_v32 = vmax.f32 %v3194_v25, %v8536_v29  ;;  %v4228_v29 = vmax.f32 %v4224_v51, %v8997_v30 }
 0x47f   : > { %4706 = vrot.lane.b32.xlu0 %v9279_v54, %s6203_s20  ;;  %4696 = vrot.lane.b32.xlu1 %v9283_v34, %s6203_s20  ;;  %v3211_v52 = vmax.f32 %v3207_v45, %v8654_v49  ;;  %v3675_v43 = vmax.f32 %v3671_v22, %v8817_v27  ;;  %v4233_v47 = vmax.f32 %v4229_v59, %v9005_v16  ;;  %v10719_v59 = vld [vmem:[#allocation77_spill] sm:$0xff] }
 0x480   : > { %v3703_v45 = vmax.f32 %v3699_v14, %v8423_v42  ;;  %v3202_v39 = vmax.f32 %v3198_v32, %v8580_v6  ;;  %v3698_v42 = vmax.f32 %v3694_v60, %v8371_v11  ;;  %v2716_v14 = vmax.f32 %v9241_v31, %v9279_v54  ;;  %v10718_v60 = vld [vmem:[#allocation161_spill] sm:$0xff] }
 0x481   : > { %v9449_v36 = vpop.permute.xlu0 %4650  ;;  %v9454_v23 = vpop.permute.xlu1 %4640  ;;  %v3215_v63 = vmax.f32 %v3211_v52, %v8703_v35  ;;  %v3679_v41 = vmax.f32 %v3675_v43, %v8861_v21  ;;  %v4232_v11 = vmax.f32 %v4228_v29, %v8389_v40 }
 0x482   : > { %10714 = vst [vmem:[#allocation249_spill] sm:$0xff] %v9449_v36  ;;  %10715 = vst [vmem:[#allocation250_spill] sm:$0xff] %v9454_v23  ;;  %v3707_v20 = vmax.f32 %v3703_v45, %v8469_v55  ;;  %v3206_v10 = vmax.f32 %v3202_v39, %v8617_v9  ;;  %v3702_v9 = vmax.f32 %v3698_v42, %v8997_v30 }
 0x483   : > { %3087 = vrot.lane.b32.xlu0 %v9251_v2, %s6201_s28  ;;  %3077 = vrot.lane.b32.xlu1 %v9255_v37, %s6201_s28  ;;  %v3219_v4 = vmax.f32 %v3215_v63, %v8743_v61  ;;  %v3683_v24 = vmax.f32 %v3679_v41, %v8905_v0  ;;  %v4245_v63 = vmax.f32 %v4233_v47, %v10718_v60 }
 0x484   : > { %v3210_v55 = vmax.f32 %v3206_v10, %v8658_v48 }
 0x485   : > { %v9469_v18 = vpop.permute.xlu0 %3029  ;;  %v9474_v25 = vpop.permute.xlu1 %3017  ;;  %v3223_v51 = vmax.f32 %v3219_v4, %v8783_v28  ;;  %v3719_v32 = vmax.f32 %v3707_v20, %v3683_v24  ;;  %v4257_v29 = vmax.f32 %v4245_v63, %v9059_v53  ;;  %v10721_v4 = vld [vmem:[#allocation88_spill] sm:$0xff]  ;;  %v10722_v20 = vld [vmem:[#allocation17_spill] sm:$0xff]  ;;  %v10726_v63 = vld [vmem:[#allocation18_spill] sm:$0xff] }
 0x486   : > { %10716 = vst [vmem:[#allocation251_spill] sm:$0xff] %v9469_v18  ;;  %10717 = vst [vmem:[#allocation252_spill] sm:$0xff] %v9474_v25  ;;  %v3214_v45 = vmax.f32 %v3210_v55, %v10719_v59  ;;  %v3706_v10 = vmax.f32 %v3702_v9, %v10722_v20 }
 0x487   : > { %3588 = vrot.lane.b32.xlu0 %v8606_v33, %s6201_s28  ;;  %3578 = vrot.lane.b32.xlu1 %v8580_v6, %s6201_s28  ;;  %v2720_v33 = vmax.f32 %v2716_v14, %v9141_v7  ;;  %v3227_v22 = vmax.f32 %v3223_v51, %v8817_v27  ;;  %v10720_v6 = vld [vmem:[#allocation6_spill] sm:$0xff]  ;;  %v3731_v24 = vmax.f32 %v3719_v32, %v9005_v16 }
 0x488   : > { %v4244_v39 = vmax.f32 %v4232_v11, %v10720_v6  ;;  %v3218_v41 = vmax.f32 %v3214_v45, %v10721_v4  ;;  %v4269_v47 = vmax.f32 %v4257_v29, %v9087_v13  ;;  %v2715_v11 = vmax.f32 %v9283_v34, %v9145_v26  ;;  %v10727_v29 = vld [vmem:[#allocation110_spill] sm:$0xff] }
 0x489   : > { %v9490_v52 = vpop.permute.xlu0 %3532  ;;  %v9495_v43 = vpop.permute.xlu1 %3522  ;;  %v2724_v40 = vmax.f32 %v2720_v33, %v9177_v58  ;;  %v3231_v48 = vmax.f32 %v3227_v22, %v8861_v21  ;;  %v10725_v33 = vld [vmem:[#allocation99_spill] sm:$0xff]  ;;  %v3718_v45 = vmax.f32 %v3706_v10, %v10726_v63  ;;  %v4205_v32 = vmax.f32 %v8817_v27, %v8861_v21 }
 0x48a   : > { %v3222_v22 = vmax.f32 %v3218_v41, %v10725_v33  ;;  %v4256_v9 = vmax.f32 %v4244_v39, %v9035_v46 }
 0x48b   : > { %4142 = vrot.lane.b32.xlu0 %v10718_v60, %s6201_s28  ;;  %4132 = vrot.lane.b32.xlu1 %v8997_v30, %s6201_s28  ;;  %v2728_v14 = vmax.f32 %v2724_v40, %v9213_v1  ;;  %v3235_v51 = vmax.f32 %v3231_v48, %v8905_v0  ;;  %v2719_v48 = vmax.f32 %v2715_v11, %v9181_v12 }
 0x48c   : > { %v3226_v41 = vmax.f32 %v3222_v22, %v10727_v29  ;;  %v4281_v10 = vmax.f32 %v4269_v47, %v4205_v32  ;;  %v3730_v11 = vmax.f32 %v3718_v45, %v9035_v46  ;;  %v4268_v22 = vmax.f32 %v4256_v9, %v9063_v57  ;;  %v10730_v32 = vld [vmem:[#allocation175_spill] sm:$0xff] }
 0x48d   : > { %v9508_v42 = vpop.permute.xlu0 %4086  ;;  %v9514_v55 = vpop.permute.xlu1 %4076  ;;  %v2732_v6 = vmax.f32 %v2728_v14, %v9251_v2  ;;  %v3239_v40 = vmax.f32 %v3235_v51, %v8941_v38  ;;  %v3666_v51 = vmax.f32 %v10719_v59, %v10721_v4 }
 0x48e   : > { %10723 = vst [vmem:[#allocation161_spill] sm:$0xff] %v9508_v42  ;;  %10724 = vst [vmem:[#allocation77_spill] sm:$0xff] %v9514_v55  ;;  %v3742_v45 = vmax.f32 %v3730_v11, %v9063_v57  ;;  %v4280_v9 = vmax.f32 %v4268_v22, %v10730_v32  ;;  %v9570_v22 = vld [vmem:[#allocation2 + $0x98] sm:$0xff]  ;;  %v10742_v55 = vld [vmem:[#allocation26_spill] sm:$0xff] }
 0x48f   : > { %4714 = vrot.lane.b32.xlu0 %v9141_v7, %s6203_s20  ;;  %4704 = vrot.lane.b32.xlu1 %v9145_v26, %s6203_s20  ;;  %v2736_v39 = vmax.f32 %v2732_v6, %v9291_v8  ;;  %v3743_v7 = vmax.f32 %v3731_v24, %v10718_v60  ;;  %v3243_v14 = vmax.f32 %v3239_v40, %v8977_v15 }
 0x490   : > { %v3230_v26 = vmax.f32 %v3226_v41, %v8851_v3  ;;  %v2723_v6 = vmax.f32 %v2719_v48, %v9217_v5  ;;  %v3670_v59 = vmax.f32 %v3666_v51, %v10725_v33  ;;  %v9556_v41 = vld [vmem:[#allocation2 + $0x88] sm:$0xff]  ;;  %v3754_v11 = vmax.f32 %v3742_v45, %v10730_v32 }
 0x491   : > { %v9531_v20 = vpop.permute.xlu0 %4658  ;;  %v9536_v63 = vpop.permute.xlu1 %4648  ;;  %v2740_v24 = vmax.f32 %v2736_v39, %v9406_v62  ;;  %v3247_v47 = vmax.f32 %v3243_v14, %v9005_v16  ;;  %v3755_v39 = vmax.f32 %v3743_v7, %v9059_v53  ;;  %v10732_v14 = vld [vmem:[#allocation23_spill] sm:$0xff] }
 0x492   : > { %10728 = vst [vmem:[#allocation6_spill] sm:$0xff] %v9531_v20  ;;  %10729 = vst [vmem:[#allocation88_spill] sm:$0xff] %v9536_v63  ;;  %v3234_v4 = vmax.f32 %v3230_v26, %v8889_v56  ;;  %v4293_v25 = vmax.f32 %v4281_v10, %v10732_v14  ;;  %v2727_v33 = vmax.f32 %v2723_v6, %v9255_v37  ;;  %v9584_v14 = vld [vmem:[#allocation2 + $0xa8] sm:$0xff] }
 0x493   : > { %3095 = vrot.lane.b32.xlu0 %v9291_v8, %s6201_s28  ;;  %3085 = vrot.lane.b32.xlu1 %v9295_v19, %s6201_s28  ;;  %v2744_v48 = vmax.f32 %v2740_v24, %v9556_v41  ;;  %v3251_v18 = vmax.f32 %v3247_v47, %v10718_v60  ;;  %v3674_v51 = vmax.f32 %v3670_v59, %v10727_v29  ;;  %v9574_v24 = vld [vmem:[#allocation2 + $0xa0] sm:$0xff] }
 0x494   : > { %v3238_v26 = vmax.f32 %v3234_v4, %v8925_v50  ;;  %v2731_v6 = vmax.f32 %v2727_v33, %v9295_v19  ;;  %v10734_v4 = vld [vmem:[#allocation21_spill] sm:$0xff] }
 0x495   : > { %v9554_v40 = vpop.permute.xlu0 %3039  ;;  %v9562_v63 = vpop.permute.xlu1 %3027  ;;  %v2748_v7 = vmax.f32 %v2744_v48, %v9570_v22  ;;  %v3255_v10 = vmax.f32 %v3251_v18, %v9059_v53  ;;  %v3678_v47 = vmax.f32 %v3674_v51, %v8851_v3  ;;  %v4292_v45 = vmax.f32 %v4280_v9, %v10734_v4 }
 0x496   : > { %10731 = vst [vmem:[#allocation17_spill] sm:$0xff] %v9554_v40  ;;  %10733 = vst [vmem:[#allocation99_spill] sm:$0xff] %v9562_v63  ;;  %v3242_v59 = vmax.f32 %v3238_v26, %v8961_v44  ;;  %v3767_v18 = vmax.f32 %v3755_v39, %v9087_v13  ;;  %v10735_v63 = vld [vmem:[#allocation24_spill] sm:$0xff]  ;;  %v10737_v26 = vld [vmem:[#allocation7_spill] sm:$0xff]  ;;  %v4204_v4 = vmax.f32 %v10727_v29, %v8851_v3 }
 0x497   : > { %3596 = vrot.lane.b32.xlu0 %v8654_v49, %s6201_s28  ;;  %3586 = vrot.lane.b32.xlu1 %v9574_v24, %s6201_s28  ;;  %v2752_v48 = vmax.f32 %v2748_v7, %v9584_v14  ;;  %v4305_v40 = vmax.f32 %v4293_v25, %v10735_v63  ;;  %v3259_v20 = vmax.f32 %v3255_v10, %v9087_v13  ;;  %v9599_v7 = vld [vmem:[#allocation2 + $0xb8] sm:$0xff] }
 0x498   : > { %v3682_v33 = vmax.f32 %v3678_v47, %v8889_v56  ;;  %v3246_v51 = vmax.f32 %v3242_v59, %v8997_v30  ;;  %v3766_v9 = vmax.f32 %v3754_v11, %v10737_v26  ;;  %10738 = vst [vmem:[#allocation110_spill] sm:$0xff] %v9599_v7  ;;  %v10739_v63 = vld [vmem:[#allocation35_spill] sm:$0xff]  ;;  %v10740_v56 = vld [vmem:[#allocation248_spill] sm:$0xff]  ;;  %v4304_v59 = vmax.f32 %v4292_v45, %v4204_v4  ;;  %v10741_v26 = vld [vmem:[#allocation13_spill] sm:$0xff] }
 0x499   : > { %v9582_v49 = vpop.permute.xlu0 %3540  ;;  %v9590_v23 = vpop.permute.xlu1 %3530  ;;  %v2756_v25 = vmax.f32 %v2752_v48, %v9599_v7  ;;  %v4317_v39 = vmax.f32 %v4305_v40, %v10739_v63  ;;  %v2735_v10 = vmax.f32 %v2731_v6, %v10740_v56  ;;  %v3271_v36 = vmax.f32 %v3259_v20, %v10741_v26  ;;  %v10743_v7 = vld [vmem:[#allocation36_spill] sm:$0xff]  ;;  %v10751_v26 = vld [vmem:[#allocation27_spill] sm:$0xff] }
 0x49a   : > { %10736 = vst [vmem:[#allocation18_spill] sm:$0xff] %v9590_v23  ;;  %v3250_v47 = vmax.f32 %v3246_v51, %v9035_v46  ;;  %v3686_v11 = vmax.f32 %v3682_v33, %v8925_v50  ;;  %v3779_v48 = vmax.f32 %v3767_v18, %v10742_v55  ;;  %v10744_v23 = vld [vmem:[#allocation28_spill] sm:$0xff] }
 0x49b   : > { %4150 = vrot.lane.b32.xlu0 %v9059_v53, %s6201_s28  ;;  %4140 = vrot.lane.b32.xlu1 %v9035_v46, %s6201_s28  ;;  %v2760_v29 = vmax.f32 %v2756_v25, %v8703_v35  ;;  %v4329_v40 = vmax.f32 %v4317_v39, %v10743_v7  ;;  %v2739_v42 = vmax.f32 %v2735_v10, %v9444_v17  ;;  %v10745_v45 = vld [vmem:[#allocation32_spill] sm:$0xff]  ;;  %v10747_v7 = vld [vmem:[#allocation31_spill] sm:$0xff]  ;;  %v10749_v10 = vld [vmem:[#allocation38_spill] sm:$0xff] }
 0x49c   : > { %v3254_v6 = vmax.f32 %v3250_v47, %v9063_v57  ;;  %v3778_v51 = vmax.f32 %v3766_v9, %v3686_v11  ;;  %v4316_v50 = vmax.f32 %v4304_v59, %v10744_v23  ;;  %v3791_v20 = vmax.f32 %v3779_v48, %v10745_v45  ;;  %v10746_v33 = vld [vmem:[#allocation44_spill] sm:$0xff] }
 0x49d   : > { %v9608_v3 = vpop.permute.xlu0 %4094  ;;  %v9614_v63 = vpop.permute.xlu1 %4084  ;;  %v2764_v35 = vmax.f32 %v2760_v29, %v8743_v61  ;;  %v4341_v55 = vmax.f32 %v4329_v40, %v10746_v33  ;;  %v9626_v18 = vld [vmem:[#allocation2 + $0x80] sm:$0xff]  ;;  %v10752_v40 = vld [vmem:[#allocation39_spill] sm:$0xff] }
 0x49e   : > { %v2743_v4 = vmax.f32 %v2739_v42, %v9626_v18  ;;  %v3258_v9 = vmax.f32 %v3254_v6, %v10730_v32  ;;  %v4328_v23 = vmax.f32 %v4316_v50, %v10747_v7  ;;  %v10748_v61 = vld [vmem:[#allocation4_spill] sm:$0xff]  ;;  %v3803_v47 = vmax.f32 %v3791_v20, %v10749_v10  ;;  %v10757_v7 = vld [vmem:[#allocation47_spill] sm:$0xff]  ;;  %v10760_v10 = vld [vmem:[#allocation46_spill] sm:$0xff] }
 0x49f   : > { %4722 = vrot.lane.b32.xlu0 %v9177_v58, %s6203_s20  ;;  %4712 = vrot.lane.b32.xlu1 %v9181_v12, %s6203_s20  ;;  %v2768_v58 = vmax.f32 %v2764_v35, %v8783_v28  ;;  %v3283_v39 = vmax.f32 %v3271_v36, %v10748_v61  ;;  %v10750_v11 = vld [vmem:[#allocation48_spill] sm:$0xff]  ;;  %v9639_v12 = vld [vmem:[#allocation2 + $0x90] sm:$0xff]  ;;  %v3790_v48 = vmax.f32 %v3778_v51, %v10751_v26  ;;  %v10754_v35 = vld [vmem:[#allocation51_spill] sm:$0xff] }
 0x4a0   : > { %v4353_v59 = vmax.f32 %v4341_v55, %v10750_v11  ;;  %v2747_v42 = vmax.f32 %v2743_v4, %v9639_v12  ;;  %v4340_v6 = vmax.f32 %v4328_v23, %v10752_v40  ;;  %v10753_v36 = vld [vmem:[#allocation40_spill] sm:$0xff]  ;;  %v10756_v4 = vld [vmem:[#allocation33_spill] sm:$0xff]  ;;  %v9663_v40 = vld [vmem:[#allocation2 + $0xb0] sm:$0xff] }
 0x4a1   : > { %v9631_v25 = vpop.permute.xlu0 %4666  ;;  %v9637_v29 = vpop.permute.xlu1 %4656  ;;  %v2772_v28 = vmax.f32 %v2768_v58, %v8817_v27  ;;  %v3815_v50 = vmax.f32 %v3803_v47, %v10753_v36  ;;  %v10755_v33 = vld [vmem:[#allocation8_spill] sm:$0xff]  ;;  %v3802_v51 = vmax.f32 %v3790_v48, %v10756_v4  ;;  %v10759_v27 = vld [vmem:[#allocation25_spill] sm:$0xff]  ;;  %v10764_v36 = vld [vmem:[#allocation55_spill] sm:$0xff] }
 0x4a2   : > { %v4365_v45 = vmax.f32 %v4353_v59, %v10754_v35  ;;  %v2751_v20 = vmax.f32 %v2747_v42, %v9574_v24  ;;  %v3270_v55 = vmax.f32 %v3258_v9, %v10755_v33  ;;  %v4352_v23 = vmax.f32 %v4340_v6, %v10757_v7  ;;  %v10761_v11 = vld [vmem:[#allocation56_spill] sm:$0xff]  ;;  %v10763_v42 = vld [vmem:[#allocation41_spill] sm:$0xff]  ;;  %v10770_v7 = vld [vmem:[#allocation14_spill] sm:$0xff] }
 0x4a3   : > { %3103 = vrot.lane.b32.xlu0 %v9406_v62, %s6201_s28  ;;  %3093 = vrot.lane.b32.xlu1 %v10740_v56, %s6201_s28  ;;  %v2776_v62 = vmax.f32 %v2772_v28, %v8861_v21  ;;  %v3295_v58 = vmax.f32 %v3283_v39, %v10759_v27  ;;  %v3827_v47 = vmax.f32 %v3815_v50, %v10760_v10  ;;  %v9668_v35 = vld [vmem:[#allocation2 + $0xc8] sm:$0xff]  ;;  %v10767_v50 = vld [vmem:[#allocation50_spill] sm:$0xff]  ;;  %v10768_v33 = vld [vmem:[#allocation60_spill] sm:$0xff] }
 0x4a4   : > { %v4377_v59 = vmax.f32 %v4365_v45, %v10761_v11  ;;  %v2755_v9 = vmax.f32 %v2751_v20, %v9663_v40  ;;  %v3814_v48 = vmax.f32 %v3802_v51, %v10763_v42  ;;  %v4364_v6 = vmax.f32 %v4352_v23, %v10764_v36  ;;  %10765 = vst [vmem:[#allocation21_spill] sm:$0xff] %v9668_v35  ;;  %v10766_v39 = vld [vmem:[#allocation37_spill] sm:$0xff]  ;;  %v9678_v20 = vld [vmem:[#allocation2 + $0xc0] sm:$0xff]  ;;  %v10772_v11 = vld [vmem:[#allocation63_spill] sm:$0xff] }
 0x4a5   : > { %v9655_v61 = vpop.permute.xlu0 %3047  ;;  %v9661_v26 = vpop.permute.xlu1 %3037  ;;  %v2780_v21 = vmax.f32 %v2776_v62, %v8905_v0  ;;  %v3305_v28 = vmax.f32 %v3295_v58, %v10766_v39  ;;  %v3839_v45 = vmax.f32 %v3827_v47, %v10767_v50  ;;  %10769 = vst [vmem:[#allocation24_spill] sm:$0xff] %v9678_v20  ;;  %v3282_v23 = vmax.f32 %v3270_v55, %v10770_v7  ;;  %v10771_v27 = vld [vmem:[#allocation49_spill] sm:$0xff]  ;;  %v10775_v39 = vld [vmem:[#allocation68_spill] sm:$0xff] }
 0x4a6   : > { %10758 = vst [vmem:[#allocation175_spill] sm:$0xff] %v9655_v61  ;;  %10762 = vst [vmem:[#allocation23_spill] sm:$0xff] %v9661_v26  ;;  %v4389_v4 = vmax.f32 %v4377_v59, %v10768_v33  ;;  %v2759_v51 = vmax.f32 %v2755_v9, %v9678_v20  ;;  %v3826_v10 = vmax.f32 %v3814_v48, %v10771_v27  ;;  %v10773_v58 = vld [vmem:[#allocation53_spill] sm:$0xff]  ;;  %v10774_v59 = vld [vmem:[#allocation58_spill] sm:$0xff] }
 0x4a7   : > { %3604 = vrot.lane.b32.xlu0 %v9668_v35, %s6201_s28  ;;  %3594 = vrot.lane.b32.xlu1 %v9663_v40, %s6201_s28  ;;  %v4376_v42 = vmax.f32 %v4364_v6, %v10772_v11  ;;  %v2784_v62 = vmax.f32 %v2780_v21, %v8941_v38  ;;  %v3315_v47 = vmax.f32 %v3305_v28, %v10773_v58  ;;  %v10776_v35 = vld [vmem:[#allocation57_spill] sm:$0xff]  ;;  %v10777_v26 = vld [vmem:[#allocation67_spill] sm:$0xff]  ;;  %v9696_v48 = vld [vmem:[#allocation2 + $0xd0] sm:$0xff] }
 0x4a8   : > { %v3851_v36 = vmax.f32 %v3839_v45, %v10774_v59  ;;  %v4401_v50 = vmax.f32 %v4389_v4, %v10775_v39  ;;  %v3838_v9 = vmax.f32 %v3826_v10, %v10776_v35  ;;  %10778 = vst [vmem:[#allocation7_spill] sm:$0xff] %v9696_v48  ;;  %v2763_v6 = vmax.f32 %v2759_v51, %v9696_v48  ;;  %v10779_v21 = vld [vmem:[#allocation62_spill] sm:$0xff]  ;;  %v10780_v45 = vld [vmem:[#allocation72_spill] sm:$0xff]  ;;  %v10781_v35 = vld [vmem:[#allocation9_spill] sm:$0xff] }
 0x4a9   : > { %v9684_v0 = vpop.permute.xlu0 %3548  ;;  %v9690_v33 = vpop.permute.xlu1 %3538  ;;  %v4388_v55 = vmax.f32 %v4376_v42, %v10777_v26  ;;  %v2788_v38 = vmax.f32 %v2784_v62, %v8977_v15  ;;  %v2787_v4 = vmax.f32 %v10781_v35, %v8961_v44  ;;  %v10782_v26 = vld [vmem:[#allocation20_spill] sm:$0xff]  ;;  %v10783_v10 = vld [vmem:[#allocation65_spill] sm:$0xff]  ;;  %v10784_v42 = vld [vmem:[#allocation75_spill] sm:$0xff] }
 0x4aa   : > { %v3861_v28 = vmax.f32 %v3851_v36, %v10779_v21  ;;  %v4413_v7 = vmax.f32 %v4401_v50, %v10780_v45  ;;  %v3294_v27 = vmax.f32 %v3282_v23, %v10782_v26  ;;  %v3850_v11 = vmax.f32 %v3838_v9, %v10783_v10  ;;  %v10785_v51 = vld [vmem:[#allocation52_spill] sm:$0xff]  ;;  %v10786_v36 = vld [vmem:[#allocation70_spill] sm:$0xff]  ;;  %v10787_v50 = vld [vmem:[#allocation81_spill] sm:$0xff] }
 0x4ab   : > { %4158 = vrot.lane.b32.xlu0 %v9087_v13, %s6201_s28  ;;  %4148 = vrot.lane.b32.xlu1 %v9063_v57, %s6201_s28  ;;  %v4400_v58 = vmax.f32 %v4388_v55, %v10784_v42  ;;  %v2792_v15 = vmax.f32 %v2788_v38, %v9005_v16  ;;  %v3325_v62 = vmax.f32 %v3315_v47, %v10785_v51  ;;  %v9717_v61 = vld [vmem:[#allocation2 + $0xe0] sm:$0xff]  ;;  %v10789_v23 = vld [vmem:[#allocation30_spill] sm:$0xff]  ;;  %v10790_v35 = vld [vmem:[#allocation69_spill] sm:$0xff] }
 0x4ac   : > { %v3871_v39 = vmax.f32 %v3861_v28, %v10786_v36  ;;  %v4423_v21 = vmax.f32 %v4413_v7, %v10787_v50  ;;  %10788 = vst [vmem:[#allocation35_spill] sm:$0xff] %v9717_v61  ;;  %v2767_v44 = vmax.f32 %v2763_v6, %v9717_v61  ;;  %v3304_v9 = vmax.f32 %v3294_v27, %v10789_v23  ;;  %v10791_v26 = vld [vmem:[#allocation80_spill] sm:$0xff]  ;;  %v10793_v28 = vld [vmem:[#allocation74_spill] sm:$0xff]  ;;  %v10794_v42 = vld [vmem:[#allocation85_spill] sm:$0xff] }
 0x4ad   : > { %v9709_v59 = vpop.permute.xlu0 %4102  ;;  %v9715_v45 = vpop.permute.xlu1 %4092  ;;  %v3860_v55 = vmax.f32 %v3850_v11, %v10790_v35  ;;  %v4412_v10 = vmax.f32 %v4400_v58, %v10791_v26  ;;  %v2796_v16 = vmax.f32 %v2792_v15, %v10718_v60  ;;  %v10792_v47 = vld [vmem:[#allocation64_spill] sm:$0xff]  ;;  %v10795_v6 = vld [vmem:[#allocation15_spill] sm:$0xff]  ;;  %v10797_v50 = vld [vmem:[#allocation78_spill] sm:$0xff] }
 0x4ae   : > { %v3335_v38 = vmax.f32 %v3325_v62, %v10792_v47  ;;  %v3881_v7 = vmax.f32 %v3871_v39, %v10793_v28  ;;  %v4433_v51 = vmax.f32 %v4423_v21, %v10794_v42  ;;  %v2791_v27 = vmax.f32 %v2787_v4, %v10795_v6  ;;  %v10796_v36 = vld [vmem:[#allocation43_spill] sm:$0xff]  ;;  %v10798_v23 = vld [vmem:[#allocation89_spill] sm:$0xff]  ;;  %v10799_v15 = vld [vmem:[#allocation76_spill] sm:$0xff] }
 0x4af   : > { %4730 = vrot.lane.b32.xlu0 %v9213_v1, %s6203_s20  ;;  %4720 = vrot.lane.b32.xlu1 %v9217_v5, %s6203_s20  ;;  %v3314_v11 = vmax.f32 %v3304_v9, %v10796_v36  ;;  %v3870_v58 = vmax.f32 %v3860_v55, %v10797_v50  ;;  %v4422_v35 = vmax.f32 %v4412_v10, %v10798_v23  ;;  %v10800_v39 = vld [vmem:[#allocation83_spill] sm:$0xff]  ;;  %v10801_v21 = vld [vmem:[#allocation94_spill] sm:$0xff]  ;;  %v10804_v6 = vld [vmem:[#allocation93_spill] sm:$0xff] }
 0x4b0   : > { %v2800_v60 = vmax.f32 %v2796_v16, %v9059_v53  ;;  %v3345_v62 = vmax.f32 %v3335_v38, %v10799_v15  ;;  %v3891_v26 = vmax.f32 %v3881_v7, %v10800_v39  ;;  %v4443_v47 = vmax.f32 %v4433_v51, %v10801_v21  ;;  %v10802_v4 = vld [vmem:[#allocation59_spill] sm:$0xff]  ;;  %v10803_v42 = vld [vmem:[#allocation82_spill] sm:$0xff] }
 0x4b1   : > { %v9735_v1 = vpop.permute.xlu0 %4674  ;;  %v9741_v28 = vpop.permute.xlu1 %4664  ;;  %v2795_v5 = vmax.f32 %v2791_v27, %v8997_v30  ;;  %v3324_v9 = vmax.f32 %v3314_v11, %v10802_v4  ;;  %v3880_v55 = vmax.f32 %v3870_v58, %v10803_v42  ;;  %v4432_v10 = vmax.f32 %v4422_v35, %v10804_v6  ;;  %v10805_v16 = vld [vmem:[#allocation87_spill] sm:$0xff]  ;;  %v10806_v7 = vld [vmem:[#allocation90_spill] sm:$0xff] }
 0x4b2   : > { %v2804_v53 = vmax.f32 %v2800_v60, %v9087_v13  ;;  %v3901_v38 = vmax.f32 %v3891_v26, %v10805_v16  ;;  %v3355_v36 = vmax.f32 %v3345_v62, %v10806_v7  ;;  %v10807_v51 = vld [vmem:[#allocation98_spill] sm:$0xff]  ;;  %v10808_v30 = vld [vmem:[#allocation19_spill] sm:$0xff]  ;;  %v10812_v13 = vld [vmem:[#allocation96_spill] sm:$0xff] }
 0x4b3   : > { %3111 = vrot.lane.b32.xlu0 %v9556_v41, %s6201_s28  ;;  %v4453_v50 = vmax.f32 %v4443_v47, %v10807_v51  ;;  %3101 = vrot.lane.b32.xlu1 %v9444_v17, %s6201_s28  ;;  %v2799_v27 = vmax.f32 %v2795_v5, %v10808_v30  ;;  %v10809_v11 = vld [vmem:[#allocation71_spill] sm:$0xff]  ;;  %v10811_v15 = vld [vmem:[#allocation102_spill] sm:$0xff]  ;;  %v10815_v5 = vld [vmem:[#allocation84_spill] sm:$0xff] }
 0x4b4   : > { %v3334_v58 = vmax.f32 %v3324_v9, %v10809_v11  ;;  %v10810_v23 = vld [vmem:[#allocation91_spill] sm:$0xff]  ;;  %v4442_v39 = vmax.f32 %v4432_v10, %v10811_v15  ;;  %v3911_v60 = vmax.f32 %v3901_v38, %v10812_v13  ;;  %v9766_v42 = vld [vmem:[#allocation2 + $0xf0] sm:$0xff]  ;;  %v10820_v51 = vld [vmem:[#allocation101_spill] sm:$0xff] }
 0x4b5   : > { %v3890_v35 = vmax.f32 %v3880_v55, %v10810_v23  ;;  %v9759_v41 = vpop.permute.xlu0 %3055  ;;  %v10813_v26 = vld [vmem:[#allocation103_spill] sm:$0xff]  ;;  %v9764_v47 = vpop.permute.xlu1 %3045  ;;  %v2771_v17 = vmax.f32 %v2767_v44, %v9766_v42  ;;  %v10817_v16 = vld [vmem:[#allocation106_spill] sm:$0xff]  ;;  %v2803_v44 = vmax.f32 %v2799_v27, %v9035_v46  ;;  %v10829_v27 = vld [vmem:[#allocation108_spill] sm:$0xff] }
 0x4b6   : > { %v3365_v21 = vmax.f32 %v3355_v36, %v10813_v26  ;;  %v10814_v62 = vld [vmem:[#allocation107_spill] sm:$0xff]  ;;  %v3344_v9 = vmax.f32 %v3334_v58, %v10815_v5  ;;  %v4452_v10 = vmax.f32 %v4442_v39, %v10817_v16  ;;  %v10819_v38 = vld [vmem:[#allocation10_spill] sm:$0xff]  ;;  %v10823_v58 = vld [vmem:[#allocation97_spill] sm:$0xff] }
 0x4b7   : > { %v4463_v4 = vmax.f32 %v4453_v50, %v10814_v62  ;;  %v10816_v6 = vld [vmem:[#allocation95_spill] sm:$0xff]  ;;  %v2814_v36 = vmax.f32 %v2804_v53, %v10819_v38  ;;  %v3921_v50 = vmax.f32 %v3911_v60, %v10820_v51  ;;  %v10821_v30 = vld [vmem:[#allocation114_spill] sm:$0xff]  ;;  %3602 = vrot.lane.b32.xlu1 %v9678_v20, %s6201_s28  ;;  %v10824_v39 = vld [vmem:[#allocation104_spill] sm:$0xff] }
 0x4b8   : > { %v3900_v55 = vmax.f32 %v3890_v35, %v10816_v6  ;;  %v9772_v7 = vld [vmem:[#allocation2 + $0xd8] sm:$0xff]  ;;  %v10822_v23 = vld [vmem:[#allocation118_spill] sm:$0xff]  ;;  %v3354_v35 = vmax.f32 %v3344_v9, %v10823_v58  ;;  %v10826_v53 = vld [vmem:[#allocation109_spill] sm:$0xff] }
 0x4b9   : > { %10818 = vst [vmem:[#allocation248_spill] sm:$0xff] %v9772_v7  ;;  %3612 = vrot.lane.b32.xlu0 %v9772_v7, %s6201_s28  ;;  %v4473_v11 = vmax.f32 %v4463_v4, %v10821_v30  ;;  %v3375_v15 = vmax.f32 %v3365_v21, %v10822_v23  ;;  %v10825_v26 = vld [vmem:[#allocation115_spill] sm:$0xff]  ;;  %v9786_v5 = vpop.permute.xlu0 %3556  ;;  %v3931_v6 = vmax.f32 %v3921_v50, %v10826_v53  ;;  %v10827_v60 = vld [vmem:[#allocation122_spill] sm:$0xff]  ;;  %v9791_v21 = vpop.permute.xlu1 %3546  ;;  %v9793_v51 = vld [vmem:[#allocation2 + $0x100] sm:$0xff] }
 0x4ba   : > { %v3910_v13 = vmax.f32 %v3900_v55, %v10824_v39  ;;  %v4462_v62 = vmax.f32 %v4452_v10, %v10825_v26  ;;  %v10828_v4 = vld [vmem:[#allocation130_spill] sm:$0xff]  ;;  %v2775_v46 = vmax.f32 %v2771_v17, %v9793_v51  ;;  %v10830_v30 = vld [vmem:[#allocation111_spill] sm:$0xff]  ;;  %v10832_v50 = vld [vmem:[#allocation16_spill] sm:$0xff]  ;;  %v2813_v17 = vmax.f32 %v2803_v44, %v9063_v57 }
 0x4bb   : > { %v4483_v16 = vmax.f32 %v4473_v11, %v10827_v60  ;;  %v3385_v38 = vmax.f32 %v3375_v15, %v10828_v4  ;;  %v3364_v55 = vmax.f32 %v3354_v35, %v10830_v30  ;;  %v10831_v23 = vld [vmem:[#allocation119_spill] sm:$0xff]  ;;  %v2824_v58 = vmax.f32 %v2814_v36, %v10832_v50  ;;  %v10833_v11 = vld [vmem:[#allocation116_spill] sm:$0xff]  ;;  %v10835_v53 = vld [vmem:[#allocation142_spill] sm:$0xff]  ;;  %4156 = vrot.lane.b32.xlu1 %v10730_v32, %s6201_s28 }
 0x4bc   : > { %v3920_v9 = vmax.f32 %v3910_v13, %v10829_v27  ;;  %v4472_v10 = vmax.f32 %v4462_v62, %v10831_v23  ;;  %v3941_v39 = vmax.f32 %v3931_v6, %v10833_v11  ;;  %v10834_v15 = vld [vmem:[#allocation128_spill] sm:$0xff]  ;;  %v10837_v4 = vld [vmem:[#allocation121_spill] sm:$0xff]  ;;  %v9813_v36 = vld [vmem:[#allocation2 + $0x110] sm:$0xff]  ;;  %v2823_v57 = vmax.f32 %v2813_v17, %v10730_v32 }
 0x4bd   : > { %4166 = vrot.lane.b32.xlu0 %v9241_v31, %s6203_s20  ;;  %v4493_v26 = vmax.f32 %v4483_v16, %v10834_v15  ;;  %v3395_v60 = vmax.f32 %v3385_v38, %v10835_v53  ;;  %v10836_v13 = vld [vmem:[#allocation112_spill] sm:$0xff]  ;;  %v3374_v62 = vmax.f32 %v3364_v55, %v10837_v4  ;;  %v10838_v27 = vld [vmem:[#allocation125_spill] sm:$0xff]  ;;  %v9811_v31 = vpop.permute.xlu0 %4110  ;;  %10839 = vst [vmem:[#allocation13_spill] sm:$0xff] %v9813_v36  ;;  %v10841_v38 = vld [vmem:[#allocation134_spill] sm:$0xff]  ;;  %v9819_v53 = vpop.permute.xlu1 %4100 }
 0x4be   : > { %v3930_v35 = vmax.f32 %v3920_v9, %v10836_v13  ;;  %v4482_v30 = vmax.f32 %v4472_v10, %v10838_v27  ;;  %v2779_v6 = vmax.f32 %v2775_v46, %v9813_v36  ;;  %v10840_v16 = vld [vmem:[#allocation124_spill] sm:$0xff]  ;;  %v10843_v44 = vld [vmem:[#allocation117_spill] sm:$0xff]  ;;  %v10845_v13 = vld [vmem:[#allocation131_spill] sm:$0xff] }
 0x4bf   : > { %v3951_v23 = vmax.f32 %v3941_v39, %v10840_v16  ;;  %v4503_v50 = vmax.f32 %v4493_v26, %v10841_v38  ;;  %v10842_v11 = vld [vmem:[#allocation152_spill] sm:$0xff]  ;;  %v10844_v55 = vld [vmem:[#allocation129_spill] sm:$0xff]  ;;  %v3384_v4 = vmax.f32 %v3374_v62, %v10845_v13  ;;  %v10846_v46 = vld [vmem:[#allocation22_spill] sm:$0xff]  ;;  %4728 = vrot.lane.b32.xlu1 %v9255_v37, %s6203_s20 }
 0x4c0   : > { %v3405_v15 = vmax.f32 %v3395_v60, %v10842_v11  ;;  %v3940_v9 = vmax.f32 %v3930_v35, %v10843_v44  ;;  %v4492_v10 = vmax.f32 %v4482_v30, %v10844_v55  ;;  %v2834_v27 = vmax.f32 %v2824_v58, %v10846_v46  ;;  %v10847_v39 = vld [vmem:[#allocation136_spill] sm:$0xff]  ;;  %v10849_v60 = vld [vmem:[#allocation163_spill] sm:$0xff]  ;;  %v10851_v35 = vld [vmem:[#allocation126_spill] sm:$0xff] }
 0x4c1   : > { %4738 = vrot.lane.b32.xlu0 %v9251_v2, %s6203_s20  ;;  %v3961_v16 = vmax.f32 %v3951_v23, %v10847_v39  ;;  %v10848_v26 = vld [vmem:[#allocation140_spill] sm:$0xff]  ;;  %v10852_v30 = vld [vmem:[#allocation135_spill] sm:$0xff]  ;;  %v10853_v2 = vld [vmem:[#allocation141_spill] sm:$0xff]  ;;  %v9839_v58 = vpop.permute.xlu0 %4682 }
 0x4c2   : > { %v4511_v38 = vmax.f32 %v4503_v50, %v10848_v26  ;;  %v3415_v11 = vmax.f32 %v3405_v15, %v10849_v60  ;;  %v9833_v32 = vld [vmem:[#allocation2 + $0x120] sm:$0xff]  ;;  %v3950_v62 = vmax.f32 %v3940_v9, %v10851_v35  ;;  %v4502_v44 = vmax.f32 %v4492_v10, %v10852_v30  ;;  %v10854_v23 = vld [vmem:[#allocation34_spill] sm:$0xff]  ;;  %v10856_v15 = vld [vmem:[#allocation173_spill] sm:$0xff]  ;;  %v9844_v26 = vpop.permute.xlu1 %4672 }
 0x4c3   : > { %10850 = vst [vmem:[#allocation26_spill] sm:$0xff] %v9833_v32  ;;  %v2783_v17 = vmax.f32 %v2779_v6, %v9833_v32  ;;  %v3394_v55 = vmax.f32 %v3384_v4, %v10853_v2  ;;  %v2844_v13 = vmax.f32 %v2834_v27, %v10854_v23  ;;  %v10855_v50 = vld [vmem:[#allocation146_spill] sm:$0xff]  ;;  %v10857_v60 = vld [vmem:[#allocation139_spill] sm:$0xff]  ;;  %v10860_v4 = vld [vmem:[#allocation137_spill] sm:$0xff]  ;;  %3109 = vrot.lane.b32.xlu1 %v9626_v18, %s6201_s28 }
 0x4c4   : > { %v4519_v46 = vmax.f32 %v4511_v38, %v10855_v50  ;;  %v3425_v39 = vmax.f32 %v3415_v11, %v10856_v15  ;;  %v4510_v36 = vmax.f32 %v4502_v44, %v10857_v60  ;;  %v10858_v6 = vld [vmem:[#allocation151_spill] sm:$0xff]  ;;  %v10859_v9 = vld [vmem:[#allocation42_spill] sm:$0xff]  ;;  %v3971_v35 = vmax.f32 %v3961_v16, %v10860_v4  ;;  %v10862_v2 = vld [vmem:[#allocation184_spill] sm:$0xff] }
 0x4c5   : > { %v2833_v37 = vmax.f32 %v2823_v57, %v2783_v17  ;;  %v3404_v32 = vmax.f32 %v3394_v55, %v10858_v6  ;;  %3119 = vrot.lane.b32.xlu0 %v9570_v22, %s6201_s28  ;;  %v2854_v10 = vmax.f32 %v2844_v13, %v10859_v9  ;;  %v10861_v30 = vld [vmem:[#allocation150_spill] sm:$0xff]  ;;  %v10863_v11 = vld [vmem:[#allocation29_spill] sm:$0xff]  ;;  %v10864_v17 = vld [vmem:[#allocation127_spill] sm:$0xff]  ;;  %v9860_v22 = vpop.permute.xlu0 %3063 }
 0x4c6   : > { %v4527_v27 = vmax.f32 %v4519_v46, %v10861_v30  ;;  %v3435_v38 = vmax.f32 %v3425_v39, %v10862_v2  ;;  %v3960_v44 = vmax.f32 %v3950_v62, %v10864_v17  ;;  %v10865_v23 = vld [vmem:[#allocation145_spill] sm:$0xff]  ;;  %v10866_v50 = vld [vmem:[#allocation162_spill] sm:$0xff]  ;;  %v10868_v16 = vld [vmem:[#allocation147_spill] sm:$0xff]  ;;  %v9866_v30 = vpop.permute.xlu1 %3053 }
 0x4c7   : > { %v2843_v57 = vmax.f32 %v2833_v37, %v10863_v11  ;;  %v4518_v55 = vmax.f32 %v4510_v36, %v10865_v23  ;;  %v3414_v15 = vmax.f32 %v3404_v32, %v10866_v50  ;;  %v10867_v13 = vld [vmem:[#allocation54_spill] sm:$0xff]  ;;  %v3979_v6 = vmax.f32 %v3971_v35, %v10868_v16  ;;  %v10869_v46 = vld [vmem:[#allocation156_spill] sm:$0xff]  ;;  %v10871_v18 = vld [vmem:[#allocation45_spill] sm:$0xff]  ;;  %3610 = vrot.lane.b32.xlu1 %v9696_v48, %s6201_s28 }
 0x4c8   : > { %v2864_v60 = vmax.f32 %v2854_v10, %v10867_v13  ;;  %v4535_v9 = vmax.f32 %v4527_v27, %v10869_v46  ;;  %v10870_v39 = vld [vmem:[#allocation194_spill] sm:$0xff]  ;;  %v10873_v11 = vld [vmem:[#allocation149_spill] sm:$0xff]  ;;  %v10874_v17 = vld [vmem:[#allocation172_spill] sm:$0xff] }
 0x4c9   : > { %v3445_v4 = vmax.f32 %v3435_v38, %v10870_v39  ;;  %v2853_v37 = vmax.f32 %v2843_v57, %v10871_v18  ;;  %v10872_v2 = vld [vmem:[#allocation138_spill] sm:$0xff]  ;;  %v4526_v36 = vmax.f32 %v4518_v55, %v10873_v11  ;;  %v3424_v32 = vmax.f32 %v3414_v15, %v10874_v17  ;;  %v9872_v23 = vld [vmem:[#allocation2 + $0xe8] sm:$0xff]  ;;  %v10878_v38 = vld [vmem:[#allocation160_spill] sm:$0xff]  ;;  %v9886_v17 = vpop.permute.xlu0 %3564 }
 0x4ca   : > { %v3970_v62 = vmax.f32 %v3960_v44, %v10872_v2  ;;  %10875 = vst [vmem:[#allocation36_spill] sm:$0xff] %v9872_v23  ;;  %3620 = vrot.lane.b32.xlu0 %v9872_v23, %s6201_s28  ;;  %v10876_v10 = vld [vmem:[#allocation66_spill] sm:$0xff]  ;;  %v10877_v27 = vld [vmem:[#allocation157_spill] sm:$0xff]  ;;  %v4543_v13 = vmax.f32 %v4535_v9, %v10878_v38  ;;  %v10881_v55 = vld [vmem:[#allocation148_spill] sm:$0xff]  ;;  %v9892_v23 = vpop.permute.xlu1 %3554 }
 0x4cb   : > { %v2874_v35 = vmax.f32 %v2864_v60, %v10876_v10  ;;  %v3987_v50 = vmax.f32 %v3979_v6, %v10877_v27  ;;  %v10879_v16 = vld [vmem:[#allocation202_spill] sm:$0xff]  ;;  %v10880_v57 = vld [vmem:[#allocation61_spill] sm:$0xff]  ;;  %v10882_v39 = vld [vmem:[#allocation155_spill] sm:$0xff]  ;;  %4164 = vrot.lane.b32.xlu1 %v9283_v34, %s6203_s20 }
 0x4cc   : > { %v3455_v46 = vmax.f32 %v3445_v4, %v10879_v16  ;;  %v2863_v44 = vmax.f32 %v2853_v37, %v10880_v57  ;;  %v3978_v15 = vmax.f32 %v3970_v62, %v10881_v55  ;;  %v4534_v18 = vmax.f32 %v4526_v36, %v10882_v39  ;;  %v10883_v2 = vld [vmem:[#allocation183_spill] sm:$0xff]  ;;  %v10886_v9 = vld [vmem:[#allocation168_spill] sm:$0xff]  ;;  %v10887_v4 = vld [vmem:[#allocation210_spill] sm:$0xff] }
 0x4cd   : > { %v3434_v11 = vmax.f32 %v3424_v32, %v10883_v2  ;;  %v10884_v60 = vld [vmem:[#allocation79_spill] sm:$0xff]  ;;  %v3995_v38 = vmax.f32 %v3987_v50, %v10886_v9  ;;  %v10888_v48 = vld [vmem:[#allocation73_spill] sm:$0xff]  ;;  %v10889_v57 = vld [vmem:[#allocation158_spill] sm:$0xff] }
 0x4ce   : > { %v2884_v10 = vmax.f32 %v2874_v35, %v10884_v60  ;;  %v10885_v6 = vld [vmem:[#allocation167_spill] sm:$0xff]  ;;  %v3465_v16 = vmax.f32 %v3455_v46, %v10887_v4  ;;  %v2873_v37 = vmax.f32 %v2863_v44, %v10888_v48  ;;  %v3986_v62 = vmax.f32 %v3978_v15, %v10889_v57  ;;  %4174 = vrot.lane.b32.xlu0 %v9279_v54, %s6203_s20  ;;  %v10892_v35 = vld [vmem:[#allocation92_spill] sm:$0xff]  ;;  %v10896_v48 = vld [vmem:[#allocation86_spill] sm:$0xff]  ;;  %v9910_v54 = vpop.permute.xlu0 %4118 }
 0x4cf   : > { %v4551_v27 = vmax.f32 %v4543_v13, %v10885_v6  ;;  %v10890_v55 = vld [vmem:[#allocation159_spill] sm:$0xff]  ;;  %v10895_v46 = vld [vmem:[#allocation216_spill] sm:$0xff]  ;;  %v10897_v15 = vld [vmem:[#allocation166_spill] sm:$0xff]  ;;  %4736 = vrot.lane.b32.xlu1 %v9295_v19, %s6203_s20 }
 0x4d0   : > { %v4542_v36 = vmax.f32 %v4534_v18, %v10890_v55  ;;  %v10891_v39 = vld [vmem:[#allocation191_spill] sm:$0xff]  ;;  %v2894_v2 = vmax.f32 %v2884_v10, %v10892_v35  ;;  %v3475_v9 = vmax.f32 %v3465_v16, %v10895_v46  ;;  %v2883_v44 = vmax.f32 %v2873_v37, %v10896_v48  ;;  %v10898_v4 = vld [vmem:[#allocation170_spill] sm:$0xff]  ;;  %v10900_v10 = vld [vmem:[#allocation105_spill] sm:$0xff]  ;;  %v9916_v46 = vpop.permute.xlu1 %4108 }
 0x4d1   : > { %v3444_v32 = vmax.f32 %v3434_v11, %v10891_v39  ;;  %v10893_v13 = vld [vmem:[#allocation171_spill] sm:$0xff]  ;;  %v3994_v11 = vmax.f32 %v3986_v62, %v10898_v4  ;;  %v10903_v16 = vld [vmem:[#allocation224_spill] sm:$0xff]  ;;  %v10905_v48 = vld [vmem:[#allocation169_spill] sm:$0xff] }
 0x4d2   : > { %v4559_v60 = vmax.f32 %v4551_v27, %v10893_v13  ;;  %v10894_v50 = vld [vmem:[#allocation179_spill] sm:$0xff]  ;;  %v4550_v18 = vmax.f32 %v4542_v36, %v10897_v15  ;;  %v2904_v39 = vmax.f32 %v2894_v2, %v10900_v10  ;;  %v10901_v27 = vld [vmem:[#allocation178_spill] sm:$0xff]  ;;  %v10904_v34 = vld [vmem:[#allocation100_spill] sm:$0xff]  ;;  %4746 = vrot.lane.b32.xlu0 %v9291_v8, %s6203_s20  ;;  %v9934_v8 = vpop.permute.xlu0 %4690 }
 0x4d3   : > { %v4003_v6 = vmax.f32 %v3995_v38, %v10894_v50  ;;  %v10899_v57 = vld [vmem:[#allocation199_spill] sm:$0xff]  ;;  %v10902_v38 = vld [vmem:[#allocation182_spill] sm:$0xff]  ;;  %v3485_v50 = vmax.f32 %v3475_v9, %v10903_v16  ;;  %v2893_v37 = vmax.f32 %v2883_v44, %v10904_v34  ;;  %v10906_v15 = vld [vmem:[#allocation181_spill] sm:$0xff]  ;;  %3117 = vrot.lane.b32.xlu1 %v9639_v12, %s6201_s28 }
 0x4d4   : > { %v3454_v55 = vmax.f32 %v3444_v32, %v10899_v57  ;;  %v4567_v35 = vmax.f32 %v4559_v60, %v10901_v27  ;;  %v4558_v36 = vmax.f32 %v4550_v18, %v10905_v48  ;;  %v4002_v62 = vmax.f32 %v3994_v11, %v10906_v15  ;;  %v10907_v4 = vld [vmem:[#allocation207_spill] sm:$0xff]  ;;  %v10908_v2 = vld [vmem:[#allocation120_spill] sm:$0xff]  ;;  %v10911_v9 = vld [vmem:[#allocation230_spill] sm:$0xff] }
 0x4d5   : > { %v4011_v13 = vmax.f32 %v4003_v6, %v10902_v38  ;;  %v2914_v57 = vmax.f32 %v2904_v39, %v10908_v2  ;;  %v10909_v60 = vld [vmem:[#allocation187_spill] sm:$0xff]  ;;  %v10910_v6 = vld [vmem:[#allocation192_spill] sm:$0xff]  ;;  %v3495_v38 = vmax.f32 %v3485_v50, %v10911_v9  ;;  %v10912_v44 = vld [vmem:[#allocation113_spill] sm:$0xff]  ;;  %v9940_v9 = vpop.permute.xlu1 %4680 }
 0x4d6   : > { %v3464_v32 = vmax.f32 %v3454_v55, %v10907_v4  ;;  %v4575_v10 = vmax.f32 %v4567_v35, %v10909_v60  ;;  %v2903_v18 = vmax.f32 %v2893_v37, %v10912_v44  ;;  %v10913_v16 = vld [vmem:[#allocation177_spill] sm:$0xff]  ;;  %v10916_v39 = vld [vmem:[#allocation132_spill] sm:$0xff]  ;;  %v10920_v19 = vld [vmem:[#allocation123_spill] sm:$0xff]  ;;  %3127 = vrot.lane.b32.xlu0 %v9584_v14, %s6201_s28 }
 0x4d7   : > { %v4019_v27 = vmax.f32 %v4011_v13, %v10910_v6  ;;  %v4566_v11 = vmax.f32 %v4558_v36, %v10913_v16  ;;  %v10914_v34 = vld [vmem:[#allocation189_spill] sm:$0xff]  ;;  %v2924_v4 = vmax.f32 %v2914_v57, %v10916_v39  ;;  %v10917_v35 = vld [vmem:[#allocation188_spill] sm:$0xff]  ;;  %v10931_v14 = vld [vmem:[#allocation154_spill] sm:$0xff]  ;;  %3618 = vrot.lane.b32.xlu1 %v9717_v61, %s6201_s28 }
 0x4d8   : > { %v4010_v55 = vmax.f32 %v4002_v62, %v10914_v34  ;;  %v10915_v48 = vld [vmem:[#allocation217_spill] sm:$0xff]  ;;  %v4583_v2 = vmax.f32 %v4575_v10, %v10917_v35  ;;  %v10918_v13 = vld [vmem:[#allocation200_spill] sm:$0xff]  ;;  %v2913_v37 = vmax.f32 %v2903_v18, %v10920_v19  ;;  %v10925_v10 = vld [vmem:[#allocation195_spill] sm:$0xff] }
 0x4d9   : > { %v3474_v15 = vmax.f32 %v3464_v32, %v10915_v48  ;;  %v4027_v60 = vmax.f32 %v4019_v27, %v10918_v13  ;;  %v10919_v50 = vld [vmem:[#allocation236_spill] sm:$0xff]  ;;  %v10922_v16 = vld [vmem:[#allocation197_spill] sm:$0xff]  ;;  %v10928_v13 = vld [vmem:[#allocation190_spill] sm:$0xff] }
 0x4da   : > { %v3505_v6 = vmax.f32 %v3495_v38, %v10919_v50  ;;  %v10921_v44 = vld [vmem:[#allocation180_spill] sm:$0xff]  ;;  %v4018_v62 = vmax.f32 %v4010_v55, %v10922_v16  ;;  %v10923_v34 = vld [vmem:[#allocation225_spill] sm:$0xff]  ;;  %v4591_v39 = vmax.f32 %v4583_v2, %v10925_v10  ;;  %v10930_v19 = vld [vmem:[#allocation231_spill] sm:$0xff] }
 0x4db   : > { %v4574_v36 = vmax.f32 %v4566_v11, %v10921_v44  ;;  %v3484_v32 = vmax.f32 %v3474_v15, %v10923_v34  ;;  %v10924_v57 = vld [vmem:[#allocation144_spill] sm:$0xff]  ;;  %v10927_v38 = vld [vmem:[#allocation133_spill] sm:$0xff]  ;;  %v9957_v44 = vpop.permute.xlu0 %3071  ;;  %v10933_v2 = vld [vmem:[#allocation214_spill] sm:$0xff] }
 0x4dc   : > { %v2934_v48 = vmax.f32 %v2924_v4, %v10924_v57  ;;  %v10926_v27 = vld [vmem:[#allocation208_spill] sm:$0xff]  ;;  %v2923_v18 = vmax.f32 %v2913_v37, %v10927_v38  ;;  %v10929_v50 = vld [vmem:[#allocation205_spill] sm:$0xff]  ;;  %v10932_v4 = vld [vmem:[#allocation203_spill] sm:$0xff] }
 0x4dd   : > { %v4035_v35 = vmax.f32 %v4027_v60, %v10926_v27  ;;  %v4582_v11 = vmax.f32 %v4574_v36, %v10928_v13  ;;  %v4026_v55 = vmax.f32 %v4018_v62, %v10929_v50  ;;  %v3494_v15 = vmax.f32 %v3484_v32, %v10930_v19  ;;  %v10934_v60 = vld [vmem:[#allocation12_spill] sm:$0xff]  ;;  %v9963_v27 = vpop.permute.xlu1 %3061  ;;  %v10935_v12 = vld [vmem:[#allocation143_spill] sm:$0xff]  ;;  %v10936_v38 = vld [vmem:[#allocation198_spill] sm:$0xff] }
 0x4de   : > { %v2944_v16 = vmax.f32 %v2934_v48, %v10931_v14  ;;  %v4599_v34 = vmax.f32 %v4591_v39, %v10932_v4  ;;  %v3513_v10 = vmax.f32 %v3505_v6, %v10934_v60  ;;  %v2933_v37 = vmax.f32 %v2923_v18, %v10935_v12  ;;  %v10937_v13 = vld [vmem:[#allocation215_spill] sm:$0xff]  ;;  %v10938_v50 = vld [vmem:[#allocation237_spill] sm:$0xff]  ;;  %v10942_v6 = vld [vmem:[#allocation222_spill] sm:$0xff] }
 0x4df   : > { %v4043_v57 = vmax.f32 %v4035_v35, %v10933_v2  ;;  %v4590_v36 = vmax.f32 %v4582_v11, %v10936_v38  ;;  %v4034_v62 = vmax.f32 %v4026_v55, %v10937_v13  ;;  %v3504_v32 = vmax.f32 %v3494_v15, %v10938_v50  ;;  %v9969_v19 = vld [vmem:[#allocation2 + $0xf8] sm:$0xff]  ;;  %v10940_v48 = vld [vmem:[#allocation165_spill] sm:$0xff]  ;;  %v10944_v2 = vld [vmem:[#allocation206_spill] sm:$0xff]  ;;  %v9981_v12 = vpop.permute.xlu0 %3572 }
 0x4e0   : > { %10939 = vst [vmem:[#allocation28_spill] sm:$0xff] %v9969_v19  ;;  %3628 = vrot.lane.b32.xlu0 %v9969_v19, %s6201_s28  ;;  %v2954_v39 = vmax.f32 %v2944_v16, %v10940_v48  ;;  %v10941_v35 = vld [vmem:[#allocation211_spill] sm:$0xff]  ;;  %v10943_v18 = vld [vmem:[#allocation153_spill] sm:$0xff]  ;;  %v10946_v38 = vld [vmem:[#allocation176_spill] sm:$0xff] }
 0x4e1   : > { %v4607_v14 = vmax.f32 %v4599_v34, %v10941_v35  ;;  %v4051_v4 = vmax.f32 %v4043_v57, %v10942_v6  ;;  %v2943_v11 = vmax.f32 %v2933_v37, %v10943_v18  ;;  %v4598_v55 = vmax.f32 %v4590_v36, %v10944_v2  ;;  %v10945_v60 = vld [vmem:[#allocation223_spill] sm:$0xff]  ;;  %v10948_v16 = vld [vmem:[#allocation228_spill] sm:$0xff]  ;;  %v10949_v34 = vld [vmem:[#allocation5_spill] sm:$0xff]  ;;  %v9987_v57 = vpop.permute.xlu1 %3562 }
 0x4e2   : > { %v4042_v15 = vmax.f32 %v4034_v62, %v10945_v60  ;;  %v2964_v13 = vmax.f32 %v2954_v39, %v10946_v38  ;;  %v10947_v50 = vld [vmem:[#allocation219_spill] sm:$0xff]  ;;  %v3521_v35 = vmax.f32 %v3513_v10, %v10949_v34  ;;  %v10950_v6 = vld [vmem:[#allocation164_spill] sm:$0xff]  ;;  %v10951_v20 = vld [vmem:[#allocation213_spill] sm:$0xff] }
 0x4e3   : > { %v4615_v19 = vmax.f32 %v4607_v14, %v10947_v50  ;;  %v4059_v48 = vmax.f32 %v4051_v4, %v10948_v16  ;;  %v2953_v61 = vmax.f32 %v2943_v11, %v10950_v6  ;;  %v4606_v37 = vmax.f32 %v4598_v55, %v10951_v20  ;;  %v10952_v18 = vld [vmem:[#allocation229_spill] sm:$0xff]  ;;  %v10953_v2 = vld [vmem:[#allocation11_spill] sm:$0xff]  ;;  %v10954_v39 = vld [vmem:[#allocation186_spill] sm:$0xff] }
 0x4e4   : > { %v4050_v36 = vmax.f32 %v4042_v15, %v10952_v18  ;;  %v3512_v62 = vmax.f32 %v3504_v32, %v10953_v2  ;;  %v6183_v60 = vld [vmem:[#allocation2 + $0x28] sm:$0xff]  ;;  %v2974_v38 = vmax.f32 %v2964_v13, %v10954_v39  ;;  %v10955_v14 = vld [vmem:[#allocation220_spill] sm:$0xff]  ;;  %v10956_v4 = vld [vmem:[#allocation234_spill] sm:$0xff] }
 0x4e5   : > { %4182 = vrot.lane.b32.xlu0 %v6183_v60, %s6203_s20  ;;  %v4623_v50 = vmax.f32 %v4615_v19, %v10955_v14  ;;  %v4067_v16 = vmax.f32 %v4059_v48, %v10956_v4  ;;  %v10957_v10 = vld [vmem:[#allocation244_spill] sm:$0xff]  ;;  %v6184_v7 = vld [vmem:[#allocation2 + $0x10] sm:$0xff]  ;;  %v10959_v55 = vld [vmem:[#allocation221_spill] sm:$0xff]  ;;  %v10003_v60 = vpop.permute.xlu0 %4126 }
 0x4e6   : > { %v3529_v34 = vmax.f32 %v3521_v35, %v10957_v10  ;;  %4172 = vrot.lane.b32.xlu1 %v6184_v7, %s6203_s20  ;;  %v10958_v11 = vld [vmem:[#allocation174_spill] sm:$0xff]  ;;  %v4614_v15 = vmax.f32 %v4606_v37, %v10959_v55  ;;  %v10960_v6 = vld [vmem:[#allocation235_spill] sm:$0xff]  ;;  %v10961_v18 = vld [vmem:[#allocation245_spill] sm:$0xff]  ;;  %v10009_v10 = vpop.permute.xlu1 %4116 }
 0x4e7   : > { %v2963_v20 = vmax.f32 %v2953_v61, %v10958_v11  ;;  %v4058_v32 = vmax.f32 %v4050_v36, %v10960_v6  ;;  %v3520_v2 = vmax.f32 %v3512_v62, %v10961_v18  ;;  %v10962_v13 = vld [vmem:[#allocation196_spill] sm:$0xff]  ;;  %v10963_v19 = vld [vmem:[#allocation226_spill] sm:$0xff]  ;;  %v10965_v7 = vld [vmem:[#allocation185_spill] sm:$0xff] }
 0x4e8   : > { %v2984_v39 = vmax.f32 %v2974_v38, %v10962_v13  ;;  %v4631_v14 = vmax.f32 %v4623_v50, %v10963_v19  ;;  %v10964_v48 = vld [vmem:[#allocation238_spill] sm:$0xff]  ;;  %v3537_v35 = vmax.f32 %v3529_v34, %v9490_v52  ;;  %v10966_v11 = vld [vmem:[#allocation227_spill] sm:$0xff]  ;;  %v10968_v38 = vld [vmem:[#allocation204_spill] sm:$0xff] }
 0x4e9   : > { %v4075_v4 = vmax.f32 %v4067_v16, %v10964_v48  ;;  %v2973_v61 = vmax.f32 %v2963_v20, %v10965_v7  ;;  %v4622_v37 = vmax.f32 %v4614_v15, %v10966_v11  ;;  %v10967_v55 = vld [vmem:[#allocation239_spill] sm:$0xff]  ;;  %v3528_v62 = vmax.f32 %v3520_v2, %v9495_v43  ;;  %3125 = vrot.lane.b32.xlu0 %v9574_v24, %s6201_s28  ;;  %v10969_v50 = vld [vmem:[#allocation232_spill] sm:$0xff]  ;;  %v10970_v16 = vld [vmem:[#allocation246_spill] sm:$0xff]  ;;  %v10027_v24 = vpop.permute.xlu0 %4698 }
 0x4ea   : > { %v4066_v36 = vmax.f32 %v4058_v32, %v10967_v55  ;;  %v2994_v6 = vmax.f32 %v2984_v39, %v10968_v38  ;;  %v4639_v18 = vmax.f32 %v4631_v14, %v10969_v50  ;;  %v3545_v52 = vmax.f32 %v3537_v35, %v9582_v49  ;;  %4744 = vrot.lane.b32.xlu1 %v10740_v56, %s6203_s20  ;;  %v10971_v34 = vld [vmem:[#allocation193_spill] sm:$0xff]  ;;  %v10973_v19 = vld [vmem:[#allocation247_spill] sm:$0xff]  ;;  %v10974_v2 = vld [vmem:[#allocation18_spill] sm:$0xff]  ;;  %v10033_v35 = vpop.permute.xlu1 %4688 }
 0x4eb   : > { %v4083_v13 = vmax.f32 %v4075_v4, %v10970_v16  ;;  %v2983_v20 = vmax.f32 %v2973_v61, %v10971_v34  ;;  %v10972_v15 = vld [vmem:[#allocation233_spill] sm:$0xff]  ;;  %v3536_v48 = vmax.f32 %v3528_v62, %v10974_v2  ;;  %v10975_v39 = vld [vmem:[#allocation212_spill] sm:$0xff] }
 0x4ec   : > { %v4630_v32 = vmax.f32 %v4622_v37, %v10972_v15  ;;  %v4074_v43 = vmax.f32 %v4066_v36, %v10973_v19  ;;  %v3004_v7 = vmax.f32 %v2994_v6, %v10975_v39  ;;  %v10976_v14 = vld [vmem:[#allocation240_spill] sm:$0xff]  ;;  %v10977_v4 = vld [vmem:[#allocation161_spill] sm:$0xff]  ;;  %v3553_v49 = vmax.f32 %v3545_v52, %v9684_v0  ;;  %v10981_v6 = vld [vmem:[#allocation218_spill] sm:$0xff] }
 0x4ed   : > { %v4647_v11 = vmax.f32 %v4639_v18, %v10976_v14  ;;  %v4091_v55 = vmax.f32 %v4083_v13, %v10977_v4  ;;  %v10978_v56 = vld [vmem:[#allocation201_spill] sm:$0xff]  ;;  %v3544_v62 = vmax.f32 %v3536_v48, %v9690_v33  ;;  %3626 = vrot.lane.b32.xlu0 %v9766_v42, %s6201_s28  ;;  %v10983_v52 = vld [vmem:[#allocation110_spill] sm:$0xff]  ;;  %v10051_v2 = vpop.permute.xlu0 %3079  ;;  %v10988_v4 = vld [vmem:[#allocation243_spill] sm:$0xff] }
 0x4ee   : > { %v2993_v61 = vmax.f32 %v2983_v20, %v10978_v56  ;;  %v10979_v38 = vld [vmem:[#allocation241_spill] sm:$0xff]  ;;  %v3014_v16 = vmax.f32 %v3004_v7, %v10981_v6  ;;  %v3561_v0 = vmax.f32 %v3553_v49, %v9786_v5  ;;  %3135 = vrot.lane.b32.xlu1 %v10983_v52, %s6201_s28  ;;  %v10986_v48 = vld [vmem:[#allocation242_spill] sm:$0xff]  ;;  %v10989_v49 = vld [vmem:[#allocation88_spill] sm:$0xff] }
 0x4ef   : > { %v4638_v37 = vmax.f32 %v4630_v32, %v10979_v38  ;;  %v10980_v50 = vld [vmem:[#allocation77_spill] sm:$0xff]  ;;  %v4099_v13 = vmax.f32 %v4091_v55, %v9608_v3  ;;  %v10985_v32 = vld [vmem:[#allocation250_spill] sm:$0xff]  ;;  %v10990_v38 = vld [vmem:[#allocation251_spill] sm:$0xff] }
 0x4f0   : > { %v4082_v36 = vmax.f32 %v4074_v43, %v10980_v50  ;;  %v10982_v18 = vld [vmem:[#allocation249_spill] sm:$0xff]  ;;  %v3552_v43 = vmax.f32 %v3544_v62, %v9791_v21  ;;  %v3024_v39 = vmax.f32 %v3014_v16, %v10986_v48  ;;  %v10987_v7 = vld [vmem:[#allocation6_spill] sm:$0xff]  ;;  %v3569_v5 = vmax.f32 %v3561_v0, %v9886_v17  ;;  %v10991_v62 = vld [vmem:[#allocation252_spill] sm:$0xff] }
 0x4f1   : > { %v4655_v34 = vmax.f32 %v4647_v11, %v10982_v18  ;;  %v10984_v20 = vld [vmem:[#allocation209_spill] sm:$0xff]  ;;  %v4646_v19 = vmax.f32 %v4638_v37, %v10985_v32  ;;  %v4107_v3 = vmax.f32 %v4099_v13, %v9709_v59  ;;  %v10057_v11 = vpop.permute.xlu1 %3069  ;;  %v3581_v18 = vpop.permute.xlu0 %3580  ;;  %v10993_v52 = vld [vmem:[#allocation99_spill] sm:$0xff] }
 0x4f2   : > { %v3003_v15 = vmax.f32 %v2993_v61, %v10984_v20  ;;  %v4090_v33 = vmax.f32 %v4082_v36, %v9614_v63  ;;  %v3560_v21 = vmax.f32 %v3552_v43, %v9892_v23  ;;  %v6185_v61 = vld [vmem:[#allocation2 + $0x20] sm:$0xff]  ;;  %v3034_v37 = vmax.f32 %v3024_v39, %v10990_v38  ;;  %v6186_v36 = vld [vmem:[#allocation2 + $0x108] sm:$0xff] }
 0x4f3   : > { %v4663_v14 = vmax.f32 %v4655_v34, %v10987_v7  ;;  %v4654_v56 = vmax.f32 %v4646_v19, %v10989_v49  ;;  %4180 = vrot.lane.b32.xlu0 %v6185_v61, %s6203_s20  ;;  %v4115_v59 = vmax.f32 %v4107_v3, %v9811_v31  ;;  %v3577_v17 = vmax.f32 %v3569_v5, %v9981_v12  ;;  %v10992_v34 = vld [vmem:[#allocation17_spill] sm:$0xff]  ;;  %v10997_v61 = vld [vmem:[#allocation248_spill] sm:$0xff] }
 0x4f4   : > { %v3013_v55 = vmax.f32 %v3003_v15, %v10988_v4  ;;  %v4098_v63 = vmax.f32 %v4090_v33, %v9715_v45  ;;  %3636 = vrot.lane.b32.xlu1 %v6186_v36, %s6201_s28  ;;  %v3568_v16 = vmax.f32 %v3560_v21, %v9987_v57  ;;  %v3044_v13 = vmax.f32 %v3034_v37, %v10992_v34  ;;  %v10995_v33 = vld [vmem:[#allocation23_spill] sm:$0xff]  ;;  %v10996_v5 = vld [vmem:[#allocation21_spill] sm:$0xff] }
 0x4f5   : > { %v4671_v50 = vmax.f32 %v4663_v14, %v9631_v25  ;;  %v4662_v45 = vmax.f32 %v4654_v56, %v9637_v29  ;;  %v4123_v31 = vmax.f32 %v4115_v59, %v9910_v54  ;;  %v10076_v0 = vmax.f32 %v3577_v17, %v3581_v18  ;;  %v3571_v12 = vpop.permute.xlu1 %3570  ;;  %v6187_v54 = vld [vmem:[#allocation2 + $0x38] sm:$0xff]  ;;  %v6188_v56 = vld [vmem:[#allocation2 + $0x30] sm:$0xff]  ;;  %v6190_v59 = vld [vmem:[#allocation2 + $0x128] sm:$0xff] }
 0x4f6   : > { %v3023_v6 = vmax.f32 %v3013_v55, %v10991_v62  ;;  %v4106_v23 = vmax.f32 %v4098_v63, %v9819_v53  ;;  %v3576_v32 = vmax.f32 %v3568_v16, %v3571_v12  ;;  %v10994_v53 = vld [vmem:[#allocation175_spill] sm:$0xff] }
 0x4f7   : > { %v4679_v25 = vmax.f32 %v4671_v50, %v9735_v1  ;;  %v4670_v15 = vmax.f32 %v4662_v45, %v9741_v28  ;;  %3133 = vrot.lane.b32.xlu0 %v9663_v40, %s6201_s28  ;;  %v3052_v57 = vmax.f32 %v3044_v13, %v10994_v53  ;;  %v4131_v1 = vmax.f32 %v4123_v31, %v10003_v60  ;;  %v11000_v45 = vld [vmem:[#allocation36_spill] sm:$0xff]  ;;  %v11002_v13 = vld [vmem:[#allocation35_spill] sm:$0xff] }
 0x4f8   : > { %v3033_v20 = vmax.f32 %v3023_v6, %v10993_v52  ;;  %v4114_v29 = vmax.f32 %v4106_v23, %v9916_v46  ;;  %4190 = vrot.lane.b32.xlu1 %v6187_v54, %s6203_s20  ;;  %v4135_v46 = vpop.permute.xlu0 %4134  ;;  %v11001_v23 = vld [vmem:[#allocation7_spill] sm:$0xff]  ;;  %v4756_v53 = vld [vmem:[%s10428_s3] sm:$0xff] }
 0x4f9   : > { %v4687_v19 = vmax.f32 %v4679_v25, %v9839_v58  ;;  %v4678_v48 = vmax.f32 %v4670_v15, %v9844_v26  ;;  %v3060_v39 = vmax.f32 %v3052_v57, %v9759_v41  ;;  %v10092_v7 = vmax.f32 %v4131_v1, %v4135_v46  ;;  %v4125_v14 = vpop.permute.xlu1 %4124  ;;  %v11003_v25 = vld [vmem:[#allocation26_spill] sm:$0xff]  ;;  %v4773_v15 = vld [vmem:[%s10429_s4 + $0x8] sm:$0xff]  ;;  %5976 = vmatprep.mubr.msk.f32.mxu1 %vm4820_vm2, %v4756_v53  ;;  %v4775_v1 = vld [vmem:[%s10429_s4 + $0x18] sm:$0xff] }
 0x4fa   : > { %v3043_v43 = vmax.f32 %v3033_v20, %v10995_v33  ;;  %v4122_v28 = vmax.f32 %v4114_v29, %v10009_v10  ;;  %v11004_v20 = vld [vmem:[#allocation28_spill] sm:$0xff]  ;;  %v4774_v33 = vld [vmem:[%s10429_s4 + $0x10] sm:$0xff]  ;;  %v4777_v46 = vld [vmem:[%s10429_s4 + $0x28] sm:$0xff] }
 0x4fb   : > { %v4695_v40 = vmax.f32 %v4687_v19, %v9934_v8  ;;  %v4686_v60 = vmax.f32 %v4678_v48, %v9940_v9  ;;  %3634 = vrot.lane.b32.xlu0 %v9793_v51, %s6201_s28  ;;  %v3068_v26 = vmax.f32 %v3060_v39, %v9860_v22 }
 0x4fc   : > { %v3051_v58 = vmax.f32 %v3043_v43, %v9764_v47  ;;  %v4130_v3 = vmax.f32 %v4122_v28, %v4125_v14  ;;  %3143 = vrot.lane.b32.xlu1 %v10996_v5, %s6201_s28  ;;  %v4707_v4 = vpop.permute.xlu0 %4706 }
 0x4fd   : > { %v4703_v10 = vmax.f32 %v4695_v40, %v10027_v24  ;;  %v4694_v8 = vmax.f32 %v4686_v60, %v10033_v35  ;;  %v3076_v47 = vmax.f32 %v3068_v26, %v9957_v44  ;;  %v4697_v9 = vpop.permute.xlu1 %4696  ;;  %v6189_v24 = vld [vmem:[#allocation2 + $0x118] sm:$0xff]  ;;  %v4776_v40 = vld [vmem:[%s10429_s4 + $0x20] sm:$0xff] }
 0x4fe   : > { %v3059_v41 = vmax.f32 %v3051_v58, %v9866_v30 }
 0x4ff   : > { %v10105_v55 = vmax.f32 %v4703_v10, %v4707_v4  ;;  %v4702_v51 = vmax.f32 %v4694_v8, %v4697_v9  ;;  %4188 = vrot.lane.b32.xlu0 %v6188_v56, %s6203_s20  ;;  %v3084_v22 = vmax.f32 %v3076_v47, %v10051_v2 }
 0x500   : > { %v3067_v49 = vmax.f32 %v3059_v41, %v9963_v27  ;;  %3644 = vrot.lane.b32.xlu1 %v6189_v24, %s6201_s28  ;;  %v3088_v35 = vpop.permute.xlu0 %3087  ;;  %v10998_v27 = vld [vmem:[#allocation24_spill] sm:$0xff] }
 0x501   : > { %v3092_v63 = vmax.f32 %v3084_v22, %v3088_v35  ;;  %v3078_v21 = vpop.permute.xlu1 %3077 }
 0x502   : > { %v3075_v30 = vmax.f32 %v3067_v49, %v10057_v11  ;;  %v10999_v11 = vld [vmem:[#allocation13_spill] sm:$0xff] }
 0x503   : > { %3151 = vrot.lane.b32.xlu0 %v10997_v61, %s6201_s28 }
 0x504   : > { %v3083_v44 = vmax.f32 %v3075_v30, %v3078_v21  ;;  %3141 = vrot.lane.b32.xlu1 %v10998_v27, %s6201_s28  ;;  %v3589_v38 = vpop.permute.xlu0 %3588 }
 0x505   : > { %v3593_v37 = vmax.f32 %v10076_v0, %v3589_v38  ;;  %v3579_v50 = vpop.permute.xlu1 %3578 }
 0x506   : > { %v3584_v2 = vmax.f32 %v3576_v32, %v3579_v50  ;;  %v4772_v32 = vld [vmem:[%s10429_s4] sm:$0xff] }
 0x507   : > { %3652 = vrot.lane.b32.xlu0 %v6190_v59, %s6201_s28 }
 0x508   : > { %3642 = vrot.lane.b32.xlu1 %v10999_v11, %s6201_s28  ;;  %v4143_v17 = vpop.permute.xlu0 %4142 }
 0x509   : > { %v4147_v36 = vmax.f32 %v10092_v7, %v4143_v17  ;;  %v4133_v62 = vpop.permute.xlu1 %4132 }
 0x50a   : > { %v10121_v6 = vmax.f32 %v4130_v3, %v4133_v62 }
 0x50b   : > { %3159 = vrot.lane.b32.xlu0 %v11000_v45, %s6201_s28 }
 0x50c   : > { %3149 = vrot.lane.b32.xlu1 %v11001_v23, %s6201_s28  ;;  %v10127_v16 = vpop.permute.xlu0 %4714 }
 0x50d   : > { %v4705_v18 = vpop.permute.xlu1 %4704  ;;  %v4719_v50 = vmax.f32 %v10105_v55, %v10127_v16 }
 0x50e   : > { %v10129_v34 = vmax.f32 %v4702_v51, %v4705_v18 }
 0x50f   : > { %3157 = vrot.lane.b32.xlu0 %v11002_v13, %s6201_s28 }
 0x510   : > { %3650 = vrot.lane.b32.xlu1 %v11003_v25, %s6201_s28  ;;  %v3096_v31 = vpop.permute.xlu0 %3095 }
 0x511   : > { %v3100_v0 = vmax.f32 %v3092_v63, %v3096_v31  ;;  %v3086_v12 = vpop.permute.xlu1 %3085 }
 0x512   : > { %v3091_v52 = vmax.f32 %v3083_v44, %v3086_v12 }
 0x513   : > { %3165 = vrot.lane.b32.xlu0 %v9766_v42, %s6201_s28 }
 0x514   : > { %3167 = vrot.lane.b32.xlu1 %v11004_v20, %s6201_s28  ;;  %v3597_v29 = vpop.permute.xlu0 %3596 }
 0x515   : > { %v10148_v57 = vmax.f32 %v3593_v37, %v3597_v29  ;;  %v3587_v42 = vpop.permute.xlu1 %3586 }
 0x516   : > { %v3592_v19 = vmax.f32 %v3584_v2, %v3587_v42 }
 0x517   : > { %4787 = vperm.xlu0 %6146, %v4773_v15  }
 0x518   : > { %4782 = vperm.xlu1 %6147, %v4772_v32   ;;  %v4151_v54 = vpop.permute.xlu0 %4150 }
 0x519   : > { %v10157_v43 = vmax.f32 %v4147_v36, %v4151_v54  ;;  %v10159_v48 = vpop.permute.xlu1 %4140 }
 0x51a   : > { %v4146_v28 = vmax.f32 %v10121_v6, %v10159_v48 }
 0x51b   : > { %4797 = vperm.xlu0 %6146, %v4775_v1  }
 0x51c   : > { %4792 = vperm.xlu1 %6147, %v4774_v33   ;;  %v4723_v39 = vpop.permute.xlu0 %4722 }
 0x51d   : > { %v4713_v7 = vpop.permute.xlu1 %4712  ;;  %v4727_v59 = vmax.f32 %v4719_v50, %v4723_v39 }
 0x51e   : > { %v4718_v16 = vmax.f32 %v10129_v34, %v4713_v7 }
 0x51f   : > { %4807 = vperm.xlu0 %6146, %v4777_v46  }
 0x520   : > { %4802 = vperm.xlu1 %6147, %v4776_v40   ;;  %v3104_v14 = vpop.permute.xlu0 %3103 }
 0x521   : > { %v3108_v58 = vmax.f32 %v3100_v0, %v3104_v14  ;;  %v3094_v60 = vpop.permute.xlu1 %3093 }
 0x522   : > { %v10169_v3 = vmax.f32 %v3091_v52, %v3094_v60 }
 0x524   : > { %v10171_v26 = vpop.permute.xlu0 %3604 }
 0x525   : > { %v3609_v10 = vmax.f32 %v10148_v57, %v10171_v26  ;;  %v3595_v5 = vpop.permute.xlu1 %3594 }
 0x526   : > { %v10175_v41 = vmax.f32 %v3592_v19, %v3595_v5 }
 0x528   : > { %v4159_v8 = vpop.permute.xlu0 %4158 }
 0x529   : > { %v4149_v4 = vpop.permute.xlu1 %4148  ;;  %v4163_v46 = vmax.f32 %v10157_v43, %v4159_v8 }
 0x52a   : > { %v4154_v14 = vmax.f32 %v4146_v28, %v4149_v4 }
 0x52c   : > { %v4731_v47 = vpop.permute.xlu0 %4730 }
 0x52d   : > { %v4721_v9 = vpop.permute.xlu1 %4720  ;;  %v4735_v17 = vmax.f32 %v4727_v59, %v4731_v47 }
 0x52e   : > { %v4726_v12 = vmax.f32 %v4718_v16, %v4721_v9 }
 0x530   : > { %v3112_v49 = vpop.permute.xlu0 %3111 }
 0x531   : > { %v10177_v51 = vmax.f32 %v3108_v58, %v3112_v49  ;;  %v10179_v56 = vpop.permute.xlu1 %3101 }
 0x532   : > { %v3107_v22 = vmax.f32 %v10169_v3, %v10179_v56 }
 0x534   : > { %v10183_v24 = vpop.permute.xlu0 %3612 }
 0x535   : > { %v10185_v30 = vpop.permute.xlu1 %3602  ;;  %v3617_v6 = vmax.f32 %v3609_v10, %v10183_v24 }
 0x536   : > { %v3608_v35 = vmax.f32 %v10175_v41, %v10185_v30 }
 0x538   : > { %v4167_v63 = vpop.permute.xlu0 %4166 }
 0x539   : > { %v4157_v21 = vpop.permute.xlu1 %4156  ;;  %v4171_v39 = vmax.f32 %v4163_v46, %v4167_v63 }
 0x53a   : > { %v4162_v5 = vmax.f32 %v4154_v14, %v4157_v21  ;;  %v4757_v14 = vld [vmem:[%s10428_s3 + $0x8] sm:$0xff] }
 0x53c   : > { %v4739_v44 = vpop.permute.xlu0 %4738 }
 0x53d   : > { %v4729_v61 = vpop.permute.xlu1 %4728  ;;  %v4743_v62 = vmax.f32 %v4735_v17, %v4739_v44 }
 0x53e   : > { %v4734_v29 = vmax.f32 %v4726_v12, %v4729_v61 }
 0x540   : > { %v10189_v27 = vpop.permute.xlu0 %3119 }
 0x541   : > { %v10191_v38 = vpop.permute.xlu1 %3109 }
 0x542   : > { %v3115_v57 = vmax.f32 %v3107_v22, %v10191_v38 }
 0x544   : > { %v3621_v37 = vpop.permute.xlu0 %3620 }
 0x545   : > { %v10195_v2 = vpop.permute.xlu1 %3610  ;;  %v3625_v4 = vmax.f32 %v3617_v6, %v3621_v37  ;;  %v4988_v6 = vld [vmem:[%s10433_s8 + $0x28] sm:$0xff] }
 0x546   : > { %v3616_v10 = vmax.f32 %v3608_v35, %v10195_v2 }
 0x548   : > { %v4175_v11 = vpop.permute.xlu0 %4174 }
 0x549   : > { %v4165_v36 = vpop.permute.xlu1 %4164  ;;  %v4179_v7 = vmax.f32 %v4171_v39, %v4175_v11 }
 0x54a   : > { %v4170_v44 = vmax.f32 %v4162_v5, %v4165_v36  ;;  %v4760_v5 = vld [vmem:[%s10428_s3 + $0x20] sm:$0xff] }
 0x54c   : > { %v4747_v45 = vpop.permute.xlu0 %4746 }
 0x54d   : > { %v4751_v23 = vmax.f32 %v4743_v62, %v4747_v45  ;;  %v4737_v18 = vpop.permute.xlu1 %4736 }
 0x54e   : > { %v4742_v32 = vmax.f32 %v4734_v29, %v4737_v18 }
 0x54f   : > { %v4753_v13 = vmax.f32 %v4751_v23, 0.0 }
 0x550   : > { %v10197_v25 = vpop.permute.xlu0 %3127 }
 0x551   : > { %4755 = vst.msk [vmem:[#allocation3 + $0x38] sm:$0xff] %vm3175_vm3, %v4753_v13  ;;  %v10200_v31 = vpop.permute.xlu1 %3117  ;;  %v3124_v13 = vmax.f32 %v10177_v51, %v10189_v27 }
 0x552   : > { %v3123_v37 = vmax.f32 %v3115_v57, %v10200_v31 }
 0x553   : > { %v3132_v56 = vmax.f32 %v3124_v13, %v10197_v25 }
 0x554   : > { %v3629_v0 = vpop.permute.xlu0 %3628 }
 0x555   : > { %v10202_v55 = vpop.permute.xlu1 %3618  ;;  %v3633_v59 = vmax.f32 %v3625_v4, %v3629_v0  ;;  %v4985_v4 = vld [vmem:[%s10433_s8 + $0x10] sm:$0xff] }
 0x556   : > { %v3624_v0 = vmax.f32 %v3616_v10, %v10202_v55  ;;  %v4779_v10 = vld [vmem:[%s10429_s4 + $0x38] sm:$0xff] }
 0x558   : > { %v4183_v52 = vpop.permute.xlu0 %4182  ;;  %v4771_v20 = vld [vmem:[#allocation3 + $0x38] sm:$0xff] }
 0x559   : > { %v4173_v15 = vpop.permute.xlu1 %4172  ;;  %5960 = vmatprep.subr.mxu1 %v4771_v20  ;;  %v4187_v58 = vmax.f32 %v4179_v7, %v4183_v52 }
 0x55a   : > { %5961 = vmatpush3.msra.mxu1 %v4771_v20  ;;  %v4178_v61 = vmax.f32 %v4170_v44, %v4173_v15  ;;  %v4993_v44 = vld [vmem:[%s10433_s8 + $0x50] sm:$0x1] }
 0x55c   : > { %v3126_v53 = vpop.permute.xlu0 %3125 }
 0x55d   : > { %v4745_v42 = vpop.permute.xlu1 %4744  ;;  %v3131_v16 = vmax.f32 %v3123_v37, %v3126_v53 }
 0x55e   : > { %v4750_v19 = vmax.f32 %v4742_v32, %v4745_v42 }
 0x560   : > { %v4752_v1 = vmax.f32 %v4750_v19, 0.0  ;;  %v3627_v54 = vpop.permute.xlu0 %3626 }
 0x561   : > { %v3136_v33 = vpop.permute.xlu1 %3135  ;;  %v3632_v22 = vmax.f32 %v3624_v0, %v3627_v54 }
 0x562   : > { %4754 = vst.msk [vmem:[#allocation3 + $0x30] sm:$0xff] %vm3175_vm3, %v4752_v1  ;;  %v3140_v30 = vmax.f32 %v3132_v56, %v3136_v33  ;;  %v5400_v56 = vld [vmem:[%s10432_s7 + $0x18] sm:$0xff] }
 0x565   : > { %v4181_v34 = vpop.permute.xlu0 %4180 }
 0x566   : > { %v3637_v40 = vpop.permute.xlu1 %3636  ;;  %v4186_v48 = vmax.f32 %v4178_v61, %v4181_v34  ;;  %v4990_v61 = vld [vmem:[%s10433_s8 + $0x38] sm:$0xff] }
 0x567   : > { %v3641_v36 = vmax.f32 %v3633_v59, %v3637_v40  ;;  %v5105_v59 = vld [vmem:[%s10434_s9 + $0x50] sm:$0x1] }
 0x569   : > { %v3134_v60 = vpop.permute.xlu0 %3133  ;;  %v4770_v9 = vld [vmem:[#allocation3 + $0x30] sm:$0xff] }
 0x56a   : > { %v4191_v47 = vpop.permute.xlu1 %4190  ;;  %5962 = vmatprep.subr.mxu1 %v4770_v9  ;;  %v3139_v52 = vmax.f32 %v3131_v16, %v3134_v60  ;;  %v4759_v60 = vld [vmem:[%s10428_s3 + $0x18] sm:$0xff]  ;;  %v5398_v16 = vld [vmem:[%s10432_s7 + $0x8] sm:$0xff] }
 0x56b   : > { %v4195_v49 = vmax.f32 %v4187_v58, %v4191_v47  ;;  %5963 = vmatpush3.msra.mxu1 %v4770_v9  ;;  %v4758_v58 = vld [vmem:[%s10428_s3 + $0x10] sm:$0xff]  ;;  %v4761_v47 = vld [vmem:[%s10428_s3 + $0x28] sm:$0xff] }
 0x56c   : > { %v4762_v9 = vld [vmem:[%s10428_s3 + $0x30] sm:$0xff] }
 0x56d   : > { %v4197_v43 = vmax.f32 %v4195_v49, 0.0  ;;  %v3635_v8 = vpop.permute.xlu0 %3634  ;;  %v4763_v49 = vld [vmem:[%s10428_s3 + $0x38] sm:$0xff] }
 0x56e   : > { %v3144_v63 = vpop.permute.xlu1 %3143  ;;  %v3640_v35 = vmax.f32 %v3632_v22, %v3635_v8  ;;  %v4991_v8 = vld [vmem:[%s10433_s8 + $0x40] sm:$0xff]  ;;  %v5399_v22 = vld [vmem:[%s10432_s7 + $0x10] sm:$0xff] }
 0x56f   : > { %4199 = vst.msk [vmem:[#allocation3 + $0x28] sm:$0xff] %vm3175_vm3, %v4197_v43  ;;  %v3148_v31 = vmax.f32 %v3140_v30, %v3144_v63  ;;  %v4992_v43 = vld [vmem:[%s10433_s8 + $0x48] sm:$0xff]  ;;  %v4989_v63 = vld [vmem:[%s10433_s8 + $0x30] sm:$0xff] }
 0x571   : > { %v4189_v28 = vpop.permute.xlu0 %4188 }
 0x572   : > { %v4194_v21 = vmax.f32 %v4186_v48, %v4189_v28  ;;  %v3645_v50 = vpop.permute.xlu1 %3644  ;;  %v4987_v48 = vld [vmem:[%s10433_s8 + $0x20] sm:$0xff]  ;;  %v4986_v28 = vld [vmem:[%s10433_s8 + $0x18] sm:$0xff] }
 0x573   : > { %v3649_v26 = vmax.f32 %v3641_v36, %v3645_v50  ;;  %v4983_v50 = vld [vmem:[%s10433_s8] sm:$0xff] }
 0x574   : > { %v4196_v11 = vmax.f32 %v4194_v21, 0.0  ;;  %v4984_v21 = vld [vmem:[%s10433_s8 + $0x8] sm:$0xff] }
 0x575   : > { %v3152_v17 = vpop.permute.xlu0 %3151 }
 0x576   : > { %4198 = vst.msk [vmem:[#allocation3 + $0x20] sm:$0xff] %vm3175_vm3, %v4196_v11  ;;  %v3142_v62 = vpop.permute.xlu1 %3141  ;;  %v4769_v45 = vld [vmem:[#allocation3 + $0x28] sm:$0xff]  ;;  %v3156_v15 = vmax.f32 %v3148_v31, %v3152_v17 }
 0x577   : > { %5964 = vmatprep.subr.mxu1 %v4769_v45  ;;  %v3147_v2 = vmax.f32 %v3139_v52, %v3142_v62 }
 0x578   : > { %5965 = vmatpush3.msra.mxu1 %v4769_v45 }
 0x579   : > { %v3653_v24 = vpop.permute.xlu0 %3652 }
 0x57a   : > { %v3657_v23 = vmax.f32 %v3649_v26, %v3653_v24  ;;  %v3643_v18 = vpop.permute.xlu1 %3642  ;;  %v4778_v24 = vld [vmem:[%s10429_s4 + $0x30] sm:$0xff] }
 0x57b   : > { %v3648_v51 = vmax.f32 %v3640_v35, %v3643_v18 }
 0x57c   : > { %v3659_v3 = vmax.f32 %v3657_v23, 0.0 }
 0x57d   : > { %v3160_v38 = vpop.permute.xlu0 %3159  ;;  %v4768_v12 = vld [vmem:[#allocation3 + $0x20] sm:$0xff] }
 0x57e   : > { %3661 = vst.msk [vmem:[#allocation3 + $0x18] sm:$0xff] %vm3175_vm3, %v3659_v3  ;;  %v3150_v41 = vpop.permute.xlu1 %3149  ;;  %5966 = vmatprep.subr.mxu1 %v4768_v12  ;;  %v3164_v32 = vmax.f32 %v3156_v15, %v3160_v38  ;;  %v5397_v3 = vld [vmem:[%s10432_s7] sm:$0xff] }
 0x57f   : > { %5967 = vmatpush3.msra.mxu1 %v4768_v12  ;;  %v3155_v55 = vmax.f32 %v3147_v2, %v3150_v41 }
 0x581   : > { %v3158_v27 = vpop.permute.xlu0 %3157 }
 0x582   : > { %v3651_v20 = vpop.permute.xlu1 %3650  ;;  %v3163_v25 = vmax.f32 %v3155_v55, %v3158_v27 }
 0x583   : > { %v3656_v29 = vmax.f32 %v3648_v51, %v3651_v20 }
 0x585   : > { %v3658_v53 = vmax.f32 %v3656_v29, 0.0  ;;  %v3166_v42 = vpop.permute.xlu0 %3165  ;;  %v4767_v19 = vld [vmem:[#allocation3 + $0x18] sm:$0xff] }
 0x586   : > { %v3171_v1 = vmax.f32 %v3163_v25, %v3166_v42  ;;  %v3168_v54 = vpop.permute.xlu1 %3167  ;;  %5968 = vmatprep.subr.mxu1 %v4767_v19  ;;  %v5104_v25 = vld [vmem:[%s10434_s9 + $0x48] sm:$0xff]  ;;  %v5102_v42 = vld [vmem:[%s10434_s9 + $0x38] sm:$0xff] }
 0x587   : > { %3660 = vst.msk [vmem:[#allocation3 + $0x10] sm:$0xff] %vm3175_vm3, %v3658_v53  ;;  %v3172_v33 = vmax.f32 %v3164_v32, %v3168_v54  ;;  %5969 = vmatpush3.msra.mxu1 %v4767_v19  ;;  %v5103_v32 = vld [vmem:[%s10434_s9 + $0x40] sm:$0xff] }
 0x588   : > { %v3173_v46 = vmax.f32 %v3171_v1, 0.0  ;;  %v5101_v1 = vld [vmem:[%s10434_s9 + $0x30] sm:$0xff] }
 0x589   : > { %v3174_v39 = vmax.f32 %v3172_v33, 0.0 }
 0x58a   : > { %3176 = vst.msk [vmem:[#allocation3] sm:$0xff] %vm3175_vm3, %v3173_v46 }
 0x58b   : > { %3177 = vst.msk [vmem:[#allocation3 + $0x8] sm:$0xff] %vm3175_vm3, %v3174_v39  ;;  %v5100_v39 = vld [vmem:[%s10434_s9 + $0x28] sm:$0xff] }
 0x58e   : > { %v4766_v34 = vld [vmem:[#allocation3 + $0x10] sm:$0xff] }
 0x58f   : > { %5970 = vmatprep.subr.mxu1 %v4766_v34 }
 0x590   : > { %5971 = vmatpush3.msra.mxu1 %v4766_v34 }
 0x591   : > { %v4764_v7 = vld [vmem:[#allocation3] sm:$0xff] }
 0x592   : > { %v4765_v40 = vld [vmem:[#allocation3 + $0x8] sm:$0xff]  ;;  %v4788_v11 = vpop.permute.xlu0 %4787 }
 0x593   : > { %5972 = vmatprep.subr.mxu1 %v4765_v40  ;;  %v4783_v62 = vpop.permute.xlu1 %4782 }
 0x594   : > { %5973 = vmatpush3.msra.mxu1 %v4765_v40 }
 0x595   : > { %5974 = vmatprep.subr.mxu1 %v4764_v7 }
 0x596   : > { %5975 = vmatpush3.msra.mxu1 %v4764_v7  ;;  %v4798_v37 = vpop.permute.xlu0 %4797 }
 0x597   : > { %5977 = vmatmul.mubr.msk.f32.vlgmr.msra.gmra.mxu1 %vm4820_vm2, %v4757_v14  ;;  %5988 = vmatprep.subr.msk.mxu1 %vm5006_vm4, %v4993_v44  ;;  %v4793_v13 = vpop.permute.xlu1 %4792  ;;  %v5099_v14 = vld [vmem:[%s10434_s9 + $0x20] sm:$0xff] }
 0x598   : > { %5979 = vmatprep.mubr.msk.f32.mxu1 %vm4820_vm2, %v4758_v58  ;;  %5989 = vmatpush3.msk.msra.mxu1 %vm5006_vm4, %v4993_v44  ;;  %v5097_v44 = vld [vmem:[%s10434_s9 + $0x10] sm:$0xff] }
 0x599   : > { %5990 = vmatprep.subr.mxu1 %v4992_v43 }
 0x59a   : > { %5991 = vmatpush3.msra.mxu1 %v4992_v43  ;;  %v4808_v12 = vpop.permute.xlu0 %4807 }
 0x59b   : > { %5980 = vmatmul.mubr.msk.f32.gmra.mxu1 %vm4820_vm2, %v4759_v60  ;;  %5992 = vmatprep.subr.mxu1 %v4991_v8  ;;  %v4803_v30 = vpop.permute.xlu1 %4802 }
 0x59c   : > { %5982 = vmatprep.mubr.msk.f32.mxu1 %vm4820_vm2, %v4760_v5  ;;  %5993 = vmatpush3.msra.mxu1 %v4991_v8  ;;  %v5096_v8 = vld [vmem:[%s10434_s9 + $0x8] sm:$0xff] }
 0x59d   : > { %5994 = vmatprep.subr.mxu1 %v4990_v61 }
 0x59e   : > { %5995 = vmatpush3.msra.mxu1 %v4990_v61  ;;  %v5095_v61 = vld [vmem:[%s10434_s9] sm:$0xff] }
 0x59f   : > { %5983 = vmatmul.mubr.msk.f32.gmra.mxu1 %vm4820_vm2, %v4761_v47  ;;  %5996 = vmatprep.subr.mxu1 %v4989_v63  ;;  %v5098_v47 = vld [vmem:[%s10434_s9 + $0x18] sm:$0xff] }
 0x5a0   : > { %5985 = vmatprep.mubr.msk.f32.mxu1 %vm4820_vm2, %v4762_v9  ;;  %5997 = vmatpush3.msra.mxu1 %v4989_v63  ;;  %v5198_v63 = vld [vmem:[%s10431_s6] sm:$0xff] }
 0x5a1   : > { %5998 = vmatprep.subr.mxu1 %v4988_v6 }
 0x5a2   : > { %5999 = vmatpush3.msra.mxu1 %v4988_v6 }
 0x5a3   : > { %5986 = vmatmul.mubr.msk.f32.gmra.mxu1 %vm4820_vm2, %v4763_v49  ;;  %6000 = vmatprep.subr.mxu1 %v4987_v48 }
 0x5a4   : > { %6001 = vmatpush3.msra.mxu1 %v4987_v48 }
 0x5a5   : > { %6002 = vmatprep.subr.mxu1 %v4986_v28 }
 0x5a6   : > { %6003 = vmatpush3.msra.mxu1 %v4986_v28 }
 0x5a7   : > { %6004 = vmatprep.subr.mxu1 %v4985_v4 }
 0x5a8   : > { %6005 = vmatpush3.msra.mxu1 %v4985_v4 }
 0x5a9   : > { %6006 = vmatprep.subr.mxu1 %v4984_v21 }
 0x5aa   : > { %6007 = vmatpush3.msra.mxu1 %v4984_v21 }
 0x5ab   : > { %6008 = vmatprep.subr.mxu1 %v4983_v50 }
 0x5ac   : > { %6009 = vmatpush3.msra.mxu1 %v4983_v50 }
 0x5ad   : > { %6016 = vmatprep.subr.msk.mxu1 %vm5006_vm4, %v5105_v59 }
 0x657   : > { %v5978_v17 = vpop.f32.mrf.mxu1 }
 0x658   : > { %v4917_v36 = vadd.f32 %v5978_v17, %v4788_v11  ;;  %v5199_v17 = vld [vmem:[%s10431_s6 + $0x8] sm:$0xff] }
 0x659   : > { %v4911_v45 = vpop.f32.mrf.mxu1 }
 0x65a   : > { %v4912_v57 = vadd.f32 %v4911_v45, %v4783_v62  ;;  %4960 = vrot.lane.b32.xlu0 %v4917_v36, %s6200_s23  ;;  %v5201_v62 = vld [vmem:[%s10431_s6 + $0x18] sm:$0xff]  ;;  %v5194_v45 = vld [vmem:[%s10430_s5] sm:$0xff] }
 0x65b   : > { %v5981_v26 = vpop.f32.mrf.mxu1 }
 0x65c   : > { %4958 = vrot.lane.b32.xlu1 %v4912_v57, %s6200_s23  ;;  %v4927_v18 = vadd.f32 %v5981_v26, %v4798_v37  ;;  %v5196_v26 = vld [vmem:[%s10430_s5 + $0x10] sm:$0xff] }
 0x65d   : > { %v4921_v23 = vpop.f32.mrf.mxu1 }
 0x65e   : > { %4817 = vperm.xlu0 %6146, %v4779_v10   ;;  %v10308_v0 = vadd.f32 %v4921_v23, %v4793_v13  ;;  %v5197_v10 = vld [vmem:[%s10430_s5 + $0x18] sm:$0xff] }
 0x65f   : > { %v5984_v38 = vpop.f32.mrf.mxu1 }
 0x660   : > { %4812 = vperm.xlu1 %6147, %v4778_v24   ;;  %v4937_v41 = vadd.f32 %v5984_v38, %v4808_v12 }
 0x661   : > { %v4931_v52 = vpop.f32.mrf.mxu1 }
 0x662   : > { %4964 = vrot.lane.b32.xlu0 %v4927_v18, %s6200_s23  ;;  %v4932_v35 = vadd.f32 %v4931_v52, %v4803_v30  ;;  %v4951_v2 = vmax.f32 %v4917_v36, %v4937_v41  ;;  %v5200_v36 = vld [vmem:[%s10431_s6 + $0x10] sm:$0xff] }
 0x663   : > { %v5987_v53 = vpop.f32.mrf.mxu1 }
 0x664   : > { %4962 = vrot.lane.b32.xlu1 %v10308_v0, %s6200_s23  ;;  %s5896_s23 = sshll.u32 %s11006_s18, 5  ;;  %v4950_v27 = vmax.f32 %v4912_v57, %v4932_v35  ;;  %v5195_v57 = vld [vmem:[%s10430_s5 + $0x8] sm:$0xff] }
 0x665   : > { %s10331_s24 = scalar_lea.vmem %s10435_s10, %s5896_s23  ;;  %v4941_v33 = vpop.f32.mrf.mxu1  ;;  %s399_s12 = scalar_lea.vmem %s10436_s11, %s5896_s23 }
 0x666   : > { %5408 = vperm.xlu0 %6146, %v5398_v16  }
 0x668   : > { %5403 = vperm.xlu1 %6147, %v5397_v3  }
 0x66a   : > { %5418 = vperm.xlu0 %6146, %v5400_v56  }
 0x66c   : > { %5413 = vperm.xlu1 %6147, %v5399_v22  }
 0x6cc   : > { %v4961_v31 = vpop.permute.xlu0 %4960 }
 0x6cd   : > { %v4971_v51 = vmax.f32 %v4951_v2, %v4961_v31 }
 0x6ce   : > { %v4959_v55 = vpop.permute.xlu1 %4958 }
 0x6cf   : > { %v4975_v20 = vmax.f32 %v4971_v51, 0.0  ;;  %v4970_v15 = vmax.f32 %v4950_v27, %v4959_v55 }
 0x6d1   : > { %4980 = vst.msk [vmem:[%s10331_s24 + $0x8] sm:$0xff] %vm4978_vm5, %v4975_v20  ;;  %v4974_v29 = vmax.f32 %v4970_v15, 0.0 }
 0x6d3   : > { %4979 = vst.msk [vmem:[%s10331_s24] sm:$0xff] %vm4978_vm5, %v4974_v29  ;;  %6010 = vmatprep.mubr.msk.f32.mxu1 %vm4978_vm5, %v4974_v29 }
 0x6d4   : > { %6011 = vmatmul.mubr.msk.f32.vlgmr.msra.gmra.mxu1 %vm4978_vm5, %v4975_v20 }
 0x6d5   : > { %6017 = vmatpush3.msk.msra.mxu1 %vm5006_vm4, %v5105_v59 }
 0x6d6   : > { %6018 = vmatprep.subr.mxu1 %v5104_v25 }
 0x6d7   : > { %6019 = vmatpush3.msra.mxu1 %v5104_v25 }
 0x6d8   : > { %6020 = vmatprep.subr.mxu1 %v5103_v32 }
 0x6d9   : > { %6021 = vmatpush3.msra.mxu1 %v5103_v32  ;;  %v4818_v19 = vpop.permute.xlu0 %4817 }
 0x6da   : > { %v4947_v54 = vadd.f32 %v5987_v53, %v4818_v19  ;;  %6022 = vmatprep.subr.mxu1 %v5102_v42 }
 0x6db   : > { %6023 = vmatpush3.msra.mxu1 %v5102_v42  ;;  %v4813_v46 = vpop.permute.xlu1 %4812 }
 0x6dc   : > { %6024 = vmatprep.subr.mxu1 %v5101_v1  ;;  %v4942_v34 = vadd.f32 %v4941_v33, %v4813_v46  ;;  %v4953_v40 = vmax.f32 %v4927_v18, %v4947_v54 }
 0x6dd   : > { %6025 = vmatpush3.msra.mxu1 %v5101_v1  ;;  %v4965_v7 = vpop.permute.xlu0 %4964 }
 0x6de   : > { %v4973_v58 = vmax.f32 %v4953_v40, %v4965_v7  ;;  %6026 = vmatprep.subr.mxu1 %v5100_v39  ;;  %v4952_v60 = vmax.f32 %v10308_v0, %v4942_v34 }
 0x6df   : > { %6027 = vmatpush3.msra.mxu1 %v5100_v39  ;;  %v4963_v5 = vpop.permute.xlu1 %4962 }
 0x6e0   : > { %v4977_v9 = vmax.f32 %v4973_v58, 0.0  ;;  %6028 = vmatprep.subr.mxu1 %v5099_v14  ;;  %v4972_v49 = vmax.f32 %v4952_v60, %v4963_v5 }
 0x6e1   : > { %6029 = vmatpush3.msra.mxu1 %v5099_v14  ;;  %v5409_v13 = vpop.permute.xlu0 %5408 }
 0x6e2   : > { %4982 = vst.msk [vmem:[%s10331_s24 + $0x18] sm:$0xff] %vm4978_vm5, %v4977_v9  ;;  %v4976_v43 = vmax.f32 %v4972_v49, 0.0  ;;  %6030 = vmatprep.subr.mxu1 %v5098_v47 }
 0x6e3   : > { %6031 = vmatpush3.msra.mxu1 %v5098_v47  ;;  %v5404_v3 = vpop.permute.xlu1 %5403 }
 0x6e4   : > { %4981 = vst.msk [vmem:[%s10331_s24 + $0x10] sm:$0xff] %vm4978_vm5, %v4976_v43  ;;  %6032 = vmatprep.subr.mxu1 %v5097_v44  ;;  %6013 = vmatprep.mubr.msk.f32.mxu1 %vm4978_vm5, %v4976_v43 }
 0x6e5   : > { %6033 = vmatpush3.msra.mxu1 %v5097_v44  ;;  %v5419_v35 = vpop.permute.xlu0 %5418 }
 0x6e6   : > { %6014 = vmatmul.mubr.msk.f32.gmra.mxu1 %vm4978_vm5, %v4977_v9  ;;  %6034 = vmatprep.subr.mxu1 %v5096_v8 }
 0x6e7   : > { %6035 = vmatpush3.msra.mxu1 %v5096_v8  ;;  %6038 = vmatprep.mubr.msk.f32.mxu1 %vm4978_vm5, %v4974_v29  ;;  %v5414_v55 = vpop.permute.xlu1 %5413 }
 0x6e8   : > { %6036 = vmatprep.subr.mxu1 %v5095_v61 }
 0x6e9   : > { %6037 = vmatpush3.msra.mxu1 %v5095_v61 }
 0x6ea   : > { %6039 = vmatmul.mubr.msk.f32.vlgmr.msra.gmra.mxu1 %vm4978_vm5, %v4975_v20 }
 0x6eb   : > { %6041 = vmatprep.mubr.msk.f32.mxu1 %vm4978_vm5, %v4976_v43 }
 0x6ee   : > { %6042 = vmatmul.mubr.msk.f32.gmra.mxu1 %vm4978_vm5, %v4977_v9 }
 0x6ef   : > { %6052 = vmatprep.mubr.msk.f32.mxu1 %vm5202_vm6, %v5198_v63 }
 0x794   : > { %v6012_v6 = vpop.f32.mrf.mxu1 }
 0x796   : > { %v5076_v48 = vpop.f32.mrf.mxu1 }
 0x7a6   : > { %v6015_v28 = vpop.f32.mrf.mxu1 }
 0x7a8   : > { %v5086_v4 = vpop.f32.mrf.mxu1 }
 0x7aa   : > { %v6040_v21 = vpop.f32.mrf.mxu1 }
 0x7ac   : > { %v5175_v50 = vpop.f32.mrf.mxu1 }
 0x7ae   : > { %v6043_v59 = vpop.f32.mrf.mxu1 }
 0x7af   : > { %6044 = vmatprep.subr.mxu1 %v6043_v59 }
 0x7b0   : > { %v5185_v11 = vpop.f32.mrf.mxu1  ;;  %6045 = vmatpush3.msra.mxu1 %v6043_v59 }
 0x7b1   : > { %6046 = vmatprep.subr.mxu1 %v5185_v11 }
 0x7b2   : > { %6047 = vmatpush3.msra.mxu1 %v5185_v11 }
 0x7b3   : > { %6048 = vmatprep.subr.mxu1 %v6040_v21 }
 0x7b4   : > { %6049 = vmatpush3.msra.mxu1 %v6040_v21 }
 0x7b5   : > { %6050 = vmatprep.subr.mxu1 %v5175_v50 }
 0x7b6   : > { %6051 = vmatpush3.msra.mxu1 %v5175_v50 }
 0x7b7   : > { %6053 = vmatmul.mubr.msk.f32.vlgmr.msra.gmra.mxu1 %vm5202_vm6, %v5199_v17  ;;  %6058 = vmatprep.subr.mxu1 %v6015_v28 }
 0x7b8   : > { %6059 = vmatpush3.msra.mxu1 %v6015_v28  ;;  %6055 = vmatprep.mubr.msk.f32.mxu1 %vm5202_vm6, %v5200_v36 }
 0x7b9   : > { %6060 = vmatprep.subr.mxu1 %v5086_v4 }
 0x7ba   : > { %6061 = vmatpush3.msra.mxu1 %v5086_v4 }
 0x7bb   : > { %6056 = vmatmul.mubr.msk.f32.gmra.mxu1 %vm5202_vm6, %v5201_v62  ;;  %6062 = vmatprep.subr.mxu1 %v6012_v6 }
 0x7bc   : > { %6063 = vmatpush3.msra.mxu1 %v6012_v6  ;;  %6066 = vmatprep.mubr.msk.f32.mxu1 %vm5202_vm6, %v5194_v45 }
 0x7bd   : > { %6064 = vmatprep.subr.mxu1 %v5076_v48 }
 0x7be   : > { %6065 = vmatpush3.msra.mxu1 %v5076_v48 }
 0x7bf   : > { %6067 = vmatmul.mubr.msk.f32.vlgmr.msra.gmra.mxu1 %vm5202_vm6, %v5195_v57 }
 0x7c0   : > { %6069 = vmatprep.mubr.msk.f32.mxu1 %vm5202_vm6, %v5196_v26 }
 0x7c3   : > { %6070 = vmatmul.mubr.msk.f32.gmra.mxu1 %vm5202_vm6, %v5197_v10 }
 0x877   : > { %v6054_v24 = vpop.f32.mrf.mxu1 }
 0x879   : > { %v5281_v37 = vpop.f32.mrf.mxu1 }
 0x87b   : > { %v6057_v23 = vpop.f32.mrf.mxu1 }
 0x87d   : > { %v5291_v18 = vpop.f32.mrf.mxu1 }
 0x87f   : > { %v6068_v0 = vpop.f32.mrf.mxu1 }
 0x880   : > { %v5384_v16 = vadd.f32 %v6068_v0, %v6054_v24 }
 0x881   : > { %v5378_v56 = vpop.f32.mrf.mxu1 }
 0x882   : > { %v5422_v22 = vadd.f32 %v5409_v13, %v5384_v16  ;;  %v5379_v38 = vadd.f32 %v5378_v56, %v5281_v37 }
 0x883   : > { %v6071_v12 = vpop.f32.mrf.mxu1 }
 0x884   : > { %v5426_v52 = vmax.f32 %v5422_v22, 0.0  ;;  %v5421_v41 = vadd.f32 %v5404_v3, %v5379_v38  ;;  %v5394_v30 = vadd.f32 %v6071_v12, %v6057_v23 }
 0x885   : > { %v5388_v2 = vpop.f32.mrf.mxu1 }
 0x886   : > { %5431 = vst.msk [vmem:[%s399_s12 + $0x8] sm:$0xff] %vm5429_vm7, %v5426_v52  ;;  %v5425_v31 = vmax.f32 %v5421_v41, 0.0  ;;  %v5424_v51 = vadd.f32 %v5419_v35, %v5394_v30  ;;  %v5389_v27 = vadd.f32 %v5388_v2, %v5291_v18 }
 0x888   : > { %5430 = vst.msk [vmem:[%s399_s12] sm:$0xff] %vm5429_vm7, %v5425_v31  ;;  %v5428_v20 = vmax.f32 %v5424_v51, 0.0  ;;  %v5423_v15 = vadd.f32 %v5414_v55, %v5389_v27 }
 0x88a   : > { %5433 = vst.msk [vmem:[%s399_s12 + $0x18] sm:$0xff] %vm5429_vm7, %v5428_v20  ;;  %v5427_v29 = vmax.f32 %v5423_v15, 0.0 }
 0x88c   : > { %5432 = vst.msk [vmem:[%s399_s12 + $0x10] sm:$0xff] %vm5429_vm7, %v5427_v29 }
 0x88d PF: > { %s22_s17 = sadd.s32 1, %s6197_s17  }
 0x88e   : > { %p19_p4 = scmp.ge.s32.totalorder %s22_s17, 8  }
 0x890   :  { %21 = sbr.rel (!%p19_p4) target bundleno = 1 (0x1), region = 104 }

</bundles_post_ra>
